<compile_context>
chip_gen: v7x
topology: tpu7x:2x2x1
jax: 0.10.0
libtpu: 0.0.40
codegen_flags: <defaults>
</compile_context>

<pallas_src>
import math

import jax
import jax.numpy as jnp
from jax import lax
from jax.experimental import pallas as pl

# Small GPT-2-like config consistent with the module's structure.
B = 2           # batch
S = 8           # sequence length
D = 32          # hidden size
N_HEAD = 4      # attention heads
DH = D // N_HEAD
DI = 4 * D      # MLP inner dim (= 128, already lane-friendly)
N_LAYER = 6     # gpt_layers=6
LN_EPS = 1e-5
ROWS = B * S    # batch folded into the row (sublane) axis
LP = 128        # lane-padded per-head width (one full lane tile)


def _ln(x, g, b, eps=LN_EPS):
    # One-pass variance (E[x^2] - mean^2): the two reduces are independent, so
    # the critical path is shorter than the two-pass form.  Cancellation is a
    # non-issue at these magnitudes (|mean| ~ O(1), values f32).
    mu = jnp.mean(x, axis=-1, keepdims=True)
    ms = jnp.mean(x * x, axis=-1, keepdims=True)
    var = ms - mu * mu
    return (x - mu) * lax.rsqrt(var + eps) * g + b


def _gelu_new(x):
    # GPT-2 "gelu_new" (tanh approximation); tanh runs on the EUP slot.
    return 0.5 * x * (1.0 + jnp.tanh(
        math.sqrt(2.0 / math.pi) * (x + 0.044715 * x * x * x)))


def fused_gpt_kernel(x_ref, wpe_ref, bias_ref,
                     ln1g, ln1b, wqkv, bqkv, wproj, bproj,
                     ln2g, ln2b, wfc, bfc, wpr2, bpr2,
                     lnfg, lnfb,
                     o_ref):
    """Single invocation: pos-emb add + 6 GPT-2 blocks + final LayerNorm.

    All refs are whole-array VMEM blocks.  Per-layer weights are stacked on a
    leading N_LAYER axis and indexed statically inside the unrolled layer loop
    (one scheduling region; activation carried in SSA values, never stored).
    """
    x = x_ref[...] + wpe_ref[...]          # (ROWS, D): fused positional add
    bias = bias_ref[...]                   # (ROWS, ROWS): block-diag + causal
    scale = 1.0 / math.sqrt(DH)

    # NOTE: a lax.fori_loop over layers (dynamic wqkv[li] indexing) is
    # equivalent; static unroll keeps all weight indexing static while still
    # giving the LLO one contiguous scheduling region across layer boundaries.
    for li in range(N_LAYER):
        # ---- attention sub-block ----------------------------------------
        h = _ln(x, ln1g[li], ln1b[li])
        # (ROWS, D) @ (D, 3*H*LP): each head's q/k/v lives in its own
        # 128-lane-aligned column block (padding columns are exactly zero).
        qkv = jnp.dot(h, wqkv[li], preferred_element_type=jnp.float32) + bqkv[li]

        attn = jnp.zeros((ROWS, D), jnp.float32)
        for hh in range(N_HEAD):           # 4 heads, all lane-tile aligned
            q = qkv[:, hh * LP:(hh + 1) * LP]                        # (ROWS, LP)
            k = qkv[:, (N_HEAD + hh) * LP:(N_HEAD + hh + 1) * LP]    # (ROWS, LP)
            v = qkv[:, (2 * N_HEAD + hh) * LP:(2 * N_HEAD + hh + 1) * LP]
            # q @ k.T without materializing a transpose; both batches at once,
            # cross-batch / non-causal entries killed by the additive bias.
            s = lax.dot_general(q, k, (((1,), (1,)), ((), ())),
                                preferred_element_type=jnp.float32)
            s = s * scale + bias                                     # (ROWS, ROWS)
            # No max-subtraction: |s| << 88 so exp cannot overflow and masked
            # entries (-1e9) underflow to exactly 0; softmax is shift-invariant.
            p = jnp.exp(s)
            inv = 1.0 / jnp.sum(p, axis=-1, keepdims=True)           # exact recip
            o = jnp.dot(p, v, preferred_element_type=jnp.float32) * inv
            # Per-head output projection accumulated on the MXU (no concat).
            attn = attn + jnp.dot(o, wproj[li * N_HEAD + hh],
                                  preferred_element_type=jnp.float32)
        x = x + attn + bproj[li]                                     # residual

        # ---- MLP sub-block ------------------------------------------------
        h2 = _ln(x, ln2g[li], ln2b[li])
        f = _gelu_new(jnp.dot(h2, wfc[li],
                              preferred_element_type=jnp.float32) + bfc[li])
        x = x + jnp.dot(f, wpr2[li],
                        preferred_element_type=jnp.float32) + bpr2[li]

    o_ref[...] = _ln(x, lnfg[...], lnfb[...])      # final ln_f, one full store


def pfa_forward(x, wpe, stacked, ln_f_g, ln_f_b):
    """Fused PFA forward: pos-emb add + 6 GPT-2 blocks + final LayerNorm."""
    (ln1g, ln1b, wqkv, bqkv, wproj, bproj,
     ln2g, ln2b, wfc, bfc, wpr2, bpr2) = stacked

    # --- layout plumbing (trace-time, outside the kernel) -------------------
    x2d = x.reshape(ROWS, D)                      # fold batch into rows
    wpe_rows = jnp.tile(wpe, (B, 1))              # (ROWS, D) positional table

    def pad_head_cols(w):                         # (L, D, D) -> (L, D, H*LP)
        w = w.reshape(N_LAYER, D, N_HEAD, DH)
        w = jnp.pad(w, ((0, 0), (0, 0), (0, 0), (0, LP - DH)))
        return w.reshape(N_LAYER, D, N_HEAD * LP)

    def pad_head_bias(b):                         # (L, 1, D) -> (L, 1, H*LP)
        b = b.reshape(N_LAYER, 1, N_HEAD, DH)
        b = jnp.pad(b, ((0, 0), (0, 0), (0, 0), (0, LP - DH)))
        return b.reshape(N_LAYER, 1, N_HEAD * LP)

    wq, wk, wv = jnp.split(wqkv, 3, axis=-1)
    bq, bk, bv = jnp.split(bqkv, 3, axis=-1)
    wqkv_pad = jnp.concatenate(
        [pad_head_cols(wq), pad_head_cols(wk), pad_head_cols(wv)], axis=-1)
    bqkv_pad = jnp.concatenate(
        [pad_head_bias(bq), pad_head_bias(bk), pad_head_bias(bv)], axis=-1)

    # Per-head c_proj blocks, sublane zero-padded DH -> LP:  (L*H, LP, D).
    wproj_pad = jnp.pad(wproj.reshape(N_LAYER, N_HEAD, DH, D),
                        ((0, 0), (0, 0), (0, LP - DH), (0, 0)))
    wproj_pad = wproj_pad.reshape(N_LAYER * N_HEAD, LP, D)

    # Combined block-diagonal (same batch) + causal additive bias over the
    # folded (B*S) rows, built once in the wrapper.
    ri = jnp.arange(ROWS)
    same_batch = (ri[:, None] // S) == (ri[None, :] // S)
    causal = ri[None, :] <= ri[:, None]
    bias = jnp.where(same_batch & causal, 0.0, -1e9).astype(jnp.float32)

    operands = (x2d, wpe_rows, bias,
                ln1g, ln1b, wqkv_pad, bqkv_pad, wproj_pad, bproj,
                ln2g, ln2b, wfc, bfc, wpr2, bpr2, ln_f_g, ln_f_b)

    # Advisory cost estimate for the XLA scheduler (padded MXU work counted).
    flops_layer = (
        2 * ROWS * D * (3 * N_HEAD * LP)            # qkv projection
        + N_HEAD * 2 * ROWS * LP * ROWS             # scores
        + N_HEAD * 2 * ROWS * ROWS * LP             # p @ v
        + N_HEAD * 2 * ROWS * LP * D                # per-head output proj
        + 2 * ROWS * D * DI + 2 * ROWS * DI * D)    # mlp fc + proj
    transcendentals = N_LAYER * (N_HEAD * ROWS * ROWS + ROWS * DI + 4 * ROWS)
    bytes_accessed = 4 * (sum(int(a.size) for a in operands) + ROWS * D)

    out2d = pl.pallas_call(
        fused_gpt_kernel,
        out_shape=jax.ShapeDtypeStruct((ROWS, D), jnp.float32),
        input_output_aliases={0: 0},        # output reuses x2d's HBM buffer
        cost_estimate=pl.CostEstimate(flops=int(N_LAYER * flops_layer),
                                      transcendentals=int(transcendentals),
                                      bytes_accessed=int(bytes_accessed)),
    )(*operands)
    return out2d.reshape(B, S, D)


def init_params(key):
    """Deterministic synthetic GPT-2 weights (std=0.02 normals, zero biases),
    stacked along a leading N_LAYER axis."""
    std = 0.02
    k = jax.random.split(key, 6)
    wpe = std * jax.random.normal(k[0], (S, D), jnp.float32)

    stacked = (
        jnp.ones((N_LAYER, 1, D), jnp.float32),                            # ln1.g
        jnp.zeros((N_LAYER, 1, D), jnp.float32),                           # ln1.b
        std * jax.random.normal(k[1], (N_LAYER, D, 3 * D), jnp.float32),   # c_attn.w
        jnp.zeros((N_LAYER, 1, 3 * D), jnp.float32),                       # c_attn.b
        std * jax.random.normal(k[2], (N_LAYER, D, D), jnp.float32),       # c_proj.w
        jnp.zeros((N_LAYER, 1, D), jnp.float32),                           # c_proj.b
        jnp.ones((N_LAYER, 1, D), jnp.float32),                            # ln2.g
        jnp.zeros((N_LAYER, 1, D), jnp.float32),                           # ln2.b
        std * jax.random.normal(k[3], (N_LAYER, D, DI), jnp.float32),      # mlp.c_fc.w
        jnp.zeros((N_LAYER, 1, DI), jnp.float32),                          # mlp.c_fc.b
        std * jax.random.normal(k[4], (N_LAYER, DI, D), jnp.float32),      # mlp.c_proj.w
        jnp.zeros((N_LAYER, 1, D), jnp.float32),                           # mlp.c_proj.b
    )
    ln_f_g = jnp.ones((1, D), jnp.float32)
    ln_f_b = jnp.zeros((1, D), jnp.float32)
    return wpe, stacked, ln_f_g, ln_f_b


if __name__ == "__main__":
    key = jax.random.PRNGKey(0)
    kx, kp = jax.random.split(key)
    x = jax.random.normal(kx, (B, S, D), jnp.float32)

    wpe, stacked, ln_f_g, ln_f_b = init_params(kp)

    fwd = jax.jit(pfa_forward)
    out = jax.block_until_ready(fwd(x, wpe, stacked, ln_f_g, ln_f_b))
    assert out.shape == (B, S, D)
    assert bool(jnp.all(jnp.isfinite(out)))
    print("KERNEL_OK")
</pallas_src>

<mosaic_0001>
module attributes {stable_mosaic.version = 11 : i64} {
  func.func @fused_gpt_kernel(%arg0: memref<16x32xf32, #tpu.memory_space<vmem>>, %arg1: memref<16x32xf32, #tpu.memory_space<vmem>>, %arg2: memref<16x16xf32, #tpu.memory_space<vmem>>, %arg3: memref<6x1x32xf32, #tpu.memory_space<vmem>>, %arg4: memref<6x1x32xf32, #tpu.memory_space<vmem>>, %arg5: memref<6x32x1536xf32, #tpu.memory_space<vmem>>, %arg6: memref<6x1x1536xf32, #tpu.memory_space<vmem>>, %arg7: memref<24x128x32xf32, #tpu.memory_space<vmem>>, %arg8: memref<6x1x32xf32, #tpu.memory_space<vmem>>, %arg9: memref<6x1x32xf32, #tpu.memory_space<vmem>>, %arg10: memref<6x1x32xf32, #tpu.memory_space<vmem>>, %arg11: memref<6x32x128xf32, #tpu.memory_space<vmem>>, %arg12: memref<6x1x128xf32, #tpu.memory_space<vmem>>, %arg13: memref<6x128x32xf32, #tpu.memory_space<vmem>>, %arg14: memref<6x1x32xf32, #tpu.memory_space<vmem>>, %arg15: memref<1x32xf32, #tpu.memory_space<vmem>>, %arg16: memref<1x32xf32, #tpu.memory_space<vmem>>, %arg17: memref<16x32xf32, #tpu.memory_space<vmem>>) attributes {dimension_semantics = [], scalar_prefetch = 0 : i64, scratch_operands = 0 : i64, tpu.core_type = #tpu.core_type<tc>} {
    %c0 = arith.constant 0 : index
    %c0_0 = arith.constant 0 : index
    %0 = vector.load %arg0[%c0, %c0_0] : memref<16x32xf32, #tpu.memory_space<vmem>>, vector<16x32xf32>
    %c0_1 = arith.constant 0 : index
    %c0_2 = arith.constant 0 : index
    %1 = vector.load %arg1[%c0_1, %c0_2] : memref<16x32xf32, #tpu.memory_space<vmem>>, vector<16x32xf32>
    %2 = arith.addf %0, %1 : vector<16x32xf32>
    %c0_3 = arith.constant 0 : index
    %c0_4 = arith.constant 0 : index
    %3 = vector.load %arg2[%c0_3, %c0_4] : memref<16x16xf32, #tpu.memory_space<vmem>>, vector<16x16xf32>
    %c0_5 = arith.constant 0 : index
    %c0_6 = arith.constant 0 : index
    %c0_7 = arith.constant 0 : index
    %4 = vector.load %arg3[%c0_5, %c0_6, %c0_7] : memref<6x1x32xf32, #tpu.memory_space<vmem>>, vector<1x1x32xf32>
    %5 = vector.shape_cast %4 : vector<1x1x32xf32> to vector<1x32xf32>
    %c0_8 = arith.constant 0 : index
    %c0_9 = arith.constant 0 : index
    %c0_10 = arith.constant 0 : index
    %6 = vector.load %arg4[%c0_8, %c0_9, %c0_10] : memref<6x1x32xf32, #tpu.memory_space<vmem>>, vector<1x1x32xf32>
    %7 = vector.shape_cast %6 : vector<1x1x32xf32> to vector<1x32xf32>
    %cst = arith.constant dense<0.000000e+00> : vector<16xf32>
    %8 = vector.multi_reduction <add>, %2, %cst [1] : vector<16x32xf32> to vector<16xf32>
    %9 = vector.shape_cast %8 : vector<16xf32> to vector<16x1xf32>
    %cst_11 = arith.constant 3.200000e+01 : f32
    %10 = vector.broadcast %cst_11 : f32 to vector<16x1xf32>
    %11 = arith.divf %9, %10 : vector<16x1xf32>
    %12 = arith.mulf %2, %2 : vector<16x32xf32>
    %cst_12 = arith.constant dense<0.000000e+00> : vector<16xf32>
    %13 = vector.multi_reduction <add>, %12, %cst_12 [1] : vector<16x32xf32> to vector<16xf32>
    %14 = vector.shape_cast %13 : vector<16xf32> to vector<16x1xf32>
    %cst_13 = arith.constant 3.200000e+01 : f32
    %15 = vector.broadcast %cst_13 : f32 to vector<16x1xf32>
    %16 = arith.divf %14, %15 : vector<16x1xf32>
    %17 = arith.mulf %11, %11 : vector<16x1xf32>
    %18 = arith.subf %16, %17 : vector<16x1xf32>
    %19 = vector.broadcast %11 : vector<16x1xf32> to vector<16x32xf32>
    %20 = arith.subf %2, %19 : vector<16x32xf32>
    %cst_14 = arith.constant 9.99999974E-6 : f32
    %21 = vector.broadcast %cst_14 : f32 to vector<16x1xf32>
    %22 = arith.addf %18, %21 : vector<16x1xf32>
    %23 = math.rsqrt %22 : vector<16x1xf32>
    %24 = vector.broadcast %23 : vector<16x1xf32> to vector<16x32xf32>
    %25 = arith.mulf %20, %24 : vector<16x32xf32>
    %26 = vector.broadcast %5 : vector<1x32xf32> to vector<16x32xf32>
    %27 = arith.mulf %25, %26 : vector<16x32xf32>
    %28 = vector.broadcast %7 : vector<1x32xf32> to vector<16x32xf32>
    %29 = arith.addf %27, %28 : vector<16x32xf32>
    %c0_15 = arith.constant 0 : index
    %c0_16 = arith.constant 0 : index
    %c0_17 = arith.constant 0 : index
    %30 = vector.load %arg5[%c0_15, %c0_16, %c0_17] : memref<6x32x1536xf32, #tpu.memory_space<vmem>>, vector<1x32x1536xf32>
    %31 = vector.shape_cast %30 : vector<1x32x1536xf32> to vector<32x1536xf32>
    %cst_18 = arith.constant dense<0.000000e+00> : vector<16x1536xf32>
    %32 = tpu.matmul %29, %31, %cst_18 {dimension_numbers = #tpu.dot_dimension_numbers<[1], [0], [0], [1], [0, 0, 1, 1], [], []>} : vector<16x32xf32>, vector<32x1536xf32>, vector<16x1536xf32> -> vector<16x1536xf32>
    %c0_19 = arith.constant 0 : index
    %c0_20 = arith.constant 0 : index
    %c0_21 = arith.constant 0 : index
    %33 = vector.load %arg6[%c0_19, %c0_20, %c0_21] : memref<6x1x1536xf32, #tpu.memory_space<vmem>>, vector<1x1x1536xf32>
    %34 = vector.shape_cast %33 : vector<1x1x1536xf32> to vector<1x1536xf32>
    %35 = vector.broadcast %34 : vector<1x1536xf32> to vector<16x1536xf32>
    %36 = arith.addf %32, %35 : vector<16x1536xf32>
    %cst_22 = arith.constant 0.000000e+00 : f32
    %37 = vector.broadcast %cst_22 : f32 to vector<16x32xf32>
    %38 = vector.extract_strided_slice %36 {offsets = [0, 0], sizes = [16, 128], strides = [1, 1]} : vector<16x1536xf32> to vector<16x128xf32>
    %39 = vector.extract_strided_slice %36 {offsets = [0, 512], sizes = [16, 128], strides = [1, 1]} : vector<16x1536xf32> to vector<16x128xf32>
    %40 = vector.extract_strided_slice %36 {offsets = [0, 1024], sizes = [16, 128], strides = [1, 1]} : vector<16x1536xf32> to vector<16x128xf32>
    %cst_23 = arith.constant dense<0.000000e+00> : vector<16x16xf32>
    %41 = tpu.matmul %38, %39, %cst_23 {dimension_numbers = #tpu.dot_dimension_numbers<[1], [1], [0], [0], [0, 0, 1, 0], [], []>} : vector<16x128xf32>, vector<16x128xf32>, vector<16x16xf32> -> vector<16x16xf32>
    %cst_24 = arith.constant 0.353553385 : f32
    %42 = vector.broadcast %cst_24 : f32 to vector<16x16xf32>
    %43 = arith.mulf %41, %42 : vector<16x16xf32>
    %44 = arith.addf %43, %3 : vector<16x16xf32>
    %45 = math.exp %44 : vector<16x16xf32>
    %cst_25 = arith.constant dense<0.000000e+00> : vector<16xf32>
    %46 = vector.multi_reduction <add>, %45, %cst_25 [1] : vector<16x16xf32> to vector<16xf32>
    %47 = vector.shape_cast %46 : vector<16xf32> to vector<16x1xf32>
    %cst_26 = arith.constant 1.000000e+00 : f32
    %48 = vector.broadcast %cst_26 : f32 to vector<16x1xf32>
    %49 = arith.divf %48, %47 : vector<16x1xf32>
    %cst_27 = arith.constant dense<0.000000e+00> : vector<16x128xf32>
    %50 = tpu.matmul %45, %40, %cst_27 {dimension_numbers = #tpu.dot_dimension_numbers<[1], [0], [0], [1], [0, 0, 1, 1], [], []>} : vector<16x16xf32>, vector<16x128xf32>, vector<16x128xf32> -> vector<16x128xf32>
    %51 = vector.broadcast %49 : vector<16x1xf32> to vector<16x128xf32>
    %52 = arith.mulf %50, %51 : vector<16x128xf32>
    %c0_28 = arith.constant 0 : index
    %c0_29 = arith.constant 0 : index
    %c0_30 = arith.constant 0 : index
    %53 = vector.load %arg7[%c0_28, %c0_29, %c0_30] : memref<24x128x32xf32, #tpu.memory_space<vmem>>, vector<1x128x32xf32>
    %54 = vector.shape_cast %53 : vector<1x128x32xf32> to vector<128x32xf32>
    %cst_31 = arith.constant dense<0.000000e+00> : vector<16x32xf32>
    %55 = tpu.matmul %52, %54, %cst_31 {dimension_numbers = #tpu.dot_dimension_numbers<[1], [0], [0], [1], [0, 0, 1, 1], [], []>} : vector<16x128xf32>, vector<128x32xf32>, vector<16x32xf32> -> vector<16x32xf32>
    %56 = arith.addf %37, %55 : vector<16x32xf32>
    %57 = vector.extract_strided_slice %36 {offsets = [0, 128], sizes = [16, 128], strides = [1, 1]} : vector<16x1536xf32> to vector<16x128xf32>
    %58 = vector.extract_strided_slice %36 {offsets = [0, 640], sizes = [16, 128], strides = [1, 1]} : vector<16x1536xf32> to vector<16x128xf32>
    %59 = vector.extract_strided_slice %36 {offsets = [0, 1152], sizes = [16, 128], strides = [1, 1]} : vector<16x1536xf32> to vector<16x128xf32>
    %cst_32 = arith.constant dense<0.000000e+00> : vector<16x16xf32>
    %60 = tpu.matmul %57, %58, %cst_32 {dimension_numbers = #tpu.dot_dimension_numbers<[1], [1], [0], [0], [0, 0, 1, 0], [], []>} : vector<16x128xf32>, vector<16x128xf32>, vector<16x16xf32> -> vector<16x16xf32>
    %cst_33 = arith.constant 0.353553385 : f32
    %61 = vector.broadcast %cst_33 : f32 to vector<16x16xf32>
    %62 = arith.mulf %60, %61 : vector<16x16xf32>
    %63 = arith.addf %62, %3 : vector<16x16xf32>
    %64 = math.exp %63 : vector<16x16xf32>
    %cst_34 = arith.constant dense<0.000000e+00> : vector<16xf32>
    %65 = vector.multi_reduction <add>, %64, %cst_34 [1] : vector<16x16xf32> to vector<16xf32>
    %66 = vector.shape_cast %65 : vector<16xf32> to vector<16x1xf32>
    %cst_35 = arith.constant 1.000000e+00 : f32
    %67 = vector.broadcast %cst_35 : f32 to vector<16x1xf32>
    %68 = arith.divf %67, %66 : vector<16x1xf32>
    %cst_36 = arith.constant dense<0.000000e+00> : vector<16x128xf32>
    %69 = tpu.matmul %64, %59, %cst_36 {dimension_numbers = #tpu.dot_dimension_numbers<[1], [0], [0], [1], [0, 0, 1, 1], [], []>} : vector<16x16xf32>, vector<16x128xf32>, vector<16x128xf32> -> vector<16x128xf32>
    %70 = vector.broadcast %68 : vector<16x1xf32> to vector<16x128xf32>
    %71 = arith.mulf %69, %70 : vector<16x128xf32>
    %c1 = arith.constant 1 : index
    %c0_37 = arith.constant 0 : index
    %c0_38 = arith.constant 0 : index
    %72 = vector.load %arg7[%c1, %c0_37, %c0_38] : memref<24x128x32xf32, #tpu.memory_space<vmem>>, vector<1x128x32xf32>
    %73 = vector.shape_cast %72 : vector<1x128x32xf32> to vector<128x32xf32>
    %cst_39 = arith.constant dense<0.000000e+00> : vector<16x32xf32>
    %74 = tpu.matmul %71, %73, %cst_39 {dimension_numbers = #tpu.dot_dimension_numbers<[1], [0], [0], [1], [0, 0, 1, 1], [], []>} : vector<16x128xf32>, vector<128x32xf32>, vector<16x32xf32> -> vector<16x32xf32>
    %75 = arith.addf %56, %74 : vector<16x32xf32>
    %76 = vector.extract_strided_slice %36 {offsets = [0, 256], sizes = [16, 128], strides = [1, 1]} : vector<16x1536xf32> to vector<16x128xf32>
    %77 = vector.extract_strided_slice %36 {offsets = [0, 768], sizes = [16, 128], strides = [1, 1]} : vector<16x1536xf32> to vector<16x128xf32>
    %78 = vector.extract_strided_slice %36 {offsets = [0, 1280], sizes = [16, 128], strides = [1, 1]} : vector<16x1536xf32> to vector<16x128xf32>
    %cst_40 = arith.constant dense<0.000000e+00> : vector<16x16xf32>
    %79 = tpu.matmul %76, %77, %cst_40 {dimension_numbers = #tpu.dot_dimension_numbers<[1], [1], [0], [0], [0, 0, 1, 0], [], []>} : vector<16x128xf32>, vector<16x128xf32>, vector<16x16xf32> -> vector<16x16xf32>
    %cst_41 = arith.constant 0.353553385 : f32
    %80 = vector.broadcast %cst_41 : f32 to vector<16x16xf32>
    %81 = arith.mulf %79, %80 : vector<16x16xf32>
    %82 = arith.addf %81, %3 : vector<16x16xf32>
    %83 = math.exp %82 : vector<16x16xf32>
    %cst_42 = arith.constant dense<0.000000e+00> : vector<16xf32>
    %84 = vector.multi_reduction <add>, %83, %cst_42 [1] : vector<16x16xf32> to vector<16xf32>
    %85 = vector.shape_cast %84 : vector<16xf32> to vector<16x1xf32>
    %cst_43 = arith.constant 1.000000e+00 : f32
    %86 = vector.broadcast %cst_43 : f32 to vector<16x1xf32>
    %87 = arith.divf %86, %85 : vector<16x1xf32>
    %cst_44 = arith.constant dense<0.000000e+00> : vector<16x128xf32>
    %88 = tpu.matmul %83, %78, %cst_44 {dimension_numbers = #tpu.dot_dimension_numbers<[1], [0], [0], [1], [0, 0, 1, 1], [], []>} : vector<16x16xf32>, vector<16x128xf32>, vector<16x128xf32> -> vector<16x128xf32>
    %89 = vector.broadcast %87 : vector<16x1xf32> to vector<16x128xf32>
    %90 = arith.mulf %88, %89 : vector<16x128xf32>
    %c2 = arith.constant 2 : index
    %c0_45 = arith.constant 0 : index
    %c0_46 = arith.constant 0 : index
    %91 = vector.load %arg7[%c2, %c0_45, %c0_46] : memref<24x128x32xf32, #tpu.memory_space<vmem>>, vector<1x128x32xf32>
    %92 = vector.shape_cast %91 : vector<1x128x32xf32> to vector<128x32xf32>
    %cst_47 = arith.constant dense<0.000000e+00> : vector<16x32xf32>
    %93 = tpu.matmul %90, %92, %cst_47 {dimension_numbers = #tpu.dot_dimension_numbers<[1], [0], [0], [1], [0, 0, 1, 1], [], []>} : vector<16x128xf32>, vector<128x32xf32>, vector<16x32xf32> -> vector<16x32xf32>
    %94 = arith.addf %75, %93 : vector<16x32xf32>
    %95 = vector.extract_strided_slice %36 {offsets = [0, 384], sizes = [16, 128], strides = [1, 1]} : vector<16x1536xf32> to vector<16x128xf32>
    %96 = vector.extract_strided_slice %36 {offsets = [0, 896], sizes = [16, 128], strides = [1, 1]} : vector<16x1536xf32> to vector<16x128xf32>
    %97 = vector.extract_strided_slice %36 {offsets = [0, 1408], sizes = [16, 128], strides = [1, 1]} : vector<16x1536xf32> to vector<16x128xf32>
    %cst_48 = arith.constant dense<0.000000e+00> : vector<16x16xf32>
    %98 = tpu.matmul %95, %96, %cst_48 {dimension_numbers = #tpu.dot_dimension_numbers<[1], [1], [0], [0], [0, 0, 1, 0], [], []>} : vector<16x128xf32>, vector<16x128xf32>, vector<16x16xf32> -> vector<16x16xf32>
    %cst_49 = arith.constant 0.353553385 : f32
    %99 = vector.broadcast %cst_49 : f32 to vector<16x16xf32>
    %100 = arith.mulf %98, %99 : vector<16x16xf32>
    %101 = arith.addf %100, %3 : vector<16x16xf32>
    %102 = math.exp %101 : vector<16x16xf32>
    %cst_50 = arith.constant dense<0.000000e+00> : vector<16xf32>
    %103 = vector.multi_reduction <add>, %102, %cst_50 [1] : vector<16x16xf32> to vector<16xf32>
    %104 = vector.shape_cast %103 : vector<16xf32> to vector<16x1xf32>
    %cst_51 = arith.constant 1.000000e+00 : f32
    %105 = vector.broadcast %cst_51 : f32 to vector<16x1xf32>
    %106 = arith.divf %105, %104 : vector<16x1xf32>
    %cst_52 = arith.constant dense<0.000000e+00> : vector<16x128xf32>
    %107 = tpu.matmul %102, %97, %cst_52 {dimension_numbers = #tpu.dot_dimension_numbers<[1], [0], [0], [1], [0, 0, 1, 1], [], []>} : vector<16x16xf32>, vector<16x128xf32>, vector<16x128xf32> -> vector<16x128xf32>
    %108 = vector.broadcast %106 : vector<16x1xf32> to vector<16x128xf32>
    %109 = arith.mulf %107, %108 : vector<16x128xf32>
    %c3 = arith.constant 3 : index
    %c0_53 = arith.constant 0 : index
    %c0_54 = arith.constant 0 : index
    %110 = vector.load %arg7[%c3, %c0_53, %c0_54] : memref<24x128x32xf32, #tpu.memory_space<vmem>>, vector<1x128x32xf32>
    %111 = vector.shape_cast %110 : vector<1x128x32xf32> to vector<128x32xf32>
    %cst_55 = arith.constant dense<0.000000e+00> : vector<16x32xf32>
    %112 = tpu.matmul %109, %111, %cst_55 {dimension_numbers = #tpu.dot_dimension_numbers<[1], [0], [0], [1], [0, 0, 1, 1], [], []>} : vector<16x128xf32>, vector<128x32xf32>, vector<16x32xf32> -> vector<16x32xf32>
    %113 = arith.addf %94, %112 : vector<16x32xf32>
    %114 = arith.addf %2, %113 : vector<16x32xf32>
    %c0_56 = arith.constant 0 : index
    %c0_57 = arith.constant 0 : index
    %c0_58 = arith.constant 0 : index
    %115 = vector.load %arg8[%c0_56, %c0_57, %c0_58] : memref<6x1x32xf32, #tpu.memory_space<vmem>>, vector<1x1x32xf32>
    %116 = vector.shape_cast %115 : vector<1x1x32xf32> to vector<1x32xf32>
    %117 = vector.broadcast %116 : vector<1x32xf32> to vector<16x32xf32>
    %118 = arith.addf %114, %117 : vector<16x32xf32>
    %c0_59 = arith.constant 0 : index
    %c0_60 = arith.constant 0 : index
    %c0_61 = arith.constant 0 : index
    %119 = vector.load %arg9[%c0_59, %c0_60, %c0_61] : memref<6x1x32xf32, #tpu.memory_space<vmem>>, vector<1x1x32xf32>
    %120 = vector.shape_cast %119 : vector<1x1x32xf32> to vector<1x32xf32>
    %c0_62 = arith.constant 0 : index
    %c0_63 = arith.constant 0 : index
    %c0_64 = arith.constant 0 : index
    %121 = vector.load %arg10[%c0_62, %c0_63, %c0_64] : memref<6x1x32xf32, #tpu.memory_space<vmem>>, vector<1x1x32xf32>
    %122 = vector.shape_cast %121 : vector<1x1x32xf32> to vector<1x32xf32>
    %cst_65 = arith.constant dense<0.000000e+00> : vector<16xf32>
    %123 = vector.multi_reduction <add>, %118, %cst_65 [1] : vector<16x32xf32> to vector<16xf32>
    %124 = vector.shape_cast %123 : vector<16xf32> to vector<16x1xf32>
    %cst_66 = arith.constant 3.200000e+01 : f32
    %125 = vector.broadcast %cst_66 : f32 to vector<16x1xf32>
    %126 = arith.divf %124, %125 : vector<16x1xf32>
    %127 = arith.mulf %118, %118 : vector<16x32xf32>
    %cst_67 = arith.constant dense<0.000000e+00> : vector<16xf32>
    %128 = vector.multi_reduction <add>, %127, %cst_67 [1] : vector<16x32xf32> to vector<16xf32>
    %129 = vector.shape_cast %128 : vector<16xf32> to vector<16x1xf32>
    %cst_68 = arith.constant 3.200000e+01 : f32
    %130 = vector.broadcast %cst_68 : f32 to vector<16x1xf32>
    %131 = arith.divf %129, %130 : vector<16x1xf32>
    %132 = arith.mulf %126, %126 : vector<16x1xf32>
    %133 = arith.subf %131, %132 : vector<16x1xf32>
    %134 = vector.broadcast %126 : vector<16x1xf32> to vector<16x32xf32>
    %135 = arith.subf %118, %134 : vector<16x32xf32>
    %cst_69 = arith.constant 9.99999974E-6 : f32
    %136 = vector.broadcast %cst_69 : f32 to vector<16x1xf32>
    %137 = arith.addf %133, %136 : vector<16x1xf32>
    %138 = math.rsqrt %137 : vector<16x1xf32>
    %139 = vector.broadcast %138 : vector<16x1xf32> to vector<16x32xf32>
    %140 = arith.mulf %135, %139 : vector<16x32xf32>
    %141 = vector.broadcast %120 : vector<1x32xf32> to vector<16x32xf32>
    %142 = arith.mulf %140, %141 : vector<16x32xf32>
    %143 = vector.broadcast %122 : vector<1x32xf32> to vector<16x32xf32>
    %144 = arith.addf %142, %143 : vector<16x32xf32>
    %c0_70 = arith.constant 0 : index
    %c0_71 = arith.constant 0 : index
    %c0_72 = arith.constant 0 : index
    %145 = vector.load %arg11[%c0_70, %c0_71, %c0_72] : memref<6x32x128xf32, #tpu.memory_space<vmem>>, vector<1x32x128xf32>
    %146 = vector.shape_cast %145 : vector<1x32x128xf32> to vector<32x128xf32>
    %cst_73 = arith.constant dense<0.000000e+00> : vector<16x128xf32>
    %147 = tpu.matmul %144, %146, %cst_73 {dimension_numbers = #tpu.dot_dimension_numbers<[1], [0], [0], [1], [0, 0, 1, 1], [], []>} : vector<16x32xf32>, vector<32x128xf32>, vector<16x128xf32> -> vector<16x128xf32>
    %c0_74 = arith.constant 0 : index
    %c0_75 = arith.constant 0 : index
    %c0_76 = arith.constant 0 : index
    %148 = vector.load %arg12[%c0_74, %c0_75, %c0_76] : memref<6x1x128xf32, #tpu.memory_space<vmem>>, vector<1x1x128xf32>
    %149 = vector.shape_cast %148 : vector<1x1x128xf32> to vector<1x128xf32>
    %150 = vector.broadcast %149 : vector<1x128xf32> to vector<16x128xf32>
    %151 = arith.addf %147, %150 : vector<16x128xf32>
    %cst_77 = arith.constant 5.000000e-01 : f32
    %152 = vector.broadcast %cst_77 : f32 to vector<16x128xf32>
    %153 = arith.mulf %152, %151 : vector<16x128xf32>
    %cst_78 = arith.constant 4.471500e-02 : f32
    %154 = vector.broadcast %cst_78 : f32 to vector<16x128xf32>
    %155 = arith.mulf %154, %151 : vector<16x128xf32>
    %156 = arith.mulf %155, %151 : vector<16x128xf32>
    %157 = arith.mulf %156, %151 : vector<16x128xf32>
    %158 = arith.addf %151, %157 : vector<16x128xf32>
    %cst_79 = arith.constant 0.797884583 : f32
    %159 = vector.broadcast %cst_79 : f32 to vector<16x128xf32>
    %160 = arith.mulf %159, %158 : vector<16x128xf32>
    %161 = math.tanh %160 : vector<16x128xf32>
    %cst_80 = arith.constant 1.000000e+00 : f32
    %162 = vector.broadcast %cst_80 : f32 to vector<16x128xf32>
    %163 = arith.addf %162, %161 : vector<16x128xf32>
    %164 = arith.mulf %153, %163 : vector<16x128xf32>
    %c0_81 = arith.constant 0 : index
    %c0_82 = arith.constant 0 : index
    %c0_83 = arith.constant 0 : index
    %165 = vector.load %arg13[%c0_81, %c0_82, %c0_83] : memref<6x128x32xf32, #tpu.memory_space<vmem>>, vector<1x128x32xf32>
    %166 = vector.shape_cast %165 : vector<1x128x32xf32> to vector<128x32xf32>
    %cst_84 = arith.constant dense<0.000000e+00> : vector<16x32xf32>
    %167 = tpu.matmul %164, %166, %cst_84 {dimension_numbers = #tpu.dot_dimension_numbers<[1], [0], [0], [1], [0, 0, 1, 1], [], []>} : vector<16x128xf32>, vector<128x32xf32>, vector<16x32xf32> -> vector<16x32xf32>
    %168 = arith.addf %118, %167 : vector<16x32xf32>
    %c0_85 = arith.constant 0 : index
    %c0_86 = arith.constant 0 : index
    %c0_87 = arith.constant 0 : index
    %169 = vector.load %arg14[%c0_85, %c0_86, %c0_87] : memref<6x1x32xf32, #tpu.memory_space<vmem>>, vector<1x1x32xf32>
    %170 = vector.shape_cast %169 : vector<1x1x32xf32> to vector<1x32xf32>
    %171 = vector.broadcast %170 : vector<1x32xf32> to vector<16x32xf32>
    %172 = arith.addf %168, %171 : vector<16x32xf32>
    %c1_88 = arith.constant 1 : index
    %c0_89 = arith.constant 0 : index
    %c0_90 = arith.constant 0 : index
    %173 = vector.load %arg3[%c1_88, %c0_89, %c0_90] : memref<6x1x32xf32, #tpu.memory_space<vmem>>, vector<1x1x32xf32>
    %174 = vector.shape_cast %173 : vector<1x1x32xf32> to vector<1x32xf32>
    %c1_91 = arith.constant 1 : index
    %c0_92 = arith.constant 0 : index
    %c0_93 = arith.constant 0 : index
    %175 = vector.load %arg4[%c1_91, %c0_92, %c0_93] : memref<6x1x32xf32, #tpu.memory_space<vmem>>, vector<1x1x32xf32>
    %176 = vector.shape_cast %175 : vector<1x1x32xf32> to vector<1x32xf32>
    %cst_94 = arith.constant dense<0.000000e+00> : vector<16xf32>
    %177 = vector.multi_reduction <add>, %172, %cst_94 [1] : vector<16x32xf32> to vector<16xf32>
    %178 = vector.shape_cast %177 : vector<16xf32> to vector<16x1xf32>
    %cst_95 = arith.constant 3.200000e+01 : f32
    %179 = vector.broadcast %cst_95 : f32 to vector<16x1xf32>
    %180 = arith.divf %178, %179 : vector<16x1xf32>
    %181 = arith.mulf %172, %172 : vector<16x32xf32>
    %cst_96 = arith.constant dense<0.000000e+00> : vector<16xf32>
    %182 = vector.multi_reduction <add>, %181, %cst_96 [1] : vector<16x32xf32> to vector<16xf32>
    %183 = vector.shape_cast %182 : vector<16xf32> to vector<16x1xf32>
    %cst_97 = arith.constant 3.200000e+01 : f32
    %184 = vector.broadcast %cst_97 : f32 to vector<16x1xf32>
    %185 = arith.divf %183, %184 : vector<16x1xf32>
    %186 = arith.mulf %180, %180 : vector<16x1xf32>
    %187 = arith.subf %185, %186 : vector<16x1xf32>
    %188 = vector.broadcast %180 : vector<16x1xf32> to vector<16x32xf32>
    %189 = arith.subf %172, %188 : vector<16x32xf32>
    %cst_98 = arith.constant 9.99999974E-6 : f32
    %190 = vector.broadcast %cst_98 : f32 to vector<16x1xf32>
    %191 = arith.addf %187, %190 : vector<16x1xf32>
    %192 = math.rsqrt %191 : vector<16x1xf32>
    %193 = vector.broadcast %192 : vector<16x1xf32> to vector<16x32xf32>
    %194 = arith.mulf %189, %193 : vector<16x32xf32>
    %195 = vector.broadcast %174 : vector<1x32xf32> to vector<16x32xf32>
    %196 = arith.mulf %194, %195 : vector<16x32xf32>
    %197 = vector.broadcast %176 : vector<1x32xf32> to vector<16x32xf32>
    %198 = arith.addf %196, %197 : vector<16x32xf32>
    %c1_99 = arith.constant 1 : index
    %c0_100 = arith.constant 0 : index
    %c0_101 = arith.constant 0 : index
    %199 = vector.load %arg5[%c1_99, %c0_100, %c0_101] : memref<6x32x1536xf32, #tpu.memory_space<vmem>>, vector<1x32x1536xf32>
    %200 = vector.shape_cast %199 : vector<1x32x1536xf32> to vector<32x1536xf32>
    %cst_102 = arith.constant dense<0.000000e+00> : vector<16x1536xf32>
    %201 = tpu.matmul %198, %200, %cst_102 {dimension_numbers = #tpu.dot_dimension_numbers<[1], [0], [0], [1], [0, 0, 1, 1], [], []>} : vector<16x32xf32>, vector<32x1536xf32>, vector<16x1536xf32> -> vector<16x1536xf32>
    %c1_103 = arith.constant 1 : index
    %c0_104 = arith.constant 0 : index
    %c0_105 = arith.constant 0 : index
    %202 = vector.load %arg6[%c1_103, %c0_104, %c0_105] : memref<6x1x1536xf32, #tpu.memory_space<vmem>>, vector<1x1x1536xf32>
    %203 = vector.shape_cast %202 : vector<1x1x1536xf32> to vector<1x1536xf32>
    %204 = vector.broadcast %203 : vector<1x1536xf32> to vector<16x1536xf32>
    %205 = arith.addf %201, %204 : vector<16x1536xf32>
    %cst_106 = arith.constant 0.000000e+00 : f32
    %206 = vector.broadcast %cst_106 : f32 to vector<16x32xf32>
    %207 = vector.extract_strided_slice %205 {offsets = [0, 0], sizes = [16, 128], strides = [1, 1]} : vector<16x1536xf32> to vector<16x128xf32>
    %208 = vector.extract_strided_slice %205 {offsets = [0, 512], sizes = [16, 128], strides = [1, 1]} : vector<16x1536xf32> to vector<16x128xf32>
    %209 = vector.extract_strided_slice %205 {offsets = [0, 1024], sizes = [16, 128], strides = [1, 1]} : vector<16x1536xf32> to vector<16x128xf32>
    %cst_107 = arith.constant dense<0.000000e+00> : vector<16x16xf32>
    %210 = tpu.matmul %207, %208, %cst_107 {dimension_numbers = #tpu.dot_dimension_numbers<[1], [1], [0], [0], [0, 0, 1, 0], [], []>} : vector<16x128xf32>, vector<16x128xf32>, vector<16x16xf32> -> vector<16x16xf32>
    %cst_108 = arith.constant 0.353553385 : f32
    %211 = vector.broadcast %cst_108 : f32 to vector<16x16xf32>
    %212 = arith.mulf %210, %211 : vector<16x16xf32>
    %213 = arith.addf %212, %3 : vector<16x16xf32>
    %214 = math.exp %213 : vector<16x16xf32>
    %cst_109 = arith.constant dense<0.000000e+00> : vector<16xf32>
    %215 = vector.multi_reduction <add>, %214, %cst_109 [1] : vector<16x16xf32> to vector<16xf32>
    %216 = vector.shape_cast %215 : vector<16xf32> to vector<16x1xf32>
    %cst_110 = arith.constant 1.000000e+00 : f32
    %217 = vector.broadcast %cst_110 : f32 to vector<16x1xf32>
    %218 = arith.divf %217, %216 : vector<16x1xf32>
    %cst_111 = arith.constant dense<0.000000e+00> : vector<16x128xf32>
    %219 = tpu.matmul %214, %209, %cst_111 {dimension_numbers = #tpu.dot_dimension_numbers<[1], [0], [0], [1], [0, 0, 1, 1], [], []>} : vector<16x16xf32>, vector<16x128xf32>, vector<16x128xf32> -> vector<16x128xf32>
    %220 = vector.broadcast %218 : vector<16x1xf32> to vector<16x128xf32>
    %221 = arith.mulf %219, %220 : vector<16x128xf32>
    %c4 = arith.constant 4 : index
    %c0_112 = arith.constant 0 : index
    %c0_113 = arith.constant 0 : index
    %222 = vector.load %arg7[%c4, %c0_112, %c0_113] : memref<24x128x32xf32, #tpu.memory_space<vmem>>, vector<1x128x32xf32>
    %223 = vector.shape_cast %222 : vector<1x128x32xf32> to vector<128x32xf32>
    %cst_114 = arith.constant dense<0.000000e+00> : vector<16x32xf32>
    %224 = tpu.matmul %221, %223, %cst_114 {dimension_numbers = #tpu.dot_dimension_numbers<[1], [0], [0], [1], [0, 0, 1, 1], [], []>} : vector<16x128xf32>, vector<128x32xf32>, vector<16x32xf32> -> vector<16x32xf32>
    %225 = arith.addf %206, %224 : vector<16x32xf32>
    %226 = vector.extract_strided_slice %205 {offsets = [0, 128], sizes = [16, 128], strides = [1, 1]} : vector<16x1536xf32> to vector<16x128xf32>
    %227 = vector.extract_strided_slice %205 {offsets = [0, 640], sizes = [16, 128], strides = [1, 1]} : vector<16x1536xf32> to vector<16x128xf32>
    %228 = vector.extract_strided_slice %205 {offsets = [0, 1152], sizes = [16, 128], strides = [1, 1]} : vector<16x1536xf32> to vector<16x128xf32>
    %cst_115 = arith.constant dense<0.000000e+00> : vector<16x16xf32>
    %229 = tpu.matmul %226, %227, %cst_115 {dimension_numbers = #tpu.dot_dimension_numbers<[1], [1], [0], [0], [0, 0, 1, 0], [], []>} : vector<16x128xf32>, vector<16x128xf32>, vector<16x16xf32> -> vector<16x16xf32>
    %cst_116 = arith.constant 0.353553385 : f32
    %230 = vector.broadcast %cst_116 : f32 to vector<16x16xf32>
    %231 = arith.mulf %229, %230 : vector<16x16xf32>
    %232 = arith.addf %231, %3 : vector<16x16xf32>
    %233 = math.exp %232 : vector<16x16xf32>
    %cst_117 = arith.constant dense<0.000000e+00> : vector<16xf32>
    %234 = vector.multi_reduction <add>, %233, %cst_117 [1] : vector<16x16xf32> to vector<16xf32>
    %235 = vector.shape_cast %234 : vector<16xf32> to vector<16x1xf32>
    %cst_118 = arith.constant 1.000000e+00 : f32
    %236 = vector.broadcast %cst_118 : f32 to vector<16x1xf32>
    %237 = arith.divf %236, %235 : vector<16x1xf32>
    %cst_119 = arith.constant dense<0.000000e+00> : vector<16x128xf32>
    %238 = tpu.matmul %233, %228, %cst_119 {dimension_numbers = #tpu.dot_dimension_numbers<[1], [0], [0], [1], [0, 0, 1, 1], [], []>} : vector<16x16xf32>, vector<16x128xf32>, vector<16x128xf32> -> vector<16x128xf32>
    %239 = vector.broadcast %237 : vector<16x1xf32> to vector<16x128xf32>
    %240 = arith.mulf %238, %239 : vector<16x128xf32>
    %c5 = arith.constant 5 : index
    %c0_120 = arith.constant 0 : index
    %c0_121 = arith.constant 0 : index
    %241 = vector.load %arg7[%c5, %c0_120, %c0_121] : memref<24x128x32xf32, #tpu.memory_space<vmem>>, vector<1x128x32xf32>
    %242 = vector.shape_cast %241 : vector<1x128x32xf32> to vector<128x32xf32>
    %cst_122 = arith.constant dense<0.000000e+00> : vector<16x32xf32>
    %243 = tpu.matmul %240, %242, %cst_122 {dimension_numbers = #tpu.dot_dimension_numbers<[1], [0], [0], [1], [0, 0, 1, 1], [], []>} : vector<16x128xf32>, vector<128x32xf32>, vector<16x32xf32> -> vector<16x32xf32>
    %244 = arith.addf %225, %243 : vector<16x32xf32>
    %245 = vector.extract_strided_slice %205 {offsets = [0, 256], sizes = [16, 128], strides = [1, 1]} : vector<16x1536xf32> to vector<16x128xf32>
    %246 = vector.extract_strided_slice %205 {offsets = [0, 768], sizes = [16, 128], strides = [1, 1]} : vector<16x1536xf32> to vector<16x128xf32>
    %247 = vector.extract_strided_slice %205 {offsets = [0, 1280], sizes = [16, 128], strides = [1, 1]} : vector<16x1536xf32> to vector<16x128xf32>
    %cst_123 = arith.constant dense<0.000000e+00> : vector<16x16xf32>
    %248 = tpu.matmul %245, %246, %cst_123 {dimension_numbers = #tpu.dot_dimension_numbers<[1], [1], [0], [0], [0, 0, 1, 0], [], []>} : vector<16x128xf32>, vector<16x128xf32>, vector<16x16xf32> -> vector<16x16xf32>
    %cst_124 = arith.constant 0.353553385 : f32
    %249 = vector.broadcast %cst_124 : f32 to vector<16x16xf32>
    %250 = arith.mulf %248, %249 : vector<16x16xf32>
    %251 = arith.addf %250, %3 : vector<16x16xf32>
    %252 = math.exp %251 : vector<16x16xf32>
    %cst_125 = arith.constant dense<0.000000e+00> : vector<16xf32>
    %253 = vector.multi_reduction <add>, %252, %cst_125 [1] : vector<16x16xf32> to vector<16xf32>
    %254 = vector.shape_cast %253 : vector<16xf32> to vector<16x1xf32>
    %cst_126 = arith.constant 1.000000e+00 : f32
    %255 = vector.broadcast %cst_126 : f32 to vector<16x1xf32>
    %256 = arith.divf %255, %254 : vector<16x1xf32>
    %cst_127 = arith.constant dense<0.000000e+00> : vector<16x128xf32>
    %257 = tpu.matmul %252, %247, %cst_127 {dimension_numbers = #tpu.dot_dimension_numbers<[1], [0], [0], [1], [0, 0, 1, 1], [], []>} : vector<16x16xf32>, vector<16x128xf32>, vector<16x128xf32> -> vector<16x128xf32>
    %258 = vector.broadcast %256 : vector<16x1xf32> to vector<16x128xf32>
    %259 = arith.mulf %257, %258 : vector<16x128xf32>
    %c6 = arith.constant 6 : index
    %c0_128 = arith.constant 0 : index
    %c0_129 = arith.constant 0 : index
    %260 = vector.load %arg7[%c6, %c0_128, %c0_129] : memref<24x128x32xf32, #tpu.memory_space<vmem>>, vector<1x128x32xf32>
    %261 = vector.shape_cast %260 : vector<1x128x32xf32> to vector<128x32xf32>
    %cst_130 = arith.constant dense<0.000000e+00> : vector<16x32xf32>
    %262 = tpu.matmul %259, %261, %cst_130 {dimension_numbers = #tpu.dot_dimension_numbers<[1], [0], [0], [1], [0, 0, 1, 1], [], []>} : vector<16x128xf32>, vector<128x32xf32>, vector<16x32xf32> -> vector<16x32xf32>
    %263 = arith.addf %244, %262 : vector<16x32xf32>
    %264 = vector.extract_strided_slice %205 {offsets = [0, 384], sizes = [16, 128], strides = [1, 1]} : vector<16x1536xf32> to vector<16x128xf32>
    %265 = vector.extract_strided_slice %205 {offsets = [0, 896], sizes = [16, 128], strides = [1, 1]} : vector<16x1536xf32> to vector<16x128xf32>
    %266 = vector.extract_strided_slice %205 {offsets = [0, 1408], sizes = [16, 128], strides = [1, 1]} : vector<16x1536xf32> to vector<16x128xf32>
    %cst_131 = arith.constant dense<0.000000e+00> : vector<16x16xf32>
    %267 = tpu.matmul %264, %265, %cst_131 {dimension_numbers = #tpu.dot_dimension_numbers<[1], [1], [0], [0], [0, 0, 1, 0], [], []>} : vector<16x128xf32>, vector<16x128xf32>, vector<16x16xf32> -> vector<16x16xf32>
    %cst_132 = arith.constant 0.353553385 : f32
    %268 = vector.broadcast %cst_132 : f32 to vector<16x16xf32>
    %269 = arith.mulf %267, %268 : vector<16x16xf32>
    %270 = arith.addf %269, %3 : vector<16x16xf32>
    %271 = math.exp %270 : vector<16x16xf32>
    %cst_133 = arith.constant dense<0.000000e+00> : vector<16xf32>
    %272 = vector.multi_reduction <add>, %271, %cst_133 [1] : vector<16x16xf32> to vector<16xf32>
    %273 = vector.shape_cast %272 : vector<16xf32> to vector<16x1xf32>
    %cst_134 = arith.constant 1.000000e+00 : f32
    %274 = vector.broadcast %cst_134 : f32 to vector<16x1xf32>
    %275 = arith.divf %274, %273 : vector<16x1xf32>
    %cst_135 = arith.constant dense<0.000000e+00> : vector<16x128xf32>
    %276 = tpu.matmul %271, %266, %cst_135 {dimension_numbers = #tpu.dot_dimension_numbers<[1], [0], [0], [1], [0, 0, 1, 1], [], []>} : vector<16x16xf32>, vector<16x128xf32>, vector<16x128xf32> -> vector<16x128xf32>
    %277 = vector.broadcast %275 : vector<16x1xf32> to vector<16x128xf32>
    %278 = arith.mulf %276, %277 : vector<16x128xf32>
    %c7 = arith.constant 7 : index
    %c0_136 = arith.constant 0 : index
    %c0_137 = arith.constant 0 : index
    %279 = vector.load %arg7[%c7, %c0_136, %c0_137] : memref<24x128x32xf32, #tpu.memory_space<vmem>>, vector<1x128x32xf32>
    %280 = vector.shape_cast %279 : vector<1x128x32xf32> to vector<128x32xf32>
    %cst_138 = arith.constant dense<0.000000e+00> : vector<16x32xf32>
    %281 = tpu.matmul %278, %280, %cst_138 {dimension_numbers = #tpu.dot_dimension_numbers<[1], [0], [0], [1], [0, 0, 1, 1], [], []>} : vector<16x128xf32>, vector<128x32xf32>, vector<16x32xf32> -> vector<16x32xf32>
    %282 = arith.addf %263, %281 : vector<16x32xf32>
    %283 = arith.addf %172, %282 : vector<16x32xf32>
    %c1_139 = arith.constant 1 : index
    %c0_140 = arith.constant 0 : index
    %c0_141 = arith.constant 0 : index
    %284 = vector.load %arg8[%c1_139, %c0_140, %c0_141] : memref<6x1x32xf32, #tpu.memory_space<vmem>>, vector<1x1x32xf32>
    %285 = vector.shape_cast %284 : vector<1x1x32xf32> to vector<1x32xf32>
    %286 = vector.broadcast %285 : vector<1x32xf32> to vector<16x32xf32>
    %287 = arith.addf %283, %286 : vector<16x32xf32>
    %c1_142 = arith.constant 1 : index
    %c0_143 = arith.constant 0 : index
    %c0_144 = arith.constant 0 : index
    %288 = vector.load %arg9[%c1_142, %c0_143, %c0_144] : memref<6x1x32xf32, #tpu.memory_space<vmem>>, vector<1x1x32xf32>
    %289 = vector.shape_cast %288 : vector<1x1x32xf32> to vector<1x32xf32>
    %c1_145 = arith.constant 1 : index
    %c0_146 = arith.constant 0 : index
    %c0_147 = arith.constant 0 : index
    %290 = vector.load %arg10[%c1_145, %c0_146, %c0_147] : memref<6x1x32xf32, #tpu.memory_space<vmem>>, vector<1x1x32xf32>
    %291 = vector.shape_cast %290 : vector<1x1x32xf32> to vector<1x32xf32>
    %cst_148 = arith.constant dense<0.000000e+00> : vector<16xf32>
    %292 = vector.multi_reduction <add>, %287, %cst_148 [1] : vector<16x32xf32> to vector<16xf32>
    %293 = vector.shape_cast %292 : vector<16xf32> to vector<16x1xf32>
    %cst_149 = arith.constant 3.200000e+01 : f32
    %294 = vector.broadcast %cst_149 : f32 to vector<16x1xf32>
    %295 = arith.divf %293, %294 : vector<16x1xf32>
    %296 = arith.mulf %287, %287 : vector<16x32xf32>
    %cst_150 = arith.constant dense<0.000000e+00> : vector<16xf32>
    %297 = vector.multi_reduction <add>, %296, %cst_150 [1] : vector<16x32xf32> to vector<16xf32>
    %298 = vector.shape_cast %297 : vector<16xf32> to vector<16x1xf32>
    %cst_151 = arith.constant 3.200000e+01 : f32
    %299 = vector.broadcast %cst_151 : f32 to vector<16x1xf32>
    %300 = arith.divf %298, %299 : vector<16x1xf32>
    %301 = arith.mulf %295, %295 : vector<16x1xf32>
    %302 = arith.subf %300, %301 : vector<16x1xf32>
    %303 = vector.broadcast %295 : vector<16x1xf32> to vector<16x32xf32>
    %304 = arith.subf %287, %303 : vector<16x32xf32>
    %cst_152 = arith.constant 9.99999974E-6 : f32
    %305 = vector.broadcast %cst_152 : f32 to vector<16x1xf32>
    %306 = arith.addf %302, %305 : vector<16x1xf32>
    %307 = math.rsqrt %306 : vector<16x1xf32>
    %308 = vector.broadcast %307 : vector<16x1xf32> to vector<16x32xf32>
    %309 = arith.mulf %304, %308 : vector<16x32xf32>
    %310 = vector.broadcast %289 : vector<1x32xf32> to vector<16x32xf32>
    %311 = arith.mulf %309, %310 : vector<16x32xf32>
    %312 = vector.broadcast %291 : vector<1x32xf32> to vector<16x32xf32>
    %313 = arith.addf %311, %312 : vector<16x32xf32>
    %c1_153 = arith.constant 1 : index
    %c0_154 = arith.constant 0 : index
    %c0_155 = arith.constant 0 : index
    %314 = vector.load %arg11[%c1_153, %c0_154, %c0_155] : memref<6x32x128xf32, #tpu.memory_space<vmem>>, vector<1x32x128xf32>
    %315 = vector.shape_cast %314 : vector<1x32x128xf32> to vector<32x128xf32>
    %cst_156 = arith.constant dense<0.000000e+00> : vector<16x128xf32>
    %316 = tpu.matmul %313, %315, %cst_156 {dimension_numbers = #tpu.dot_dimension_numbers<[1], [0], [0], [1], [0, 0, 1, 1], [], []>} : vector<16x32xf32>, vector<32x128xf32>, vector<16x128xf32> -> vector<16x128xf32>
    %c1_157 = arith.constant 1 : index
    %c0_158 = arith.constant 0 : index
    %c0_159 = arith.constant 0 : index
    %317 = vector.load %arg12[%c1_157, %c0_158, %c0_159] : memref<6x1x128xf32, #tpu.memory_space<vmem>>, vector<1x1x128xf32>
    %318 = vector.shape_cast %317 : vector<1x1x128xf32> to vector<1x128xf32>
    %319 = vector.broadcast %318 : vector<1x128xf32> to vector<16x128xf32>
    %320 = arith.addf %316, %319 : vector<16x128xf32>
    %cst_160 = arith.constant 5.000000e-01 : f32
    %321 = vector.broadcast %cst_160 : f32 to vector<16x128xf32>
    %322 = arith.mulf %321, %320 : vector<16x128xf32>
    %cst_161 = arith.constant 4.471500e-02 : f32
    %323 = vector.broadcast %cst_161 : f32 to vector<16x128xf32>
    %324 = arith.mulf %323, %320 : vector<16x128xf32>
    %325 = arith.mulf %324, %320 : vector<16x128xf32>
    %326 = arith.mulf %325, %320 : vector<16x128xf32>
    %327 = arith.addf %320, %326 : vector<16x128xf32>
    %cst_162 = arith.constant 0.797884583 : f32
    %328 = vector.broadcast %cst_162 : f32 to vector<16x128xf32>
    %329 = arith.mulf %328, %327 : vector<16x128xf32>
    %330 = math.tanh %329 : vector<16x128xf32>
    %cst_163 = arith.constant 1.000000e+00 : f32
    %331 = vector.broadcast %cst_163 : f32 to vector<16x128xf32>
    %332 = arith.addf %331, %330 : vector<16x128xf32>
    %333 = arith.mulf %322, %332 : vector<16x128xf32>
    %c1_164 = arith.constant 1 : index
    %c0_165 = arith.constant 0 : index
    %c0_166 = arith.constant 0 : index
    %334 = vector.load %arg13[%c1_164, %c0_165, %c0_166] : memref<6x128x32xf32, #tpu.memory_space<vmem>>, vector<1x128x32xf32>
    %335 = vector.shape_cast %334 : vector<1x128x32xf32> to vector<128x32xf32>
    %cst_167 = arith.constant dense<0.000000e+00> : vector<16x32xf32>
    %336 = tpu.matmul %333, %335, %cst_167 {dimension_numbers = #tpu.dot_dimension_numbers<[1], [0], [0], [1], [0, 0, 1, 1], [], []>} : vector<16x128xf32>, vector<128x32xf32>, vector<16x32xf32> -> vector<16x32xf32>
    %337 = arith.addf %287, %336 : vector<16x32xf32>
    %c1_168 = arith.constant 1 : index
    %c0_169 = arith.constant 0 : index
    %c0_170 = arith.constant 0 : index
    %338 = vector.load %arg14[%c1_168, %c0_169, %c0_170] : memref<6x1x32xf32, #tpu.memory_space<vmem>>, vector<1x1x32xf32>
    %339 = vector.shape_cast %338 : vector<1x1x32xf32> to vector<1x32xf32>
    %340 = vector.broadcast %339 : vector<1x32xf32> to vector<16x32xf32>
    %341 = arith.addf %337, %340 : vector<16x32xf32>
    %c2_171 = arith.constant 2 : index
    %c0_172 = arith.constant 0 : index
    %c0_173 = arith.constant 0 : index
    %342 = vector.load %arg3[%c2_171, %c0_172, %c0_173] : memref<6x1x32xf32, #tpu.memory_space<vmem>>, vector<1x1x32xf32>
    %343 = vector.shape_cast %342 : vector<1x1x32xf32> to vector<1x32xf32>
    %c2_174 = arith.constant 2 : index
    %c0_175 = arith.constant 0 : index
    %c0_176 = arith.constant 0 : index
    %344 = vector.load %arg4[%c2_174, %c0_175, %c0_176] : memref<6x1x32xf32, #tpu.memory_space<vmem>>, vector<1x1x32xf32>
    %345 = vector.shape_cast %344 : vector<1x1x32xf32> to vector<1x32xf32>
    %cst_177 = arith.constant dense<0.000000e+00> : vector<16xf32>
    %346 = vector.multi_reduction <add>, %341, %cst_177 [1] : vector<16x32xf32> to vector<16xf32>
    %347 = vector.shape_cast %346 : vector<16xf32> to vector<16x1xf32>
    %cst_178 = arith.constant 3.200000e+01 : f32
    %348 = vector.broadcast %cst_178 : f32 to vector<16x1xf32>
    %349 = arith.divf %347, %348 : vector<16x1xf32>
    %350 = arith.mulf %341, %341 : vector<16x32xf32>
    %cst_179 = arith.constant dense<0.000000e+00> : vector<16xf32>
    %351 = vector.multi_reduction <add>, %350, %cst_179 [1] : vector<16x32xf32> to vector<16xf32>
    %352 = vector.shape_cast %351 : vector<16xf32> to vector<16x1xf32>
    %cst_180 = arith.constant 3.200000e+01 : f32
    %353 = vector.broadcast %cst_180 : f32 to vector<16x1xf32>
    %354 = arith.divf %352, %353 : vector<16x1xf32>
    %355 = arith.mulf %349, %349 : vector<16x1xf32>
    %356 = arith.subf %354, %355 : vector<16x1xf32>
    %357 = vector.broadcast %349 : vector<16x1xf32> to vector<16x32xf32>
    %358 = arith.subf %341, %357 : vector<16x32xf32>
    %cst_181 = arith.constant 9.99999974E-6 : f32
    %359 = vector.broadcast %cst_181 : f32 to vector<16x1xf32>
    %360 = arith.addf %356, %359 : vector<16x1xf32>
    %361 = math.rsqrt %360 : vector<16x1xf32>
    %362 = vector.broadcast %361 : vector<16x1xf32> to vector<16x32xf32>
    %363 = arith.mulf %358, %362 : vector<16x32xf32>
    %364 = vector.broadcast %343 : vector<1x32xf32> to vector<16x32xf32>
    %365 = arith.mulf %363, %364 : vector<16x32xf32>
    %366 = vector.broadcast %345 : vector<1x32xf32> to vector<16x32xf32>
    %367 = arith.addf %365, %366 : vector<16x32xf32>
    %c2_182 = arith.constant 2 : index
    %c0_183 = arith.constant 0 : index
    %c0_184 = arith.constant 0 : index
    %368 = vector.load %arg5[%c2_182, %c0_183, %c0_184] : memref<6x32x1536xf32, #tpu.memory_space<vmem>>, vector<1x32x1536xf32>
    %369 = vector.shape_cast %368 : vector<1x32x1536xf32> to vector<32x1536xf32>
    %cst_185 = arith.constant dense<0.000000e+00> : vector<16x1536xf32>
    %370 = tpu.matmul %367, %369, %cst_185 {dimension_numbers = #tpu.dot_dimension_numbers<[1], [0], [0], [1], [0, 0, 1, 1], [], []>} : vector<16x32xf32>, vector<32x1536xf32>, vector<16x1536xf32> -> vector<16x1536xf32>
    %c2_186 = arith.constant 2 : index
    %c0_187 = arith.constant 0 : index
    %c0_188 = arith.constant 0 : index
    %371 = vector.load %arg6[%c2_186, %c0_187, %c0_188] : memref<6x1x1536xf32, #tpu.memory_space<vmem>>, vector<1x1x1536xf32>
    %372 = vector.shape_cast %371 : vector<1x1x1536xf32> to vector<1x1536xf32>
    %373 = vector.broadcast %372 : vector<1x1536xf32> to vector<16x1536xf32>
    %374 = arith.addf %370, %373 : vector<16x1536xf32>
    %cst_189 = arith.constant 0.000000e+00 : f32
    %375 = vector.broadcast %cst_189 : f32 to vector<16x32xf32>
    %376 = vector.extract_strided_slice %374 {offsets = [0, 0], sizes = [16, 128], strides = [1, 1]} : vector<16x1536xf32> to vector<16x128xf32>
    %377 = vector.extract_strided_slice %374 {offsets = [0, 512], sizes = [16, 128], strides = [1, 1]} : vector<16x1536xf32> to vector<16x128xf32>
    %378 = vector.extract_strided_slice %374 {offsets = [0, 1024], sizes = [16, 128], strides = [1, 1]} : vector<16x1536xf32> to vector<16x128xf32>
    %cst_190 = arith.constant dense<0.000000e+00> : vector<16x16xf32>
    %379 = tpu.matmul %376, %377, %cst_190 {dimension_numbers = #tpu.dot_dimension_numbers<[1], [1], [0], [0], [0, 0, 1, 0], [], []>} : vector<16x128xf32>, vector<16x128xf32>, vector<16x16xf32> -> vector<16x16xf32>
    %cst_191 = arith.constant 0.353553385 : f32
    %380 = vector.broadcast %cst_191 : f32 to vector<16x16xf32>
    %381 = arith.mulf %379, %380 : vector<16x16xf32>
    %382 = arith.addf %381, %3 : vector<16x16xf32>
    %383 = math.exp %382 : vector<16x16xf32>
    %cst_192 = arith.constant dense<0.000000e+00> : vector<16xf32>
    %384 = vector.multi_reduction <add>, %383, %cst_192 [1] : vector<16x16xf32> to vector<16xf32>
    %385 = vector.shape_cast %384 : vector<16xf32> to vector<16x1xf32>
    %cst_193 = arith.constant 1.000000e+00 : f32
    %386 = vector.broadcast %cst_193 : f32 to vector<16x1xf32>
    %387 = arith.divf %386, %385 : vector<16x1xf32>
    %cst_194 = arith.constant dense<0.000000e+00> : vector<16x128xf32>
    %388 = tpu.matmul %383, %378, %cst_194 {dimension_numbers = #tpu.dot_dimension_numbers<[1], [0], [0], [1], [0, 0, 1, 1], [], []>} : vector<16x16xf32>, vector<16x128xf32>, vector<16x128xf32> -> vector<16x128xf32>
    %389 = vector.broadcast %387 : vector<16x1xf32> to vector<16x128xf32>
    %390 = arith.mulf %388, %389 : vector<16x128xf32>
    %c8 = arith.constant 8 : index
    %c0_195 = arith.constant 0 : index
    %c0_196 = arith.constant 0 : index
    %391 = vector.load %arg7[%c8, %c0_195, %c0_196] : memref<24x128x32xf32, #tpu.memory_space<vmem>>, vector<1x128x32xf32>
    %392 = vector.shape_cast %391 : vector<1x128x32xf32> to vector<128x32xf32>
    %cst_197 = arith.constant dense<0.000000e+00> : vector<16x32xf32>
    %393 = tpu.matmul %390, %392, %cst_197 {dimension_numbers = #tpu.dot_dimension_numbers<[1], [0], [0], [1], [0, 0, 1, 1], [], []>} : vector<16x128xf32>, vector<128x32xf32>, vector<16x32xf32> -> vector<16x32xf32>
    %394 = arith.addf %375, %393 : vector<16x32xf32>
    %395 = vector.extract_strided_slice %374 {offsets = [0, 128], sizes = [16, 128], strides = [1, 1]} : vector<16x1536xf32> to vector<16x128xf32>
    %396 = vector.extract_strided_slice %374 {offsets = [0, 640], sizes = [16, 128], strides = [1, 1]} : vector<16x1536xf32> to vector<16x128xf32>
    %397 = vector.extract_strided_slice %374 {offsets = [0, 1152], sizes = [16, 128], strides = [1, 1]} : vector<16x1536xf32> to vector<16x128xf32>
    %cst_198 = arith.constant dense<0.000000e+00> : vector<16x16xf32>
    %398 = tpu.matmul %395, %396, %cst_198 {dimension_numbers = #tpu.dot_dimension_numbers<[1], [1], [0], [0], [0, 0, 1, 0], [], []>} : vector<16x128xf32>, vector<16x128xf32>, vector<16x16xf32> -> vector<16x16xf32>
    %cst_199 = arith.constant 0.353553385 : f32
    %399 = vector.broadcast %cst_199 : f32 to vector<16x16xf32>
    %400 = arith.mulf %398, %399 : vector<16x16xf32>
    %401 = arith.addf %400, %3 : vector<16x16xf32>
    %402 = math.exp %401 : vector<16x16xf32>
    %cst_200 = arith.constant dense<0.000000e+00> : vector<16xf32>
    %403 = vector.multi_reduction <add>, %402, %cst_200 [1] : vector<16x16xf32> to vector<16xf32>
    %404 = vector.shape_cast %403 : vector<16xf32> to vector<16x1xf32>
    %cst_201 = arith.constant 1.000000e+00 : f32
    %405 = vector.broadcast %cst_201 : f32 to vector<16x1xf32>
    %406 = arith.divf %405, %404 : vector<16x1xf32>
    %cst_202 = arith.constant dense<0.000000e+00> : vector<16x128xf32>
    %407 = tpu.matmul %402, %397, %cst_202 {dimension_numbers = #tpu.dot_dimension_numbers<[1], [0], [0], [1], [0, 0, 1, 1], [], []>} : vector<16x16xf32>, vector<16x128xf32>, vector<16x128xf32> -> vector<16x128xf32>
    %408 = vector.broadcast %406 : vector<16x1xf32> to vector<16x128xf32>
    %409 = arith.mulf %407, %408 : vector<16x128xf32>
    %c9 = arith.constant 9 : index
    %c0_203 = arith.constant 0 : index
    %c0_204 = arith.constant 0 : index
    %410 = vector.load %arg7[%c9, %c0_203, %c0_204] : memref<24x128x32xf32, #tpu.memory_space<vmem>>, vector<1x128x32xf32>
    %411 = vector.shape_cast %410 : vector<1x128x32xf32> to vector<128x32xf32>
    %cst_205 = arith.constant dense<0.000000e+00> : vector<16x32xf32>
    %412 = tpu.matmul %409, %411, %cst_205 {dimension_numbers = #tpu.dot_dimension_numbers<[1], [0], [0], [1], [0, 0, 1, 1], [], []>} : vector<16x128xf32>, vector<128x32xf32>, vector<16x32xf32> -> vector<16x32xf32>
    %413 = arith.addf %394, %412 : vector<16x32xf32>
    %414 = vector.extract_strided_slice %374 {offsets = [0, 256], sizes = [16, 128], strides = [1, 1]} : vector<16x1536xf32> to vector<16x128xf32>
    %415 = vector.extract_strided_slice %374 {offsets = [0, 768], sizes = [16, 128], strides = [1, 1]} : vector<16x1536xf32> to vector<16x128xf32>
    %416 = vector.extract_strided_slice %374 {offsets = [0, 1280], sizes = [16, 128], strides = [1, 1]} : vector<16x1536xf32> to vector<16x128xf32>
    %cst_206 = arith.constant dense<0.000000e+00> : vector<16x16xf32>
    %417 = tpu.matmul %414, %415, %cst_206 {dimension_numbers = #tpu.dot_dimension_numbers<[1], [1], [0], [0], [0, 0, 1, 0], [], []>} : vector<16x128xf32>, vector<16x128xf32>, vector<16x16xf32> -> vector<16x16xf32>
    %cst_207 = arith.constant 0.353553385 : f32
    %418 = vector.broadcast %cst_207 : f32 to vector<16x16xf32>
    %419 = arith.mulf %417, %418 : vector<16x16xf32>
    %420 = arith.addf %419, %3 : vector<16x16xf32>
    %421 = math.exp %420 : vector<16x16xf32>
    %cst_208 = arith.constant dense<0.000000e+00> : vector<16xf32>
    %422 = vector.multi_reduction <add>, %421, %cst_208 [1] : vector<16x16xf32> to vector<16xf32>
    %423 = vector.shape_cast %422 : vector<16xf32> to vector<16x1xf32>
    %cst_209 = arith.constant 1.000000e+00 : f32
    %424 = vector.broadcast %cst_209 : f32 to vector<16x1xf32>
    %425 = arith.divf %424, %423 : vector<16x1xf32>
    %cst_210 = arith.constant dense<0.000000e+00> : vector<16x128xf32>
    %426 = tpu.matmul %421, %416, %cst_210 {dimension_numbers = #tpu.dot_dimension_numbers<[1], [0], [0], [1], [0, 0, 1, 1], [], []>} : vector<16x16xf32>, vector<16x128xf32>, vector<16x128xf32> -> vector<16x128xf32>
    %427 = vector.broadcast %425 : vector<16x1xf32> to vector<16x128xf32>
    %428 = arith.mulf %426, %427 : vector<16x128xf32>
    %c10 = arith.constant 10 : index
    %c0_211 = arith.constant 0 : index
    %c0_212 = arith.constant 0 : index
    %429 = vector.load %arg7[%c10, %c0_211, %c0_212] : memref<24x128x32xf32, #tpu.memory_space<vmem>>, vector<1x128x32xf32>
    %430 = vector.shape_cast %429 : vector<1x128x32xf32> to vector<128x32xf32>
    %cst_213 = arith.constant dense<0.000000e+00> : vector<16x32xf32>
    %431 = tpu.matmul %428, %430, %cst_213 {dimension_numbers = #tpu.dot_dimension_numbers<[1], [0], [0], [1], [0, 0, 1, 1], [], []>} : vector<16x128xf32>, vector<128x32xf32>, vector<16x32xf32> -> vector<16x32xf32>
    %432 = arith.addf %413, %431 : vector<16x32xf32>
    %433 = vector.extract_strided_slice %374 {offsets = [0, 384], sizes = [16, 128], strides = [1, 1]} : vector<16x1536xf32> to vector<16x128xf32>
    %434 = vector.extract_strided_slice %374 {offsets = [0, 896], sizes = [16, 128], strides = [1, 1]} : vector<16x1536xf32> to vector<16x128xf32>
    %435 = vector.extract_strided_slice %374 {offsets = [0, 1408], sizes = [16, 128], strides = [1, 1]} : vector<16x1536xf32> to vector<16x128xf32>
    %cst_214 = arith.constant dense<0.000000e+00> : vector<16x16xf32>
    %436 = tpu.matmul %433, %434, %cst_214 {dimension_numbers = #tpu.dot_dimension_numbers<[1], [1], [0], [0], [0, 0, 1, 0], [], []>} : vector<16x128xf32>, vector<16x128xf32>, vector<16x16xf32> -> vector<16x16xf32>
    %cst_215 = arith.constant 0.353553385 : f32
    %437 = vector.broadcast %cst_215 : f32 to vector<16x16xf32>
    %438 = arith.mulf %436, %437 : vector<16x16xf32>
    %439 = arith.addf %438, %3 : vector<16x16xf32>
    %440 = math.exp %439 : vector<16x16xf32>
    %cst_216 = arith.constant dense<0.000000e+00> : vector<16xf32>
    %441 = vector.multi_reduction <add>, %440, %cst_216 [1] : vector<16x16xf32> to vector<16xf32>
    %442 = vector.shape_cast %441 : vector<16xf32> to vector<16x1xf32>
    %cst_217 = arith.constant 1.000000e+00 : f32
    %443 = vector.broadcast %cst_217 : f32 to vector<16x1xf32>
    %444 = arith.divf %443, %442 : vector<16x1xf32>
    %cst_218 = arith.constant dense<0.000000e+00> : vector<16x128xf32>
    %445 = tpu.matmul %440, %435, %cst_218 {dimension_numbers = #tpu.dot_dimension_numbers<[1], [0], [0], [1], [0, 0, 1, 1], [], []>} : vector<16x16xf32>, vector<16x128xf32>, vector<16x128xf32> -> vector<16x128xf32>
    %446 = vector.broadcast %444 : vector<16x1xf32> to vector<16x128xf32>
    %447 = arith.mulf %445, %446 : vector<16x128xf32>
    %c11 = arith.constant 11 : index
    %c0_219 = arith.constant 0 : index
    %c0_220 = arith.constant 0 : index
    %448 = vector.load %arg7[%c11, %c0_219, %c0_220] : memref<24x128x32xf32, #tpu.memory_space<vmem>>, vector<1x128x32xf32>
    %449 = vector.shape_cast %448 : vector<1x128x32xf32> to vector<128x32xf32>
    %cst_221 = arith.constant dense<0.000000e+00> : vector<16x32xf32>
    %450 = tpu.matmul %447, %449, %cst_221 {dimension_numbers = #tpu.dot_dimension_numbers<[1], [0], [0], [1], [0, 0, 1, 1], [], []>} : vector<16x128xf32>, vector<128x32xf32>, vector<16x32xf32> -> vector<16x32xf32>
    %451 = arith.addf %432, %450 : vector<16x32xf32>
    %452 = arith.addf %341, %451 : vector<16x32xf32>
    %c2_222 = arith.constant 2 : index
    %c0_223 = arith.constant 0 : index
    %c0_224 = arith.constant 0 : index
    %453 = vector.load %arg8[%c2_222, %c0_223, %c0_224] : memref<6x1x32xf32, #tpu.memory_space<vmem>>, vector<1x1x32xf32>
    %454 = vector.shape_cast %453 : vector<1x1x32xf32> to vector<1x32xf32>
    %455 = vector.broadcast %454 : vector<1x32xf32> to vector<16x32xf32>
    %456 = arith.addf %452, %455 : vector<16x32xf32>
    %c2_225 = arith.constant 2 : index
    %c0_226 = arith.constant 0 : index
    %c0_227 = arith.constant 0 : index
    %457 = vector.load %arg9[%c2_225, %c0_226, %c0_227] : memref<6x1x32xf32, #tpu.memory_space<vmem>>, vector<1x1x32xf32>
    %458 = vector.shape_cast %457 : vector<1x1x32xf32> to vector<1x32xf32>
    %c2_228 = arith.constant 2 : index
    %c0_229 = arith.constant 0 : index
    %c0_230 = arith.constant 0 : index
    %459 = vector.load %arg10[%c2_228, %c0_229, %c0_230] : memref<6x1x32xf32, #tpu.memory_space<vmem>>, vector<1x1x32xf32>
    %460 = vector.shape_cast %459 : vector<1x1x32xf32> to vector<1x32xf32>
    %cst_231 = arith.constant dense<0.000000e+00> : vector<16xf32>
    %461 = vector.multi_reduction <add>, %456, %cst_231 [1] : vector<16x32xf32> to vector<16xf32>
    %462 = vector.shape_cast %461 : vector<16xf32> to vector<16x1xf32>
    %cst_232 = arith.constant 3.200000e+01 : f32
    %463 = vector.broadcast %cst_232 : f32 to vector<16x1xf32>
    %464 = arith.divf %462, %463 : vector<16x1xf32>
    %465 = arith.mulf %456, %456 : vector<16x32xf32>
    %cst_233 = arith.constant dense<0.000000e+00> : vector<16xf32>
    %466 = vector.multi_reduction <add>, %465, %cst_233 [1] : vector<16x32xf32> to vector<16xf32>
    %467 = vector.shape_cast %466 : vector<16xf32> to vector<16x1xf32>
    %cst_234 = arith.constant 3.200000e+01 : f32
    %468 = vector.broadcast %cst_234 : f32 to vector<16x1xf32>
    %469 = arith.divf %467, %468 : vector<16x1xf32>
    %470 = arith.mulf %464, %464 : vector<16x1xf32>
    %471 = arith.subf %469, %470 : vector<16x1xf32>
    %472 = vector.broadcast %464 : vector<16x1xf32> to vector<16x32xf32>
    %473 = arith.subf %456, %472 : vector<16x32xf32>
    %cst_235 = arith.constant 9.99999974E-6 : f32
    %474 = vector.broadcast %cst_235 : f32 to vector<16x1xf32>
    %475 = arith.addf %471, %474 : vector<16x1xf32>
    %476 = math.rsqrt %475 : vector<16x1xf32>
    %477 = vector.broadcast %476 : vector<16x1xf32> to vector<16x32xf32>
    %478 = arith.mulf %473, %477 : vector<16x32xf32>
    %479 = vector.broadcast %458 : vector<1x32xf32> to vector<16x32xf32>
    %480 = arith.mulf %478, %479 : vector<16x32xf32>
    %481 = vector.broadcast %460 : vector<1x32xf32> to vector<16x32xf32>
    %482 = arith.addf %480, %481 : vector<16x32xf32>
    %c2_236 = arith.constant 2 : index
    %c0_237 = arith.constant 0 : index
    %c0_238 = arith.constant 0 : index
    %483 = vector.load %arg11[%c2_236, %c0_237, %c0_238] : memref<6x32x128xf32, #tpu.memory_space<vmem>>, vector<1x32x128xf32>
    %484 = vector.shape_cast %483 : vector<1x32x128xf32> to vector<32x128xf32>
    %cst_239 = arith.constant dense<0.000000e+00> : vector<16x128xf32>
    %485 = tpu.matmul %482, %484, %cst_239 {dimension_numbers = #tpu.dot_dimension_numbers<[1], [0], [0], [1], [0, 0, 1, 1], [], []>} : vector<16x32xf32>, vector<32x128xf32>, vector<16x128xf32> -> vector<16x128xf32>
    %c2_240 = arith.constant 2 : index
    %c0_241 = arith.constant 0 : index
    %c0_242 = arith.constant 0 : index
    %486 = vector.load %arg12[%c2_240, %c0_241, %c0_242] : memref<6x1x128xf32, #tpu.memory_space<vmem>>, vector<1x1x128xf32>
    %487 = vector.shape_cast %486 : vector<1x1x128xf32> to vector<1x128xf32>
    %488 = vector.broadcast %487 : vector<1x128xf32> to vector<16x128xf32>
    %489 = arith.addf %485, %488 : vector<16x128xf32>
    %cst_243 = arith.constant 5.000000e-01 : f32
    %490 = vector.broadcast %cst_243 : f32 to vector<16x128xf32>
    %491 = arith.mulf %490, %489 : vector<16x128xf32>
    %cst_244 = arith.constant 4.471500e-02 : f32
    %492 = vector.broadcast %cst_244 : f32 to vector<16x128xf32>
    %493 = arith.mulf %492, %489 : vector<16x128xf32>
    %494 = arith.mulf %493, %489 : vector<16x128xf32>
    %495 = arith.mulf %494, %489 : vector<16x128xf32>
    %496 = arith.addf %489, %495 : vector<16x128xf32>
    %cst_245 = arith.constant 0.797884583 : f32
    %497 = vector.broadcast %cst_245 : f32 to vector<16x128xf32>
    %498 = arith.mulf %497, %496 : vector<16x128xf32>
    %499 = math.tanh %498 : vector<16x128xf32>
    %cst_246 = arith.constant 1.000000e+00 : f32
    %500 = vector.broadcast %cst_246 : f32 to vector<16x128xf32>
    %501 = arith.addf %500, %499 : vector<16x128xf32>
    %502 = arith.mulf %491, %501 : vector<16x128xf32>
    %c2_247 = arith.constant 2 : index
    %c0_248 = arith.constant 0 : index
    %c0_249 = arith.constant 0 : index
    %503 = vector.load %arg13[%c2_247, %c0_248, %c0_249] : memref<6x128x32xf32, #tpu.memory_space<vmem>>, vector<1x128x32xf32>
    %504 = vector.shape_cast %503 : vector<1x128x32xf32> to vector<128x32xf32>
    %cst_250 = arith.constant dense<0.000000e+00> : vector<16x32xf32>
    %505 = tpu.matmul %502, %504, %cst_250 {dimension_numbers = #tpu.dot_dimension_numbers<[1], [0], [0], [1], [0, 0, 1, 1], [], []>} : vector<16x128xf32>, vector<128x32xf32>, vector<16x32xf32> -> vector<16x32xf32>
    %506 = arith.addf %456, %505 : vector<16x32xf32>
    %c2_251 = arith.constant 2 : index
    %c0_252 = arith.constant 0 : index
    %c0_253 = arith.constant 0 : index
    %507 = vector.load %arg14[%c2_251, %c0_252, %c0_253] : memref<6x1x32xf32, #tpu.memory_space<vmem>>, vector<1x1x32xf32>
    %508 = vector.shape_cast %507 : vector<1x1x32xf32> to vector<1x32xf32>
    %509 = vector.broadcast %508 : vector<1x32xf32> to vector<16x32xf32>
    %510 = arith.addf %506, %509 : vector<16x32xf32>
    %c3_254 = arith.constant 3 : index
    %c0_255 = arith.constant 0 : index
    %c0_256 = arith.constant 0 : index
    %511 = vector.load %arg3[%c3_254, %c0_255, %c0_256] : memref<6x1x32xf32, #tpu.memory_space<vmem>>, vector<1x1x32xf32>
    %512 = vector.shape_cast %511 : vector<1x1x32xf32> to vector<1x32xf32>
    %c3_257 = arith.constant 3 : index
    %c0_258 = arith.constant 0 : index
    %c0_259 = arith.constant 0 : index
    %513 = vector.load %arg4[%c3_257, %c0_258, %c0_259] : memref<6x1x32xf32, #tpu.memory_space<vmem>>, vector<1x1x32xf32>
    %514 = vector.shape_cast %513 : vector<1x1x32xf32> to vector<1x32xf32>
    %cst_260 = arith.constant dense<0.000000e+00> : vector<16xf32>
    %515 = vector.multi_reduction <add>, %510, %cst_260 [1] : vector<16x32xf32> to vector<16xf32>
    %516 = vector.shape_cast %515 : vector<16xf32> to vector<16x1xf32>
    %cst_261 = arith.constant 3.200000e+01 : f32
    %517 = vector.broadcast %cst_261 : f32 to vector<16x1xf32>
    %518 = arith.divf %516, %517 : vector<16x1xf32>
    %519 = arith.mulf %510, %510 : vector<16x32xf32>
    %cst_262 = arith.constant dense<0.000000e+00> : vector<16xf32>
    %520 = vector.multi_reduction <add>, %519, %cst_262 [1] : vector<16x32xf32> to vector<16xf32>
    %521 = vector.shape_cast %520 : vector<16xf32> to vector<16x1xf32>
    %cst_263 = arith.constant 3.200000e+01 : f32
    %522 = vector.broadcast %cst_263 : f32 to vector<16x1xf32>
    %523 = arith.divf %521, %522 : vector<16x1xf32>
    %524 = arith.mulf %518, %518 : vector<16x1xf32>
    %525 = arith.subf %523, %524 : vector<16x1xf32>
    %526 = vector.broadcast %518 : vector<16x1xf32> to vector<16x32xf32>
    %527 = arith.subf %510, %526 : vector<16x32xf32>
    %cst_264 = arith.constant 9.99999974E-6 : f32
    %528 = vector.broadcast %cst_264 : f32 to vector<16x1xf32>
    %529 = arith.addf %525, %528 : vector<16x1xf32>
    %530 = math.rsqrt %529 : vector<16x1xf32>
    %531 = vector.broadcast %530 : vector<16x1xf32> to vector<16x32xf32>
    %532 = arith.mulf %527, %531 : vector<16x32xf32>
    %533 = vector.broadcast %512 : vector<1x32xf32> to vector<16x32xf32>
    %534 = arith.mulf %532, %533 : vector<16x32xf32>
    %535 = vector.broadcast %514 : vector<1x32xf32> to vector<16x32xf32>
    %536 = arith.addf %534, %535 : vector<16x32xf32>
    %c3_265 = arith.constant 3 : index
    %c0_266 = arith.constant 0 : index
    %c0_267 = arith.constant 0 : index
    %537 = vector.load %arg5[%c3_265, %c0_266, %c0_267] : memref<6x32x1536xf32, #tpu.memory_space<vmem>>, vector<1x32x1536xf32>
    %538 = vector.shape_cast %537 : vector<1x32x1536xf32> to vector<32x1536xf32>
    %cst_268 = arith.constant dense<0.000000e+00> : vector<16x1536xf32>
    %539 = tpu.matmul %536, %538, %cst_268 {dimension_numbers = #tpu.dot_dimension_numbers<[1], [0], [0], [1], [0, 0, 1, 1], [], []>} : vector<16x32xf32>, vector<32x1536xf32>, vector<16x1536xf32> -> vector<16x1536xf32>
    %c3_269 = arith.constant 3 : index
    %c0_270 = arith.constant 0 : index
    %c0_271 = arith.constant 0 : index
    %540 = vector.load %arg6[%c3_269, %c0_270, %c0_271] : memref<6x1x1536xf32, #tpu.memory_space<vmem>>, vector<1x1x1536xf32>
    %541 = vector.shape_cast %540 : vector<1x1x1536xf32> to vector<1x1536xf32>
    %542 = vector.broadcast %541 : vector<1x1536xf32> to vector<16x1536xf32>
    %543 = arith.addf %539, %542 : vector<16x1536xf32>
    %cst_272 = arith.constant 0.000000e+00 : f32
    %544 = vector.broadcast %cst_272 : f32 to vector<16x32xf32>
    %545 = vector.extract_strided_slice %543 {offsets = [0, 0], sizes = [16, 128], strides = [1, 1]} : vector<16x1536xf32> to vector<16x128xf32>
    %546 = vector.extract_strided_slice %543 {offsets = [0, 512], sizes = [16, 128], strides = [1, 1]} : vector<16x1536xf32> to vector<16x128xf32>
    %547 = vector.extract_strided_slice %543 {offsets = [0, 1024], sizes = [16, 128], strides = [1, 1]} : vector<16x1536xf32> to vector<16x128xf32>
    %cst_273 = arith.constant dense<0.000000e+00> : vector<16x16xf32>
    %548 = tpu.matmul %545, %546, %cst_273 {dimension_numbers = #tpu.dot_dimension_numbers<[1], [1], [0], [0], [0, 0, 1, 0], [], []>} : vector<16x128xf32>, vector<16x128xf32>, vector<16x16xf32> -> vector<16x16xf32>
    %cst_274 = arith.constant 0.353553385 : f32
    %549 = vector.broadcast %cst_274 : f32 to vector<16x16xf32>
    %550 = arith.mulf %548, %549 : vector<16x16xf32>
    %551 = arith.addf %550, %3 : vector<16x16xf32>
    %552 = math.exp %551 : vector<16x16xf32>
    %cst_275 = arith.constant dense<0.000000e+00> : vector<16xf32>
    %553 = vector.multi_reduction <add>, %552, %cst_275 [1] : vector<16x16xf32> to vector<16xf32>
    %554 = vector.shape_cast %553 : vector<16xf32> to vector<16x1xf32>
    %cst_276 = arith.constant 1.000000e+00 : f32
    %555 = vector.broadcast %cst_276 : f32 to vector<16x1xf32>
    %556 = arith.divf %555, %554 : vector<16x1xf32>
    %cst_277 = arith.constant dense<0.000000e+00> : vector<16x128xf32>
    %557 = tpu.matmul %552, %547, %cst_277 {dimension_numbers = #tpu.dot_dimension_numbers<[1], [0], [0], [1], [0, 0, 1, 1], [], []>} : vector<16x16xf32>, vector<16x128xf32>, vector<16x128xf32> -> vector<16x128xf32>
    %558 = vector.broadcast %556 : vector<16x1xf32> to vector<16x128xf32>
    %559 = arith.mulf %557, %558 : vector<16x128xf32>
    %c12 = arith.constant 12 : index
    %c0_278 = arith.constant 0 : index
    %c0_279 = arith.constant 0 : index
    %560 = vector.load %arg7[%c12, %c0_278, %c0_279] : memref<24x128x32xf32, #tpu.memory_space<vmem>>, vector<1x128x32xf32>
    %561 = vector.shape_cast %560 : vector<1x128x32xf32> to vector<128x32xf32>
    %cst_280 = arith.constant dense<0.000000e+00> : vector<16x32xf32>
    %562 = tpu.matmul %559, %561, %cst_280 {dimension_numbers = #tpu.dot_dimension_numbers<[1], [0], [0], [1], [0, 0, 1, 1], [], []>} : vector<16x128xf32>, vector<128x32xf32>, vector<16x32xf32> -> vector<16x32xf32>
    %563 = arith.addf %544, %562 : vector<16x32xf32>
    %564 = vector.extract_strided_slice %543 {offsets = [0, 128], sizes = [16, 128], strides = [1, 1]} : vector<16x1536xf32> to vector<16x128xf32>
    %565 = vector.extract_strided_slice %543 {offsets = [0, 640], sizes = [16, 128], strides = [1, 1]} : vector<16x1536xf32> to vector<16x128xf32>
    %566 = vector.extract_strided_slice %543 {offsets = [0, 1152], sizes = [16, 128], strides = [1, 1]} : vector<16x1536xf32> to vector<16x128xf32>
    %cst_281 = arith.constant dense<0.000000e+00> : vector<16x16xf32>
    %567 = tpu.matmul %564, %565, %cst_281 {dimension_numbers = #tpu.dot_dimension_numbers<[1], [1], [0], [0], [0, 0, 1, 0], [], []>} : vector<16x128xf32>, vector<16x128xf32>, vector<16x16xf32> -> vector<16x16xf32>
    %cst_282 = arith.constant 0.353553385 : f32
    %568 = vector.broadcast %cst_282 : f32 to vector<16x16xf32>
    %569 = arith.mulf %567, %568 : vector<16x16xf32>
    %570 = arith.addf %569, %3 : vector<16x16xf32>
    %571 = math.exp %570 : vector<16x16xf32>
    %cst_283 = arith.constant dense<0.000000e+00> : vector<16xf32>
    %572 = vector.multi_reduction <add>, %571, %cst_283 [1] : vector<16x16xf32> to vector<16xf32>
    %573 = vector.shape_cast %572 : vector<16xf32> to vector<16x1xf32>
    %cst_284 = arith.constant 1.000000e+00 : f32
    %574 = vector.broadcast %cst_284 : f32 to vector<16x1xf32>
    %575 = arith.divf %574, %573 : vector<16x1xf32>
    %cst_285 = arith.constant dense<0.000000e+00> : vector<16x128xf32>
    %576 = tpu.matmul %571, %566, %cst_285 {dimension_numbers = #tpu.dot_dimension_numbers<[1], [0], [0], [1], [0, 0, 1, 1], [], []>} : vector<16x16xf32>, vector<16x128xf32>, vector<16x128xf32> -> vector<16x128xf32>
    %577 = vector.broadcast %575 : vector<16x1xf32> to vector<16x128xf32>
    %578 = arith.mulf %576, %577 : vector<16x128xf32>
    %c13 = arith.constant 13 : index
    %c0_286 = arith.constant 0 : index
    %c0_287 = arith.constant 0 : index
    %579 = vector.load %arg7[%c13, %c0_286, %c0_287] : memref<24x128x32xf32, #tpu.memory_space<vmem>>, vector<1x128x32xf32>
    %580 = vector.shape_cast %579 : vector<1x128x32xf32> to vector<128x32xf32>
    %cst_288 = arith.constant dense<0.000000e+00> : vector<16x32xf32>
    %581 = tpu.matmul %578, %580, %cst_288 {dimension_numbers = #tpu.dot_dimension_numbers<[1], [0], [0], [1], [0, 0, 1, 1], [], []>} : vector<16x128xf32>, vector<128x32xf32>, vector<16x32xf32> -> vector<16x32xf32>
    %582 = arith.addf %563, %581 : vector<16x32xf32>
    %583 = vector.extract_strided_slice %543 {offsets = [0, 256], sizes = [16, 128], strides = [1, 1]} : vector<16x1536xf32> to vector<16x128xf32>
    %584 = vector.extract_strided_slice %543 {offsets = [0, 768], sizes = [16, 128], strides = [1, 1]} : vector<16x1536xf32> to vector<16x128xf32>
    %585 = vector.extract_strided_slice %543 {offsets = [0, 1280], sizes = [16, 128], strides = [1, 1]} : vector<16x1536xf32> to vector<16x128xf32>
    %cst_289 = arith.constant dense<0.000000e+00> : vector<16x16xf32>
    %586 = tpu.matmul %583, %584, %cst_289 {dimension_numbers = #tpu.dot_dimension_numbers<[1], [1], [0], [0], [0, 0, 1, 0], [], []>} : vector<16x128xf32>, vector<16x128xf32>, vector<16x16xf32> -> vector<16x16xf32>
    %cst_290 = arith.constant 0.353553385 : f32
    %587 = vector.broadcast %cst_290 : f32 to vector<16x16xf32>
    %588 = arith.mulf %586, %587 : vector<16x16xf32>
    %589 = arith.addf %588, %3 : vector<16x16xf32>
    %590 = math.exp %589 : vector<16x16xf32>
    %cst_291 = arith.constant dense<0.000000e+00> : vector<16xf32>
    %591 = vector.multi_reduction <add>, %590, %cst_291 [1] : vector<16x16xf32> to vector<16xf32>
    %592 = vector.shape_cast %591 : vector<16xf32> to vector<16x1xf32>
    %cst_292 = arith.constant 1.000000e+00 : f32
    %593 = vector.broadcast %cst_292 : f32 to vector<16x1xf32>
    %594 = arith.divf %593, %592 : vector<16x1xf32>
    %cst_293 = arith.constant dense<0.000000e+00> : vector<16x128xf32>
    %595 = tpu.matmul %590, %585, %cst_293 {dimension_numbers = #tpu.dot_dimension_numbers<[1], [0], [0], [1], [0, 0, 1, 1], [], []>} : vector<16x16xf32>, vector<16x128xf32>, vector<16x128xf32> -> vector<16x128xf32>
    %596 = vector.broadcast %594 : vector<16x1xf32> to vector<16x128xf32>
    %597 = arith.mulf %595, %596 : vector<16x128xf32>
    %c14 = arith.constant 14 : index
    %c0_294 = arith.constant 0 : index
    %c0_295 = arith.constant 0 : index
    %598 = vector.load %arg7[%c14, %c0_294, %c0_295] : memref<24x128x32xf32, #tpu.memory_space<vmem>>, vector<1x128x32xf32>
    %599 = vector.shape_cast %598 : vector<1x128x32xf32> to vector<128x32xf32>
    %cst_296 = arith.constant dense<0.000000e+00> : vector<16x32xf32>
    %600 = tpu.matmul %597, %599, %cst_296 {dimension_numbers = #tpu.dot_dimension_numbers<[1], [0], [0], [1], [0, 0, 1, 1], [], []>} : vector<16x128xf32>, vector<128x32xf32>, vector<16x32xf32> -> vector<16x32xf32>
    %601 = arith.addf %582, %600 : vector<16x32xf32>
    %602 = vector.extract_strided_slice %543 {offsets = [0, 384], sizes = [16, 128], strides = [1, 1]} : vector<16x1536xf32> to vector<16x128xf32>
    %603 = vector.extract_strided_slice %543 {offsets = [0, 896], sizes = [16, 128], strides = [1, 1]} : vector<16x1536xf32> to vector<16x128xf32>
    %604 = vector.extract_strided_slice %543 {offsets = [0, 1408], sizes = [16, 128], strides = [1, 1]} : vector<16x1536xf32> to vector<16x128xf32>
    %cst_297 = arith.constant dense<0.000000e+00> : vector<16x16xf32>
    %605 = tpu.matmul %602, %603, %cst_297 {dimension_numbers = #tpu.dot_dimension_numbers<[1], [1], [0], [0], [0, 0, 1, 0], [], []>} : vector<16x128xf32>, vector<16x128xf32>, vector<16x16xf32> -> vector<16x16xf32>
    %cst_298 = arith.constant 0.353553385 : f32
    %606 = vector.broadcast %cst_298 : f32 to vector<16x16xf32>
    %607 = arith.mulf %605, %606 : vector<16x16xf32>
    %608 = arith.addf %607, %3 : vector<16x16xf32>
    %609 = math.exp %608 : vector<16x16xf32>
    %cst_299 = arith.constant dense<0.000000e+00> : vector<16xf32>
    %610 = vector.multi_reduction <add>, %609, %cst_299 [1] : vector<16x16xf32> to vector<16xf32>
    %611 = vector.shape_cast %610 : vector<16xf32> to vector<16x1xf32>
    %cst_300 = arith.constant 1.000000e+00 : f32
    %612 = vector.broadcast %cst_300 : f32 to vector<16x1xf32>
    %613 = arith.divf %612, %611 : vector<16x1xf32>
    %cst_301 = arith.constant dense<0.000000e+00> : vector<16x128xf32>
    %614 = tpu.matmul %609, %604, %cst_301 {dimension_numbers = #tpu.dot_dimension_numbers<[1], [0], [0], [1], [0, 0, 1, 1], [], []>} : vector<16x16xf32>, vector<16x128xf32>, vector<16x128xf32> -> vector<16x128xf32>
    %615 = vector.broadcast %613 : vector<16x1xf32> to vector<16x128xf32>
    %616 = arith.mulf %614, %615 : vector<16x128xf32>
    %c15 = arith.constant 15 : index
    %c0_302 = arith.constant 0 : index
    %c0_303 = arith.constant 0 : index
    %617 = vector.load %arg7[%c15, %c0_302, %c0_303] : memref<24x128x32xf32, #tpu.memory_space<vmem>>, vector<1x128x32xf32>
    %618 = vector.shape_cast %617 : vector<1x128x32xf32> to vector<128x32xf32>
    %cst_304 = arith.constant dense<0.000000e+00> : vector<16x32xf32>
    %619 = tpu.matmul %616, %618, %cst_304 {dimension_numbers = #tpu.dot_dimension_numbers<[1], [0], [0], [1], [0, 0, 1, 1], [], []>} : vector<16x128xf32>, vector<128x32xf32>, vector<16x32xf32> -> vector<16x32xf32>
    %620 = arith.addf %601, %619 : vector<16x32xf32>
    %621 = arith.addf %510, %620 : vector<16x32xf32>
    %c3_305 = arith.constant 3 : index
    %c0_306 = arith.constant 0 : index
    %c0_307 = arith.constant 0 : index
    %622 = vector.load %arg8[%c3_305, %c0_306, %c0_307] : memref<6x1x32xf32, #tpu.memory_space<vmem>>, vector<1x1x32xf32>
    %623 = vector.shape_cast %622 : vector<1x1x32xf32> to vector<1x32xf32>
    %624 = vector.broadcast %623 : vector<1x32xf32> to vector<16x32xf32>
    %625 = arith.addf %621, %624 : vector<16x32xf32>
    %c3_308 = arith.constant 3 : index
    %c0_309 = arith.constant 0 : index
    %c0_310 = arith.constant 0 : index
    %626 = vector.load %arg9[%c3_308, %c0_309, %c0_310] : memref<6x1x32xf32, #tpu.memory_space<vmem>>, vector<1x1x32xf32>
    %627 = vector.shape_cast %626 : vector<1x1x32xf32> to vector<1x32xf32>
    %c3_311 = arith.constant 3 : index
    %c0_312 = arith.constant 0 : index
    %c0_313 = arith.constant 0 : index
    %628 = vector.load %arg10[%c3_311, %c0_312, %c0_313] : memref<6x1x32xf32, #tpu.memory_space<vmem>>, vector<1x1x32xf32>
    %629 = vector.shape_cast %628 : vector<1x1x32xf32> to vector<1x32xf32>
    %cst_314 = arith.constant dense<0.000000e+00> : vector<16xf32>
    %630 = vector.multi_reduction <add>, %625, %cst_314 [1] : vector<16x32xf32> to vector<16xf32>
    %631 = vector.shape_cast %630 : vector<16xf32> to vector<16x1xf32>
    %cst_315 = arith.constant 3.200000e+01 : f32
    %632 = vector.broadcast %cst_315 : f32 to vector<16x1xf32>
    %633 = arith.divf %631, %632 : vector<16x1xf32>
    %634 = arith.mulf %625, %625 : vector<16x32xf32>
    %cst_316 = arith.constant dense<0.000000e+00> : vector<16xf32>
    %635 = vector.multi_reduction <add>, %634, %cst_316 [1] : vector<16x32xf32> to vector<16xf32>
    %636 = vector.shape_cast %635 : vector<16xf32> to vector<16x1xf32>
    %cst_317 = arith.constant 3.200000e+01 : f32
    %637 = vector.broadcast %cst_317 : f32 to vector<16x1xf32>
    %638 = arith.divf %636, %637 : vector<16x1xf32>
    %639 = arith.mulf %633, %633 : vector<16x1xf32>
    %640 = arith.subf %638, %639 : vector<16x1xf32>
    %641 = vector.broadcast %633 : vector<16x1xf32> to vector<16x32xf32>
    %642 = arith.subf %625, %641 : vector<16x32xf32>
    %cst_318 = arith.constant 9.99999974E-6 : f32
    %643 = vector.broadcast %cst_318 : f32 to vector<16x1xf32>
    %644 = arith.addf %640, %643 : vector<16x1xf32>
    %645 = math.rsqrt %644 : vector<16x1xf32>
    %646 = vector.broadcast %645 : vector<16x1xf32> to vector<16x32xf32>
    %647 = arith.mulf %642, %646 : vector<16x32xf32>
    %648 = vector.broadcast %627 : vector<1x32xf32> to vector<16x32xf32>
    %649 = arith.mulf %647, %648 : vector<16x32xf32>
    %650 = vector.broadcast %629 : vector<1x32xf32> to vector<16x32xf32>
    %651 = arith.addf %649, %650 : vector<16x32xf32>
    %c3_319 = arith.constant 3 : index
    %c0_320 = arith.constant 0 : index
    %c0_321 = arith.constant 0 : index
    %652 = vector.load %arg11[%c3_319, %c0_320, %c0_321] : memref<6x32x128xf32, #tpu.memory_space<vmem>>, vector<1x32x128xf32>
    %653 = vector.shape_cast %652 : vector<1x32x128xf32> to vector<32x128xf32>
    %cst_322 = arith.constant dense<0.000000e+00> : vector<16x128xf32>
    %654 = tpu.matmul %651, %653, %cst_322 {dimension_numbers = #tpu.dot_dimension_numbers<[1], [0], [0], [1], [0, 0, 1, 1], [], []>} : vector<16x32xf32>, vector<32x128xf32>, vector<16x128xf32> -> vector<16x128xf32>
    %c3_323 = arith.constant 3 : index
    %c0_324 = arith.constant 0 : index
    %c0_325 = arith.constant 0 : index
    %655 = vector.load %arg12[%c3_323, %c0_324, %c0_325] : memref<6x1x128xf32, #tpu.memory_space<vmem>>, vector<1x1x128xf32>
    %656 = vector.shape_cast %655 : vector<1x1x128xf32> to vector<1x128xf32>
    %657 = vector.broadcast %656 : vector<1x128xf32> to vector<16x128xf32>
    %658 = arith.addf %654, %657 : vector<16x128xf32>
    %cst_326 = arith.constant 5.000000e-01 : f32
    %659 = vector.broadcast %cst_326 : f32 to vector<16x128xf32>
    %660 = arith.mulf %659, %658 : vector<16x128xf32>
    %cst_327 = arith.constant 4.471500e-02 : f32
    %661 = vector.broadcast %cst_327 : f32 to vector<16x128xf32>
    %662 = arith.mulf %661, %658 : vector<16x128xf32>
    %663 = arith.mulf %662, %658 : vector<16x128xf32>
    %664 = arith.mulf %663, %658 : vector<16x128xf32>
    %665 = arith.addf %658, %664 : vector<16x128xf32>
    %cst_328 = arith.constant 0.797884583 : f32
    %666 = vector.broadcast %cst_328 : f32 to vector<16x128xf32>
    %667 = arith.mulf %666, %665 : vector<16x128xf32>
    %668 = math.tanh %667 : vector<16x128xf32>
    %cst_329 = arith.constant 1.000000e+00 : f32
    %669 = vector.broadcast %cst_329 : f32 to vector<16x128xf32>
    %670 = arith.addf %669, %668 : vector<16x128xf32>
    %671 = arith.mulf %660, %670 : vector<16x128xf32>
    %c3_330 = arith.constant 3 : index
    %c0_331 = arith.constant 0 : index
    %c0_332 = arith.constant 0 : index
    %672 = vector.load %arg13[%c3_330, %c0_331, %c0_332] : memref<6x128x32xf32, #tpu.memory_space<vmem>>, vector<1x128x32xf32>
    %673 = vector.shape_cast %672 : vector<1x128x32xf32> to vector<128x32xf32>
    %cst_333 = arith.constant dense<0.000000e+00> : vector<16x32xf32>
    %674 = tpu.matmul %671, %673, %cst_333 {dimension_numbers = #tpu.dot_dimension_numbers<[1], [0], [0], [1], [0, 0, 1, 1], [], []>} : vector<16x128xf32>, vector<128x32xf32>, vector<16x32xf32> -> vector<16x32xf32>
    %675 = arith.addf %625, %674 : vector<16x32xf32>
    %c3_334 = arith.constant 3 : index
    %c0_335 = arith.constant 0 : index
    %c0_336 = arith.constant 0 : index
    %676 = vector.load %arg14[%c3_334, %c0_335, %c0_336] : memref<6x1x32xf32, #tpu.memory_space<vmem>>, vector<1x1x32xf32>
    %677 = vector.shape_cast %676 : vector<1x1x32xf32> to vector<1x32xf32>
    %678 = vector.broadcast %677 : vector<1x32xf32> to vector<16x32xf32>
    %679 = arith.addf %675, %678 : vector<16x32xf32>
    %c4_337 = arith.constant 4 : index
    %c0_338 = arith.constant 0 : index
    %c0_339 = arith.constant 0 : index
    %680 = vector.load %arg3[%c4_337, %c0_338, %c0_339] : memref<6x1x32xf32, #tpu.memory_space<vmem>>, vector<1x1x32xf32>
    %681 = vector.shape_cast %680 : vector<1x1x32xf32> to vector<1x32xf32>
    %c4_340 = arith.constant 4 : index
    %c0_341 = arith.constant 0 : index
    %c0_342 = arith.constant 0 : index
    %682 = vector.load %arg4[%c4_340, %c0_341, %c0_342] : memref<6x1x32xf32, #tpu.memory_space<vmem>>, vector<1x1x32xf32>
    %683 = vector.shape_cast %682 : vector<1x1x32xf32> to vector<1x32xf32>
    %cst_343 = arith.constant dense<0.000000e+00> : vector<16xf32>
    %684 = vector.multi_reduction <add>, %679, %cst_343 [1] : vector<16x32xf32> to vector<16xf32>
    %685 = vector.shape_cast %684 : vector<16xf32> to vector<16x1xf32>
    %cst_344 = arith.constant 3.200000e+01 : f32
    %686 = vector.broadcast %cst_344 : f32 to vector<16x1xf32>
    %687 = arith.divf %685, %686 : vector<16x1xf32>
    %688 = arith.mulf %679, %679 : vector<16x32xf32>
    %cst_345 = arith.constant dense<0.000000e+00> : vector<16xf32>
    %689 = vector.multi_reduction <add>, %688, %cst_345 [1] : vector<16x32xf32> to vector<16xf32>
    %690 = vector.shape_cast %689 : vector<16xf32> to vector<16x1xf32>
    %cst_346 = arith.constant 3.200000e+01 : f32
    %691 = vector.broadcast %cst_346 : f32 to vector<16x1xf32>
    %692 = arith.divf %690, %691 : vector<16x1xf32>
    %693 = arith.mulf %687, %687 : vector<16x1xf32>
    %694 = arith.subf %692, %693 : vector<16x1xf32>
    %695 = vector.broadcast %687 : vector<16x1xf32> to vector<16x32xf32>
    %696 = arith.subf %679, %695 : vector<16x32xf32>
    %cst_347 = arith.constant 9.99999974E-6 : f32
    %697 = vector.broadcast %cst_347 : f32 to vector<16x1xf32>
    %698 = arith.addf %694, %697 : vector<16x1xf32>
    %699 = math.rsqrt %698 : vector<16x1xf32>
    %700 = vector.broadcast %699 : vector<16x1xf32> to vector<16x32xf32>
    %701 = arith.mulf %696, %700 : vector<16x32xf32>
    %702 = vector.broadcast %681 : vector<1x32xf32> to vector<16x32xf32>
    %703 = arith.mulf %701, %702 : vector<16x32xf32>
    %704 = vector.broadcast %683 : vector<1x32xf32> to vector<16x32xf32>
    %705 = arith.addf %703, %704 : vector<16x32xf32>
    %c4_348 = arith.constant 4 : index
    %c0_349 = arith.constant 0 : index
    %c0_350 = arith.constant 0 : index
    %706 = vector.load %arg5[%c4_348, %c0_349, %c0_350] : memref<6x32x1536xf32, #tpu.memory_space<vmem>>, vector<1x32x1536xf32>
    %707 = vector.shape_cast %706 : vector<1x32x1536xf32> to vector<32x1536xf32>
    %cst_351 = arith.constant dense<0.000000e+00> : vector<16x1536xf32>
    %708 = tpu.matmul %705, %707, %cst_351 {dimension_numbers = #tpu.dot_dimension_numbers<[1], [0], [0], [1], [0, 0, 1, 1], [], []>} : vector<16x32xf32>, vector<32x1536xf32>, vector<16x1536xf32> -> vector<16x1536xf32>
    %c4_352 = arith.constant 4 : index
    %c0_353 = arith.constant 0 : index
    %c0_354 = arith.constant 0 : index
    %709 = vector.load %arg6[%c4_352, %c0_353, %c0_354] : memref<6x1x1536xf32, #tpu.memory_space<vmem>>, vector<1x1x1536xf32>
    %710 = vector.shape_cast %709 : vector<1x1x1536xf32> to vector<1x1536xf32>
    %711 = vector.broadcast %710 : vector<1x1536xf32> to vector<16x1536xf32>
    %712 = arith.addf %708, %711 : vector<16x1536xf32>
    %cst_355 = arith.constant 0.000000e+00 : f32
    %713 = vector.broadcast %cst_355 : f32 to vector<16x32xf32>
    %714 = vector.extract_strided_slice %712 {offsets = [0, 0], sizes = [16, 128], strides = [1, 1]} : vector<16x1536xf32> to vector<16x128xf32>
    %715 = vector.extract_strided_slice %712 {offsets = [0, 512], sizes = [16, 128], strides = [1, 1]} : vector<16x1536xf32> to vector<16x128xf32>
    %716 = vector.extract_strided_slice %712 {offsets = [0, 1024], sizes = [16, 128], strides = [1, 1]} : vector<16x1536xf32> to vector<16x128xf32>
    %cst_356 = arith.constant dense<0.000000e+00> : vector<16x16xf32>
    %717 = tpu.matmul %714, %715, %cst_356 {dimension_numbers = #tpu.dot_dimension_numbers<[1], [1], [0], [0], [0, 0, 1, 0], [], []>} : vector<16x128xf32>, vector<16x128xf32>, vector<16x16xf32> -> vector<16x16xf32>
    %cst_357 = arith.constant 0.353553385 : f32
    %718 = vector.broadcast %cst_357 : f32 to vector<16x16xf32>
    %719 = arith.mulf %717, %718 : vector<16x16xf32>
    %720 = arith.addf %719, %3 : vector<16x16xf32>
    %721 = math.exp %720 : vector<16x16xf32>
    %cst_358 = arith.constant dense<0.000000e+00> : vector<16xf32>
    %722 = vector.multi_reduction <add>, %721, %cst_358 [1] : vector<16x16xf32> to vector<16xf32>
    %723 = vector.shape_cast %722 : vector<16xf32> to vector<16x1xf32>
    %cst_359 = arith.constant 1.000000e+00 : f32
    %724 = vector.broadcast %cst_359 : f32 to vector<16x1xf32>
    %725 = arith.divf %724, %723 : vector<16x1xf32>
    %cst_360 = arith.constant dense<0.000000e+00> : vector<16x128xf32>
    %726 = tpu.matmul %721, %716, %cst_360 {dimension_numbers = #tpu.dot_dimension_numbers<[1], [0], [0], [1], [0, 0, 1, 1], [], []>} : vector<16x16xf32>, vector<16x128xf32>, vector<16x128xf32> -> vector<16x128xf32>
    %727 = vector.broadcast %725 : vector<16x1xf32> to vector<16x128xf32>
    %728 = arith.mulf %726, %727 : vector<16x128xf32>
    %c16 = arith.constant 16 : index
    %c0_361 = arith.constant 0 : index
    %c0_362 = arith.constant 0 : index
    %729 = vector.load %arg7[%c16, %c0_361, %c0_362] : memref<24x128x32xf32, #tpu.memory_space<vmem>>, vector<1x128x32xf32>
    %730 = vector.shape_cast %729 : vector<1x128x32xf32> to vector<128x32xf32>
    %cst_363 = arith.constant dense<0.000000e+00> : vector<16x32xf32>
    %731 = tpu.matmul %728, %730, %cst_363 {dimension_numbers = #tpu.dot_dimension_numbers<[1], [0], [0], [1], [0, 0, 1, 1], [], []>} : vector<16x128xf32>, vector<128x32xf32>, vector<16x32xf32> -> vector<16x32xf32>
    %732 = arith.addf %713, %731 : vector<16x32xf32>
    %733 = vector.extract_strided_slice %712 {offsets = [0, 128], sizes = [16, 128], strides = [1, 1]} : vector<16x1536xf32> to vector<16x128xf32>
    %734 = vector.extract_strided_slice %712 {offsets = [0, 640], sizes = [16, 128], strides = [1, 1]} : vector<16x1536xf32> to vector<16x128xf32>
    %735 = vector.extract_strided_slice %712 {offsets = [0, 1152], sizes = [16, 128], strides = [1, 1]} : vector<16x1536xf32> to vector<16x128xf32>
    %cst_364 = arith.constant dense<0.000000e+00> : vector<16x16xf32>
    %736 = tpu.matmul %733, %734, %cst_364 {dimension_numbers = #tpu.dot_dimension_numbers<[1], [1], [0], [0], [0, 0, 1, 0], [], []>} : vector<16x128xf32>, vector<16x128xf32>, vector<16x16xf32> -> vector<16x16xf32>
    %cst_365 = arith.constant 0.353553385 : f32
    %737 = vector.broadcast %cst_365 : f32 to vector<16x16xf32>
    %738 = arith.mulf %736, %737 : vector<16x16xf32>
    %739 = arith.addf %738, %3 : vector<16x16xf32>
    %740 = math.exp %739 : vector<16x16xf32>
    %cst_366 = arith.constant dense<0.000000e+00> : vector<16xf32>
    %741 = vector.multi_reduction <add>, %740, %cst_366 [1] : vector<16x16xf32> to vector<16xf32>
    %742 = vector.shape_cast %741 : vector<16xf32> to vector<16x1xf32>
    %cst_367 = arith.constant 1.000000e+00 : f32
    %743 = vector.broadcast %cst_367 : f32 to vector<16x1xf32>
    %744 = arith.divf %743, %742 : vector<16x1xf32>
    %cst_368 = arith.constant dense<0.000000e+00> : vector<16x128xf32>
    %745 = tpu.matmul %740, %735, %cst_368 {dimension_numbers = #tpu.dot_dimension_numbers<[1], [0], [0], [1], [0, 0, 1, 1], [], []>} : vector<16x16xf32>, vector<16x128xf32>, vector<16x128xf32> -> vector<16x128xf32>
    %746 = vector.broadcast %744 : vector<16x1xf32> to vector<16x128xf32>
    %747 = arith.mulf %745, %746 : vector<16x128xf32>
    %c17 = arith.constant 17 : index
    %c0_369 = arith.constant 0 : index
    %c0_370 = arith.constant 0 : index
    %748 = vector.load %arg7[%c17, %c0_369, %c0_370] : memref<24x128x32xf32, #tpu.memory_space<vmem>>, vector<1x128x32xf32>
    %749 = vector.shape_cast %748 : vector<1x128x32xf32> to vector<128x32xf32>
    %cst_371 = arith.constant dense<0.000000e+00> : vector<16x32xf32>
    %750 = tpu.matmul %747, %749, %cst_371 {dimension_numbers = #tpu.dot_dimension_numbers<[1], [0], [0], [1], [0, 0, 1, 1], [], []>} : vector<16x128xf32>, vector<128x32xf32>, vector<16x32xf32> -> vector<16x32xf32>
    %751 = arith.addf %732, %750 : vector<16x32xf32>
    %752 = vector.extract_strided_slice %712 {offsets = [0, 256], sizes = [16, 128], strides = [1, 1]} : vector<16x1536xf32> to vector<16x128xf32>
    %753 = vector.extract_strided_slice %712 {offsets = [0, 768], sizes = [16, 128], strides = [1, 1]} : vector<16x1536xf32> to vector<16x128xf32>
    %754 = vector.extract_strided_slice %712 {offsets = [0, 1280], sizes = [16, 128], strides = [1, 1]} : vector<16x1536xf32> to vector<16x128xf32>
    %cst_372 = arith.constant dense<0.000000e+00> : vector<16x16xf32>
    %755 = tpu.matmul %752, %753, %cst_372 {dimension_numbers = #tpu.dot_dimension_numbers<[1], [1], [0], [0], [0, 0, 1, 0], [], []>} : vector<16x128xf32>, vector<16x128xf32>, vector<16x16xf32> -> vector<16x16xf32>
    %cst_373 = arith.constant 0.353553385 : f32
    %756 = vector.broadcast %cst_373 : f32 to vector<16x16xf32>
    %757 = arith.mulf %755, %756 : vector<16x16xf32>
    %758 = arith.addf %757, %3 : vector<16x16xf32>
    %759 = math.exp %758 : vector<16x16xf32>
    %cst_374 = arith.constant dense<0.000000e+00> : vector<16xf32>
    %760 = vector.multi_reduction <add>, %759, %cst_374 [1] : vector<16x16xf32> to vector<16xf32>
    %761 = vector.shape_cast %760 : vector<16xf32> to vector<16x1xf32>
    %cst_375 = arith.constant 1.000000e+00 : f32
    %762 = vector.broadcast %cst_375 : f32 to vector<16x1xf32>
    %763 = arith.divf %762, %761 : vector<16x1xf32>
    %cst_376 = arith.constant dense<0.000000e+00> : vector<16x128xf32>
    %764 = tpu.matmul %759, %754, %cst_376 {dimension_numbers = #tpu.dot_dimension_numbers<[1], [0], [0], [1], [0, 0, 1, 1], [], []>} : vector<16x16xf32>, vector<16x128xf32>, vector<16x128xf32> -> vector<16x128xf32>
    %765 = vector.broadcast %763 : vector<16x1xf32> to vector<16x128xf32>
    %766 = arith.mulf %764, %765 : vector<16x128xf32>
    %c18 = arith.constant 18 : index
    %c0_377 = arith.constant 0 : index
    %c0_378 = arith.constant 0 : index
    %767 = vector.load %arg7[%c18, %c0_377, %c0_378] : memref<24x128x32xf32, #tpu.memory_space<vmem>>, vector<1x128x32xf32>
    %768 = vector.shape_cast %767 : vector<1x128x32xf32> to vector<128x32xf32>
    %cst_379 = arith.constant dense<0.000000e+00> : vector<16x32xf32>
    %769 = tpu.matmul %766, %768, %cst_379 {dimension_numbers = #tpu.dot_dimension_numbers<[1], [0], [0], [1], [0, 0, 1, 1], [], []>} : vector<16x128xf32>, vector<128x32xf32>, vector<16x32xf32> -> vector<16x32xf32>
    %770 = arith.addf %751, %769 : vector<16x32xf32>
    %771 = vector.extract_strided_slice %712 {offsets = [0, 384], sizes = [16, 128], strides = [1, 1]} : vector<16x1536xf32> to vector<16x128xf32>
    %772 = vector.extract_strided_slice %712 {offsets = [0, 896], sizes = [16, 128], strides = [1, 1]} : vector<16x1536xf32> to vector<16x128xf32>
    %773 = vector.extract_strided_slice %712 {offsets = [0, 1408], sizes = [16, 128], strides = [1, 1]} : vector<16x1536xf32> to vector<16x128xf32>
    %cst_380 = arith.constant dense<0.000000e+00> : vector<16x16xf32>
    %774 = tpu.matmul %771, %772, %cst_380 {dimension_numbers = #tpu.dot_dimension_numbers<[1], [1], [0], [0], [0, 0, 1, 0], [], []>} : vector<16x128xf32>, vector<16x128xf32>, vector<16x16xf32> -> vector<16x16xf32>
    %cst_381 = arith.constant 0.353553385 : f32
    %775 = vector.broadcast %cst_381 : f32 to vector<16x16xf32>
    %776 = arith.mulf %774, %775 : vector<16x16xf32>
    %777 = arith.addf %776, %3 : vector<16x16xf32>
    %778 = math.exp %777 : vector<16x16xf32>
    %cst_382 = arith.constant dense<0.000000e+00> : vector<16xf32>
    %779 = vector.multi_reduction <add>, %778, %cst_382 [1] : vector<16x16xf32> to vector<16xf32>
    %780 = vector.shape_cast %779 : vector<16xf32> to vector<16x1xf32>
    %cst_383 = arith.constant 1.000000e+00 : f32
    %781 = vector.broadcast %cst_383 : f32 to vector<16x1xf32>
    %782 = arith.divf %781, %780 : vector<16x1xf32>
    %cst_384 = arith.constant dense<0.000000e+00> : vector<16x128xf32>
    %783 = tpu.matmul %778, %773, %cst_384 {dimension_numbers = #tpu.dot_dimension_numbers<[1], [0], [0], [1], [0, 0, 1, 1], [], []>} : vector<16x16xf32>, vector<16x128xf32>, vector<16x128xf32> -> vector<16x128xf32>
    %784 = vector.broadcast %782 : vector<16x1xf32> to vector<16x128xf32>
    %785 = arith.mulf %783, %784 : vector<16x128xf32>
    %c19 = arith.constant 19 : index
    %c0_385 = arith.constant 0 : index
    %c0_386 = arith.constant 0 : index
    %786 = vector.load %arg7[%c19, %c0_385, %c0_386] : memref<24x128x32xf32, #tpu.memory_space<vmem>>, vector<1x128x32xf32>
    %787 = vector.shape_cast %786 : vector<1x128x32xf32> to vector<128x32xf32>
    %cst_387 = arith.constant dense<0.000000e+00> : vector<16x32xf32>
    %788 = tpu.matmul %785, %787, %cst_387 {dimension_numbers = #tpu.dot_dimension_numbers<[1], [0], [0], [1], [0, 0, 1, 1], [], []>} : vector<16x128xf32>, vector<128x32xf32>, vector<16x32xf32> -> vector<16x32xf32>
    %789 = arith.addf %770, %788 : vector<16x32xf32>
    %790 = arith.addf %679, %789 : vector<16x32xf32>
    %c4_388 = arith.constant 4 : index
    %c0_389 = arith.constant 0 : index
    %c0_390 = arith.constant 0 : index
    %791 = vector.load %arg8[%c4_388, %c0_389, %c0_390] : memref<6x1x32xf32, #tpu.memory_space<vmem>>, vector<1x1x32xf32>
    %792 = vector.shape_cast %791 : vector<1x1x32xf32> to vector<1x32xf32>
    %793 = vector.broadcast %792 : vector<1x32xf32> to vector<16x32xf32>
    %794 = arith.addf %790, %793 : vector<16x32xf32>
    %c4_391 = arith.constant 4 : index
    %c0_392 = arith.constant 0 : index
    %c0_393 = arith.constant 0 : index
    %795 = vector.load %arg9[%c4_391, %c0_392, %c0_393] : memref<6x1x32xf32, #tpu.memory_space<vmem>>, vector<1x1x32xf32>
    %796 = vector.shape_cast %795 : vector<1x1x32xf32> to vector<1x32xf32>
    %c4_394 = arith.constant 4 : index
    %c0_395 = arith.constant 0 : index
    %c0_396 = arith.constant 0 : index
    %797 = vector.load %arg10[%c4_394, %c0_395, %c0_396] : memref<6x1x32xf32, #tpu.memory_space<vmem>>, vector<1x1x32xf32>
    %798 = vector.shape_cast %797 : vector<1x1x32xf32> to vector<1x32xf32>
    %cst_397 = arith.constant dense<0.000000e+00> : vector<16xf32>
    %799 = vector.multi_reduction <add>, %794, %cst_397 [1] : vector<16x32xf32> to vector<16xf32>
    %800 = vector.shape_cast %799 : vector<16xf32> to vector<16x1xf32>
    %cst_398 = arith.constant 3.200000e+01 : f32
    %801 = vector.broadcast %cst_398 : f32 to vector<16x1xf32>
    %802 = arith.divf %800, %801 : vector<16x1xf32>
    %803 = arith.mulf %794, %794 : vector<16x32xf32>
    %cst_399 = arith.constant dense<0.000000e+00> : vector<16xf32>
    %804 = vector.multi_reduction <add>, %803, %cst_399 [1] : vector<16x32xf32> to vector<16xf32>
    %805 = vector.shape_cast %804 : vector<16xf32> to vector<16x1xf32>
    %cst_400 = arith.constant 3.200000e+01 : f32
    %806 = vector.broadcast %cst_400 : f32 to vector<16x1xf32>
    %807 = arith.divf %805, %806 : vector<16x1xf32>
    %808 = arith.mulf %802, %802 : vector<16x1xf32>
    %809 = arith.subf %807, %808 : vector<16x1xf32>
    %810 = vector.broadcast %802 : vector<16x1xf32> to vector<16x32xf32>
    %811 = arith.subf %794, %810 : vector<16x32xf32>
    %cst_401 = arith.constant 9.99999974E-6 : f32
    %812 = vector.broadcast %cst_401 : f32 to vector<16x1xf32>
    %813 = arith.addf %809, %812 : vector<16x1xf32>
    %814 = math.rsqrt %813 : vector<16x1xf32>
    %815 = vector.broadcast %814 : vector<16x1xf32> to vector<16x32xf32>
    %816 = arith.mulf %811, %815 : vector<16x32xf32>
    %817 = vector.broadcast %796 : vector<1x32xf32> to vector<16x32xf32>
    %818 = arith.mulf %816, %817 : vector<16x32xf32>
    %819 = vector.broadcast %798 : vector<1x32xf32> to vector<16x32xf32>
    %820 = arith.addf %818, %819 : vector<16x32xf32>
    %c4_402 = arith.constant 4 : index
    %c0_403 = arith.constant 0 : index
    %c0_404 = arith.constant 0 : index
    %821 = vector.load %arg11[%c4_402, %c0_403, %c0_404] : memref<6x32x128xf32, #tpu.memory_space<vmem>>, vector<1x32x128xf32>
    %822 = vector.shape_cast %821 : vector<1x32x128xf32> to vector<32x128xf32>
    %cst_405 = arith.constant dense<0.000000e+00> : vector<16x128xf32>
    %823 = tpu.matmul %820, %822, %cst_405 {dimension_numbers = #tpu.dot_dimension_numbers<[1], [0], [0], [1], [0, 0, 1, 1], [], []>} : vector<16x32xf32>, vector<32x128xf32>, vector<16x128xf32> -> vector<16x128xf32>
    %c4_406 = arith.constant 4 : index
    %c0_407 = arith.constant 0 : index
    %c0_408 = arith.constant 0 : index
    %824 = vector.load %arg12[%c4_406, %c0_407, %c0_408] : memref<6x1x128xf32, #tpu.memory_space<vmem>>, vector<1x1x128xf32>
    %825 = vector.shape_cast %824 : vector<1x1x128xf32> to vector<1x128xf32>
    %826 = vector.broadcast %825 : vector<1x128xf32> to vector<16x128xf32>
    %827 = arith.addf %823, %826 : vector<16x128xf32>
    %cst_409 = arith.constant 5.000000e-01 : f32
    %828 = vector.broadcast %cst_409 : f32 to vector<16x128xf32>
    %829 = arith.mulf %828, %827 : vector<16x128xf32>
    %cst_410 = arith.constant 4.471500e-02 : f32
    %830 = vector.broadcast %cst_410 : f32 to vector<16x128xf32>
    %831 = arith.mulf %830, %827 : vector<16x128xf32>
    %832 = arith.mulf %831, %827 : vector<16x128xf32>
    %833 = arith.mulf %832, %827 : vector<16x128xf32>
    %834 = arith.addf %827, %833 : vector<16x128xf32>
    %cst_411 = arith.constant 0.797884583 : f32
    %835 = vector.broadcast %cst_411 : f32 to vector<16x128xf32>
    %836 = arith.mulf %835, %834 : vector<16x128xf32>
    %837 = math.tanh %836 : vector<16x128xf32>
    %cst_412 = arith.constant 1.000000e+00 : f32
    %838 = vector.broadcast %cst_412 : f32 to vector<16x128xf32>
    %839 = arith.addf %838, %837 : vector<16x128xf32>
    %840 = arith.mulf %829, %839 : vector<16x128xf32>
    %c4_413 = arith.constant 4 : index
    %c0_414 = arith.constant 0 : index
    %c0_415 = arith.constant 0 : index
    %841 = vector.load %arg13[%c4_413, %c0_414, %c0_415] : memref<6x128x32xf32, #tpu.memory_space<vmem>>, vector<1x128x32xf32>
    %842 = vector.shape_cast %841 : vector<1x128x32xf32> to vector<128x32xf32>
    %cst_416 = arith.constant dense<0.000000e+00> : vector<16x32xf32>
    %843 = tpu.matmul %840, %842, %cst_416 {dimension_numbers = #tpu.dot_dimension_numbers<[1], [0], [0], [1], [0, 0, 1, 1], [], []>} : vector<16x128xf32>, vector<128x32xf32>, vector<16x32xf32> -> vector<16x32xf32>
    %844 = arith.addf %794, %843 : vector<16x32xf32>
    %c4_417 = arith.constant 4 : index
    %c0_418 = arith.constant 0 : index
    %c0_419 = arith.constant 0 : index
    %845 = vector.load %arg14[%c4_417, %c0_418, %c0_419] : memref<6x1x32xf32, #tpu.memory_space<vmem>>, vector<1x1x32xf32>
    %846 = vector.shape_cast %845 : vector<1x1x32xf32> to vector<1x32xf32>
    %847 = vector.broadcast %846 : vector<1x32xf32> to vector<16x32xf32>
    %848 = arith.addf %844, %847 : vector<16x32xf32>
    %c5_420 = arith.constant 5 : index
    %c0_421 = arith.constant 0 : index
    %c0_422 = arith.constant 0 : index
    %849 = vector.load %arg3[%c5_420, %c0_421, %c0_422] : memref<6x1x32xf32, #tpu.memory_space<vmem>>, vector<1x1x32xf32>
    %850 = vector.shape_cast %849 : vector<1x1x32xf32> to vector<1x32xf32>
    %c5_423 = arith.constant 5 : index
    %c0_424 = arith.constant 0 : index
    %c0_425 = arith.constant 0 : index
    %851 = vector.load %arg4[%c5_423, %c0_424, %c0_425] : memref<6x1x32xf32, #tpu.memory_space<vmem>>, vector<1x1x32xf32>
    %852 = vector.shape_cast %851 : vector<1x1x32xf32> to vector<1x32xf32>
    %cst_426 = arith.constant dense<0.000000e+00> : vector<16xf32>
    %853 = vector.multi_reduction <add>, %848, %cst_426 [1] : vector<16x32xf32> to vector<16xf32>
    %854 = vector.shape_cast %853 : vector<16xf32> to vector<16x1xf32>
    %cst_427 = arith.constant 3.200000e+01 : f32
    %855 = vector.broadcast %cst_427 : f32 to vector<16x1xf32>
    %856 = arith.divf %854, %855 : vector<16x1xf32>
    %857 = arith.mulf %848, %848 : vector<16x32xf32>
    %cst_428 = arith.constant dense<0.000000e+00> : vector<16xf32>
    %858 = vector.multi_reduction <add>, %857, %cst_428 [1] : vector<16x32xf32> to vector<16xf32>
    %859 = vector.shape_cast %858 : vector<16xf32> to vector<16x1xf32>
    %cst_429 = arith.constant 3.200000e+01 : f32
    %860 = vector.broadcast %cst_429 : f32 to vector<16x1xf32>
    %861 = arith.divf %859, %860 : vector<16x1xf32>
    %862 = arith.mulf %856, %856 : vector<16x1xf32>
    %863 = arith.subf %861, %862 : vector<16x1xf32>
    %864 = vector.broadcast %856 : vector<16x1xf32> to vector<16x32xf32>
    %865 = arith.subf %848, %864 : vector<16x32xf32>
    %cst_430 = arith.constant 9.99999974E-6 : f32
    %866 = vector.broadcast %cst_430 : f32 to vector<16x1xf32>
    %867 = arith.addf %863, %866 : vector<16x1xf32>
    %868 = math.rsqrt %867 : vector<16x1xf32>
    %869 = vector.broadcast %868 : vector<16x1xf32> to vector<16x32xf32>
    %870 = arith.mulf %865, %869 : vector<16x32xf32>
    %871 = vector.broadcast %850 : vector<1x32xf32> to vector<16x32xf32>
    %872 = arith.mulf %870, %871 : vector<16x32xf32>
    %873 = vector.broadcast %852 : vector<1x32xf32> to vector<16x32xf32>
    %874 = arith.addf %872, %873 : vector<16x32xf32>
    %c5_431 = arith.constant 5 : index
    %c0_432 = arith.constant 0 : index
    %c0_433 = arith.constant 0 : index
    %875 = vector.load %arg5[%c5_431, %c0_432, %c0_433] : memref<6x32x1536xf32, #tpu.memory_space<vmem>>, vector<1x32x1536xf32>
    %876 = vector.shape_cast %875 : vector<1x32x1536xf32> to vector<32x1536xf32>
    %cst_434 = arith.constant dense<0.000000e+00> : vector<16x1536xf32>
    %877 = tpu.matmul %874, %876, %cst_434 {dimension_numbers = #tpu.dot_dimension_numbers<[1], [0], [0], [1], [0, 0, 1, 1], [], []>} : vector<16x32xf32>, vector<32x1536xf32>, vector<16x1536xf32> -> vector<16x1536xf32>
    %c5_435 = arith.constant 5 : index
    %c0_436 = arith.constant 0 : index
    %c0_437 = arith.constant 0 : index
    %878 = vector.load %arg6[%c5_435, %c0_436, %c0_437] : memref<6x1x1536xf32, #tpu.memory_space<vmem>>, vector<1x1x1536xf32>
    %879 = vector.shape_cast %878 : vector<1x1x1536xf32> to vector<1x1536xf32>
    %880 = vector.broadcast %879 : vector<1x1536xf32> to vector<16x1536xf32>
    %881 = arith.addf %877, %880 : vector<16x1536xf32>
    %cst_438 = arith.constant 0.000000e+00 : f32
    %882 = vector.broadcast %cst_438 : f32 to vector<16x32xf32>
    %883 = vector.extract_strided_slice %881 {offsets = [0, 0], sizes = [16, 128], strides = [1, 1]} : vector<16x1536xf32> to vector<16x128xf32>
    %884 = vector.extract_strided_slice %881 {offsets = [0, 512], sizes = [16, 128], strides = [1, 1]} : vector<16x1536xf32> to vector<16x128xf32>
    %885 = vector.extract_strided_slice %881 {offsets = [0, 1024], sizes = [16, 128], strides = [1, 1]} : vector<16x1536xf32> to vector<16x128xf32>
    %cst_439 = arith.constant dense<0.000000e+00> : vector<16x16xf32>
    %886 = tpu.matmul %883, %884, %cst_439 {dimension_numbers = #tpu.dot_dimension_numbers<[1], [1], [0], [0], [0, 0, 1, 0], [], []>} : vector<16x128xf32>, vector<16x128xf32>, vector<16x16xf32> -> vector<16x16xf32>
    %cst_440 = arith.constant 0.353553385 : f32
    %887 = vector.broadcast %cst_440 : f32 to vector<16x16xf32>
    %888 = arith.mulf %886, %887 : vector<16x16xf32>
    %889 = arith.addf %888, %3 : vector<16x16xf32>
    %890 = math.exp %889 : vector<16x16xf32>
    %cst_441 = arith.constant dense<0.000000e+00> : vector<16xf32>
    %891 = vector.multi_reduction <add>, %890, %cst_441 [1] : vector<16x16xf32> to vector<16xf32>
    %892 = vector.shape_cast %891 : vector<16xf32> to vector<16x1xf32>
    %cst_442 = arith.constant 1.000000e+00 : f32
    %893 = vector.broadcast %cst_442 : f32 to vector<16x1xf32>
    %894 = arith.divf %893, %892 : vector<16x1xf32>
    %cst_443 = arith.constant dense<0.000000e+00> : vector<16x128xf32>
    %895 = tpu.matmul %890, %885, %cst_443 {dimension_numbers = #tpu.dot_dimension_numbers<[1], [0], [0], [1], [0, 0, 1, 1], [], []>} : vector<16x16xf32>, vector<16x128xf32>, vector<16x128xf32> -> vector<16x128xf32>
    %896 = vector.broadcast %894 : vector<16x1xf32> to vector<16x128xf32>
    %897 = arith.mulf %895, %896 : vector<16x128xf32>
    %c20 = arith.constant 20 : index
    %c0_444 = arith.constant 0 : index
    %c0_445 = arith.constant 0 : index
    %898 = vector.load %arg7[%c20, %c0_444, %c0_445] : memref<24x128x32xf32, #tpu.memory_space<vmem>>, vector<1x128x32xf32>
    %899 = vector.shape_cast %898 : vector<1x128x32xf32> to vector<128x32xf32>
    %cst_446 = arith.constant dense<0.000000e+00> : vector<16x32xf32>
    %900 = tpu.matmul %897, %899, %cst_446 {dimension_numbers = #tpu.dot_dimension_numbers<[1], [0], [0], [1], [0, 0, 1, 1], [], []>} : vector<16x128xf32>, vector<128x32xf32>, vector<16x32xf32> -> vector<16x32xf32>
    %901 = arith.addf %882, %900 : vector<16x32xf32>
    %902 = vector.extract_strided_slice %881 {offsets = [0, 128], sizes = [16, 128], strides = [1, 1]} : vector<16x1536xf32> to vector<16x128xf32>
    %903 = vector.extract_strided_slice %881 {offsets = [0, 640], sizes = [16, 128], strides = [1, 1]} : vector<16x1536xf32> to vector<16x128xf32>
    %904 = vector.extract_strided_slice %881 {offsets = [0, 1152], sizes = [16, 128], strides = [1, 1]} : vector<16x1536xf32> to vector<16x128xf32>
    %cst_447 = arith.constant dense<0.000000e+00> : vector<16x16xf32>
    %905 = tpu.matmul %902, %903, %cst_447 {dimension_numbers = #tpu.dot_dimension_numbers<[1], [1], [0], [0], [0, 0, 1, 0], [], []>} : vector<16x128xf32>, vector<16x128xf32>, vector<16x16xf32> -> vector<16x16xf32>
    %cst_448 = arith.constant 0.353553385 : f32
    %906 = vector.broadcast %cst_448 : f32 to vector<16x16xf32>
    %907 = arith.mulf %905, %906 : vector<16x16xf32>
    %908 = arith.addf %907, %3 : vector<16x16xf32>
    %909 = math.exp %908 : vector<16x16xf32>
    %cst_449 = arith.constant dense<0.000000e+00> : vector<16xf32>
    %910 = vector.multi_reduction <add>, %909, %cst_449 [1] : vector<16x16xf32> to vector<16xf32>
    %911 = vector.shape_cast %910 : vector<16xf32> to vector<16x1xf32>
    %cst_450 = arith.constant 1.000000e+00 : f32
    %912 = vector.broadcast %cst_450 : f32 to vector<16x1xf32>
    %913 = arith.divf %912, %911 : vector<16x1xf32>
    %cst_451 = arith.constant dense<0.000000e+00> : vector<16x128xf32>
    %914 = tpu.matmul %909, %904, %cst_451 {dimension_numbers = #tpu.dot_dimension_numbers<[1], [0], [0], [1], [0, 0, 1, 1], [], []>} : vector<16x16xf32>, vector<16x128xf32>, vector<16x128xf32> -> vector<16x128xf32>
    %915 = vector.broadcast %913 : vector<16x1xf32> to vector<16x128xf32>
    %916 = arith.mulf %914, %915 : vector<16x128xf32>
    %c21 = arith.constant 21 : index
    %c0_452 = arith.constant 0 : index
    %c0_453 = arith.constant 0 : index
    %917 = vector.load %arg7[%c21, %c0_452, %c0_453] : memref<24x128x32xf32, #tpu.memory_space<vmem>>, vector<1x128x32xf32>
    %918 = vector.shape_cast %917 : vector<1x128x32xf32> to vector<128x32xf32>
    %cst_454 = arith.constant dense<0.000000e+00> : vector<16x32xf32>
    %919 = tpu.matmul %916, %918, %cst_454 {dimension_numbers = #tpu.dot_dimension_numbers<[1], [0], [0], [1], [0, 0, 1, 1], [], []>} : vector<16x128xf32>, vector<128x32xf32>, vector<16x32xf32> -> vector<16x32xf32>
    %920 = arith.addf %901, %919 : vector<16x32xf32>
    %921 = vector.extract_strided_slice %881 {offsets = [0, 256], sizes = [16, 128], strides = [1, 1]} : vector<16x1536xf32> to vector<16x128xf32>
    %922 = vector.extract_strided_slice %881 {offsets = [0, 768], sizes = [16, 128], strides = [1, 1]} : vector<16x1536xf32> to vector<16x128xf32>
    %923 = vector.extract_strided_slice %881 {offsets = [0, 1280], sizes = [16, 128], strides = [1, 1]} : vector<16x1536xf32> to vector<16x128xf32>
    %cst_455 = arith.constant dense<0.000000e+00> : vector<16x16xf32>
    %924 = tpu.matmul %921, %922, %cst_455 {dimension_numbers = #tpu.dot_dimension_numbers<[1], [1], [0], [0], [0, 0, 1, 0], [], []>} : vector<16x128xf32>, vector<16x128xf32>, vector<16x16xf32> -> vector<16x16xf32>
    %cst_456 = arith.constant 0.353553385 : f32
    %925 = vector.broadcast %cst_456 : f32 to vector<16x16xf32>
    %926 = arith.mulf %924, %925 : vector<16x16xf32>
    %927 = arith.addf %926, %3 : vector<16x16xf32>
    %928 = math.exp %927 : vector<16x16xf32>
    %cst_457 = arith.constant dense<0.000000e+00> : vector<16xf32>
    %929 = vector.multi_reduction <add>, %928, %cst_457 [1] : vector<16x16xf32> to vector<16xf32>
    %930 = vector.shape_cast %929 : vector<16xf32> to vector<16x1xf32>
    %cst_458 = arith.constant 1.000000e+00 : f32
    %931 = vector.broadcast %cst_458 : f32 to vector<16x1xf32>
    %932 = arith.divf %931, %930 : vector<16x1xf32>
    %cst_459 = arith.constant dense<0.000000e+00> : vector<16x128xf32>
    %933 = tpu.matmul %928, %923, %cst_459 {dimension_numbers = #tpu.dot_dimension_numbers<[1], [0], [0], [1], [0, 0, 1, 1], [], []>} : vector<16x16xf32>, vector<16x128xf32>, vector<16x128xf32> -> vector<16x128xf32>
    %934 = vector.broadcast %932 : vector<16x1xf32> to vector<16x128xf32>
    %935 = arith.mulf %933, %934 : vector<16x128xf32>
    %c22 = arith.constant 22 : index
    %c0_460 = arith.constant 0 : index
    %c0_461 = arith.constant 0 : index
    %936 = vector.load %arg7[%c22, %c0_460, %c0_461] : memref<24x128x32xf32, #tpu.memory_space<vmem>>, vector<1x128x32xf32>
    %937 = vector.shape_cast %936 : vector<1x128x32xf32> to vector<128x32xf32>
    %cst_462 = arith.constant dense<0.000000e+00> : vector<16x32xf32>
    %938 = tpu.matmul %935, %937, %cst_462 {dimension_numbers = #tpu.dot_dimension_numbers<[1], [0], [0], [1], [0, 0, 1, 1], [], []>} : vector<16x128xf32>, vector<128x32xf32>, vector<16x32xf32> -> vector<16x32xf32>
    %939 = arith.addf %920, %938 : vector<16x32xf32>
    %940 = vector.extract_strided_slice %881 {offsets = [0, 384], sizes = [16, 128], strides = [1, 1]} : vector<16x1536xf32> to vector<16x128xf32>
    %941 = vector.extract_strided_slice %881 {offsets = [0, 896], sizes = [16, 128], strides = [1, 1]} : vector<16x1536xf32> to vector<16x128xf32>
    %942 = vector.extract_strided_slice %881 {offsets = [0, 1408], sizes = [16, 128], strides = [1, 1]} : vector<16x1536xf32> to vector<16x128xf32>
    %cst_463 = arith.constant dense<0.000000e+00> : vector<16x16xf32>
    %943 = tpu.matmul %940, %941, %cst_463 {dimension_numbers = #tpu.dot_dimension_numbers<[1], [1], [0], [0], [0, 0, 1, 0], [], []>} : vector<16x128xf32>, vector<16x128xf32>, vector<16x16xf32> -> vector<16x16xf32>
    %cst_464 = arith.constant 0.353553385 : f32
    %944 = vector.broadcast %cst_464 : f32 to vector<16x16xf32>
    %945 = arith.mulf %943, %944 : vector<16x16xf32>
    %946 = arith.addf %945, %3 : vector<16x16xf32>
    %947 = math.exp %946 : vector<16x16xf32>
    %cst_465 = arith.constant dense<0.000000e+00> : vector<16xf32>
    %948 = vector.multi_reduction <add>, %947, %cst_465 [1] : vector<16x16xf32> to vector<16xf32>
    %949 = vector.shape_cast %948 : vector<16xf32> to vector<16x1xf32>
    %cst_466 = arith.constant 1.000000e+00 : f32
    %950 = vector.broadcast %cst_466 : f32 to vector<16x1xf32>
    %951 = arith.divf %950, %949 : vector<16x1xf32>
    %cst_467 = arith.constant dense<0.000000e+00> : vector<16x128xf32>
    %952 = tpu.matmul %947, %942, %cst_467 {dimension_numbers = #tpu.dot_dimension_numbers<[1], [0], [0], [1], [0, 0, 1, 1], [], []>} : vector<16x16xf32>, vector<16x128xf32>, vector<16x128xf32> -> vector<16x128xf32>
    %953 = vector.broadcast %951 : vector<16x1xf32> to vector<16x128xf32>
    %954 = arith.mulf %952, %953 : vector<16x128xf32>
    %c23 = arith.constant 23 : index
    %c0_468 = arith.constant 0 : index
    %c0_469 = arith.constant 0 : index
    %955 = vector.load %arg7[%c23, %c0_468, %c0_469] : memref<24x128x32xf32, #tpu.memory_space<vmem>>, vector<1x128x32xf32>
    %956 = vector.shape_cast %955 : vector<1x128x32xf32> to vector<128x32xf32>
    %cst_470 = arith.constant dense<0.000000e+00> : vector<16x32xf32>
    %957 = tpu.matmul %954, %956, %cst_470 {dimension_numbers = #tpu.dot_dimension_numbers<[1], [0], [0], [1], [0, 0, 1, 1], [], []>} : vector<16x128xf32>, vector<128x32xf32>, vector<16x32xf32> -> vector<16x32xf32>
    %958 = arith.addf %939, %957 : vector<16x32xf32>
    %959 = arith.addf %848, %958 : vector<16x32xf32>
    %c5_471 = arith.constant 5 : index
    %c0_472 = arith.constant 0 : index
    %c0_473 = arith.constant 0 : index
    %960 = vector.load %arg8[%c5_471, %c0_472, %c0_473] : memref<6x1x32xf32, #tpu.memory_space<vmem>>, vector<1x1x32xf32>
    %961 = vector.shape_cast %960 : vector<1x1x32xf32> to vector<1x32xf32>
    %962 = vector.broadcast %961 : vector<1x32xf32> to vector<16x32xf32>
    %963 = arith.addf %959, %962 : vector<16x32xf32>
    %c5_474 = arith.constant 5 : index
    %c0_475 = arith.constant 0 : index
    %c0_476 = arith.constant 0 : index
    %964 = vector.load %arg9[%c5_474, %c0_475, %c0_476] : memref<6x1x32xf32, #tpu.memory_space<vmem>>, vector<1x1x32xf32>
    %965 = vector.shape_cast %964 : vector<1x1x32xf32> to vector<1x32xf32>
    %c5_477 = arith.constant 5 : index
    %c0_478 = arith.constant 0 : index
    %c0_479 = arith.constant 0 : index
    %966 = vector.load %arg10[%c5_477, %c0_478, %c0_479] : memref<6x1x32xf32, #tpu.memory_space<vmem>>, vector<1x1x32xf32>
    %967 = vector.shape_cast %966 : vector<1x1x32xf32> to vector<1x32xf32>
    %cst_480 = arith.constant dense<0.000000e+00> : vector<16xf32>
    %968 = vector.multi_reduction <add>, %963, %cst_480 [1] : vector<16x32xf32> to vector<16xf32>
    %969 = vector.shape_cast %968 : vector<16xf32> to vector<16x1xf32>
    %cst_481 = arith.constant 3.200000e+01 : f32
    %970 = vector.broadcast %cst_481 : f32 to vector<16x1xf32>
    %971 = arith.divf %969, %970 : vector<16x1xf32>
    %972 = arith.mulf %963, %963 : vector<16x32xf32>
    %cst_482 = arith.constant dense<0.000000e+00> : vector<16xf32>
    %973 = vector.multi_reduction <add>, %972, %cst_482 [1] : vector<16x32xf32> to vector<16xf32>
    %974 = vector.shape_cast %973 : vector<16xf32> to vector<16x1xf32>
    %cst_483 = arith.constant 3.200000e+01 : f32
    %975 = vector.broadcast %cst_483 : f32 to vector<16x1xf32>
    %976 = arith.divf %974, %975 : vector<16x1xf32>
    %977 = arith.mulf %971, %971 : vector<16x1xf32>
    %978 = arith.subf %976, %977 : vector<16x1xf32>
    %979 = vector.broadcast %971 : vector<16x1xf32> to vector<16x32xf32>
    %980 = arith.subf %963, %979 : vector<16x32xf32>
    %cst_484 = arith.constant 9.99999974E-6 : f32
    %981 = vector.broadcast %cst_484 : f32 to vector<16x1xf32>
    %982 = arith.addf %978, %981 : vector<16x1xf32>
    %983 = math.rsqrt %982 : vector<16x1xf32>
    %984 = vector.broadcast %983 : vector<16x1xf32> to vector<16x32xf32>
    %985 = arith.mulf %980, %984 : vector<16x32xf32>
    %986 = vector.broadcast %965 : vector<1x32xf32> to vector<16x32xf32>
    %987 = arith.mulf %985, %986 : vector<16x32xf32>
    %988 = vector.broadcast %967 : vector<1x32xf32> to vector<16x32xf32>
    %989 = arith.addf %987, %988 : vector<16x32xf32>
    %c5_485 = arith.constant 5 : index
    %c0_486 = arith.constant 0 : index
    %c0_487 = arith.constant 0 : index
    %990 = vector.load %arg11[%c5_485, %c0_486, %c0_487] : memref<6x32x128xf32, #tpu.memory_space<vmem>>, vector<1x32x128xf32>
    %991 = vector.shape_cast %990 : vector<1x32x128xf32> to vector<32x128xf32>
    %cst_488 = arith.constant dense<0.000000e+00> : vector<16x128xf32>
    %992 = tpu.matmul %989, %991, %cst_488 {dimension_numbers = #tpu.dot_dimension_numbers<[1], [0], [0], [1], [0, 0, 1, 1], [], []>} : vector<16x32xf32>, vector<32x128xf32>, vector<16x128xf32> -> vector<16x128xf32>
    %c5_489 = arith.constant 5 : index
    %c0_490 = arith.constant 0 : index
    %c0_491 = arith.constant 0 : index
    %993 = vector.load %arg12[%c5_489, %c0_490, %c0_491] : memref<6x1x128xf32, #tpu.memory_space<vmem>>, vector<1x1x128xf32>
    %994 = vector.shape_cast %993 : vector<1x1x128xf32> to vector<1x128xf32>
    %995 = vector.broadcast %994 : vector<1x128xf32> to vector<16x128xf32>
    %996 = arith.addf %992, %995 : vector<16x128xf32>
    %cst_492 = arith.constant 5.000000e-01 : f32
    %997 = vector.broadcast %cst_492 : f32 to vector<16x128xf32>
    %998 = arith.mulf %997, %996 : vector<16x128xf32>
    %cst_493 = arith.constant 4.471500e-02 : f32
    %999 = vector.broadcast %cst_493 : f32 to vector<16x128xf32>
    %1000 = arith.mulf %999, %996 : vector<16x128xf32>
    %1001 = arith.mulf %1000, %996 : vector<16x128xf32>
    %1002 = arith.mulf %1001, %996 : vector<16x128xf32>
    %1003 = arith.addf %996, %1002 : vector<16x128xf32>
    %cst_494 = arith.constant 0.797884583 : f32
    %1004 = vector.broadcast %cst_494 : f32 to vector<16x128xf32>
    %1005 = arith.mulf %1004, %1003 : vector<16x128xf32>
    %1006 = math.tanh %1005 : vector<16x128xf32>
    %cst_495 = arith.constant 1.000000e+00 : f32
    %1007 = vector.broadcast %cst_495 : f32 to vector<16x128xf32>
    %1008 = arith.addf %1007, %1006 : vector<16x128xf32>
    %1009 = arith.mulf %998, %1008 : vector<16x128xf32>
    %c5_496 = arith.constant 5 : index
    %c0_497 = arith.constant 0 : index
    %c0_498 = arith.constant 0 : index
    %1010 = vector.load %arg13[%c5_496, %c0_497, %c0_498] : memref<6x128x32xf32, #tpu.memory_space<vmem>>, vector<1x128x32xf32>
    %1011 = vector.shape_cast %1010 : vector<1x128x32xf32> to vector<128x32xf32>
    %cst_499 = arith.constant dense<0.000000e+00> : vector<16x32xf32>
    %1012 = tpu.matmul %1009, %1011, %cst_499 {dimension_numbers = #tpu.dot_dimension_numbers<[1], [0], [0], [1], [0, 0, 1, 1], [], []>} : vector<16x128xf32>, vector<128x32xf32>, vector<16x32xf32> -> vector<16x32xf32>
    %1013 = arith.addf %963, %1012 : vector<16x32xf32>
    %c5_500 = arith.constant 5 : index
    %c0_501 = arith.constant 0 : index
    %c0_502 = arith.constant 0 : index
    %1014 = vector.load %arg14[%c5_500, %c0_501, %c0_502] : memref<6x1x32xf32, #tpu.memory_space<vmem>>, vector<1x1x32xf32>
    %1015 = vector.shape_cast %1014 : vector<1x1x32xf32> to vector<1x32xf32>
    %1016 = vector.broadcast %1015 : vector<1x32xf32> to vector<16x32xf32>
    %1017 = arith.addf %1013, %1016 : vector<16x32xf32>
    %c0_503 = arith.constant 0 : index
    %c0_504 = arith.constant 0 : index
    %1018 = vector.load %arg15[%c0_503, %c0_504] : memref<1x32xf32, #tpu.memory_space<vmem>>, vector<1x32xf32>
    %c0_505 = arith.constant 0 : index
    %c0_506 = arith.constant 0 : index
    %1019 = vector.load %arg16[%c0_505, %c0_506] : memref<1x32xf32, #tpu.memory_space<vmem>>, vector<1x32xf32>
    %cst_507 = arith.constant dense<0.000000e+00> : vector<16xf32>
    %1020 = vector.multi_reduction <add>, %1017, %cst_507 [1] : vector<16x32xf32> to vector<16xf32>
    %1021 = vector.shape_cast %1020 : vector<16xf32> to vector<16x1xf32>
    %cst_508 = arith.constant 3.200000e+01 : f32
    %1022 = vector.broadcast %cst_508 : f32 to vector<16x1xf32>
    %1023 = arith.divf %1021, %1022 : vector<16x1xf32>
    %1024 = arith.mulf %1017, %1017 : vector<16x32xf32>
    %cst_509 = arith.constant dense<0.000000e+00> : vector<16xf32>
    %1025 = vector.multi_reduction <add>, %1024, %cst_509 [1] : vector<16x32xf32> to vector<16xf32>
    %1026 = vector.shape_cast %1025 : vector<16xf32> to vector<16x1xf32>
    %cst_510 = arith.constant 3.200000e+01 : f32
    %1027 = vector.broadcast %cst_510 : f32 to vector<16x1xf32>
    %1028 = arith.divf %1026, %1027 : vector<16x1xf32>
    %1029 = arith.mulf %1023, %1023 : vector<16x1xf32>
    %1030 = arith.subf %1028, %1029 : vector<16x1xf32>
    %1031 = vector.broadcast %1023 : vector<16x1xf32> to vector<16x32xf32>
    %1032 = arith.subf %1017, %1031 : vector<16x32xf32>
    %cst_511 = arith.constant 9.99999974E-6 : f32
    %1033 = vector.broadcast %cst_511 : f32 to vector<16x1xf32>
    %1034 = arith.addf %1030, %1033 : vector<16x1xf32>
    %1035 = math.rsqrt %1034 : vector<16x1xf32>
    %1036 = vector.broadcast %1035 : vector<16x1xf32> to vector<16x32xf32>
    %1037 = arith.mulf %1032, %1036 : vector<16x32xf32>
    %1038 = vector.broadcast %1018 : vector<1x32xf32> to vector<16x32xf32>
    %1039 = arith.mulf %1037, %1038 : vector<16x32xf32>
    %1040 = vector.broadcast %1019 : vector<1x32xf32> to vector<16x32xf32>
    %1041 = arith.addf %1039, %1040 : vector<16x32xf32>
    %c0_512 = arith.constant 0 : index
    %c0_513 = arith.constant 0 : index
    %1042 = vector.load %arg17[%c0_512, %c0_513] : memref<16x32xf32, #tpu.memory_space<vmem>>, vector<16x32xf32>
    tpu.vector_store %arg17[%c0_512, %c0_513], %1041 {strides = array<i32>} : memref<16x32xf32, #tpu.memory_space<vmem>>, vector<16x32xf32>,
    return
  }
}

</mosaic_0001>

<bundles_post_ra>
// kernel: pfa_forward.1
= control target key start
LH: loop header
LB: loop body
LE: loop exit
PB: predicated region body
PF: predicated region fallthrough
CT: control target
= control target key end

     0   :  { %vm66_vm0 = vcmask 261120   ;;  %v16977_v38 = vmov 0.0   ;;  %vm777_vm1 = vcmask 130048   ;;  %s20694_s0 = inlined_call_operand.vmem [shape: f32[16,32], index: 0, kind: input, shape index: {}, may-alias: {0,17}]   ;;  %s20695_s1 = inlined_call_operand.vmem [shape: f32[16,32], index: 1, kind: input, shape index: {}]   ;;  %s20696_s5 = inlined_call_operand.vmem [shape: f32[6,32,1536], index: 5, kind: input, shape index: {}]   ;;  %s20697_s3 = inlined_call_operand.vmem [shape: f32[6,1,32], index: 3, kind: input, shape index: {}]   ;;  %s20698_s4 = inlined_call_operand.vmem [shape: f32[6,1,32], index: 4, kind: input, shape index: {}]   ;;  %s20699_s6 = inlined_call_operand.vmem [shape: f32[6,1,1536], index: 6, kind: input, shape index: {}]   ;;  %s20700_s7 = inlined_call_operand.vmem [shape: f32[24,128,32], index: 7, kind: input, shape index: {}]   ;;  %s20701_s2 = inlined_call_operand.vmem [shape: f32[16,16], index: 2, kind: input, shape index: {}]   ;;  %s20702_s8 = inlined_call_operand.vmem [shape: f32[6,1,32], index: 8, kind: input, shape index: {}]   ;;  %s20703_s11 = inlined_call_operand.vmem [shape: f32[6,32,128], index: 11, kind: input, shape index: {}]   ;;  %s20704_s13 = inlined_call_operand.vmem [shape: f32[6,128,32], index: 13, kind: input, shape index: {}]   ;;  %s20705_s9 = inlined_call_operand.vmem [shape: f32[6,1,32], index: 9, kind: input, shape index: {}]   ;;  %s20706_s10 = inlined_call_operand.vmem [shape: f32[6,1,32], index: 10, kind: input, shape index: {}]   ;;  %s20707_s12 = inlined_call_operand.vmem [shape: f32[6,1,128], index: 12, kind: input, shape index: {}]   ;;  %s20708_s14 = inlined_call_operand.vmem [shape: f32[6,1,32], index: 14, kind: input, shape index: {}]   ;;  %s20709_s15 = inlined_call_operand.vmem [shape: f32[1,32], index: 15, kind: input, shape index: {}]   ;;  %s20710_s16 = inlined_call_operand.vmem [shape: f32[1,32], index: 16, kind: input, shape index: {}]   ;;  %s20711_s17 = inlined_call_operand.vmem [shape: f32[16,32], index: 17, kind: output, shape index: {}, may-alias: {0,17}]  }
   0x1   :  { %20715 = sst [smem:[#allocation2_spill]] %s20694_s0  ;;  %v115_v12 = vld [vmem:[%s20696_s5 + $0x8] sm:$0xff]  ;;  %v117_v14 = vld [vmem:[%s20696_s5 + $0x18] sm:$0xff]  ;;  %v114_v17 = vld [vmem:[%s20696_s5] sm:$0xff]  ;;  %296 = vmatprep.mubr.f32.mxu0 %v16977_v38  ;;  %373 = vmatprep.mubr.f32.mxu1 %v16977_v38 }
   0x2   :  { %20716 = sst [smem:[#allocation3_spill]] %s20695_s1  ;;  %s20718_s26 = sld [smem:[#allocation2_spill]]  ;;  %v127_v13 = vld [vmem:[%s20696_s5 + $0x68] sm:$0xff]  ;;  %v129_v16 = vld [vmem:[%s20696_s5 + $0x78] sm:$0xff]  ;;  %v126_v18 = vld [vmem:[%s20696_s5 + $0x60] sm:$0xff] }
   0x3   :  { %20717 = sst [smem:[#allocation4_spill]] %s20706_s10  ;;  %s20719_s10 = sld [smem:[#allocation3_spill]]  ;;  %v15174_v15 = vpack.c.bf16 %v127_v13, %v115_v12  ;;  %v15182_v19 = vpack.c.bf16 %v129_v16, %v117_v14  ;;  %v15176_v20 = vpack.c.bf16 %v126_v18, %v114_v17  ;;  %v116_v21 = vld [vmem:[%s20696_s5 + $0x10] sm:$0xff]  ;;  %v139_v24 = vld [vmem:[%s20696_s5 + $0xc8] sm:$0xff]  ;;  %v141_v26 = vld [vmem:[%s20696_s5 + $0xd8] sm:$0xff] }
   0x4   :  { %v128_v22 = vld [vmem:[%s20696_s5 + $0x70] sm:$0xff]  ;;  %v151_v25 = vld [vmem:[%s20696_s5 + $0x128] sm:$0xff]  ;;  %v153_v28 = vld [vmem:[%s20696_s5 + $0x138] sm:$0xff]  ;;  %s20720_s30 = sld [smem:[#allocation4_spill]] }
   0x5   :  { %15175 = vmatprep.subr.bf16.mxu0 %v15174_v15  ;;  %v15184_v23 = vpack.c.bf16 %v128_v22, %v116_v21  ;;  %15183 = vmatprep.subr.bf16.mxu1 %v15182_v19  ;;  %v15178_v27 = vpack.c.bf16 %v151_v25, %v139_v24  ;;  %v138_v29 = vld [vmem:[%s20696_s5 + $0xc0] sm:$0xff]  ;;  %v15186_v31 = vpack.c.bf16 %v153_v28, %v141_v26  ;;  %v140_v33 = vld [vmem:[%s20696_s5 + $0xd0] sm:$0xff]  ;;  %v119_v36 = vld [vmem:[%s20696_s5 + $0x28] sm:$0xff] }
   0x6   :  { %15177 = vmatpush1.bf16.msra.mxu0 %v15176_v20  ;;  %v150_v30 = vld [vmem:[%s20696_s5 + $0x120] sm:$0xff]  ;;  %v152_v34 = vld [vmem:[%s20696_s5 + $0x130] sm:$0xff]  ;;  %v131_v37 = vld [vmem:[%s20696_s5 + $0x88] sm:$0xff] }
   0x7   :  { %15185 = vmatpush1.bf16.msra.mxu1 %v15184_v23  ;;  %v15180_v32 = vpack.c.bf16 %v150_v30, %v138_v29  ;;  %15179 = vmatprep.subr.bf16.mxu0 %v15178_v27  ;;  %v15188_v35 = vpack.c.bf16 %v152_v34, %v140_v33  ;;  %v15190_v39 = vpack.c.bf16 %v131_v37, %v119_v36  ;;  %v121_v40 = vld [vmem:[%s20696_s5 + $0x38] sm:$0xff]  ;;  %v12025_v61 = vld [vmem:[%s20697_s3] ss:$0 sm:$0xff]  ;;  %v144_v18 = vld [vmem:[%s20696_s5 + $0xf0] sm:$0xff] }
   0x8   :  { %v57_v0 = vld [vmem:[%s20718_s26 + $0x8] sm:$0xff]  ;;  %v56_v2 = vld [vmem:[%s20718_s26] sm:$0xff]  ;;  %15187 = vmatprep.subr.bf16.mxu1 %v15186_v31  ;;  %v133_v41 = vld [vmem:[%s20696_s5 + $0x98] sm:$0xff] }
   0x9   :  { %v59_v1 = vld [vmem:[%s20719_s10 + $0x8] sm:$0xff]  ;;  %v58_v4 = vld [vmem:[%s20719_s10] sm:$0xff]  ;;  %v15198_v42 = vpack.c.bf16 %v133_v41, %v121_v40  ;;  %v156_v19 = vld [vmem:[%s20696_s5 + $0x150] sm:$0xff] }
   0xa   :  { %v17077_v3 = vadd.f32 %v59_v1, %v57_v0  ;;  %v17082_v5 = vadd.f32 %v58_v4, %v56_v2  ;;  %15181 = vmatpush1.bf16.msra.mxu0 %v15180_v32  ;;  %v118_v62 = vld [vmem:[%s20696_s5 + $0x20] sm:$0xff]  ;;  %v120_v2 = vld [vmem:[%s20696_s5 + $0x30] sm:$0xff]  ;;  %v123_v22 = vld [vmem:[%s20696_s5 + $0x48] sm:$0xff]  ;;  %v15204_v27 = vpack.c.bf16 %v156_v19, %v144_v18 }
   0xb   :  { %15189 = vmatpush1.bf16.msra.mxu1 %v15188_v35  ;;  %15191 = vmatprep.subr.bf16.mxu0 %v15190_v39  ;;  %v130_v1 = vld [vmem:[%s20696_s5 + $0x80] sm:$0xff]  ;;  %v132_v4 = vld [vmem:[%s20696_s5 + $0x90] sm:$0xff]  ;;  %v135_v23 = vld [vmem:[%s20696_s5 + $0xa8] sm:$0xff] }
   0xc   :  { %v70_v6 = vsel %vm66_vm0, %v17077_v3, 0.0  ;;  %v77_v7 = vmul.f32 %v17077_v3, %v17077_v3  ;;  %v67_v8 = vsel %vm66_vm0, %v17082_v5, 0.0  ;;  %v76_v9 = vmul.f32 %v17082_v5, %v17082_v5  ;;  %15199 = vmatprep.subr.bf16.mxu1 %v15198_v42  ;;  %v142_v14 = vld [vmem:[%s20696_s5 + $0xe0] sm:$0xff]  ;;  %v125_v24 = vld [vmem:[%s20696_s5 + $0x58] sm:$0xff]  ;;  %v124_v31 = vld [vmem:[%s20696_s5 + $0x50] sm:$0xff] }
   0xd   :  { %71 = vadd.xlane.f32.xlu1 %v70_v6  ;;  %68 = vadd.xlane.f32.xlu0 %v67_v8  ;;  %v12026_v6 = vld [vmem:[%s20698_s4] ss:$0 sm:$0xff]  ;;  %v15192_v12 = vpack.c.bf16 %v130_v1, %v118_v62  ;;  %v15200_v13 = vpack.c.bf16 %v132_v4, %v120_v2  ;;  %v137_v25 = vld [vmem:[%s20696_s5 + $0xb8] sm:$0xff]  ;;  %v136_v32 = vld [vmem:[%s20696_s5 + $0xb0] sm:$0xff]  ;;  %v15206_v33 = vpack.c.bf16 %v135_v23, %v123_v22 }
   0xe   :  { %v81_v10 = vsel %vm66_vm0, %v77_v7, 0.0  ;;  %v78_v11 = vsel %vm66_vm0, %v76_v9, 0.0  ;;  %v143_v7 = vld [vmem:[%s20696_s5 + $0xe8] sm:$0xff]  ;;  %v154_v17 = vld [vmem:[%s20696_s5 + $0x140] sm:$0xff]  ;;  %v15214_v34 = vpack.c.bf16 %v137_v25, %v125_v24  ;;  %v149_v37 = vld [vmem:[%s20696_s5 + $0x118] sm:$0xff]  ;;  %v15216_v41 = vpack.c.bf16 %v136_v32, %v124_v31 }
   0xf   :  { %v155_v9 = vld [vmem:[%s20696_s5 + $0x148] sm:$0xff]  ;;  %v15196_v26 = vpack.c.bf16 %v154_v17, %v142_v14  ;;  %v122_v28 = vld [vmem:[%s20696_s5 + $0x40] sm:$0xff]  ;;  %v161_v39 = vld [vmem:[%s20696_s5 + $0x178] sm:$0xff] }
  0x10   :  { %v15194_v20 = vpack.c.bf16 %v155_v9, %v143_v7  ;;  %v134_v30 = vld [vmem:[%s20696_s5 + $0xa0] sm:$0xff]  ;;  %v147_v35 = vld [vmem:[%s20696_s5 + $0x108] sm:$0xff] }
  0x11   :  { %82 = vadd.xlane.f32.xlu1 %v81_v10  ;;  %79 = vadd.xlane.f32.xlu0 %v78_v11  ;;  %v145_v10 = vld [vmem:[%s20696_s5 + $0xf8] sm:$0xff]  ;;  %v159_v36 = vld [vmem:[%s20696_s5 + $0x168] sm:$0xff]  ;;  %v15208_v40 = vpack.c.bf16 %v134_v30, %v122_v28  ;;  %v146_v42 = vld [vmem:[%s20696_s5 + $0x100] sm:$0xff] }
  0x12   :  { %v157_v11 = vld [vmem:[%s20696_s5 + $0x158] sm:$0xff] }
  0x13   :  { %v15202_v21 = vpack.c.bf16 %v157_v11, %v145_v10 }
  0x9a   :  { %v72_v43 = vpop.xlane.xlu1 %71  ;;  %v69_v45 = vpop.xlane.xlu0 %68 }
  0x9b   :  { %v75_v44 = vmul.f32 0.03125, %v72_v43  ;;  %v74_v46 = vmul.f32 0.03125, %v69_v45  ;;  %v158_v43 = vld [vmem:[%s20696_s5 + $0x160] sm:$0xff]  ;;  %v160_v45 = vld [vmem:[%s20696_s5 + $0x170] sm:$0xff] }
  0x9d   :  { %v87_v47 = vmul.f32 %v75_v44, %v75_v44  ;;  %v86_v51 = vmul.f32 %v74_v46, %v74_v46  ;;  %v91_v58 = vsub.f32 %v17077_v3, %v75_v44  ;;  %v90_v59 = vsub.f32 %v17082_v5, %v74_v46  ;;  %v148_v44 = vld [vmem:[%s20696_s5 + $0x110] sm:$0xff] }
  0x9e   :  { %v83_v48 = vpop.xlane.xlu1 %82  ;;  %v80_v50 = vpop.xlane.xlu0 %79  ;;  %v15210_v46 = vpack.c.bf16 %v159_v36, %v147_v35 }
  0x9f   :  { %v85_v49 = vmul.f32 0.03125, %v83_v48  ;;  %v84_v52 = vmul.f32 0.03125, %v80_v50  ;;  %v15212_v48 = vpack.c.bf16 %v158_v43, %v146_v42  ;;  %v166_v50 = vlaneseq }
  0xa1   :  { %v89_v53 = vsub.f32 %v85_v49, %v87_v47  ;;  %v88_v54 = vsub.f32 %v84_v52, %v86_v51  ;;  %v15218_v47 = vpack.c.bf16 %v161_v39, %v149_v37  ;;  %v15220_v49 = vpack.c.bf16 %v160_v45, %v148_v44 }
  0xa2   :  { %v167_v51 = vshrl.u32 %v166_v50, 7 }
  0xa3   :  { %v93_v55 = vadd.f32 1e-05, %v89_v53  ;;  %v92_v56 = vadd.f32 1e-05, %v88_v54  ;;  %v17283_v53 = vld [vmem:[%s20699_s6] sm:$0xff] }
  0xa4   :  { %v17278_v52 = vsub.s32 0, %v167_v51  ;;  %v17306_v1 = vsub.s32 6, %v167_v51  ;;  %v17308_v2 = vsub.s32 5, %v167_v51  ;;  %v17310_v4 = vsub.s32 7, %v167_v51 }
  0xa5   :  { %16699 = vrsqrt.f32 %v93_v55  ;;  %v17321_v14 = vsub.s32 3, %v167_v51 }
  0xa6   :  { %16701 = vrsqrt.f32 %v92_v56  ;;  %v17287_v54 = vrot.slane %v17283_v53, %v17278_v52  ;;  %v193_v9 = vrot.slane %v17283_v53, %v17306_v1 }
  0xaf   :  { %v16700_v57 = vpop.eup %16699 }
  0xb0   :  { %v16702_v60 = vpop.eup %16701  ;;  %v97_v63 = vmul.f32 %v16700_v57, %v91_v58 }
  0xb1   :  { %v96_v0 = vmul.f32 %v16702_v60, %v90_v59 }
  0xb2   :  { %v105_v15 = vmul.f32 %v12025_v61, %v97_v63 }
  0xb3   :  { %v104_v8 = vmul.f32 %v12025_v61, %v96_v0  ;;  %v17304_v0 = vsub.s32 4, %v167_v51 }
  0xb4   :  { %v113_v29 = vadd.f32 %v12026_v6, %v105_v15  ;;  %v189_v15 = vrot.slane %v17283_v53, %v17308_v2 }
  0xb5   :  { %v17191_v16 = vadd.f32 %v12026_v6, %v104_v8  ;;  %v185_v8 = vrot.slane %v17283_v53, %v17304_v0 }
  0xb7   :  { %12027 = vmatmul.mubr.msk.f32.vlgmr.msra.gmra.mrb[0].mxu0 %vm66_vm0, %v17191_v16  ;;  %12029 = vmatmul.mubr.msk.f32.vlgmr.msra.gmra.mrb[0].mxu1 %vm66_vm0, %v17191_v16 }
  0xb8   :  { %15193 = vmatpush1.bf16.msra.mxu0 %v15192_v12  ;;  %15201 = vmatpush1.bf16.msra.mxu1 %v15200_v13  ;;  %v163_v12 = vld [vmem:[%s20699_s6 + $0x8] sm:$0xf]  ;;  %v17319_v13 = vsub.s32 2, %v167_v51 }
  0xb9   :  { %302 = vmatprep.mubr.f32.mxu0 %v16977_v38  ;;  %379 = vmatprep.mubr.f32.mxu1 %v16977_v38  ;;  %v201_v39 = vrot.slane %v163_v12, %v17278_v52 }
  0xba   :  { %15195 = vmatprep.subr.bf16.mxu0 %v15194_v20  ;;  %15203 = vmatprep.subr.bf16.mxu1 %v15202_v21  ;;  %v209_v19 = vrot.slane %v163_v12, %v17319_v13  ;;  %v213_v20 = vrot.slane %v163_v12, %v17321_v14 }
  0xbb   :  { %12028 = vmatmul.mubr.msk.f32.gmra.mrb[2].mxu0 %vm66_vm0, %v113_v29  ;;  %12030 = vmatmul.mubr.msk.f32.gmra.mrb[2].mxu1 %vm66_vm0, %v113_v29 }
  0xbc   :  { %15197 = vmatpush1.bf16.msra.mxu0 %v15196_v26  ;;  %15205 = vmatpush1.bf16.msra.mxu1 %v15204_v27 }
  0xbd   :  { %450 = vmatprep.mubr.f32.mxu0 %v16977_v38  ;;  %527 = vmatprep.mubr.f32.mxu1 %v16977_v38 }
  0xbe   :  { %15207 = vmatprep.subr.bf16.mxu0 %v15206_v33  ;;  %15215 = vmatprep.subr.bf16.mxu1 %v15214_v34  ;;  %v17331_v33 = vsub.s32 1, %v167_v51 }
  0xbf   :  { %12031 = vmatmul.mubr.msk.f32.vlgmr.msra.gmra.mrb[4].mxu0 %vm66_vm0, %v17191_v16  ;;  %12033 = vmatmul.mubr.msk.f32.vlgmr.msra.gmra.mrb[4].mxu1 %vm66_vm0, %v17191_v16 }
  0xc0   :  { %15209 = vmatpush1.bf16.msra.mxu0 %v15208_v40  ;;  %15217 = vmatpush1.bf16.msra.mxu1 %v15216_v41  ;;  %v205_v43 = vrot.slane %v163_v12, %v17331_v33 }
  0xc1   :  { %456 = vmatprep.mubr.f32.mxu0 %v16977_v38  ;;  %533 = vmatprep.mubr.f32.mxu1 %v16977_v38 }
  0xc2   :  { %15211 = vmatprep.subr.bf16.mxu0 %v15210_v46  ;;  %15219 = vmatprep.subr.bf16.mxu1 %v15218_v47  ;;  %v173_v47 = vrot.slane %v17283_v53, %v17331_v33 }
  0xc3   :  { %12032 = vmatmul.mubr.msk.f32.gmra.mrb[6].mxu0 %vm66_vm0, %v113_v29  ;;  %12034 = vmatmul.mubr.msk.f32.gmra.mrb[6].mxu1 %vm66_vm0, %v113_v29 }
  0xc4   :  { %15213 = vmatpush1.bf16.msra.mxu0 %v15212_v48  ;;  %15221 = vmatpush1.bf16.msra.mxu1 %v15220_v49 }
  0xc5   :  { %604 = vmatprep.mubr.f32.mxu0 %v16977_v38  ;;  %681 = vmatprep.mubr.f32.mxu1 %v16977_v38 }
  0xc7   :  { %12035 = vmatmul.mubr.msk.f32.vlgmr.msra.gmra.mrb[8].mxu0 %vm66_vm0, %v17191_v16  ;;  %12037 = vmatmul.mubr.msk.f32.vlgmr.msra.gmra.mrb[8].mxu1 %vm66_vm0, %v17191_v16  ;;  %v197_v16 = vrot.slane %v17283_v53, %v17310_v4 }
  0xc8   :  { %610 = vmatprep.mubr.f32.mxu0 %v16977_v38  ;;  %687 = vmatprep.mubr.f32.mxu1 %v16977_v38 }
  0xcb   :  { %12036 = vmatmul.mubr.msk.f32.gmra.mrb[10].mxu0 %vm66_vm0, %v113_v29  ;;  %12038 = vmatmul.mubr.msk.f32.gmra.mrb[10].mxu1 %vm66_vm0, %v113_v29 }
 0x18a   :  { %v298_v55 = vpop.f32.mrb[0].mxu0  ;;  %v17289_v56 = vpop.f32.mrb[0].mxu1 }
 0x18b   :  { %v299_v57 = vadd.f32 %v298_v55, %v17287_v54  ;;  %v17292_v58 = vpop.f32.mrb[1].mxu0  ;;  %v17294_v59 = vpop.f32.mrb[1].mxu1 }
 0x18d   :  { %13726 = vmatprep.mubr.f32.mxu0 %v299_v57  ;;  %v12043_v57 = vld [vmem:[%s20700_s7 + $0x80] sm:$0xff] }
 0x18e   :  { %v17296_v60 = vpop.f32.mrb[2].mxu0  ;;  %v17298_v61 = vpop.f32.mrb[2].mxu1 }
 0x18f   :  { %v17300_v62 = vpop.f32.mrb[3].mxu0  ;;  %v17302_v63 = vpop.f32.mrb[3].mxu1 }
 0x192   :  { %v452_v6 = vpop.f32.mrb[4].mxu0  ;;  %v529_v7 = vpop.f32.mrb[4].mxu1 }
 0x193   :  { %v454_v10 = vpop.f32.mrb[5].mxu0  ;;  %v531_v11 = vpop.f32.mrb[5].mxu1  ;;  %v453_v21 = vadd.f32 %v452_v6, %v185_v8  ;;  %v530_v22 = vadd.f32 %v529_v7, %v193_v9  ;;  %v12044_v6 = vld [vmem:[%s20700_s7 + $0x88] sm:$0xff] }
 0x194   :  { %v455_v27 = vadd.f32 %v454_v10, %v189_v15  ;;  %v532_v28 = vadd.f32 %v531_v11, %v197_v16  ;;  %v305_v10 = vadd.f32 %v17296_v60, %v17287_v54  ;;  %v12045_v54 = vld [vmem:[%s20700_s7 + $0x90] sm:$0xff]  ;;  %v12046_v60 = vld [vmem:[%s20700_s7 + $0x98] sm:$0xff] }
 0x196   :  { %v458_v17 = vpop.f32.mrb[6].mxu0  ;;  %v535_v18 = vpop.f32.mrb[6].mxu1 }
 0x197   :  { %v459_v23 = vadd.f32 %v458_v17, %v185_v8  ;;  %v536_v24 = vadd.f32 %v535_v18, %v193_v9  ;;  %v460_v25 = vpop.f32.mrb[7].mxu0  ;;  %v537_v26 = vpop.f32.mrb[7].mxu1  ;;  %v15238_v17 = vpack.c.bf16 %v12044_v6, %v12043_v57  ;;  %v301_v18 = vadd.f32 %v17292_v58, %v173_v47  ;;  %v12047_v58 = vld [vmem:[%s20700_s7 + $0xa0] sm:$0xff] }
 0x198   :  { %v461_v29 = vadd.f32 %v460_v25, %v189_v15  ;;  %v538_v30 = vadd.f32 %v537_v26, %v197_v16  ;;  %v12051_v25 = vld [vmem:[%s20700_s7 + $0xc0] sm:$0xff]  ;;  %v12052_v26 = vld [vmem:[%s20700_s7 + $0xc8] sm:$0xff] }
 0x199   :  { %v15222_v31 = vpack.c.bf16 %v459_v23, %v453_v21  ;;  %v17329_v32 = vpack.c.bf16 %v536_v24, %v530_v22  ;;  %v12048_v21 = vld [vmem:[%s20700_s7 + $0xa8] sm:$0xff]  ;;  %v12049_v23 = vld [vmem:[%s20700_s7 + $0xb0] sm:$0xff] }
 0x19a   :  { %v15230_v34 = vpack.c.bf16 %v461_v29, %v455_v27  ;;  %v17333_v35 = vpack.c.bf16 %v538_v30, %v532_v28  ;;  %v606_v36 = vpop.f32.mrb[8].mxu0  ;;  %v683_v37 = vpop.f32.mrb[8].mxu1  ;;  %v15246_v22 = vpack.c.bf16 %v12048_v21, %v12047_v58  ;;  %v15254_v27 = vpack.c.bf16 %v12052_v26, %v12051_v25  ;;  %v12053_v28 = vld [vmem:[%s20700_s7 + $0xd0] sm:$0xff]  ;;  %v12054_v29 = vld [vmem:[%s20700_s7 + $0xd8] sm:$0xff]  ;;  %v872_v21 = vld [vmem:[%s20700_s7 + $0x8] sm:$0xff] }
 0x19b   :  { %v684_v40 = vadd.f32 %v683_v37, %v209_v19  ;;  %v608_v41 = vpop.f32.mrb[9].mxu0  ;;  %v685_v42 = vpop.f32.mrb[9].mxu1  ;;  %15223 = vmatprep.subr.bf16.mxu0 %v15222_v31  ;;  %v607_v48 = vadd.f32 %v606_v36, %v201_v39  ;;  %v15258_v30 = vpack.c.bf16 %v12054_v29, %v12053_v28  ;;  %v12057_v37 = vld [vmem:[%s20700_s7 + $0xf0] sm:$0xff]  ;;  %v875_v25 = vld [vmem:[%s20700_s7 + $0x20] sm:$0xff]  ;;  %v876_v26 = vld [vmem:[%s20700_s7 + $0x28] sm:$0xff] }
 0x19c   :  { %v686_v44 = vadd.f32 %v685_v42, %v213_v20  ;;  %15225 = vmatpush3.bf16.xpose.msra.mxu0 %v15222_v31  ;;  %v609_v7 = vadd.f32 %v608_v41, %v205_v43  ;;  %v12055_v31 = vld [vmem:[%s20700_s7 + $0xe0] sm:$0xff]  ;;  %v17402_v41 = vld [vmem:[%s20701_s2 + $0x8] sm:$0xff]  ;;  %v877_v28 = vld [vmem:[%s20700_s7 + $0x30] sm:$0xff] }
 0x19d   :  { %15231 = vmatprep.subr.bf16.mxu0 %v15230_v34  ;;  %v878_v29 = vld [vmem:[%s20700_s7 + $0x38] sm:$0xff] }
 0x19e   :  { %v612_v45 = vpop.f32.mrb[10].mxu0  ;;  %v689_v46 = vpop.f32.mrb[10].mxu1 }
 0x19f   :  { %v613_v49 = vadd.f32 %v612_v45, %v201_v39  ;;  %v690_v50 = vadd.f32 %v689_v46, %v209_v19  ;;  %v614_v51 = vpop.f32.mrb[11].mxu0  ;;  %v691_v55 = vpop.f32.mrb[11].mxu1  ;;  %v307_v19 = vadd.f32 %v17300_v62, %v173_v47  ;;  %v12050_v62 = vld [vmem:[%s20700_s7 + $0xb8] sm:$0xff] }
 0x1a0   :  { %v615_v8 = vadd.f32 %v614_v51, %v205_v43  ;;  %v692_v9 = vadd.f32 %v691_v55, %v213_v20  ;;  %v15242_v20 = vpack.c.bf16 %v12046_v60, %v12045_v54  ;;  %v15250_v24 = vpack.c.bf16 %v12050_v62, %v12049_v23  ;;  %v12058_v39 = vld [vmem:[%s20700_s7 + $0xf8] sm:$0xff] }
 0x1a1   :  { %v15226_v11 = vpack.c.bf16 %v613_v49, %v607_v48  ;;  %v17347_v12 = vpack.c.bf16 %v690_v50, %v684_v40  ;;  %v15266_v40 = vpack.c.bf16 %v12058_v39, %v12057_v37  ;;  %v874_v62 = vld [vmem:[%s20700_s7 + $0x18] sm:$0xff]  ;;  %v881_v37 = vld [vmem:[%s20700_s7 + $0x50] sm:$0xff] }
 0x1a2   :  { %v17349_v15 = vpack.c.bf16 %v615_v8, %v609_v7  ;;  %v17351_v16 = vpack.c.bf16 %v692_v9, %v686_v44  ;;  %v17407_v44 = vld [vmem:[%s20701_s2] sm:$0xff]  ;;  %v882_v39 = vld [vmem:[%s20700_s7 + $0x58] sm:$0xff] }
 0x1a3   :  { %13727 = vmatmul.mubr.f32.vlgmr.msra.gmra.mrb[12].mxu0 %v305_v10  ;;  %15227 = vmatprep.subr.bf16.mxu1 %v15226_v11 }
 0x1a4   :  { %15229 = vmatpush3.bf16.msra.mxu1 %v15226_v11  ;;  %15233 = vmatpush3.bf16.xpose.msra.mxu0 %v15230_v34  ;;  %v12056_v34 = vld [vmem:[%s20700_s7 + $0xe8] sm:$0xff] }
 0x1a5   :  { %13740 = vmatprep.mubr.f32.mxu0 %v301_v18  ;;  %15235 = vmatprep.subr.bf16.mxu1 %v17349_v15  ;;  %v15262_v36 = vpack.c.bf16 %v12056_v34, %v12055_v31  ;;  %v879_v31 = vld [vmem:[%s20700_s7 + $0x40] sm:$0xff]  ;;  %v880_v34 = vld [vmem:[%s20700_s7 + $0x48] sm:$0xff] }
 0x1a6   :  { %15239 = vmatprep.subr.bf16.mxu0 %v15238_v17 }
 0x1ab   :  { %13741 = vmatmul.mubr.f32.vlgmr.msra.gmra.mrb[14].mxu0 %v307_v19 }
 0x1ac   :  { %15241 = vmatpush3.bf16.msra.mxu0 %v15238_v17 }
 0x1ad   :  { %15243 = vmatprep.subr.bf16.mxu0 %v15242_v20 }
 0x1b0   :  { %15245 = vmatpush3.bf16.msra.mxu0 %v15242_v20 }
 0x1b1   :  { %15247 = vmatprep.subr.bf16.mxu0 %v15246_v22 }
 0x1b4   :  { %15249 = vmatpush3.bf16.msra.mxu0 %v15246_v22  ;;  %v873_v22 = vld [vmem:[%s20700_s7 + $0x10] sm:$0xff] }
 0x1b5   :  { %15251 = vmatprep.subr.bf16.mxu0 %v15250_v24 }
 0x1b8   :  { %15253 = vmatpush3.bf16.msra.mxu0 %v15250_v24  ;;  %v15274_v24 = vpack.c.bf16 %v874_v62, %v873_v22 }
 0x1b9   :  { %15255 = vmatprep.subr.bf16.mxu0 %v15254_v27 }
 0x1bc   :  { %15257 = vmatpush3.bf16.msra.mxu0 %v15254_v27  ;;  %v15278_v27 = vpack.c.bf16 %v876_v26, %v875_v25 }
 0x1bd   :  { %15259 = vmatprep.subr.bf16.mxu0 %v15258_v30 }
 0x1c0   :  { %15261 = vmatpush3.bf16.msra.mxu0 %v15258_v30  ;;  %v15282_v30 = vpack.c.bf16 %v878_v29, %v877_v28 }
 0x1c1   :  { %15263 = vmatprep.subr.bf16.mxu0 %v15262_v36 }
 0x1c4   :  { %15265 = vmatpush3.bf16.msra.mxu0 %v15262_v36  ;;  %v15286_v36 = vpack.c.bf16 %v880_v34, %v879_v31  ;;  %v12062_v34 = vld [vmem:[%s20700_s7 + $0x108] sm:$0xff] }
 0x1c5   :  { %15267 = vmatprep.subr.bf16.mxu0 %v15266_v40 }
 0x1c8   :  { %15269 = vmatpush3.bf16.msra.mxu0 %v15266_v40  ;;  %v15290_v40 = vpack.c.bf16 %v882_v39, %v881_v37  ;;  %v12066_v39 = vld [vmem:[%s20700_s7 + $0x128] sm:$0xff] }
 0x1c9   :  { %15303 = vmatprep.subr.bf16.mxu0 %v17329_v32 }
 0x276   :  { %v13728_v42 = vpop.f32.mrb[12].mxu0 }
 0x277   :  { %v770_v43 = vmul.f32 0.35355338, %v13728_v42  ;;  %v760_v45 = vpop.f32.mrb[13].mxu0  ;;  %v883_v42 = vld [vmem:[%s20700_s7 + $0x60] sm:$0xff] }
 0x278   :  { %v769_v46 = vmul.f32 0.35355338, %v760_v45 }
 0x279   :  { %v772_v47 = vadd.f32 %v770_v43, %v17402_v41  ;;  %v884_v43 = vld [vmem:[%s20700_s7 + $0x68] sm:$0xff] }
 0x27a   :  { %v771_v48 = vadd.f32 %v769_v46, %v17407_v44  ;;  %v15294_v45 = vpack.c.bf16 %v884_v43, %v883_v42  ;;  %v885_v46 = vld [vmem:[%s20700_s7 + $0x70] sm:$0xff]  ;;  %v12068_v43 = vld [vmem:[%s20700_s7 + $0x138] sm:$0xff] }
 0x27b   :  { %v775_v49 = vmul.f32 1.442695, %v772_v47  ;;  %v886_v47 = vld [vmem:[%s20700_s7 + $0x78] sm:$0xff]  ;;  %v12067_v42 = vld [vmem:[%s20700_s7 + $0x130] sm:$0xff] }
 0x27c   :  { %v773_v50 = vmul.f32 1.442695, %v771_v48  ;;  %v15298_v48 = vpack.c.bf16 %v886_v47, %v885_v46  ;;  %v12069_v46 = vld [vmem:[%s20700_s7 + $0x140] sm:$0xff]  ;;  %v12070_v47 = vld [vmem:[%s20700_s7 + $0x148] sm:$0xff] }
 0x27e   :  { %16703 = vpow2.f32 %v773_v50  ;;  %v13742_v51 = vpop.f32.mrb[14].mxu0 }
 0x27f   :  { %16705 = vpow2.f32 %v775_v49  ;;  %v963_v55 = vmul.f32 0.35355338, %v13742_v51  ;;  %v953_v57 = vpop.f32.mrb[15].mxu0 }
 0x280   :  { %v962_v6 = vmul.f32 0.35355338, %v953_v57 }
 0x281   :  { %v965_v7 = vadd.f32 %v963_v55, %v17402_v41 }
 0x282   :  { %v964_v8 = vadd.f32 %v962_v6, %v17407_v44 }
 0x283   :  { %v968_v9 = vmul.f32 1.442695, %v965_v7 }
 0x284   :  { %v966_v10 = vmul.f32 1.442695, %v964_v8 }
 0x285   :  { %16707 = vpow2.f32 %v968_v9 }
 0x286   :  { %16709 = vpow2.f32 %v966_v10 }
 0x288   :  { %v16704_v11 = vpop.eup %16703 }
 0x289   :  { %v16706_v17 = vpop.eup %16705  ;;  %13733 = vmatprep.mubr.msk.f32.mxu1 %vm777_vm1, %v16704_v11  ;;  %v778_v58 = vsel %vm777_vm1, %v16704_v11, 0.0  ;;  %v177_v11 = vrot.slane %v17283_v53, %v17319_v13 }
 0x28a   :  { %13734 = vmatmul.mubr.msk.f32.vlgmr.msra.gmra.mrb[12].mxu1 %vm777_vm1, %v16706_v17  ;;  %v781_v20 = vsel %vm777_vm1, %v16706_v17, 0.0 }
 0x28b   :  { %15237 = vmatpush3.bf16.msra.mxu1 %v17349_v15  ;;  %v871_v15 = vld [vmem:[%s20700_s7] sm:$0xff] }
 0x28c   :  { %v15270_v23 = vpack.c.bf16 %v872_v21, %v871_v15  ;;  %v382_v15 = vadd.f32 %v17298_v61, %v177_v11  ;;  %v181_v61 = vrot.slane %v17283_v53, %v17321_v14 }
 0x28e   :  { %15271 = vmatprep.subr.bf16.mxu1 %v15270_v23  ;;  %v384_v53 = vadd.f32 %v17302_v63, %v181_v61  ;;  %v12064_v63 = vld [vmem:[%s20700_s7 + $0x118] sm:$0xff] }
 0x28f   :  { %v16708_v18 = vpop.eup %16707 }
 0x290   :  { %v16710_v54 = vpop.eup %16709  ;;  %v973_v60 = vsel %vm777_vm1, %v16708_v18, 0.0 }
 0x291   :  { %974 = vadd.xlane.f32.xlu1 %v973_v60  ;;  %13747 = vmatprep.mubr.msk.f32.mxu1 %vm777_vm1, %v16710_v54  ;;  %v970_v19 = vsel %vm777_vm1, %v16710_v54, 0.0 }
 0x292   :  { %971 = vadd.xlane.f32.xlu0 %v970_v19  ;;  %13748 = vmatmul.mubr.msk.f32.vlgmr.msra.gmra.mrb[14].mxu1 %vm777_vm1, %v16708_v18 }
 0x293   :  { %15273 = vmatpush3.bf16.msra.mxu1 %v15270_v23 }
 0x294   :  { %15275 = vmatprep.subr.bf16.mxu1 %v15274_v24 }
 0x295   :  { %782 = vadd.xlane.f32.xlu1 %v781_v20 }
 0x296   :  { %779 = vadd.xlane.f32.xlu0 %v778_v58  ;;  %v376_v58 = vadd.f32 %v17289_v56, %v177_v11 }
 0x297   :  { %15277 = vmatpush3.bf16.msra.mxu1 %v15274_v24 }
 0x298   :  { %15279 = vmatprep.subr.bf16.mxu1 %v15278_v27 }
 0x29b   :  { %15281 = vmatpush3.bf16.msra.mxu1 %v15278_v27 }
 0x29c   :  { %15283 = vmatprep.subr.bf16.mxu1 %v15282_v30 }
 0x29f   :  { %15285 = vmatpush3.bf16.msra.mxu1 %v15282_v30  ;;  %v378_v30 = vadd.f32 %v17294_v59, %v181_v61  ;;  %v12061_v59 = vld [vmem:[%s20700_s7 + $0x100] sm:$0xff] }
 0x2a0   :  { %15287 = vmatprep.subr.bf16.mxu1 %v15286_v36 }
 0x2a3   :  { %15289 = vmatpush3.bf16.msra.mxu1 %v15286_v36  ;;  %v15310_v36 = vpack.c.bf16 %v12062_v34, %v12061_v59  ;;  %v12084_v59 = vld [vmem:[%s20700_s7 + $0x1a8] sm:$0xff] }
 0x2a4   :  { %15291 = vmatprep.subr.bf16.mxu1 %v15290_v40 }
 0x2a7   :  { %15293 = vmatpush3.bf16.msra.mxu1 %v15290_v40 }
 0x2a8   :  { %15295 = vmatprep.subr.bf16.mxu1 %v15294_v45 }
 0x2ab   :  { %15297 = vmatpush3.bf16.msra.mxu1 %v15294_v45  ;;  %v15322_v45 = vpack.c.bf16 %v12068_v43, %v12067_v42  ;;  %v12090_v42 = vld [vmem:[%s20700_s7 + $0x1d8] sm:$0xff] }
 0x2ac   :  { %15299 = vmatprep.subr.bf16.mxu1 %v15298_v48 }
 0x2af   :  { %15301 = vmatpush3.bf16.msra.mxu1 %v15298_v48  ;;  %v15326_v48 = vpack.c.bf16 %v12070_v47, %v12069_v46  ;;  %v12092_v46 = vld [vmem:[%s20700_s7 + $0x1e8] sm:$0xff] }
 0x2b0   :  { %15311 = vmatprep.subr.bf16.mxu1 %v15310_v36 }
 0x31e   :  { %v975_v50 = vpop.xlane.xlu1 %974 }
 0x31f   :  { %v972_v49 = vpop.xlane.xlu0 %971 }
 0x322   :  { %v783_v55 = vpop.xlane.xlu1 %782 }
 0x323   :  { %v780_v51 = vpop.xlane.xlu0 %779 }
 0x324   :  { %16711 = vrcp.f32 %v780_v51 }
 0x325   :  { %16713 = vrcp.f32 %v783_v55  ;;  %v12073_v55 = vld [vmem:[%s20700_s7 + $0x160] sm:$0xff] }
 0x326   :  { %16715 = vrcp.f32 %v972_v49  ;;  %v12071_v49 = vld [vmem:[%s20700_s7 + $0x150] sm:$0xff] }
 0x327   :  { %16717 = vrcp.f32 %v975_v50  ;;  %v12072_v50 = vld [vmem:[%s20700_s7 + $0x158] sm:$0xff] }
 0x328   :  { %v15330_v51 = vpack.c.bf16 %v12072_v50, %v12071_v49  ;;  %v12094_v49 = vld [vmem:[%s20700_s7 + $0x1f8] sm:$0xff] }
 0x32e   :  { %v16712_v6 = vpop.eup %16711 }
 0x32f   :  { %v16714_v8 = vpop.eup %16713 }
 0x330   :  { %v16716_v18 = vpop.eup %16715 }
 0x331   :  { %v16718_v60 = vpop.eup %16717 }
 0x35d   :  { %v13735_v57 = vpop.f32.mrb[12].mxu1 }
 0x35e   :  { %v860_v7 = vpop.f32.mrb[13].mxu1  ;;  %v870_v10 = vmul.f32 %v16714_v8, %v13735_v57  ;;  %v12074_v57 = vld [vmem:[%s20700_s7 + $0x168] sm:$0xff]  ;;  %v12076_v8 = vld [vmem:[%s20700_s7 + $0x178] sm:$0xff] }
 0x35f   :  { %v869_v9 = vmul.f32 %v16712_v6, %v860_v7  ;;  %v15334_v6 = vpack.c.bf16 %v12074_v57, %v12073_v55  ;;  %v12075_v7 = vld [vmem:[%s20700_s7 + $0x170] sm:$0xff] }
 0x361   :  { %13817 = vmatprep.mubr.f32.mxu1 %v869_v9  ;;  %v15338_v9 = vpack.c.bf16 %v12076_v8, %v12075_v7 }
 0x362   :  { %13818 = vmatmul.mubr.f32.vlgmr.msra.gmra.mrb[16].mxu1 %v870_v10 }
 0x363   :  { %15313 = vmatpush3.bf16.msra.mxu1 %v15310_v36  ;;  %v12086_v36 = vld [vmem:[%s20700_s7 + $0x1b8] sm:$0xff] }
 0x365   :  { %v13749_v17 = vpop.f32.mrb[14].mxu1 }
 0x366   :  { %v1052_v54 = vpop.f32.mrb[15].mxu1  ;;  %v1062_v20 = vmul.f32 %v16718_v60, %v13749_v17 }
 0x367   :  { %v1061_v19 = vmul.f32 %v16716_v18, %v1052_v54 }
 0x369   :  { %13782 = vmatprep.mubr.f32.mxu0 %v1061_v19 }
 0x36a   :  { %13783 = vmatmul.mubr.f32.vlgmr.msra.gmra.mrb[16].mxu0 %v1062_v20 }
 0x36b   :  { %15305 = vmatpush3.bf16.xpose.msra.mxu0 %v17329_v32  ;;  %13824 = vmatprep.mubr.f32.mxu0 %v376_v58 }
 0x36c   :  { %15307 = vmatprep.subr.bf16.mxu0 %v17347_v12 }
 0x372   :  { %13825 = vmatmul.mubr.f32.vlgmr.msra.gmra.mrb[18].mxu0 %v382_v15 }
 0x373   :  { %15309 = vmatpush3.bf16.msra.mxu0 %v17347_v12 }
 0x374   :  { %15343 = vmatprep.subr.bf16.mxu0 %v17333_v35 }
 0x43d   :  { %v17478_v21 = vpop.f32.mrb[16].mxu0 }
 0x43e   :  { %v17480_v22 = vpop.f32.mrb[17].mxu0 }
 0x445   :  { %v13826_v23 = vpop.f32.mrb[18].mxu0 }
 0x446   :  { %v1306_v56 = vmul.f32 0.35355338, %v13826_v23  ;;  %v1296_v62 = vpop.f32.mrb[19].mxu0 }
 0x447   :  { %v1305_v24 = vmul.f32 0.35355338, %v1296_v62 }
 0x448   :  { %v1308_v32 = vadd.f32 %v1306_v56, %v17402_v41 }
 0x449   :  { %v1307_v25 = vadd.f32 %v1305_v24, %v17407_v44 }
 0x44a   :  { %v1311_v26 = vmul.f32 1.442695, %v1308_v32 }
 0x44b   :  { %v1309_v27 = vmul.f32 1.442695, %v1307_v25 }
 0x44c   :  { %16719 = vpow2.f32 %v1311_v26 }
 0x44d   :  { %16721 = vpow2.f32 %v1309_v27 }
 0x456   :  { %v16720_v12 = vpop.eup %16719 }
 0x457   :  { %v16722_v28 = vpop.eup %16721  ;;  %v1316_v29 = vsel %vm777_vm1, %v16720_v12, 0.0 }
 0x458   :  { %1317 = vadd.xlane.f32.xlu1 %v1316_v29  ;;  %13831 = vmatprep.mubr.msk.f32.mxu0 %vm777_vm1, %v16722_v28  ;;  %v1313_v31 = vsel %vm777_vm1, %v16722_v28, 0.0  ;;  %v12081_v28 = vld [vmem:[%s20700_s7 + $0x190] sm:$0xff] }
 0x459   :  { %13832 = vmatmul.mubr.msk.f32.vlgmr.msra.gmra.mrb[20].mxu0 %vm777_vm1, %v16720_v12  ;;  %1314 = vadd.xlane.f32.xlu0 %v1313_v31 }
 0x45a   :  { %15345 = vmatpush3.bf16.xpose.msra.mxu0 %v17333_v35  ;;  %13873 = vmatprep.mubr.f32.mxu0 %v378_v30  ;;  %v12063_v35 = vld [vmem:[%s20700_s7 + $0x110] sm:$0xff]  ;;  %v12082_v30 = vld [vmem:[%s20700_s7 + $0x198] sm:$0xff] }
 0x45b   :  { %15347 = vmatprep.subr.bf16.mxu0 %v17351_v16  ;;  %v15314_v37 = vpack.c.bf16 %v12064_v63, %v12063_v35  ;;  %v15354_v31 = vpack.c.bf16 %v12082_v30, %v12081_v28  ;;  %v12085_v35 = vld [vmem:[%s20700_s7 + $0x1b0] sm:$0xff] }
 0x45c   :  { %v15362_v63 = vpack.c.bf16 %v12086_v36, %v12085_v35 }
 0x45d   :  { %15315 = vmatprep.subr.bf16.mxu1 %v15314_v37 }
 0x45e   :  { %15317 = vmatpush3.bf16.msra.mxu1 %v15314_v37  ;;  %v12087_v37 = vld [vmem:[%s20700_s7 + $0x1c0] sm:$0xff] }
 0x461   :  { %13874 = vmatmul.mubr.f32.vlgmr.msra.gmra.mrb[22].mxu0 %v384_v53  ;;  %v12083_v53 = vld [vmem:[%s20700_s7 + $0x1a0] sm:$0xff] }
 0x462   :  { %15349 = vmatpush3.bf16.msra.mxu0 %v17351_v16  ;;  %v12065_v16 = vld [vmem:[%s20700_s7 + $0x120] sm:$0xff]  ;;  %v15358_v34 = vpack.c.bf16 %v12084_v59, %v12083_v53 }
 0x463   :  { %v15318_v40 = vpack.c.bf16 %v12066_v39, %v12065_v16  ;;  %v12088_v16 = vld [vmem:[%s20700_s7 + $0x1c8] sm:$0xff] }
 0x464   :  { %v15366_v39 = vpack.c.bf16 %v12088_v16, %v12087_v37 }
 0x465   :  { %15319 = vmatprep.subr.bf16.mxu1 %v15318_v40 }
 0x466   :  { %15321 = vmatpush3.bf16.msra.mxu1 %v15318_v40  ;;  %v12089_v40 = vld [vmem:[%s20700_s7 + $0x1d0] sm:$0xff] }
 0x467   :  { %15323 = vmatprep.subr.bf16.mxu1 %v15322_v45  ;;  %v15370_v43 = vpack.c.bf16 %v12090_v42, %v12089_v40 }
 0x46a   :  { %15325 = vmatpush3.bf16.msra.mxu1 %v15322_v45  ;;  %v12091_v45 = vld [vmem:[%s20700_s7 + $0x1e0] sm:$0xff] }
 0x46b   :  { %15327 = vmatprep.subr.bf16.mxu1 %v15326_v48  ;;  %v15374_v47 = vpack.c.bf16 %v12092_v46, %v12091_v45  ;;  %v12096_v45 = vld [vmem:[%s20705_s9] ss:$0 sm:$0xff] }
 0x46e   :  { %15329 = vmatpush3.bf16.msra.mxu1 %v15326_v48  ;;  %v12093_v48 = vld [vmem:[%s20700_s7 + $0x1f0] sm:$0xff] }
 0x46f   :  { %15331 = vmatprep.subr.bf16.mxu1 %v15330_v51  ;;  %v15378_v50 = vpack.c.bf16 %v12094_v49, %v12093_v48  ;;  %v12097_v49 = vld [vmem:[%s20720_s30] ss:$0 sm:$0xff] }
 0x472   :  { %15333 = vmatpush3.bf16.msra.mxu1 %v15330_v51 }
 0x473   :  { %15335 = vmatprep.subr.bf16.mxu1 %v15334_v6 }
 0x476   :  { %15337 = vmatpush3.bf16.msra.mxu1 %v15334_v6 }
 0x477   :  { %15339 = vmatprep.subr.bf16.mxu1 %v15338_v9 }
 0x47a   :  { %15341 = vmatpush3.bf16.msra.mxu1 %v15338_v9 }
 0x4e5   :  { %v1318_v11 = vpop.xlane.xlu1 %1317 }
 0x4e6   :  { %v1315_v10 = vpop.xlane.xlu0 %1314 }
 0x4e7   :  { %16723 = vrcp.f32 %v1315_v10 }
 0x4e8   :  { %16725 = vrcp.f32 %v1318_v11 }
 0x4f1   :  { %v16724_v18 = vpop.eup %16723 }
 0x4f2   :  { %v16726_v60 = vpop.eup %16725 }
 0x52c   :  { %v13833_v17 = vpop.f32.mrb[20].mxu0 }
 0x52d   :  { %v1395_v54 = vpop.f32.mrb[21].mxu0  ;;  %v1405_v20 = vmul.f32 %v16726_v60, %v13833_v17 }
 0x52e   :  { %v1404_v19 = vmul.f32 %v16724_v18, %v1395_v54  ;;  %v12095_v54 = vld [vmem:[%s20702_s8] ss:$0 sm:$0xff] }
 0x530   :  { %13866 = vmatprep.mubr.f32.mxu1 %v1404_v19 }
 0x531   :  { %13867 = vmatmul.mubr.f32.vlgmr.msra.gmra.mrb[16].mxu1 %v1405_v20 }
 0x534   :  { %v13875_v58 = vpop.f32.mrb[22].mxu0 }
 0x535   :  { %v1576_v15 = vmul.f32 0.35355338, %v13875_v58  ;;  %v1566_v23 = vpop.f32.mrb[23].mxu0 }
 0x536   :  { %v1575_v56 = vmul.f32 0.35355338, %v1566_v23 }
 0x537   :  { %v1578_v62 = vadd.f32 %v1576_v15, %v17402_v41  ;;  %v12079_v41 = vld [vmem:[%s20700_s7 + $0x180] sm:$0xff] }
 0x538   :  { %v1577_v24 = vadd.f32 %v1575_v56, %v17407_v44  ;;  %v12080_v44 = vld [vmem:[%s20700_s7 + $0x188] sm:$0xff] }
 0x539   :  { %v1581_v32 = vmul.f32 1.442695, %v1578_v62  ;;  %v15350_v29 = vpack.c.bf16 %v12080_v44, %v12079_v41  ;;  %v1829_v62 = vld [vmem:[%s20703_s11] sm:$0xff] }
 0x53a   :  { %v1579_v25 = vmul.f32 1.442695, %v1577_v24  ;;  %v1830_v24 = vld [vmem:[%s20703_s11 + $0x8] sm:$0xff] }
 0x53b   :  { %16727 = vpow2.f32 %v1581_v32  ;;  %15351 = vmatprep.subr.bf16.mxu1 %v15350_v29  ;;  %v1831_v32 = vld [vmem:[%s20703_s11 + $0x10] sm:$0xff] }
 0x53c   :  { %16729 = vpow2.f32 %v1579_v25  ;;  %15353 = vmatpush3.bf16.msra.mxu1 %v15350_v29  ;;  %v15382_v25 = vpack.c.bf16 %v1830_v24, %v1829_v62  ;;  %v1953_v62 = vld [vmem:[%s20704_s13 + $0x70] sm:$0xff]  ;;  %v1954_v24 = vld [vmem:[%s20704_s13 + $0x78] sm:$0xff] }
 0x53d   :  { %15355 = vmatprep.subr.bf16.mxu1 %v15354_v31 }
 0x53e   :  { %15383 = vmatprep.subr.bf16.mxu0 %v15382_v25 }
 0x540   :  { %15357 = vmatpush3.bf16.msra.mxu1 %v15354_v31 }
 0x541   :  { %15359 = vmatprep.subr.bf16.mxu1 %v15358_v34 }
 0x544   :  { %15361 = vmatpush3.bf16.msra.mxu1 %v15358_v34 }
 0x545   :  { %v16728_v26 = vpop.eup %16727  ;;  %15363 = vmatprep.subr.bf16.mxu1 %v15362_v63 }
 0x546   :  { %v16730_v27 = vpop.eup %16729  ;;  %v1586_v61 = vsel %vm777_vm1, %v16728_v26, 0.0 }
 0x547   :  { %1587 = vadd.xlane.f32.xlu1 %v1586_v61  ;;  %13880 = vmatprep.mubr.msk.f32.mxu0 %vm777_vm1, %v16730_v27  ;;  %v1583_v12 = vsel %vm777_vm1, %v16730_v27, 0.0  ;;  %v1939_v61 = vld [vmem:[%s20704_s13] sm:$0xff] }
 0x548   :  { %13881 = vmatmul.mubr.msk.f32.vlgmr.msra.gmra.mrb[24].mxu0 %vm777_vm1, %v16728_v26  ;;  %1584 = vadd.xlane.f32.xlu0 %v1583_v12  ;;  %v1832_v26 = vld [vmem:[%s20703_s11 + $0x18] sm:$0xff]  ;;  %v1940_v12 = vld [vmem:[%s20704_s13 + $0x8] sm:$0xff] }
 0x549   :  { %15365 = vmatpush3.bf16.msra.mxu1 %v15362_v63  ;;  %v15386_v27 = vpack.c.bf16 %v1832_v26, %v1831_v32  ;;  %15385 = vmatpush3.bf16.msra.mxu0 %v15382_v25  ;;  %v15390_v41 = vpack.c.bf16 %v1940_v12, %v1939_v61  ;;  %v15418_v32 = vpack.c.bf16 %v1954_v24, %v1953_v62  ;;  %v12098_v25 = vld [vmem:[%s20707_s12] ss:$0 sm:$0xff] }
 0x54a   :  { %15367 = vmatprep.subr.bf16.mxu1 %v15366_v39 }
 0x54b   :  { %15387 = vmatprep.subr.bf16.mxu0 %v15386_v27 }
 0x54d   :  { %15369 = vmatpush3.bf16.msra.mxu1 %v15366_v39  ;;  %15389 = vmatpush3.bf16.msra.mxu0 %v15386_v27 }
 0x54e   :  { %15371 = vmatprep.subr.bf16.mxu1 %v15370_v43  ;;  %15391 = vmatprep.subr.bf16.mxu0 %v15390_v41 }
 0x551   :  { %15373 = vmatpush3.bf16.msra.mxu1 %v15370_v43 }
 0x552   :  { %15375 = vmatprep.subr.bf16.mxu1 %v15374_v47 }
 0x555   :  { %15377 = vmatpush3.bf16.msra.mxu1 %v15374_v47 }
 0x556   :  { %15379 = vmatprep.subr.bf16.mxu1 %v15378_v50 }
 0x559   :  { %15381 = vmatpush3.bf16.msra.mxu1 %v15378_v50 }
 0x5d4   :  { %v1588_v55 = vpop.xlane.xlu1 %1587 }
 0x5d5   :  { %v1585_v51 = vpop.xlane.xlu0 %1584 }
 0x5d6   :  { %16731 = vrcp.f32 %v1585_v51 }
 0x5d7   :  { %16733 = vrcp.f32 %v1588_v55 }
 0x5e0   :  { %v16732_v6 = vpop.eup %16731 }
 0x5e1   :  { %v16734_v8 = vpop.eup %16733 }
 0x61b   :  { %v13882_v57 = vpop.f32.mrb[24].mxu0 }
 0x61c   :  { %v1665_v7 = vpop.f32.mrb[25].mxu0  ;;  %v1675_v10 = vmul.f32 %v16734_v8, %v13882_v57 }
 0x61d   :  { %v1674_v9 = vmul.f32 %v16732_v6, %v1665_v7  ;;  %v1941_v6 = vld [vmem:[%s20704_s13 + $0x10] sm:$0xff]  ;;  %v1942_v7 = vld [vmem:[%s20704_s13 + $0x18] sm:$0xff] }
 0x61e   :  { %v15394_v8 = vpack.c.bf16 %v1942_v7, %v1941_v6 }
 0x61f   :  { %13915 = vmatprep.mubr.f32.mxu1 %v1674_v9  ;;  %v1943_v9 = vld [vmem:[%s20704_s13 + $0x20] sm:$0xff] }
 0x620   :  { %13916 = vmatmul.mubr.f32.vlgmr.msra.gmra.mrb[16].mxu1 %v1675_v10  ;;  %v1944_v10 = vld [vmem:[%s20704_s13 + $0x28] sm:$0xff] }
 0x6f3   :  { %v13917_v11 = vpop.f32.mrb[16].mxu1 }
 0x6f4   :  { %v16662_v17 = vadd.f32 %v13917_v11, %v17478_v21  ;;  %v1759_v18 = vpop.f32.mrb[17].mxu1  ;;  %v15398_v11 = vpack.c.bf16 %v1944_v10, %v1943_v9  ;;  %v12119_v9 = vld [vmem:[%s20696_s5 + $0x1e8] sm:$0xff] }
 0x6f5   :  { %v16663_v60 = vadd.f32 %v1759_v18, %v17480_v22  ;;  %v1946_v18 = vld [vmem:[%s20704_s13 + $0x38] sm:$0xff] }
 0x6f6   :  { %v1771_v19 = vadd.f32 %v16662_v17, %v17077_v3  ;;  %v1945_v17 = vld [vmem:[%s20704_s13 + $0x30] sm:$0xff] }
 0x6f7   :  { %v1770_v20 = vadd.f32 %v16663_v60, %v17082_v5  ;;  %v1947_v60 = vld [vmem:[%s20704_s13 + $0x40] sm:$0xff] }
 0x6f8   :  { %v17604_v58 = vadd.f32 %v12095_v54, %v1771_v19  ;;  %v1948_v19 = vld [vmem:[%s20704_s13 + $0x48] sm:$0xff] }
 0x6f9   :  { %v17606_v15 = vadd.f32 %v12095_v54, %v1770_v20  ;;  %v15402_v54 = vpack.c.bf16 %v1946_v18, %v1945_v17  ;;  %v1949_v20 = vld [vmem:[%s20704_s13 + $0x50] sm:$0xff]  ;;  %v12118_v17 = vld [vmem:[%s20696_s5 + $0x1e0] sm:$0xff] }
 0x6fa   :  { %v1786_v23 = vsel %vm66_vm0, %v17604_v58, 0.0  ;;  %v1792_v21 = vmul.f32 %v17604_v58, %v17604_v58 }
 0x6fb   :  { %1787 = vadd.xlane.f32.xlu1 %v1786_v23  ;;  %v1783_v56 = vsel %vm66_vm0, %v17606_v15, 0.0  ;;  %v1791_v22 = vmul.f32 %v17606_v15, %v17606_v15  ;;  %v15406_v23 = vpack.c.bf16 %v1948_v19, %v1947_v60  ;;  %v12143_v60 = vld [vmem:[%s20696_s5 + $0x2a8] sm:$0xff] }
 0x6fc   :  { %1784 = vadd.xlane.f32.xlu0 %v1783_v56  ;;  %v1796_v3 = vsel %vm66_vm0, %v1792_v21, 0.0  ;;  %v1950_v21 = vld [vmem:[%s20704_s13 + $0x58] sm:$0xff] }
 0x6fd   :  { %v1793_v5 = vsel %vm66_vm0, %v1791_v22, 0.0  ;;  %v15410_v56 = vpack.c.bf16 %v1950_v21, %v1949_v20  ;;  %v1951_v22 = vld [vmem:[%s20704_s13 + $0x60] sm:$0xff] }
 0x6fe   :  { %v12130_v20 = vld [vmem:[%s20696_s5 + $0x240] sm:$0xff] }
 0x6ff   :  { %1797 = vadd.xlane.f32.xlu1 %v1796_v3  ;;  %v1952_v3 = vld [vmem:[%s20704_s13 + $0x68] sm:$0xff] }
 0x700   :  { %1794 = vadd.xlane.f32.xlu0 %v1793_v5  ;;  %v15414_v5 = vpack.c.bf16 %v1952_v3, %v1951_v22  ;;  %v12121_v22 = vld [vmem:[%s20696_s5 + $0x1f8] sm:$0xff] }
 0x788   :  { %v1788_v44 = vpop.xlane.xlu1 %1787 }
 0x789   :  { %v1790_v28 = vmul.f32 0.03125, %v1788_v44  ;;  %v1785_v29 = vpop.xlane.xlu0 %1784 }
 0x78a   :  { %v1789_v30 = vmul.f32 0.03125, %v1785_v29 }
 0x78b   :  { %v1802_v53 = vmul.f32 %v1790_v28, %v1790_v28  ;;  %v1806_v40 = vsub.f32 %v17604_v58, %v1790_v28 }
 0x78c   :  { %v1798_v31 = vpop.xlane.xlu1 %1797  ;;  %v1801_v35 = vmul.f32 %v1789_v30, %v1789_v30  ;;  %v1805_v43 = vsub.f32 %v17606_v15, %v1789_v30 }
 0x78d   :  { %v1800_v59 = vmul.f32 0.03125, %v1798_v31  ;;  %v1795_v34 = vpop.xlane.xlu0 %1794 }
 0x78e   :  { %v1799_v36 = vmul.f32 0.03125, %v1795_v34 }
 0x78f   :  { %v1804_v63 = vsub.f32 %v1800_v59, %v1802_v53 }
 0x790   :  { %v1803_v37 = vsub.f32 %v1799_v36, %v1801_v35 }
 0x791   :  { %v1808_v16 = vadd.f32 1e-05, %v1804_v63 }
 0x792   :  { %v1807_v39 = vadd.f32 1e-05, %v1803_v37 }
 0x793   :  { %16735 = vrsqrt.f32 %v1808_v16 }
 0x794   :  { %16737 = vrsqrt.f32 %v1807_v39 }
 0x79d   :  { %v16736_v42 = vpop.eup %16735 }
 0x79e   :  { %v16738_v46 = vpop.eup %16737  ;;  %v1812_v47 = vmul.f32 %v16736_v42, %v1806_v40 }
 0x79f   :  { %v1811_v48 = vmul.f32 %v16738_v46, %v1805_v43 }
 0x7a0   :  { %v1820_v50 = vmul.f32 %v12096_v45, %v1812_v47  ;;  %v12101_v47 = vld [vmem:[%s20708_s14] ss:$0 sm:$0xff] }
 0x7a1   :  { %v1819_v51 = vmul.f32 %v12096_v45, %v1811_v48 }
 0x7a2   :  { %v1828_v57 = vadd.f32 %v12097_v49, %v1820_v50 }
 0x7a3   :  { %v1827_v55 = vadd.f32 %v12097_v49, %v1819_v51 }
 0x7a5   :  { %13926 = vmatprep.mubr.msk.f32.mxu0 %vm66_vm0, %v1827_v55 }
 0x7a6   :  { %13927 = vmatmul.mubr.msk.f32.vlgmr.msra.gmra.mrb[26].mxu0 %vm66_vm0, %v1828_v57 }
 0x7a7   :  { %15393 = vmatpush3.bf16.msra.mxu0 %v15390_v41 }
 0x7a8   :  { %15395 = vmatprep.subr.bf16.mxu0 %v15394_v8 }
 0x7ab   :  { %15397 = vmatpush3.bf16.msra.mxu0 %v15394_v8  ;;  %v12107_v8 = vld [vmem:[%s20696_s5 + $0x188] sm:$0xff] }
 0x7ac   :  { %15399 = vmatprep.subr.bf16.mxu0 %v15398_v11  ;;  %v15422_v10 = vpack.c.bf16 %v12119_v9, %v12107_v8  ;;  %v12110_v8 = vld [vmem:[%s20696_s5 + $0x1a0] sm:$0xff] }
 0x7ad   :  { %v12122_v9 = vld [vmem:[%s20696_s5 + $0x200] sm:$0xff] }
 0x7af   :  { %15401 = vmatpush3.bf16.msra.mxu0 %v15398_v11  ;;  %v12106_v11 = vld [vmem:[%s20696_s5 + $0x180] sm:$0xff] }
 0x7b0   :  { %15403 = vmatprep.subr.bf16.mxu0 %v15402_v54  ;;  %v15424_v18 = vpack.c.bf16 %v12118_v17, %v12106_v11  ;;  %v12147_v11 = vld [vmem:[%s20696_s5 + $0x2c8] sm:$0xff]  ;;  %v15440_v17 = vpack.c.bf16 %v12122_v9, %v12110_v8 }
 0x7b3   :  { %15405 = vmatpush3.bf16.msra.mxu0 %v15402_v54  ;;  %v12131_v54 = vld [vmem:[%s20696_s5 + $0x248] sm:$0xff] }
 0x7b4   :  { %15407 = vmatprep.subr.bf16.mxu0 %v15406_v23  ;;  %v15426_v19 = vpack.c.bf16 %v12143_v60, %v12131_v54  ;;  %v12134_v54 = vld [vmem:[%s20696_s5 + $0x260] sm:$0xff] }
 0x7b5   :  { %v12146_v60 = vld [vmem:[%s20696_s5 + $0x2c0] sm:$0xff] }
 0x7b7   :  { %15409 = vmatpush3.bf16.msra.mxu0 %v15406_v23  ;;  %v12142_v23 = vld [vmem:[%s20696_s5 + $0x2a0] sm:$0xff] }
 0x7b8   :  { %15411 = vmatprep.subr.bf16.mxu0 %v15410_v56  ;;  %v15428_v21 = vpack.c.bf16 %v12142_v23, %v12130_v20  ;;  %v12125_v20 = vld [vmem:[%s20696_s5 + $0x218] sm:$0xff]  ;;  %v15444_v23 = vpack.c.bf16 %v12146_v60, %v12134_v54 }
 0x7bb   :  { %15413 = vmatpush3.bf16.msra.mxu0 %v15410_v56  ;;  %v12109_v56 = vld [vmem:[%s20696_s5 + $0x198] sm:$0xff] }
 0x7bc   :  { %15415 = vmatprep.subr.bf16.mxu0 %v15414_v5  ;;  %v15430_v3 = vpack.c.bf16 %v12121_v22, %v12109_v56  ;;  %v12112_v56 = vld [vmem:[%s20696_s5 + $0x1b0] sm:$0xff] }
 0x7bd   :  { %v12124_v22 = vld [vmem:[%s20696_s5 + $0x210] sm:$0xff] }
 0x7bf   :  { %15417 = vmatpush3.bf16.msra.mxu0 %v15414_v5 }
 0x7c0   :  { %15419 = vmatprep.subr.bf16.mxu0 %v15418_v32 }
 0x7c3   :  { %15421 = vmatpush3.bf16.msra.mxu0 %v15418_v32 }
 0x7c4   :  { %15423 = vmatprep.subr.bf16.mxu0 %v15422_v10  ;;  %v12135_v10 = vld [vmem:[%s20696_s5 + $0x268] sm:$0xff] }
 0x879   :  { %v13928_v26 = vpop.f32.mrb[26].mxu0 }
 0x87a   :  { %v1918_v27 = vadd.f32 %v13928_v26, %v12098_v25  ;;  %v1912_v61 = vpop.f32.mrb[27].mxu0 }
 0x87b   :  { %v1913_v12 = vadd.f32 %v12098_v25, %v1912_v61 }
 0x87c   :  { %v1924_v41 = vmul.f32 0.044715, %v1918_v27  ;;  %v1922_v40 = vmul.f32 0.5, %v1918_v27 }
 0x87d   :  { %v1923_v44 = vmul.f32 0.044715, %v1913_v12  ;;  %v1921_v16 = vmul.f32 0.5, %v1913_v12 }
 0x87e   :  { %v1926_v28 = vmul.f32 %v1924_v41, %v1918_v27 }
 0x87f   :  { %v1925_v29 = vmul.f32 %v1923_v44, %v1913_v12 }
 0x880   :  { %v1928_v30 = vmul.f32 %v1926_v28, %v1918_v27 }
 0x881   :  { %v1927_v31 = vmul.f32 %v1925_v29, %v1913_v12 }
 0x882   :  { %v1930_v53 = vadd.f32 %v1928_v30, %v1918_v27 }
 0x883   :  { %v1929_v59 = vadd.f32 %v1927_v31, %v1913_v12 }
 0x884   :  { %v1932_v34 = vmul.f32 0.7978846, %v1930_v53 }
 0x885   :  { %v1931_v35 = vmul.f32 0.7978846, %v1929_v59  ;;  %v12104_v59 = vld [vmem:[%s20697_s3 + $0x1] ss:$0 sm:$0xff] }
 0x886   :  { %16739 = vtanh.f32 %v1932_v34 }
 0x887   :  { %16741 = vtanh.f32 %v1931_v35  ;;  %v12108_v35 = vld [vmem:[%s20696_s5 + $0x190] sm:$0xff] }
 0x890   :  { %v16740_v36 = vpop.eup %16739 }
 0x891   :  { %v16742_v63 = vpop.eup %16741  ;;  %v1936_v37 = vadd.f32 1.0, %v16740_v36  ;;  %v12120_v36 = vld [vmem:[%s20696_s5 + $0x1f0] sm:$0xff] }
 0x892   :  { %v1935_v39 = vadd.f32 1.0, %v16742_v63  ;;  %v12105_v63 = vld [vmem:[%s20698_s4 + $0x1] ss:$0 sm:$0xff] }
 0x893   :  { %v1938_v43 = vmul.f32 %v1936_v37, %v1922_v40  ;;  %v12133_v37 = vld [vmem:[%s20696_s5 + $0x258] sm:$0xff] }
 0x894   :  { %v1937_v42 = vmul.f32 %v1935_v39, %v1921_v16  ;;  %v12145_v16 = vld [vmem:[%s20696_s5 + $0x2b8] sm:$0xff] }
 0x896   :  { %13961 = vmatprep.mubr.f32.mxu0 %v1937_v42 }
 0x897   :  { %13962 = vmatmul.mubr.f32.vlgmr.msra.gmra.mrb[28].mxu0 %v1938_v43  ;;  %v15432_v43 = vpack.c.bf16 %v12120_v36, %v12108_v35  ;;  %v12129_v35 = vld [vmem:[%s20696_s5 + $0x238] sm:$0xff] }
 0x898   :  { %2275 = vmatprep.mubr.f32.mxu0 %v16977_v38  ;;  %15425 = vmatpush1.bf16.msra.mxu0 %v15424_v18  ;;  %v15442_v18 = vpack.c.bf16 %v12147_v11, %v12135_v10 }
 0x899   :  { %15427 = vmatprep.subr.bf16.mxu0 %v15426_v19  ;;  %v12113_v19 = vld [vmem:[%s20696_s5 + $0x1b8] sm:$0xff] }
 0x89c   :  { %15429 = vmatpush1.bf16.msra.mxu0 %v15428_v21  ;;  %v15446_v21 = vpack.c.bf16 %v12125_v20, %v12113_v19 }
 0x89d   :  { %15431 = vmatprep.subr.bf16.mxu0 %v15430_v3  ;;  %v12137_v3 = vld [vmem:[%s20696_s5 + $0x278] sm:$0xff] }
 0x96a   :  { %v13963_v45 = vpop.f32.mrb[28].mxu0 }
 0x96b   :  { %v2031_v46 = vadd.f32 %v13963_v45, %v17604_v58  ;;  %v2021_v48 = vpop.f32.mrb[29].mxu0 }
 0x96c   :  { %v2030_v49 = vadd.f32 %v2021_v48, %v17606_v15  ;;  %v12132_v48 = vld [vmem:[%s20696_s5 + $0x250] sm:$0xff] }
 0x96d   :  { %v17697_v50 = vadd.f32 %v12101_v47, %v2031_v46 }
 0x96e   :  { %v17699_v51 = vadd.f32 %v12101_v47, %v2030_v49  ;;  %v15434_v47 = vpack.c.bf16 %v12145_v16, %v12133_v37  ;;  %v12144_v49 = vld [vmem:[%s20696_s5 + $0x2b0] sm:$0xff] }
 0x96f   :  { %v2054_v6 = vmul.f32 %v17697_v50, %v17697_v50  ;;  %v2048_v15 = vsel %vm66_vm0, %v17697_v50, 0.0  ;;  %v12116_v37 = vld [vmem:[%s20696_s5 + $0x1d0] sm:$0xff] }
 0x970   :  { %v2045_v55 = vsel %vm66_vm0, %v17699_v51, 0.0  ;;  %v2053_v57 = vmul.f32 %v17699_v51, %v17699_v51  ;;  %v12128_v16 = vld [vmem:[%s20696_s5 + $0x230] sm:$0xff] }
 0x971   :  { %2046 = vadd.xlane.f32.xlu0 %v2045_v55  ;;  %v2058_v7 = vsel %vm66_vm0, %v2054_v6, 0.0  ;;  %v12111_v55 = vld [vmem:[%s20696_s5 + $0x1a8] sm:$0xff]  ;;  %v15436_v6 = vpack.c.bf16 %v12144_v49, %v12132_v48 }
 0x972   :  { %v2055_v58 = vsel %vm66_vm0, %v2053_v57, 0.0  ;;  %v12123_v57 = vld [vmem:[%s20696_s5 + $0x208] sm:$0xff] }
 0x973   :  { %2056 = vadd.xlane.f32.xlu1 %v2055_v58  ;;  %v17905_v49 = vld [vmem:[%s20699_s6 + $0xc] sm:$0xff] }
 0x974   :  { %v2168_v54 = vrot.slane %v17905_v49, %v17308_v2 }
 0x975   :  { %2049 = vadd.xlane.f32.xlu0 %v2048_v15 }
 0x977   :  { %2059 = vadd.xlane.f32.xlu1 %v2058_v7  ;;  %v15438_v7 = vpack.c.bf16 %v12123_v57, %v12111_v55  ;;  %v2148_v55 = vrot.slane %v17905_v49, %v17278_v52 }
 0x9fe   :  { %v2047_v5 = vpop.xlane.xlu0 %2046 }
 0x9ff   :  { %v2051_v62 = vmul.f32 0.03125, %v2047_v5  ;;  %v12149_v5 = vld [vmem:[%s20696_s5 + $0x2d8] sm:$0xff] }
 0xa00   :  { %v2057_v24 = vpop.xlane.xlu1 %2056 }
 0xa01   :  { %v2063_v32 = vmul.f32 %v2051_v62, %v2051_v62  ;;  %v2061_v25 = vmul.f32 0.03125, %v2057_v24  ;;  %v2067_v31 = vsub.f32 %v17699_v51, %v2051_v62  ;;  %v15448_v62 = vpack.c.bf16 %v12124_v22, %v12112_v56 }
 0xa02   :  { %v2050_v26 = vpop.xlane.xlu0 %2049  ;;  %v15450_v24 = vpack.c.bf16 %v12149_v5, %v12137_v3 }
 0xa03   :  { %v2065_v27 = vsub.f32 %v2061_v25, %v2063_v32  ;;  %v2052_v61 = vmul.f32 0.03125, %v2050_v26  ;;  %v12136_v32 = vld [vmem:[%s20696_s5 + $0x270] sm:$0xff]  ;;  %v12115_v26 = vld [vmem:[%s20696_s5 + $0x1c8] sm:$0xff] }
 0xa04   :  { %v2060_v12 = vpop.xlane.xlu1 %2059  ;;  %v12148_v25 = vld [vmem:[%s20696_s5 + $0x2d0] sm:$0xff] }
 0xa05   :  { %v2069_v41 = vadd.f32 1e-05, %v2065_v27  ;;  %v2064_v44 = vmul.f32 %v2052_v61, %v2052_v61  ;;  %v2062_v28 = vmul.f32 0.03125, %v2060_v12  ;;  %v2068_v40 = vsub.f32 %v17697_v50, %v2052_v61  ;;  %v12127_v27 = vld [vmem:[%s20696_s5 + $0x228] sm:$0xff] }
 0xa06   :  { %v15452_v61 = vpack.c.bf16 %v12148_v25, %v12136_v32  ;;  %v15454_v12 = vpack.c.bf16 %v12127_v27, %v12115_v26  ;;  %v2176_v32 = vrot.slane %v17905_v49, %v17310_v4 }
 0xa07   :  { %16743 = vrsqrt.f32 %v2069_v41  ;;  %v2066_v29 = vsub.f32 %v2062_v28, %v2064_v44  ;;  %v12114_v41 = vld [vmem:[%s20696_s5 + $0x1c0] sm:$0xff]  ;;  %v12139_v28 = vld [vmem:[%s20696_s5 + $0x288] sm:$0xff] }
 0xa08   :  { %v12126_v44 = vld [vmem:[%s20696_s5 + $0x220] sm:$0xff] }
 0xa09   :  { %v2070_v30 = vadd.f32 1e-05, %v2066_v29  ;;  %v12151_v29 = vld [vmem:[%s20696_s5 + $0x2e8] sm:$0xff] }
 0xa0b   :  { %16745 = vrsqrt.f32 %v2070_v30  ;;  %v15456_v30 = vpack.c.bf16 %v12126_v44, %v12114_v41  ;;  %v12155_v44 = vld [vmem:[%s20699_s6 + $0x14] sm:$0xf] }
 0xa11   :  { %v16744_v53 = vpop.eup %16743 }
 0xa12   :  { %v2073_v34 = vmul.f32 %v16744_v53, %v2067_v31  ;;  %v15458_v31 = vpack.c.bf16 %v12151_v29, %v12139_v28  ;;  %v12138_v53 = vld [vmem:[%s20696_s5 + $0x280] sm:$0xff] }
 0xa14   :  { %v2081_v39 = vmul.f32 %v12104_v59, %v2073_v34  ;;  %v12117_v34 = vld [vmem:[%s20696_s5 + $0x1d8] sm:$0xff] }
 0xa15   :  { %v16746_v42 = vpop.eup %16745 }
 0xa16   :  { %v2074_v45 = vmul.f32 %v16746_v42, %v2068_v40  ;;  %v17761_v46 = vadd.f32 %v12105_v63, %v2081_v39  ;;  %v12141_v39 = vld [vmem:[%s20696_s5 + $0x298] sm:$0xff]  ;;  %v15464_v42 = vpack.c.bf16 %v12128_v16, %v12116_v37  ;;  %v2188_v16 = vrot.slane %v12155_v44, %v17319_v13 }
 0xa17   :  { %v12153_v40 = vld [vmem:[%s20696_s5 + $0x2f8] sm:$0xff] }
 0xa18   :  { %v2082_v58 = vmul.f32 %v12104_v59, %v2074_v45  ;;  %12156 = vmatmul.mubr.msk.f32.vlgmr.msra.gmra.mrb[30].mxu0 %vm66_vm0, %v17761_v46  ;;  %v12150_v59 = vld [vmem:[%s20696_s5 + $0x2e0] sm:$0xff]  ;;  %v12140_v45 = vld [vmem:[%s20696_s5 + $0x290] sm:$0xff] }
 0xa19   :  { %15433 = vmatpush1.bf16.msra.mxu0 %v15432_v43  ;;  %2281 = vmatprep.mubr.f32.mxu0 %v16977_v38  ;;  %v15460_v36 = vpack.c.bf16 %v12150_v59, %v12138_v53  ;;  %v15466_v43 = vpack.c.bf16 %v12153_v40, %v12141_v39  ;;  %v2180_v53 = vrot.slane %v12155_v44, %v17278_v52 }
 0xa1a   :  { %v17778_v15 = vadd.f32 %v12105_v63, %v2082_v58  ;;  %15435 = vmatprep.subr.bf16.mxu0 %v15434_v47  ;;  %v15462_v63 = vpack.c.bf16 %v12129_v35, %v12117_v34  ;;  %v12152_v47 = vld [vmem:[%s20696_s5 + $0x2f0] sm:$0xff]  ;;  %v2184_v34 = vrot.slane %v12155_v44, %v17331_v33 }
 0xa1b   :  { %v15468_v48 = vpack.c.bf16 %v12152_v47, %v12140_v45 }
 0xa1c   :  { %12157 = vmatmul.mubr.msk.f32.gmra.mrb[32].mxu0 %vm66_vm0, %v17778_v15 }
 0xa1d   :  { %15437 = vmatpush1.bf16.msra.mxu0 %v15436_v6  ;;  %2352 = vmatprep.mubr.f32.mxu0 %v16977_v38 }
 0xa1e   :  { %15439 = vmatprep.subr.bf16.mxu0 %v15438_v7 }
 0xa20   :  { %12158 = vmatmul.mubr.msk.f32.vlgmr.msra.gmra.mrb[34].mxu0 %vm66_vm0, %v17761_v46 }
 0xa21   :  { %15441 = vmatpush1.bf16.msra.mxu0 %v15440_v17  ;;  %2358 = vmatprep.mubr.f32.mxu0 %v16977_v38  ;;  %v2164_v17 = vrot.slane %v17905_v49, %v17304_v0 }
 0xa22   :  { %15443 = vmatprep.subr.bf16.mxu0 %v15442_v18 }
 0xa24   :  { %12159 = vmatmul.mubr.msk.f32.gmra.mrb[36].mxu0 %vm66_vm0, %v17778_v15 }
 0xa25   :  { %15445 = vmatpush1.bf16.msra.mxu0 %v15444_v23  ;;  %2429 = vmatprep.mubr.f32.mxu0 %v16977_v38 }
 0xa26   :  { %15447 = vmatprep.subr.bf16.mxu0 %v15446_v21 }
 0xa28   :  { %12160 = vmatmul.mubr.msk.f32.vlgmr.msra.gmra.mrb[38].mxu0 %vm66_vm0, %v17761_v46 }
 0xa29   :  { %15449 = vmatpush1.bf16.msra.mxu0 %v15448_v62  ;;  %2435 = vmatprep.mubr.f32.mxu0 %v16977_v38  ;;  %v2172_v62 = vrot.slane %v17905_v49, %v17306_v1 }
 0xa2a   :  { %15451 = vmatprep.subr.bf16.mxu0 %v15450_v24 }
 0xa2c   :  { %12161 = vmatmul.mubr.msk.f32.gmra.mrb[40].mxu0 %vm66_vm0, %v17778_v15 }
 0xa2d   :  { %15453 = vmatpush1.bf16.msra.mxu0 %v15452_v61  ;;  %2506 = vmatprep.mubr.f32.mxu0 %v16977_v38 }
 0xa2e   :  { %15455 = vmatprep.subr.bf16.mxu0 %v15454_v12 }
 0xa30   :  { %12162 = vmatmul.mubr.msk.f32.vlgmr.msra.gmra.mrb[42].mxu0 %vm66_vm0, %v17761_v46 }
 0xa31   :  { %15457 = vmatpush1.bf16.msra.mxu0 %v15456_v30  ;;  %2512 = vmatprep.mubr.f32.mxu0 %v16977_v38 }
 0xa32   :  { %15459 = vmatprep.subr.bf16.mxu0 %v15458_v31 }
 0xa34   :  { %12163 = vmatmul.mubr.msk.f32.gmra.mrb[44].mxu0 %vm66_vm0, %v17778_v15 }
 0xa35   :  { %15461 = vmatpush1.bf16.msra.mxu0 %v15460_v36  ;;  %2583 = vmatprep.mubr.f32.mxu0 %v16977_v38 }
 0xa36   :  { %15463 = vmatprep.subr.bf16.mxu0 %v15462_v63 }
 0xa38   :  { %12164 = vmatmul.mubr.msk.f32.vlgmr.msra.gmra.mrb[46].mxu0 %vm66_vm0, %v17761_v46 }
 0xa39   :  { %15465 = vmatpush1.bf16.msra.mxu0 %v15464_v42  ;;  %2589 = vmatprep.mubr.f32.mxu0 %v16977_v38  ;;  %v2192_v42 = vrot.slane %v12155_v44, %v17321_v14 }
 0xa3a   :  { %15467 = vmatprep.subr.bf16.mxu0 %v15466_v43 }
 0xa3c   :  { %12165 = vmatmul.mubr.msk.f32.gmra.mrb[48].mxu0 %vm66_vm0, %v17778_v15 }
 0xa3d   :  { %15469 = vmatpush1.bf16.msra.mxu0 %v15468_v48  ;;  %2660 = vmatprep.mubr.f32.mxu0 %v16977_v38 }
 0xa40   :  { %12166 = vmatmul.mubr.msk.f32.vlgmr.msra.gmra.mrb[50].mxu0 %vm66_vm0, %v17761_v46 }
 0xa41   :  { %2666 = vmatprep.mubr.f32.mxu0 %v16977_v38 }
 0xa44   :  { %12167 = vmatmul.mubr.msk.f32.gmra.mrb[52].mxu0 %vm66_vm0, %v17778_v15 }
 0xaeb   :  { %v2277_v57 = vpop.f32.mrb[30].mxu0 }
 0xaec   :  { %v2278_v58 = vadd.f32 %v2277_v57, %v2148_v55  ;;  %v17909_v6 = vpop.f32.mrb[31].mxu0 }
 0xaee   :  { %13968 = vmatprep.mubr.f32.mxu0 %v2278_v58 }
 0xaef   :  { %v2283_v7 = vpop.f32.mrb[32].mxu0 }
 0xaf0   :  { %v17911_v46 = vpop.f32.mrb[33].mxu0  ;;  %v2284_v28 = vadd.f32 %v2283_v7, %v2148_v55 }
 0xaf3   :  { %v17913_v8 = vpop.f32.mrb[34].mxu0 }
 0xaf4   :  { %v17915_v9 = vpop.f32.mrb[35].mxu0 }
 0xaf7   :  { %v17917_v15 = vpop.f32.mrb[36].mxu0 }
 0xaf8   :  { %v17919_v10 = vpop.f32.mrb[37].mxu0 }
 0xafb   :  { %v2431_v11 = vpop.f32.mrb[38].mxu0 }
 0xafc   :  { %v2433_v18 = vpop.f32.mrb[39].mxu0  ;;  %v2432_v19 = vadd.f32 %v2431_v11, %v2164_v17 }
 0xafd   :  { %v2434_v21 = vadd.f32 %v2433_v18, %v2168_v54 }
 0xaff   :  { %v2437_v60 = vpop.f32.mrb[40].mxu0 }
 0xb00   :  { %v2438_v20 = vadd.f32 %v2437_v60, %v2164_v17  ;;  %v2439_v23 = vpop.f32.mrb[41].mxu0 }
 0xb01   :  { %v2440_v56 = vadd.f32 %v2439_v23, %v2168_v54 }
 0xb02   :  { %v15470_v22 = vpack.c.bf16 %v2438_v20, %v2432_v19 }
 0xb03   :  { %v17925_v3 = vpack.c.bf16 %v2440_v56, %v2434_v21  ;;  %v2508_v5 = vpop.f32.mrb[42].mxu0  ;;  %v17946_v21 = vld [vmem:[%s20701_s2 + $0x8] sm:$0xff] }
 0xb04   :  { %v2510_v24 = vpop.f32.mrb[43].mxu0  ;;  %15471 = vmatprep.subr.bf16.mxu0 %v15470_v22  ;;  %v2509_v26 = vadd.f32 %v2508_v5, %v2172_v62 }
 0xb05   :  { %15473 = vmatpush3.bf16.xpose.msra.mxu0 %v15470_v22  ;;  %v2511_v12 = vadd.f32 %v2510_v24, %v2176_v32  ;;  %v17952_v22 = vld [vmem:[%s20701_s2] sm:$0xff] }
 0xb07   :  { %v2514_v25 = vpop.f32.mrb[44].mxu0 }
 0xb08   :  { %v2515_v27 = vadd.f32 %v2514_v25, %v2172_v62  ;;  %v2516_v61 = vpop.f32.mrb[45].mxu0 }
 0xb09   :  { %v2517_v41 = vadd.f32 %v2516_v61, %v2176_v32  ;;  %v2152_v32 = vrot.slane %v17905_v49, %v17331_v33  ;;  %v2156_v61 = vrot.slane %v17905_v49, %v17319_v13 }
 0xb0a   :  { %v15550_v29 = vpack.c.bf16 %v2515_v27, %v2509_v26 }
 0xb0b   :  { %v17934_v30 = vpack.c.bf16 %v2517_v41, %v2511_v12  ;;  %v2585_v31 = vpop.f32.mrb[46].mxu0  ;;  %v2280_v27 = vadd.f32 %v17909_v6, %v2152_v32  ;;  %v2286_v12 = vadd.f32 %v17911_v46, %v2152_v32  ;;  %v2355_v41 = vadd.f32 %v17913_v8, %v2156_v61  ;;  %v12196_v32 = vld [vmem:[%s20700_s7 + $0x2c0] sm:$0xff] }
 0xb0c   :  { %v2587_v59 = vpop.f32.mrb[47].mxu0  ;;  %13969 = vmatmul.mubr.f32.vlgmr.msra.gmra.mrb[54].mxu0 %v2284_v28  ;;  %v2586_v36 = vadd.f32 %v2585_v31, %v2180_v53  ;;  %v2361_v6 = vadd.f32 %v17917_v15, %v2156_v61  ;;  %v12199_v61 = vld [vmem:[%s20700_s7 + $0x2d8] sm:$0xff] }
 0xb0d   :  { %v2588_v39 = vadd.f32 %v2587_v59, %v2184_v34 }
 0xb0f   :  { %v2591_v35 = vpop.f32.mrb[48].mxu0 }
 0xb10   :  { %v2592_v63 = vadd.f32 %v2591_v35, %v2180_v53  ;;  %v2593_v37 = vpop.f32.mrb[49].mxu0 }
 0xb11   :  { %v2594_v40 = vadd.f32 %v2593_v37, %v2184_v34 }
 0xb12   :  { %v15474_v43 = vpack.c.bf16 %v2592_v63, %v2586_v36 }
 0xb13   :  { %v15482_v45 = vpack.c.bf16 %v2594_v40, %v2588_v39  ;;  %v2662_v47 = vpop.f32.mrb[50].mxu0 }
 0xb14   :  { %v2663_v48 = vadd.f32 %v2662_v47, %v2188_v16  ;;  %v2664_v55 = vpop.f32.mrb[51].mxu0  ;;  %15475 = vmatprep.subr.bf16.mxu0 %v15474_v43 }
 0xb15   :  { %v2665_v57 = vadd.f32 %v2664_v55, %v2192_v42  ;;  %15477 = vmatpush3.bf16.msra.mxu0 %v15474_v43  ;;  %15483 = vmatprep.subr.bf16.mxu1 %v15482_v45  ;;  %v2160_v55 = vrot.slane %v17905_v49, %v17321_v14 }
 0xb16   :  { %15479 = vmatprep.subr.bf16.mxu0 %v17925_v3  ;;  %15485 = vmatpush3.bf16.msra.mxu1 %v15482_v45 }
 0xb17   :  { %v2668_v58 = vpop.f32.mrb[52].mxu0  ;;  %v2363_v49 = vadd.f32 %v17919_v10, %v2160_v55  ;;  %v12191_v10 = vld [vmem:[%s20700_s7 + $0x298] sm:$0xff] }
 0xb18   :  { %v2669_v7 = vadd.f32 %v2668_v58, %v2188_v16  ;;  %v2670_v11 = vpop.f32.mrb[53].mxu0 }
 0xb19   :  { %v2671_v17 = vadd.f32 %v2670_v11, %v2192_v42 }
 0xb1a   :  { %v15554_v18 = vpack.c.bf16 %v2669_v7, %v2663_v48 }
 0xb1b   :  { %v17941_v54 = vpack.c.bf16 %v2671_v17, %v2665_v57  ;;  %v2357_v17 = vadd.f32 %v17915_v9, %v2160_v55  ;;  %v12188_v9 = vld [vmem:[%s20700_s7 + $0x280] sm:$0xff] }
 0xb1c   :  { %v12174_v55 = vld [vmem:[%s20700_s7 + $0x220] sm:$0xff] }
 0xbdf   :  { %v13970_v60 = vpop.f32.mrb[54].mxu0 }
 0xbe0   :  { %v2749_v19 = vmul.f32 0.35355338, %v13970_v60  ;;  %v2739_v20 = vpop.f32.mrb[55].mxu0  ;;  %v12189_v60 = vld [vmem:[%s20700_s7 + $0x288] sm:$0xff] }
 0xbe1   :  { %v2748_v23 = vmul.f32 0.35355338, %v2739_v20 }
 0xbe2   :  { %v2751_v56 = vadd.f32 %v17946_v21, %v2749_v19  ;;  %v15486_v19 = vpack.c.bf16 %v12189_v60, %v12188_v9  ;;  %v12179_v9 = vld [vmem:[%s20700_s7 + $0x248] sm:$0xff] }
 0xbe3   :  { %v2750_v5 = vadd.f32 %v17952_v22, %v2748_v23  ;;  %v12193_v23 = vld [vmem:[%s20700_s7 + $0x2a8] sm:$0xff] }
 0xbe4   :  { %v2754_v62 = vmul.f32 1.442695, %v2751_v56  ;;  %15487 = vmatprep.subr.bf16.mxu1 %v15486_v19 }
 0xbe5   :  { %v2752_v24 = vmul.f32 1.442695, %v2750_v5  ;;  %v12194_v5 = vld [vmem:[%s20700_s7 + $0x2b0] sm:$0xff] }
 0xbe7   :  { %16747 = vpow2.f32 %v2752_v24 }
 0xbe8   :  { %16749 = vpow2.f32 %v2754_v62  ;;  %v12195_v62 = vld [vmem:[%s20700_s7 + $0x2b8] sm:$0xff] }
 0xbe9   :  { %v15498_v24 = vpack.c.bf16 %v12195_v62, %v12194_v5 }
 0xbf1   :  { %v16748_v25 = vpop.eup %16747 }
 0xbf2   :  { %v16750_v26 = vpop.eup %16749  ;;  %13975 = vmatprep.mubr.msk.f32.mxu0 %vm777_vm1, %v16748_v25  ;;  %v2756_v57 = vsel %vm777_vm1, %v16748_v25, 0.0  ;;  %v12197_v25 = vld [vmem:[%s20700_s7 + $0x2c8] sm:$0xff] }
 0xbf3   :  { %13976 = vmatmul.mubr.msk.f32.vlgmr.msra.gmra.mrb[56].mxu0 %vm777_vm1, %v16750_v26  ;;  %v2759_v48 = vsel %vm777_vm1, %v16750_v26, 0.0  ;;  %v15502_v26 = vpack.c.bf16 %v12197_v25, %v12196_v32  ;;  %v12182_v32 = vld [vmem:[%s20700_s7 + $0x260] sm:$0xff]  ;;  %v12183_v25 = vld [vmem:[%s20700_s7 + $0x268] sm:$0xff] }
 0xbf4   :  { %15481 = vmatpush3.bf16.xpose.msra.mxu0 %v17925_v3  ;;  %13982 = vmatprep.mubr.f32.mxu0 %v2280_v27  ;;  %v12198_v27 = vld [vmem:[%s20700_s7 + $0x2d0] sm:$0xff] }
 0xbf5   :  { %15551 = vmatprep.subr.bf16.mxu0 %v15550_v29 }
 0xbfb   :  { %13983 = vmatmul.mubr.f32.vlgmr.msra.gmra.mrb[58].mxu0 %v2286_v12  ;;  %v15506_v12 = vpack.c.bf16 %v12199_v61, %v12198_v27 }
 0xbfc   :  { %15553 = vmatpush3.bf16.xpose.msra.mxu0 %v15550_v29  ;;  %14066 = vmatprep.mubr.f32.mxu0 %v2355_v41  ;;  %v12200_v41 = vld [vmem:[%s20700_s7 + $0x2e0] sm:$0xff] }
 0xbfd   :  { %15555 = vmatprep.subr.bf16.mxu0 %v15554_v18 }
 0xc03   :  { %14067 = vmatmul.mubr.f32.vlgmr.msra.gmra.mrb[60].mxu0 %v2361_v6  ;;  %v12201_v6 = vld [vmem:[%s20700_s7 + $0x2e8] sm:$0xff] }
 0xc04   :  { %15557 = vmatpush3.bf16.msra.mxu0 %v15554_v18 }
 0xc05   :  { %15591 = vmatprep.subr.bf16.mxu0 %v17934_v30 }
 0xcc6   :  { %v17967_v3 = vpop.f32.mrb[56].mxu0 }
 0xcc7   :  { %v17969_v44 = vpop.f32.mrb[57].mxu0 }
 0xcce   :  { %v13984_v28 = vpop.f32.mrb[58].mxu0 }
 0xccf   :  { %v2942_v31 = vmul.f32 0.35355338, %v13984_v28  ;;  %v2932_v53 = vpop.f32.mrb[59].mxu0  ;;  %v15510_v28 = vpack.c.bf16 %v12201_v6, %v12200_v41  ;;  %v12206_v6 = vld [vmem:[%s20700_s7 + $0x300] sm:$0xff] }
 0xcd0   :  { %v2941_v46 = vmul.f32 0.35355338, %v2932_v53  ;;  %v12203_v53 = vld [vmem:[%s20700_s7 + $0x2f8] sm:$0xff] }
 0xcd1   :  { %v2944_v8 = vadd.f32 %v17946_v21, %v2942_v31  ;;  %v12202_v31 = vld [vmem:[%s20700_s7 + $0x2f0] sm:$0xff] }
 0xcd2   :  { %v2943_v29 = vadd.f32 %v17952_v22, %v2941_v46  ;;  %v15514_v46 = vpack.c.bf16 %v12203_v53, %v12202_v31  ;;  %v12208_v53 = vld [vmem:[%s20700_s7 + $0x310] sm:$0xff] }
 0xcd3   :  { %v2947_v59 = vmul.f32 1.442695, %v2944_v8  ;;  %v12170_v8 = vld [vmem:[%s20700_s7 + $0x200] sm:$0xff] }
 0xcd4   :  { %v2945_v34 = vmul.f32 1.442695, %v2943_v29  ;;  %v12171_v29 = vld [vmem:[%s20700_s7 + $0x208] sm:$0xff] }
 0xcd5   :  { %16751 = vpow2.f32 %v2947_v59  ;;  %v15518_v59 = vpack.c.bf16 %v12171_v29, %v12170_v8 }
 0xcd6   :  { %16753 = vpow2.f32 %v2945_v34  ;;  %v14068_v15 = vpop.f32.mrb[60].mxu0 }
 0xcd7   :  { %v3285_v35 = vmul.f32 0.35355338, %v14068_v15  ;;  %v3275_v36 = vpop.f32.mrb[61].mxu0 }
 0xcd8   :  { %v3284_v63 = vmul.f32 0.35355338, %v3275_v36 }
 0xcd9   :  { %v3287_v37 = vadd.f32 %v17946_v21, %v3285_v35 }
 0xcda   :  { %v3286_v16 = vadd.f32 %v17952_v22, %v3284_v63 }
 0xcdb   :  { %v3290_v39 = vmul.f32 1.442695, %v3287_v37  ;;  %v12172_v37 = vld [vmem:[%s20700_s7 + $0x210] sm:$0xff] }
 0xcdc   :  { %v3288_v40 = vmul.f32 1.442695, %v3286_v16  ;;  %v12173_v16 = vld [vmem:[%s20700_s7 + $0x218] sm:$0xff] }
 0xcdd   :  { %16755 = vpow2.f32 %v3290_v39 }
 0xcde   :  { %16757 = vpow2.f32 %v3288_v40 }
 0xcdf   :  { %v16752_v42 = vpop.eup %16751 }
 0xce0   :  { %v16754_v43 = vpop.eup %16753  ;;  %v2952_v45 = vsel %vm777_vm1, %v16752_v42, 0.0 }
 0xce1   :  { %2953 = vadd.xlane.f32.xlu1 %v2952_v45  ;;  %13989 = vmatprep.mubr.msk.f32.mxu1 %vm777_vm1, %v16754_v43  ;;  %v2949_v47 = vsel %vm777_vm1, %v16754_v43, 0.0 }
 0xce2   :  { %13990 = vmatmul.mubr.msk.f32.vlgmr.msra.gmra.mrb[18].mxu1 %vm777_vm1, %v16752_v42  ;;  %2950 = vadd.xlane.f32.xlu0 %v2949_v47  ;;  %v15522_v47 = vpack.c.bf16 %v12173_v16, %v12172_v37  ;;  %v12210_v16 = vld [vmem:[%s20700_s7 + $0x320] sm:$0xff] }
 0xce3   :  { %15489 = vmatpush3.bf16.msra.mxu1 %v15486_v19  ;;  %v12180_v19 = vld [vmem:[%s20700_s7 + $0x250] sm:$0xff] }
 0xce5   :  { %2760 = vadd.xlane.f32.xlu1 %v2759_v48 }
 0xce6   :  { %2757 = vadd.xlane.f32.xlu0 %v2756_v57  ;;  %v12175_v57 = vld [vmem:[%s20700_s7 + $0x228] sm:$0xff] }
 0xce7   :  { %v16756_v58 = vpop.eup %16755 }
 0xce8   :  { %v16758_v7 = vpop.eup %16757  ;;  %v3295_v11 = vsel %vm777_vm1, %v16756_v58, 0.0 }
 0xce9   :  { %3296 = vadd.xlane.f32.xlu1 %v3295_v11  ;;  %14073 = vmatprep.mubr.msk.f32.mxu0 %vm777_vm1, %v16758_v7  ;;  %v3292_v18 = vsel %vm777_vm1, %v16758_v7, 0.0  ;;  %v12176_v11 = vld [vmem:[%s20700_s7 + $0x230] sm:$0xff] }
 0xcea   :  { %14074 = vmatmul.mubr.msk.f32.vlgmr.msra.gmra.mrb[62].mxu0 %vm777_vm1, %v16756_v58  ;;  %3293 = vadd.xlane.f32.xlu0 %v3292_v18  ;;  %v15526_v58 = vpack.c.bf16 %v12175_v57, %v12174_v55  ;;  %v12216_v55 = vld [vmem:[%s20700_s7 + $0x350] sm:$0xff]  ;;  %v12217_v57 = vld [vmem:[%s20700_s7 + $0x358] sm:$0xff] }
 0xceb   :  { %15593 = vmatpush3.bf16.xpose.msra.mxu0 %v17934_v30  ;;  %14115 = vmatprep.mubr.f32.mxu0 %v2357_v17  ;;  %v12190_v30 = vld [vmem:[%s20700_s7 + $0x290] sm:$0xff] }
 0xcec   :  { %15595 = vmatprep.subr.bf16.mxu0 %v17941_v54  ;;  %v15490_v20 = vpack.c.bf16 %v12191_v10, %v12190_v30  ;;  %v12181_v10 = vld [vmem:[%s20700_s7 + $0x258] sm:$0xff] }
 0xced   :  { %v15538_v62 = vpack.c.bf16 %v12181_v10, %v12180_v19  ;;  %v12225_v19 = vld [vmem:[%s20700_s7 + $0x388] sm:$0xff] }
 0xcee   :  { %15491 = vmatprep.subr.bf16.mxu1 %v15490_v20 }
 0xcef   :  { %15493 = vmatpush3.bf16.msra.mxu1 %v15490_v20 }
 0xcf2   :  { %14116 = vmatmul.mubr.f32.vlgmr.msra.gmra.mrb[64].mxu0 %v2363_v49  ;;  %v12178_v49 = vld [vmem:[%s20700_s7 + $0x240] sm:$0xff] }
 0xcf3   :  { %15597 = vmatpush3.bf16.msra.mxu0 %v17941_v54  ;;  %v12192_v54 = vld [vmem:[%s20700_s7 + $0x2a0] sm:$0xff]  ;;  %v15534_v60 = vpack.c.bf16 %v12179_v9, %v12178_v49  ;;  %v12220_v49 = vld [vmem:[%s20700_s7 + $0x370] sm:$0xff]  ;;  %v12221_v9 = vld [vmem:[%s20700_s7 + $0x378] sm:$0xff] }
 0xcf4   :  { %v15494_v56 = vpack.c.bf16 %v12193_v23, %v12192_v54 }
 0xcf6   :  { %15495 = vmatprep.subr.bf16.mxu1 %v15494_v56 }
 0xcf7   :  { %15497 = vmatpush3.bf16.msra.mxu1 %v15494_v56 }
 0xcf8   :  { %15499 = vmatprep.subr.bf16.mxu1 %v15498_v24 }
 0xcfb   :  { %15501 = vmatpush3.bf16.msra.mxu1 %v15498_v24 }
 0xcfc   :  { %15503 = vmatprep.subr.bf16.mxu1 %v15502_v26 }
 0xcff   :  { %15505 = vmatpush3.bf16.msra.mxu1 %v15502_v26 }
 0xd00   :  { %15507 = vmatprep.subr.bf16.mxu1 %v15506_v12 }
 0xd03   :  { %15509 = vmatpush3.bf16.msra.mxu1 %v15506_v12  ;;  %v12185_v12 = vld [vmem:[%s20700_s7 + $0x278] sm:$0xff] }
 0xd04   :  { %15511 = vmatprep.subr.bf16.mxu1 %v15510_v28 }
 0xd07   :  { %15513 = vmatpush3.bf16.msra.mxu1 %v15510_v28  ;;  %v12207_v28 = vld [vmem:[%s20700_s7 + $0x308] sm:$0xff] }
 0xd08   :  { %15515 = vmatprep.subr.bf16.mxu1 %v15514_v46  ;;  %v15558_v29 = vpack.c.bf16 %v12207_v28, %v12206_v6  ;;  %v12236_v6 = vld [vmem:[%s20700_s7 + $0x3e0] sm:$0xff]  ;;  %v12237_v28 = vld [vmem:[%s20700_s7 + $0x3e8] sm:$0xff] }
 0xd0b   :  { %15517 = vmatpush3.bf16.msra.mxu1 %v15514_v46  ;;  %v12209_v46 = vld [vmem:[%s20700_s7 + $0x318] sm:$0xff] }
 0xd0c   :  { %15519 = vmatprep.subr.bf16.mxu1 %v15518_v59 }
 0xd6e   :  { %v2954_v35 = vpop.xlane.xlu1 %2953 }
 0xd6f   :  { %v2951_v34 = vpop.xlane.xlu0 %2950 }
 0xd70   :  { %16759 = vrcp.f32 %v2951_v34 }
 0xd72   :  { %v2761_v56 = vpop.xlane.xlu1 %2760 }
 0xd73   :  { %v2758_v15 = vpop.xlane.xlu0 %2757 }
 0xd74   :  { %16761 = vrcp.f32 %v2758_v15 }
 0xd75   :  { %16763 = vrcp.f32 %v2954_v35 }
 0xd76   :  { %16765 = vrcp.f32 %v2761_v56 }
 0xd77   :  { %v3294_v27 = vpop.xlane.xlu0 %3293 }
 0xd7a   :  { %v16760_v36 = vpop.eup %16759 }
 0xd7e   :  { %v16762_v39 = vpop.eup %16761 }
 0xd7f   :  { %v16764_v42 = vpop.eup %16763  ;;  %v2847_v48 = vmul.f32 %v16762_v39, %v17969_v44  ;;  %v12177_v44 = vld [vmem:[%s20700_s7 + $0x238] sm:$0xff]  ;;  %v12211_v39 = vld [vmem:[%s20700_s7 + $0x328] sm:$0xff] }
 0xd80   :  { %v15530_v18 = vpack.c.bf16 %v12177_v44, %v12176_v11  ;;  %v16766_v31 = vpop.eup %16765  ;;  %v12218_v11 = vld [vmem:[%s20700_s7 + $0x360] sm:$0xff]  ;;  %v12219_v44 = vld [vmem:[%s20700_s7 + $0x368] sm:$0xff] }
 0xdb5   :  { %v13991_v63 = vpop.f32.mrb[18].mxu1 }
 0xdb6   :  { %v3031_v40 = vpop.f32.mrb[19].mxu1  ;;  %v3041_v45 = vmul.f32 %v16764_v42, %v13991_v63  ;;  %v15562_v63 = vpack.c.bf16 %v12209_v46, %v12208_v53  ;;  %v12213_v42 = vld [vmem:[%s20700_s7 + $0x338] sm:$0xff]  ;;  %v12238_v53 = vld [vmem:[%s20700_s7 + $0x3f0] sm:$0xff] }
 0xdb7   :  { %v3040_v43 = vmul.f32 %v16760_v36, %v3031_v40  ;;  %v2848_v36 = vmul.f32 %v16766_v31, %v17967_v3  ;;  %v15566_v40 = vpack.c.bf16 %v12211_v39, %v12210_v16  ;;  %v12212_v3 = vld [vmem:[%s20700_s7 + $0x330] sm:$0xff]  ;;  %v15622_v31 = vpack.c.bf16 %v12237_v28, %v12236_v6  ;;  %v12239_v46 = vld [vmem:[%s20700_s7 + $0x3f8] sm:$0xff]  ;;  %v12241_v39 = vld [vmem:[%s20702_s8 + $0x1] ss:$0 sm:$0xff] }
 0xdb9   :  { %14024 = vmatprep.mubr.f32.mxu1 %v3040_v43  ;;  %v15570_v43 = vpack.c.bf16 %v12213_v42, %v12212_v3 }
 0xdba   :  { %14025 = vmatmul.mubr.f32.vlgmr.msra.gmra.mrb[20].mxu1 %v3041_v45  ;;  %v12214_v45 = vld [vmem:[%s20700_s7 + $0x340] sm:$0xff] }
 0xdbb   :  { %15521 = vmatpush3.bf16.msra.mxu1 %v15518_v59  ;;  %14059 = vmatprep.mubr.f32.mxu1 %v2847_v48 }
 0xdbc   :  { %15523 = vmatprep.subr.bf16.mxu1 %v15522_v47 }
 0xdbd   :  { %v18059_v7 = vpop.f32.mrb[62].mxu0 }
 0xdbe   :  { %v3374_v17 = vpop.f32.mrb[63].mxu0 }
 0xdbf   :  { %15525 = vmatpush3.bf16.msra.mxu1 %v15522_v47  ;;  %v12215_v47 = vld [vmem:[%s20700_s7 + $0x348] sm:$0xff] }
 0xdc0   :  { %15527 = vmatprep.subr.bf16.mxu1 %v15526_v58  ;;  %v15574_v48 = vpack.c.bf16 %v12215_v47, %v12214_v45 }
 0xdc3   :  { %15529 = vmatpush3.bf16.msra.mxu1 %v15526_v58  ;;  %v15578_v58 = vpack.c.bf16 %v12217_v57, %v12216_v55 }
 0xdc4   :  { %15531 = vmatprep.subr.bf16.mxu1 %v15530_v18 }
 0xdc5   :  { %v14117_v30 = vpop.f32.mrb[64].mxu0 }
 0xdc6   :  { %v3555_v20 = vmul.f32 0.35355338, %v14117_v30  ;;  %v3545_v54 = vpop.f32.mrb[65].mxu0  ;;  %v12224_v30 = vld [vmem:[%s20700_s7 + $0x380] sm:$0xff] }
 0xdc7   :  { %v3554_v23 = vmul.f32 0.35355338, %v3545_v54  ;;  %15533 = vmatpush3.bf16.msra.mxu1 %v15530_v18  ;;  %v15582_v18 = vpack.c.bf16 %v12219_v44, %v12218_v11  ;;  %v15598_v10 = vpack.c.bf16 %v12225_v19, %v12224_v30  ;;  %v12227_v54 = vld [vmem:[%s20700_s7 + $0x398] sm:$0xff]  ;;  %v12247_v11 = vld [vmem:[%s20703_s11 + $0x28] sm:$0xff]  ;;  %v12248_v44 = vld [vmem:[%s20703_s11 + $0x30] sm:$0xff] }
 0xdc8   :  { %v3557_v5 = vadd.f32 %v17946_v21, %v3555_v20  ;;  %15535 = vmatprep.subr.bf16.mxu1 %v15534_v60  ;;  %v15542_v21 = vpack.c.bf16 %v12183_v25, %v12182_v32  ;;  %v12226_v20 = vld [vmem:[%s20700_s7 + $0x390] sm:$0xff] }
 0xdc9   :  { %v3556_v24 = vadd.f32 %v17952_v22, %v3554_v23  ;;  %v12184_v22 = vld [vmem:[%s20700_s7 + $0x270] sm:$0xff] }
 0xdca   :  { %v3560_v26 = vmul.f32 1.442695, %v3557_v5  ;;  %v15546_v41 = vpack.c.bf16 %v12185_v12, %v12184_v22  ;;  %v15602_v5 = vpack.c.bf16 %v12227_v54, %v12226_v20  ;;  %v12230_v25 = vld [vmem:[%s20700_s7 + $0x3b0] sm:$0xff]  ;;  %v12235_v12 = vld [vmem:[%s20700_s7 + $0x3d8] sm:$0xff] }
 0xdcb   :  { %v3558_v61 = vmul.f32 1.442695, %v3556_v24  ;;  %15537 = vmatpush3.bf16.msra.mxu1 %v15534_v60  ;;  %v15586_v60 = vpack.c.bf16 %v12221_v9, %v12220_v49  ;;  %v12229_v24 = vld [vmem:[%s20700_s7 + $0x3a8] sm:$0xff]  ;;  %v12234_v22 = vld [vmem:[%s20700_s7 + $0x3d0] sm:$0xff]  ;;  %v12254_v9 = vld [vmem:[%s20704_s13 + $0x80] sm:$0xff] }
 0xdcc   :  { %16767 = vpow2.f32 %v3560_v26  ;;  %15539 = vmatprep.subr.bf16.mxu1 %v15538_v62 }
 0xdcd   :  { %16769 = vpow2.f32 %v3558_v61  ;;  %v12233_v61 = vld [vmem:[%s20700_s7 + $0x3c8] sm:$0xff] }
 0xdce   :  { %16771 = vrcp.f32 %v3294_v27  ;;  %v12232_v27 = vld [vmem:[%s20700_s7 + $0x3c0] sm:$0xff] }
 0xdcf   :  { %15541 = vmatpush3.bf16.msra.mxu1 %v15538_v62  ;;  %v12228_v62 = vld [vmem:[%s20700_s7 + $0x3a0] sm:$0xff] }
 0xdd0   :  { %15543 = vmatprep.subr.bf16.mxu1 %v15542_v21  ;;  %v15606_v32 = vpack.c.bf16 %v12229_v24, %v12228_v62 }
 0xdd3   :  { %15545 = vmatpush3.bf16.msra.mxu1 %v15542_v21  ;;  %v15614_v21 = vpack.c.bf16 %v12233_v61, %v12232_v27 }
 0xdd4   :  { %15547 = vmatprep.subr.bf16.mxu1 %v15546_v41 }
 0xdd6   :  { %v16768_v8 = vpop.eup %16767 }
 0xdd7   :  { %v16770_v59 = vpop.eup %16769  ;;  %15549 = vmatpush3.bf16.msra.mxu1 %v15546_v41  ;;  %v3565_v34 = vsel %vm777_vm1, %v16768_v8, 0.0  ;;  %v15618_v41 = vpack.c.bf16 %v12235_v12, %v12234_v22  ;;  %v12244_v12 = vld [vmem:[%s20705_s9 + $0x1] ss:$0 sm:$0xff] }
 0xdd8   :  { %v16772_v15 = vpop.eup %16771  ;;  %3566 = vadd.xlane.f32.xlu1 %v3565_v34  ;;  %14122 = vmatprep.mubr.msk.f32.mxu0 %vm777_vm1, %v16770_v59  ;;  %v3562_v35 = vsel %vm777_vm1, %v16770_v59, 0.0 }
 0xdd9   :  { %v3383_v37 = vmul.f32 %v16772_v15, %v3374_v17  ;;  %14123 = vmatmul.mubr.msk.f32.vlgmr.msra.gmra.mrb[66].mxu0 %vm777_vm1, %v16768_v8  ;;  %3563 = vadd.xlane.f32.xlu0 %v3562_v35  ;;  %v3297_v17 = vpop.xlane.xlu1 %3296  ;;  %v15626_v8 = vpack.c.bf16 %v12239_v46, %v12238_v53 }
 0xdda   :  { %14060 = vmatmul.mubr.f32.vlgmr.msra.gmra.mrb[20].mxu1 %v2848_v36  ;;  %15559 = vmatprep.subr.bf16.mxu1 %v15558_v29  ;;  %16773 = vrcp.f32 %v3297_v17 }
 0xddb   :  { %15561 = vmatpush3.bf16.msra.mxu1 %v15558_v29  ;;  %14108 = vmatprep.mubr.f32.mxu1 %v3383_v37 }
 0xddc   :  { %15563 = vmatprep.subr.bf16.mxu1 %v15562_v63 }
 0xddf   :  { %15565 = vmatpush3.bf16.msra.mxu1 %v15562_v63 }
 0xde0   :  { %15567 = vmatprep.subr.bf16.mxu1 %v15566_v40 }
 0xde3   :  { %15569 = vmatpush3.bf16.msra.mxu1 %v15566_v40 }
 0xde4   :  { %15571 = vmatprep.subr.bf16.mxu1 %v15570_v43  ;;  %v16774_v23 = vpop.eup %16773 }
 0xde5   :  { %v3384_v56 = vmul.f32 %v16774_v23, %v18059_v7  ;;  %v12231_v7 = vld [vmem:[%s20700_s7 + $0x3b8] sm:$0xff] }
 0xde6   :  { %v15610_v26 = vpack.c.bf16 %v12231_v7, %v12230_v25 }
 0xde7   :  { %15573 = vmatpush3.bf16.msra.mxu1 %v15570_v43 }
 0xde8   :  { %15575 = vmatprep.subr.bf16.mxu1 %v15574_v48 }
 0xdeb   :  { %15577 = vmatpush3.bf16.msra.mxu1 %v15574_v48 }
 0xdec   :  { %15579 = vmatprep.subr.bf16.mxu1 %v15578_v58 }
 0xdef   :  { %15581 = vmatpush3.bf16.msra.mxu1 %v15578_v58  ;;  %v12246_v58 = vld [vmem:[%s20703_s11 + $0x20] sm:$0xff] }
 0xdf0   :  { %15583 = vmatprep.subr.bf16.mxu1 %v15582_v18  ;;  %v15630_v17 = vpack.c.bf16 %v12247_v11, %v12246_v58  ;;  %v12268_v58 = vld [vmem:[%s20704_s13 + $0xf0] sm:$0xff]  ;;  %v12269_v11 = vld [vmem:[%s20704_s13 + $0xf8] sm:$0xff] }
 0xdf2   :  { %15631 = vmatprep.subr.bf16.mxu0 %v15630_v17 }
 0xdf3   :  { %15585 = vmatpush3.bf16.msra.mxu1 %v15582_v18  ;;  %v12249_v18 = vld [vmem:[%s20703_s11 + $0x38] sm:$0xff]  ;;  %15633 = vmatpush3.bf16.msra.mxu0 %v15630_v17  ;;  %v12251_v17 = vld [vmem:[%s20707_s12 + $0x1] ss:$0 sm:$0xff] }
 0xdf4   :  { %15587 = vmatprep.subr.bf16.mxu1 %v15586_v60  ;;  %v15634_v49 = vpack.c.bf16 %v12249_v18, %v12248_v44  ;;  %v15666_v44 = vpack.c.bf16 %v12269_v11, %v12268_v58 }
 0xdf6   :  { %15635 = vmatprep.subr.bf16.mxu0 %v15634_v49 }
 0xdf7   :  { %15589 = vmatpush3.bf16.msra.mxu1 %v15586_v60  ;;  %15637 = vmatpush3.bf16.msra.mxu0 %v15634_v49  ;;  %v12255_v60 = vld [vmem:[%s20704_s13 + $0x88] sm:$0xff] }
 0xdf8   :  { %15599 = vmatprep.subr.bf16.mxu1 %v15598_v10  ;;  %v15638_v30 = vpack.c.bf16 %v12255_v60, %v12254_v9 }
 0xdfa   :  { %14109 = vmatmul.mubr.f32.vlgmr.msra.gmra.mrb[20].mxu1 %v3384_v56  ;;  %15639 = vmatprep.subr.bf16.mxu0 %v15638_v30 }
 0xdfb   :  { %15601 = vmatpush3.bf16.msra.mxu1 %v15598_v10 }
 0xdfc   :  { %15603 = vmatprep.subr.bf16.mxu1 %v15602_v5 }
 0xdff   :  { %15605 = vmatpush3.bf16.msra.mxu1 %v15602_v5 }
 0xe00   :  { %15607 = vmatprep.subr.bf16.mxu1 %v15606_v32 }
 0xe03   :  { %15609 = vmatpush3.bf16.msra.mxu1 %v15606_v32 }
 0xe04   :  { %15611 = vmatprep.subr.bf16.mxu1 %v15610_v26 }
 0xe07   :  { %15613 = vmatpush3.bf16.msra.mxu1 %v15610_v26 }
 0xe08   :  { %15615 = vmatprep.subr.bf16.mxu1 %v15614_v21 }
 0xe0b   :  { %15617 = vmatpush3.bf16.msra.mxu1 %v15614_v21 }
 0xe0c   :  { %15619 = vmatprep.subr.bf16.mxu1 %v15618_v41 }
 0xe0f   :  { %15621 = vmatpush3.bf16.msra.mxu1 %v15618_v41 }
 0xe10   :  { %15623 = vmatprep.subr.bf16.mxu1 %v15622_v31 }
 0xe13   :  { %15625 = vmatpush3.bf16.msra.mxu1 %v15622_v31  ;;  %v12245_v31 = vld [vmem:[%s20720_s30 + $0x1] ss:$0 sm:$0xff] }
 0xe14   :  { %15627 = vmatprep.subr.bf16.mxu1 %v15626_v8 }
 0xe17   :  { %15629 = vmatpush3.bf16.msra.mxu1 %v15626_v8 }
 0xe65   :  { %v3567_v59 = vpop.xlane.xlu1 %3566 }
 0xe66   :  { %v3564_v29 = vpop.xlane.xlu0 %3563 }
 0xe67   :  { %16775 = vrcp.f32 %v3564_v29 }
 0xe68   :  { %16777 = vrcp.f32 %v3567_v59  ;;  %v12256_v59 = vld [vmem:[%s20704_s13 + $0x90] sm:$0xff] }
 0xe71   :  { %v16776_v15 = vpop.eup %16775 }
 0xe72   :  { %v16778_v36 = vpop.eup %16777 }
 0xeac   :  { %v14124_v34 = vpop.f32.mrb[66].mxu0 }
 0xead   :  { %v3644_v35 = vpop.f32.mrb[67].mxu0  ;;  %v3654_v37 = vmul.f32 %v16778_v36, %v14124_v34  ;;  %v12257_v34 = vld [vmem:[%s20704_s13 + $0x98] sm:$0xff]  ;;  %v12259_v36 = vld [vmem:[%s20704_s13 + $0xa8] sm:$0xff] }
 0xeae   :  { %v3653_v63 = vmul.f32 %v16776_v15, %v3644_v35  ;;  %v15642_v15 = vpack.c.bf16 %v12257_v34, %v12256_v59  ;;  %v12258_v35 = vld [vmem:[%s20704_s13 + $0xa0] sm:$0xff] }
 0xeb0   :  { %14157 = vmatprep.mubr.f32.mxu1 %v3653_v63  ;;  %v15646_v63 = vpack.c.bf16 %v12259_v36, %v12258_v35  ;;  %v12289_v35 = vld [vmem:[%s20696_s5 + $0x368] sm:$0xff] }
 0xeb1   :  { %14158 = vmatmul.mubr.f32.vlgmr.msra.gmra.mrb[20].mxu1 %v3654_v37  ;;  %v12260_v37 = vld [vmem:[%s20704_s13 + $0xb0] sm:$0xff] }
 0xf84   :  { %v14159_v16 = vpop.f32.mrb[20].mxu1 }
 0xf85   :  { %v3750_v40 = vadd.f32 %v14159_v16, %v17697_v50  ;;  %v3738_v3 = vpop.f32.mrb[21].mxu1  ;;  %v12261_v16 = vld [vmem:[%s20704_s13 + $0xb8] sm:$0xff] }
 0xf86   :  { %v3749_v42 = vadd.f32 %v3738_v3, %v17699_v51  ;;  %v12263_v3 = vld [vmem:[%s20704_s13 + $0xc8] sm:$0xff] }
 0xf87   :  { %v18200_v43 = vadd.f32 %v12241_v39, %v3750_v40  ;;  %v12262_v40 = vld [vmem:[%s20704_s13 + $0xc0] sm:$0xff] }
 0xf88   :  { %v18202_v45 = vadd.f32 %v12241_v39, %v3749_v42  ;;  %v15650_v39 = vpack.c.bf16 %v12261_v16, %v12260_v37  ;;  %v12264_v42 = vld [vmem:[%s20704_s13 + $0xd0] sm:$0xff]  ;;  %v12288_v37 = vld [vmem:[%s20696_s5 + $0x360] sm:$0xff] }
 0xf89   :  { %v3768_v47 = vsel %vm66_vm0, %v18200_v43, 0.0  ;;  %v3774_v48 = vmul.f32 %v18200_v43, %v18200_v43 }
 0xf8a   :  { %3769 = vadd.xlane.f32.xlu1 %v3768_v47  ;;  %v3765_v55 = vsel %vm66_vm0, %v18202_v45, 0.0  ;;  %v3773_v50 = vmul.f32 %v18202_v45, %v18202_v45  ;;  %v15654_v47 = vpack.c.bf16 %v12263_v3, %v12262_v40  ;;  %v12313_v40 = vld [vmem:[%s20696_s5 + $0x428] sm:$0xff] }
 0xf8b   :  { %3766 = vadd.xlane.f32.xlu0 %v3765_v55  ;;  %v3778_v51 = vsel %vm66_vm0, %v3774_v48, 0.0  ;;  %v12265_v48 = vld [vmem:[%s20704_s13 + $0xd8] sm:$0xff] }
 0xf8c   :  { %v3775_v57 = vsel %vm66_vm0, %v3773_v50, 0.0  ;;  %v15658_v55 = vpack.c.bf16 %v12265_v48, %v12264_v42  ;;  %v12266_v50 = vld [vmem:[%s20704_s13 + $0xe0] sm:$0xff] }
 0xf8d   :  { %v12300_v42 = vld [vmem:[%s20696_s5 + $0x3c0] sm:$0xff] }
 0xf8e   :  { %3779 = vadd.xlane.f32.xlu1 %v3778_v51  ;;  %v12267_v51 = vld [vmem:[%s20704_s13 + $0xe8] sm:$0xff] }
 0xf8f   :  { %3776 = vadd.xlane.f32.xlu0 %v3775_v57  ;;  %v15662_v57 = vpack.c.bf16 %v12267_v51, %v12266_v50  ;;  %v12291_v50 = vld [vmem:[%s20696_s5 + $0x378] sm:$0xff] }
0x1017   :  { %v3770_v19 = vpop.xlane.xlu1 %3769 }
0x1018   :  { %v3772_v10 = vmul.f32 0.03125, %v3770_v19  ;;  %v3767_v20 = vpop.xlane.xlu0 %3766 }
0x1019   :  { %v3771_v54 = vmul.f32 0.03125, %v3767_v20 }
0x101a   :  { %v3784_v56 = vmul.f32 %v3772_v10, %v3772_v10  ;;  %v3788_v61 = vsub.f32 %v18200_v43, %v3772_v10 }
0x101b   :  { %v3780_v23 = vpop.xlane.xlu1 %3779  ;;  %v3783_v24 = vmul.f32 %v3771_v54, %v3771_v54  ;;  %v3787_v22 = vsub.f32 %v18202_v45, %v3771_v54 }
0x101c   :  { %v3782_v5 = vmul.f32 0.03125, %v3780_v23  ;;  %v3777_v62 = vpop.xlane.xlu0 %3776 }
0x101d   :  { %v3781_v32 = vmul.f32 0.03125, %v3777_v62 }
0x101e   :  { %v3786_v25 = vsub.f32 %v3782_v5, %v3784_v56 }
0x101f   :  { %v3785_v7 = vsub.f32 %v3781_v32, %v3783_v24 }
0x1020   :  { %v3790_v26 = vadd.f32 1e-05, %v3786_v25 }
0x1021   :  { %v3789_v27 = vadd.f32 1e-05, %v3785_v7 }
0x1022   :  { %16779 = vrsqrt.f32 %v3790_v26 }
0x1023   :  { %16781 = vrsqrt.f32 %v3789_v27 }
0x102c   :  { %v16780_v21 = vpop.eup %16779 }
0x102d   :  { %v16782_v41 = vpop.eup %16781  ;;  %v3794_v6 = vmul.f32 %v16780_v21, %v3788_v61 }
0x102e   :  { %v3793_v28 = vmul.f32 %v16782_v41, %v3787_v22 }
0x102f   :  { %v3802_v53 = vmul.f32 %v12244_v12, %v3794_v6  ;;  %v12271_v6 = vld [vmem:[%s20708_s14 + $0x1] ss:$0 sm:$0xff] }
0x1030   :  { %v3801_v46 = vmul.f32 %v12244_v12, %v3793_v28 }
0x1031   :  { %v3810_v29 = vadd.f32 %v12245_v31, %v3802_v53 }
0x1032   :  { %v3809_v8 = vadd.f32 %v12245_v31, %v3801_v46 }
0x1034   :  { %14168 = vmatprep.mubr.msk.f32.mxu0 %vm66_vm0, %v3809_v8 }
0x1035   :  { %14169 = vmatmul.mubr.msk.f32.vlgmr.msra.gmra.mrb[68].mxu0 %vm66_vm0, %v3810_v29 }
0x1036   :  { %15641 = vmatpush3.bf16.msra.mxu0 %v15638_v30 }
0x1037   :  { %15643 = vmatprep.subr.bf16.mxu0 %v15642_v15 }
0x103a   :  { %15645 = vmatpush3.bf16.msra.mxu0 %v15642_v15  ;;  %v12277_v15 = vld [vmem:[%s20696_s5 + $0x308] sm:$0xff] }
0x103b   :  { %15647 = vmatprep.subr.bf16.mxu0 %v15646_v63  ;;  %v15670_v36 = vpack.c.bf16 %v12289_v35, %v12277_v15  ;;  %v12280_v15 = vld [vmem:[%s20696_s5 + $0x320] sm:$0xff] }
0x103c   :  { %v12292_v35 = vld [vmem:[%s20696_s5 + $0x380] sm:$0xff] }
0x103e   :  { %15649 = vmatpush3.bf16.msra.mxu0 %v15646_v63  ;;  %v12276_v63 = vld [vmem:[%s20696_s5 + $0x300] sm:$0xff] }
0x103f   :  { %15651 = vmatprep.subr.bf16.mxu0 %v15650_v39  ;;  %v15672_v16 = vpack.c.bf16 %v12288_v37, %v12276_v63  ;;  %v12317_v63 = vld [vmem:[%s20696_s5 + $0x448] sm:$0xff]  ;;  %v15688_v37 = vpack.c.bf16 %v12292_v35, %v12280_v15 }
0x1042   :  { %15653 = vmatpush3.bf16.msra.mxu0 %v15650_v39  ;;  %v12301_v39 = vld [vmem:[%s20696_s5 + $0x3c8] sm:$0xff] }
0x1043   :  { %15655 = vmatprep.subr.bf16.mxu0 %v15654_v47  ;;  %v15674_v3 = vpack.c.bf16 %v12313_v40, %v12301_v39  ;;  %v12304_v39 = vld [vmem:[%s20696_s5 + $0x3e0] sm:$0xff] }
0x1044   :  { %v12316_v40 = vld [vmem:[%s20696_s5 + $0x440] sm:$0xff] }
0x1046   :  { %15657 = vmatpush3.bf16.msra.mxu0 %v15654_v47  ;;  %v12312_v47 = vld [vmem:[%s20696_s5 + $0x420] sm:$0xff] }
0x1047   :  { %15659 = vmatprep.subr.bf16.mxu0 %v15658_v55  ;;  %v15676_v48 = vpack.c.bf16 %v12312_v47, %v12300_v42  ;;  %v12295_v42 = vld [vmem:[%s20696_s5 + $0x398] sm:$0xff]  ;;  %v15692_v47 = vpack.c.bf16 %v12316_v40, %v12304_v39 }
0x104a   :  { %15661 = vmatpush3.bf16.msra.mxu0 %v15658_v55  ;;  %v12279_v55 = vld [vmem:[%s20696_s5 + $0x318] sm:$0xff] }
0x104b   :  { %15663 = vmatprep.subr.bf16.mxu0 %v15662_v57  ;;  %v15678_v51 = vpack.c.bf16 %v12291_v50, %v12279_v55  ;;  %v12282_v55 = vld [vmem:[%s20696_s5 + $0x330] sm:$0xff] }
0x104c   :  { %v12294_v50 = vld [vmem:[%s20696_s5 + $0x390] sm:$0xff] }
0x104e   :  { %15665 = vmatpush3.bf16.msra.mxu0 %v15662_v57 }
0x104f   :  { %15667 = vmatprep.subr.bf16.mxu0 %v15666_v44 }
0x1052   :  { %15669 = vmatpush3.bf16.msra.mxu0 %v15666_v44 }
0x1053   :  { %15671 = vmatprep.subr.bf16.mxu0 %v15670_v36  ;;  %v12305_v36 = vld [vmem:[%s20696_s5 + $0x3e8] sm:$0xff] }
0x1108   :  { %v14170_v18 = vpop.f32.mrb[68].mxu0 }
0x1109   :  { %v3902_v49 = vadd.f32 %v14170_v18, %v12251_v17  ;;  %v3896_v9 = vpop.f32.mrb[69].mxu0 }
0x110a   :  { %v3897_v60 = vadd.f32 %v12251_v17, %v3896_v9 }
0x110b   :  { %v3908_v30 = vmul.f32 0.044715, %v3902_v49  ;;  %v3906_v61 = vmul.f32 0.5, %v3902_v49 }
0x110c   :  { %v3907_v19 = vmul.f32 0.044715, %v3897_v60  ;;  %v3905_v26 = vmul.f32 0.5, %v3897_v60 }
0x110d   :  { %v3910_v10 = vmul.f32 %v3908_v30, %v3902_v49 }
0x110e   :  { %v3909_v20 = vmul.f32 %v3907_v19, %v3897_v60 }
0x110f   :  { %v3912_v54 = vmul.f32 %v3910_v10, %v3902_v49 }
0x1110   :  { %v3911_v23 = vmul.f32 %v3909_v20, %v3897_v60 }
0x1111   :  { %v3914_v56 = vadd.f32 %v3912_v54, %v3902_v49 }
0x1112   :  { %v3913_v5 = vadd.f32 %v3911_v23, %v3897_v60 }
0x1113   :  { %v3916_v62 = vmul.f32 0.7978846, %v3914_v56 }
0x1114   :  { %v3915_v24 = vmul.f32 0.7978846, %v3913_v5  ;;  %v12274_v5 = vld [vmem:[%s20697_s3 + $0x2] ss:$0 sm:$0xff] }
0x1115   :  { %16783 = vtanh.f32 %v3916_v62 }
0x1116   :  { %16785 = vtanh.f32 %v3915_v24  ;;  %v12278_v24 = vld [vmem:[%s20696_s5 + $0x310] sm:$0xff] }
0x111f   :  { %v16784_v32 = vpop.eup %16783 }
0x1120   :  { %v16786_v25 = vpop.eup %16785  ;;  %v3920_v7 = vadd.f32 1.0, %v16784_v32  ;;  %v12290_v32 = vld [vmem:[%s20696_s5 + $0x370] sm:$0xff] }
0x1121   :  { %v3919_v27 = vadd.f32 1.0, %v16786_v25  ;;  %v12275_v25 = vld [vmem:[%s20698_s4 + $0x2] ss:$0 sm:$0xff] }
0x1122   :  { %v3922_v22 = vmul.f32 %v3920_v7, %v3906_v61  ;;  %v12303_v7 = vld [vmem:[%s20696_s5 + $0x3d8] sm:$0xff] }
0x1123   :  { %v3921_v21 = vmul.f32 %v3919_v27, %v3905_v26  ;;  %v12315_v26 = vld [vmem:[%s20696_s5 + $0x438] sm:$0xff] }
0x1125   :  { %14203 = vmatprep.mubr.f32.mxu0 %v3921_v21 }
0x1126   :  { %14204 = vmatmul.mubr.f32.vlgmr.msra.gmra.mrb[70].mxu0 %v3922_v22  ;;  %v15680_v22 = vpack.c.bf16 %v12290_v32, %v12278_v24  ;;  %v12299_v24 = vld [vmem:[%s20696_s5 + $0x3b8] sm:$0xff] }
0x1127   :  { %4261 = vmatprep.mubr.f32.mxu0 %v16977_v38  ;;  %15673 = vmatpush1.bf16.msra.mxu0 %v15672_v16  ;;  %v15690_v16 = vpack.c.bf16 %v12317_v63, %v12305_v36 }
0x1128   :  { %15675 = vmatprep.subr.bf16.mxu0 %v15674_v3  ;;  %v12283_v3 = vld [vmem:[%s20696_s5 + $0x338] sm:$0xff] }
0x112b   :  { %15677 = vmatpush1.bf16.msra.mxu0 %v15676_v48  ;;  %v15694_v48 = vpack.c.bf16 %v12295_v42, %v12283_v3 }
0x112c   :  { %15679 = vmatprep.subr.bf16.mxu0 %v15678_v51  ;;  %v12307_v51 = vld [vmem:[%s20696_s5 + $0x3f8] sm:$0xff] }
0x11f9   :  { %v14205_v12 = vpop.f32.mrb[70].mxu0 }
0x11fa   :  { %v4016_v41 = vadd.f32 %v14205_v12, %v18200_v43  ;;  %v4006_v28 = vpop.f32.mrb[71].mxu0 }
0x11fb   :  { %v4015_v31 = vadd.f32 %v4006_v28, %v18202_v45  ;;  %v12302_v28 = vld [vmem:[%s20696_s5 + $0x3d0] sm:$0xff] }
0x11fc   :  { %v18293_v53 = vadd.f32 %v12271_v6, %v4016_v41 }
0x11fd   :  { %v18295_v46 = vadd.f32 %v12271_v6, %v4015_v31  ;;  %v15682_v6 = vpack.c.bf16 %v12315_v26, %v12303_v7  ;;  %v12314_v31 = vld [vmem:[%s20696_s5 + $0x430] sm:$0xff] }
0x11fe   :  { %v4040_v59 = vmul.f32 %v18293_v53, %v18293_v53  ;;  %v4034_v45 = vsel %vm66_vm0, %v18293_v53, 0.0  ;;  %v12286_v7 = vld [vmem:[%s20696_s5 + $0x350] sm:$0xff] }
0x11ff   :  { %v4031_v8 = vsel %vm66_vm0, %v18295_v46, 0.0  ;;  %v4039_v29 = vmul.f32 %v18295_v46, %v18295_v46  ;;  %v12298_v26 = vld [vmem:[%s20696_s5 + $0x3b0] sm:$0xff] }
0x1200   :  { %4032 = vadd.xlane.f32.xlu0 %v4031_v8  ;;  %v4044_v34 = vsel %vm66_vm0, %v4040_v59, 0.0  ;;  %v12281_v8 = vld [vmem:[%s20696_s5 + $0x328] sm:$0xff]  ;;  %v15684_v59 = vpack.c.bf16 %v12314_v31, %v12302_v28  ;;  %v18501_v31 = vld [vmem:[%s20699_s6 + $0x18] sm:$0xff] }
0x1201   :  { %v4041_v43 = vsel %vm66_vm0, %v4039_v29, 0.0  ;;  %v12293_v29 = vld [vmem:[%s20696_s5 + $0x388] sm:$0xff]  ;;  %v4154_v39 = vrot.slane %v18501_v31, %v17308_v2 }
0x1202   :  { %4042 = vadd.xlane.f32.xlu1 %v4041_v43 }
0x1204   :  { %4035 = vadd.xlane.f32.xlu0 %v4034_v45 }
0x1206   :  { %4045 = vadd.xlane.f32.xlu1 %v4044_v34  ;;  %v15686_v34 = vpack.c.bf16 %v12293_v29, %v12281_v8  ;;  %v4134_v8 = vrot.slane %v18501_v31, %v17278_v52 }
0x128d   :  { %v4033_v57 = vpop.xlane.xlu0 %4032 }
0x128e   :  { %v4037_v58 = vmul.f32 0.03125, %v4033_v57  ;;  %v12319_v57 = vld [vmem:[%s20696_s5 + $0x458] sm:$0xff] }
0x128f   :  { %v4043_v11 = vpop.xlane.xlu1 %4042 }
0x1290   :  { %v4049_v44 = vmul.f32 %v4037_v58, %v4037_v58  ;;  %v4047_v17 = vmul.f32 0.03125, %v4043_v11  ;;  %v4053_v23 = vsub.f32 %v18295_v46, %v4037_v58  ;;  %v15696_v58 = vpack.c.bf16 %v12294_v50, %v12282_v55 }
0x1291   :  { %v4036_v18 = vpop.xlane.xlu0 %4035  ;;  %v15698_v11 = vpack.c.bf16 %v12319_v57, %v12307_v51 }
0x1292   :  { %v4051_v49 = vsub.f32 %v4047_v17, %v4049_v44  ;;  %v4038_v9 = vmul.f32 0.03125, %v4036_v18  ;;  %v12306_v44 = vld [vmem:[%s20696_s5 + $0x3f0] sm:$0xff]  ;;  %v12285_v18 = vld [vmem:[%s20696_s5 + $0x348] sm:$0xff] }
0x1293   :  { %v4046_v60 = vpop.xlane.xlu1 %4045  ;;  %v12318_v17 = vld [vmem:[%s20696_s5 + $0x450] sm:$0xff] }
0x1294   :  { %v4055_v30 = vadd.f32 1e-05, %v4051_v49  ;;  %v4050_v19 = vmul.f32 %v4038_v9, %v4038_v9  ;;  %v4048_v10 = vmul.f32 0.03125, %v4046_v60  ;;  %v4054_v61 = vsub.f32 %v18293_v53, %v4038_v9  ;;  %v12297_v49 = vld [vmem:[%s20696_s5 + $0x3a8] sm:$0xff] }
0x1295   :  { %v15700_v9 = vpack.c.bf16 %v12318_v17, %v12306_v44  ;;  %v15702_v60 = vpack.c.bf16 %v12297_v49, %v12285_v18  ;;  %v4162_v44 = vrot.slane %v18501_v31, %v17310_v4 }
0x1296   :  { %16787 = vrsqrt.f32 %v4055_v30  ;;  %v4052_v20 = vsub.f32 %v4048_v10, %v4050_v19  ;;  %v12284_v30 = vld [vmem:[%s20696_s5 + $0x340] sm:$0xff]  ;;  %v12309_v10 = vld [vmem:[%s20696_s5 + $0x408] sm:$0xff] }
0x1297   :  { %v12296_v19 = vld [vmem:[%s20696_s5 + $0x3a0] sm:$0xff] }
0x1298   :  { %v4056_v54 = vadd.f32 1e-05, %v4052_v20  ;;  %v12321_v20 = vld [vmem:[%s20696_s5 + $0x468] sm:$0xff] }
0x129a   :  { %16789 = vrsqrt.f32 %v4056_v54  ;;  %v15704_v54 = vpack.c.bf16 %v12296_v19, %v12284_v30  ;;  %v12325_v19 = vld [vmem:[%s20699_s6 + $0x20] sm:$0xf] }
0x12a0   :  { %v16788_v56 = vpop.eup %16787 }
0x12a1   :  { %v4059_v62 = vmul.f32 %v16788_v56, %v4053_v23  ;;  %v15706_v23 = vpack.c.bf16 %v12321_v20, %v12309_v10  ;;  %v12308_v56 = vld [vmem:[%s20696_s5 + $0x400] sm:$0xff] }
0x12a3   :  { %v4067_v27 = vmul.f32 %v12274_v5, %v4059_v62  ;;  %v12287_v62 = vld [vmem:[%s20696_s5 + $0x358] sm:$0xff] }
0x12a4   :  { %v16790_v21 = vpop.eup %16789 }
0x12a5   :  { %v4060_v12 = vmul.f32 %v16790_v21, %v4054_v61  ;;  %v18357_v41 = vadd.f32 %v12275_v25, %v4067_v27  ;;  %v12311_v27 = vld [vmem:[%s20696_s5 + $0x418] sm:$0xff]  ;;  %v15712_v21 = vpack.c.bf16 %v12298_v26, %v12286_v7  ;;  %v4174_v26 = vrot.slane %v12325_v19, %v17319_v13 }
0x12a6   :  { %v12323_v61 = vld [vmem:[%s20696_s5 + $0x478] sm:$0xff] }
0x12a7   :  { %v4068_v43 = vmul.f32 %v12274_v5, %v4060_v12  ;;  %12326 = vmatmul.mubr.msk.f32.vlgmr.msra.gmra.mrb[72].mxu0 %vm66_vm0, %v18357_v41  ;;  %v12320_v5 = vld [vmem:[%s20696_s5 + $0x460] sm:$0xff]  ;;  %v12310_v12 = vld [vmem:[%s20696_s5 + $0x410] sm:$0xff] }
0x12a8   :  { %15681 = vmatpush1.bf16.msra.mxu0 %v15680_v22  ;;  %4267 = vmatprep.mubr.f32.mxu0 %v16977_v38  ;;  %v15708_v32 = vpack.c.bf16 %v12320_v5, %v12308_v56  ;;  %v15714_v22 = vpack.c.bf16 %v12323_v61, %v12311_v27  ;;  %v4166_v56 = vrot.slane %v12325_v19, %v17278_v52 }
0x12a9   :  { %v18374_v45 = vadd.f32 %v12275_v25, %v4068_v43  ;;  %15683 = vmatprep.subr.bf16.mxu0 %v15682_v6  ;;  %v15710_v25 = vpack.c.bf16 %v12299_v24, %v12287_v62  ;;  %v12322_v6 = vld [vmem:[%s20696_s5 + $0x470] sm:$0xff]  ;;  %v4170_v62 = vrot.slane %v12325_v19, %v17331_v33 }
0x12aa   :  { %v15716_v28 = vpack.c.bf16 %v12322_v6, %v12310_v12 }
0x12ab   :  { %12327 = vmatmul.mubr.msk.f32.gmra.mrb[74].mxu0 %vm66_vm0, %v18374_v45 }
0x12ac   :  { %15685 = vmatpush1.bf16.msra.mxu0 %v15684_v59  ;;  %4338 = vmatprep.mubr.f32.mxu0 %v16977_v38 }
0x12ad   :  { %15687 = vmatprep.subr.bf16.mxu0 %v15686_v34 }
0x12af   :  { %12328 = vmatmul.mubr.msk.f32.vlgmr.msra.gmra.mrb[76].mxu0 %vm66_vm0, %v18357_v41 }
0x12b0   :  { %15689 = vmatpush1.bf16.msra.mxu0 %v15688_v37  ;;  %4344 = vmatprep.mubr.f32.mxu0 %v16977_v38  ;;  %v4150_v37 = vrot.slane %v18501_v31, %v17304_v0 }
0x12b1   :  { %15691 = vmatprep.subr.bf16.mxu0 %v15690_v16 }
0x12b3   :  { %12329 = vmatmul.mubr.msk.f32.gmra.mrb[78].mxu0 %vm66_vm0, %v18374_v45 }
0x12b4   :  { %15693 = vmatpush1.bf16.msra.mxu0 %v15692_v47  ;;  %4415 = vmatprep.mubr.f32.mxu0 %v16977_v38 }
0x12b5   :  { %15695 = vmatprep.subr.bf16.mxu0 %v15694_v48 }
0x12b7   :  { %12330 = vmatmul.mubr.msk.f32.vlgmr.msra.gmra.mrb[80].mxu0 %vm66_vm0, %v18357_v41 }
0x12b8   :  { %15697 = vmatpush1.bf16.msra.mxu0 %v15696_v58  ;;  %4421 = vmatprep.mubr.f32.mxu0 %v16977_v38  ;;  %v4158_v58 = vrot.slane %v18501_v31, %v17306_v1 }
0x12b9   :  { %15699 = vmatprep.subr.bf16.mxu0 %v15698_v11 }
0x12bb   :  { %12331 = vmatmul.mubr.msk.f32.gmra.mrb[82].mxu0 %vm66_vm0, %v18374_v45 }
0x12bc   :  { %15701 = vmatpush1.bf16.msra.mxu0 %v15700_v9  ;;  %4492 = vmatprep.mubr.f32.mxu0 %v16977_v38 }
0x12bd   :  { %15703 = vmatprep.subr.bf16.mxu0 %v15702_v60 }
0x12bf   :  { %12332 = vmatmul.mubr.msk.f32.vlgmr.msra.gmra.mrb[84].mxu0 %vm66_vm0, %v18357_v41 }
0x12c0   :  { %15705 = vmatpush1.bf16.msra.mxu0 %v15704_v54  ;;  %4498 = vmatprep.mubr.f32.mxu0 %v16977_v38 }
0x12c1   :  { %15707 = vmatprep.subr.bf16.mxu0 %v15706_v23 }
0x12c3   :  { %12333 = vmatmul.mubr.msk.f32.gmra.mrb[86].mxu0 %vm66_vm0, %v18374_v45 }
0x12c4   :  { %15709 = vmatpush1.bf16.msra.mxu0 %v15708_v32  ;;  %4569 = vmatprep.mubr.f32.mxu0 %v16977_v38 }
0x12c5   :  { %15711 = vmatprep.subr.bf16.mxu0 %v15710_v25 }
0x12c7   :  { %12334 = vmatmul.mubr.msk.f32.vlgmr.msra.gmra.mrb[88].mxu0 %vm66_vm0, %v18357_v41 }
0x12c8   :  { %15713 = vmatpush1.bf16.msra.mxu0 %v15712_v21  ;;  %4575 = vmatprep.mubr.f32.mxu0 %v16977_v38  ;;  %v4178_v21 = vrot.slane %v12325_v19, %v17321_v14 }
0x12c9   :  { %15715 = vmatprep.subr.bf16.mxu0 %v15714_v22 }
0x12cb   :  { %12335 = vmatmul.mubr.msk.f32.gmra.mrb[90].mxu0 %vm66_vm0, %v18374_v45 }
0x12cc   :  { %15717 = vmatpush1.bf16.msra.mxu0 %v15716_v28  ;;  %4646 = vmatprep.mubr.f32.mxu0 %v16977_v38 }
0x12cf   :  { %12336 = vmatmul.mubr.msk.f32.vlgmr.msra.gmra.mrb[92].mxu0 %vm66_vm0, %v18357_v41 }
0x12d0   :  { %4652 = vmatprep.mubr.f32.mxu0 %v16977_v38 }
0x12d3   :  { %12337 = vmatmul.mubr.msk.f32.gmra.mrb[94].mxu0 %vm66_vm0, %v18374_v45 }
0x137a   :  { %v4263_v29 = vpop.f32.mrb[72].mxu0 }
0x137b   :  { %v4264_v43 = vadd.f32 %v4263_v29, %v4134_v8  ;;  %v18505_v59 = vpop.f32.mrb[73].mxu0 }
0x137d   :  { %14210 = vmatprep.mubr.f32.mxu0 %v4264_v43 }
0x137e   :  { %v4269_v34 = vpop.f32.mrb[74].mxu0 }
0x137f   :  { %v18507_v41 = vpop.f32.mrb[75].mxu0  ;;  %v4270_v10 = vadd.f32 %v4269_v34, %v4134_v8 }
0x1382   :  { %v18509_v15 = vpop.f32.mrb[76].mxu0 }
0x1383   :  { %v18511_v35 = vpop.f32.mrb[77].mxu0 }
0x1386   :  { %v18513_v45 = vpop.f32.mrb[78].mxu0 }
0x1387   :  { %v18515_v36 = vpop.f32.mrb[79].mxu0 }
0x138a   :  { %v4417_v63 = vpop.f32.mrb[80].mxu0 }
0x138b   :  { %v4419_v16 = vpop.f32.mrb[81].mxu0  ;;  %v4418_v3 = vadd.f32 %v4417_v63, %v4150_v37 }
0x138c   :  { %v4420_v48 = vadd.f32 %v4419_v16, %v4154_v39 }
0x138e   :  { %v4423_v40 = vpop.f32.mrb[82].mxu0 }
0x138f   :  { %v4424_v42 = vadd.f32 %v4423_v40, %v4150_v37  ;;  %v4425_v47 = vpop.f32.mrb[83].mxu0 }
0x1390   :  { %v4426_v55 = vadd.f32 %v4425_v47, %v4154_v39 }
0x1391   :  { %v15718_v50 = vpack.c.bf16 %v4424_v42, %v4418_v3 }
0x1392   :  { %v18521_v51 = vpack.c.bf16 %v4426_v55, %v4420_v48  ;;  %v4494_v57 = vpop.f32.mrb[84].mxu0  ;;  %v18542_v48 = vld [vmem:[%s20701_s2 + $0x8] sm:$0xff] }
0x1393   :  { %v4496_v11 = vpop.f32.mrb[85].mxu0  ;;  %15719 = vmatprep.subr.bf16.mxu0 %v15718_v50  ;;  %v4495_v18 = vadd.f32 %v4494_v57, %v4158_v58 }
0x1394   :  { %15721 = vmatpush3.bf16.xpose.msra.mxu0 %v15718_v50  ;;  %v4497_v60 = vadd.f32 %v4496_v11, %v4162_v44  ;;  %v18548_v50 = vld [vmem:[%s20701_s2] sm:$0xff] }
0x1396   :  { %v4500_v17 = vpop.f32.mrb[86].mxu0 }
0x1397   :  { %v4501_v49 = vadd.f32 %v4500_v17, %v4158_v58  ;;  %v4502_v9 = vpop.f32.mrb[87].mxu0 }
0x1398   :  { %v4503_v30 = vadd.f32 %v4502_v9, %v4162_v44  ;;  %v4138_v44 = vrot.slane %v18501_v31, %v17331_v33  ;;  %v4142_v9 = vrot.slane %v18501_v31, %v17319_v13 }
0x1399   :  { %v15798_v20 = vpack.c.bf16 %v4501_v49, %v4495_v18 }
0x139a   :  { %v18530_v54 = vpack.c.bf16 %v4503_v30, %v4497_v60  ;;  %v4571_v23 = vpop.f32.mrb[88].mxu0  ;;  %v4266_v49 = vadd.f32 %v18505_v59, %v4138_v44  ;;  %v4272_v60 = vadd.f32 %v18507_v41, %v4138_v44  ;;  %v4341_v30 = vadd.f32 %v18509_v15, %v4142_v9  ;;  %v12366_v44 = vld [vmem:[%s20700_s7 + $0x4c0] sm:$0xff] }
0x139b   :  { %v4573_v5 = vpop.f32.mrb[89].mxu0  ;;  %14211 = vmatmul.mubr.f32.vlgmr.msra.gmra.mrb[96].mxu0 %v4270_v10  ;;  %v4572_v32 = vadd.f32 %v4571_v23, %v4166_v56  ;;  %v4347_v59 = vadd.f32 %v18513_v45, %v4142_v9  ;;  %v12369_v9 = vld [vmem:[%s20700_s7 + $0x4d8] sm:$0xff] }
0x139c   :  { %v4574_v27 = vadd.f32 %v4573_v5, %v4170_v62 }
0x139e   :  { %v4577_v24 = vpop.f32.mrb[90].mxu0 }
0x139f   :  { %v4578_v25 = vadd.f32 %v4577_v24, %v4166_v56  ;;  %v4579_v7 = vpop.f32.mrb[91].mxu0 }
0x13a0   :  { %v4580_v61 = vadd.f32 %v4579_v7, %v4170_v62 }
0x13a1   :  { %v15722_v22 = vpack.c.bf16 %v4578_v25, %v4572_v32 }
0x13a2   :  { %v15730_v12 = vpack.c.bf16 %v4580_v61, %v4574_v27  ;;  %v4648_v6 = vpop.f32.mrb[92].mxu0 }
0x13a3   :  { %v4649_v28 = vadd.f32 %v4648_v6, %v4174_v26  ;;  %v4650_v8 = vpop.f32.mrb[93].mxu0  ;;  %15723 = vmatprep.subr.bf16.mxu0 %v15722_v22 }
0x13a4   :  { %v4651_v29 = vadd.f32 %v4650_v8, %v4178_v21  ;;  %15725 = vmatpush3.bf16.msra.mxu0 %v15722_v22  ;;  %15731 = vmatprep.subr.bf16.mxu1 %v15730_v12  ;;  %v4146_v8 = vrot.slane %v18501_v31, %v17321_v14 }
0x13a5   :  { %15727 = vmatprep.subr.bf16.mxu0 %v18521_v51  ;;  %15733 = vmatpush3.bf16.msra.mxu1 %v15730_v12 }
0x13a6   :  { %v4654_v43 = vpop.f32.mrb[94].mxu0  ;;  %v4349_v31 = vadd.f32 %v18515_v36, %v4146_v8  ;;  %v12361_v36 = vld [vmem:[%s20700_s7 + $0x498] sm:$0xff] }
0x13a7   :  { %v4655_v34 = vadd.f32 %v4654_v43, %v4174_v26  ;;  %v4656_v63 = vpop.f32.mrb[95].mxu0 }
0x13a8   :  { %v4657_v37 = vadd.f32 %v4656_v63, %v4178_v21 }
0x13a9   :  { %v15802_v16 = vpack.c.bf16 %v4655_v34, %v4649_v28 }
0x13aa   :  { %v18537_v39 = vpack.c.bf16 %v4657_v37, %v4651_v29  ;;  %v4343_v37 = vadd.f32 %v18511_v35, %v4146_v8  ;;  %v12358_v35 = vld [vmem:[%s20700_s7 + $0x480] sm:$0xff] }
0x13ab   :  { %v12344_v8 = vld [vmem:[%s20700_s7 + $0x420] sm:$0xff] }
0x146e   :  { %v14212_v40 = vpop.f32.mrb[96].mxu0 }
0x146f   :  { %v4735_v3 = vmul.f32 0.35355338, %v14212_v40  ;;  %v4725_v42 = vpop.f32.mrb[97].mxu0  ;;  %v12359_v40 = vld [vmem:[%s20700_s7 + $0x488] sm:$0xff] }
0x1470   :  { %v4734_v47 = vmul.f32 0.35355338, %v4725_v42 }
0x1471   :  { %v4737_v55 = vadd.f32 %v18542_v48, %v4735_v3  ;;  %v15734_v3 = vpack.c.bf16 %v12359_v40, %v12358_v35  ;;  %v12349_v35 = vld [vmem:[%s20700_s7 + $0x448] sm:$0xff] }
0x1472   :  { %v4736_v57 = vadd.f32 %v18548_v50, %v4734_v47  ;;  %v12363_v47 = vld [vmem:[%s20700_s7 + $0x4a8] sm:$0xff] }
0x1473   :  { %v4740_v58 = vmul.f32 1.442695, %v4737_v55  ;;  %15735 = vmatprep.subr.bf16.mxu1 %v15734_v3 }
0x1474   :  { %v4738_v11 = vmul.f32 1.442695, %v4736_v57  ;;  %v12364_v57 = vld [vmem:[%s20700_s7 + $0x4b0] sm:$0xff] }
0x1476   :  { %16791 = vpow2.f32 %v4738_v11 }
0x1477   :  { %16793 = vpow2.f32 %v4740_v58  ;;  %v12365_v58 = vld [vmem:[%s20700_s7 + $0x4b8] sm:$0xff] }
0x1478   :  { %v15746_v11 = vpack.c.bf16 %v12365_v58, %v12364_v57 }
0x1480   :  { %v16792_v17 = vpop.eup %16791 }
0x1481   :  { %v16794_v18 = vpop.eup %16793  ;;  %14217 = vmatprep.mubr.msk.f32.mxu0 %vm777_vm1, %v16792_v17  ;;  %v4742_v29 = vsel %vm777_vm1, %v16792_v17, 0.0  ;;  %v12367_v17 = vld [vmem:[%s20700_s7 + $0x4c8] sm:$0xff] }
0x1482   :  { %14218 = vmatmul.mubr.msk.f32.vlgmr.msra.gmra.mrb[98].mxu0 %vm777_vm1, %v16794_v18  ;;  %v4745_v28 = vsel %vm777_vm1, %v16794_v18, 0.0  ;;  %v15750_v18 = vpack.c.bf16 %v12367_v17, %v12366_v44  ;;  %v12352_v44 = vld [vmem:[%s20700_s7 + $0x460] sm:$0xff]  ;;  %v12353_v17 = vld [vmem:[%s20700_s7 + $0x468] sm:$0xff] }
0x1483   :  { %15729 = vmatpush3.bf16.xpose.msra.mxu0 %v18521_v51  ;;  %14224 = vmatprep.mubr.f32.mxu0 %v4266_v49  ;;  %v12368_v49 = vld [vmem:[%s20700_s7 + $0x4d0] sm:$0xff] }
0x1484   :  { %15799 = vmatprep.subr.bf16.mxu0 %v15798_v20 }
0x148a   :  { %14225 = vmatmul.mubr.f32.vlgmr.msra.gmra.mrb[100].mxu0 %v4272_v60  ;;  %v15754_v60 = vpack.c.bf16 %v12369_v9, %v12368_v49 }
0x148b   :  { %15801 = vmatpush3.bf16.xpose.msra.mxu0 %v15798_v20  ;;  %14308 = vmatprep.mubr.f32.mxu0 %v4341_v30  ;;  %v12370_v30 = vld [vmem:[%s20700_s7 + $0x4e0] sm:$0xff] }
0x148c   :  { %15803 = vmatprep.subr.bf16.mxu0 %v15802_v16 }
0x1492   :  { %14309 = vmatmul.mubr.f32.vlgmr.msra.gmra.mrb[102].mxu0 %v4347_v59  ;;  %v12371_v59 = vld [vmem:[%s20700_s7 + $0x4e8] sm:$0xff] }
0x1493   :  { %15805 = vmatpush3.bf16.msra.mxu0 %v15802_v16 }
0x1494   :  { %15839 = vmatprep.subr.bf16.mxu0 %v18530_v54 }
0x1555   :  { %v18563_v51 = vpop.f32.mrb[98].mxu0 }
0x1556   :  { %v18565_v19 = vpop.f32.mrb[99].mxu0 }
0x155d   :  { %v14226_v10 = vpop.f32.mrb[100].mxu0 }
0x155e   :  { %v4928_v23 = vmul.f32 0.35355338, %v14226_v10  ;;  %v4918_v56 = vpop.f32.mrb[101].mxu0  ;;  %v15758_v10 = vpack.c.bf16 %v12371_v59, %v12370_v30  ;;  %v12376_v59 = vld [vmem:[%s20700_s7 + $0x500] sm:$0xff] }
0x155f   :  { %v4927_v41 = vmul.f32 0.35355338, %v4918_v56  ;;  %v12373_v56 = vld [vmem:[%s20700_s7 + $0x4f8] sm:$0xff] }
0x1560   :  { %v4930_v15 = vadd.f32 %v18542_v48, %v4928_v23  ;;  %v12372_v23 = vld [vmem:[%s20700_s7 + $0x4f0] sm:$0xff] }
0x1561   :  { %v4929_v20 = vadd.f32 %v18548_v50, %v4927_v41  ;;  %v15762_v41 = vpack.c.bf16 %v12373_v56, %v12372_v23  ;;  %v12378_v56 = vld [vmem:[%s20700_s7 + $0x510] sm:$0xff] }
0x1562   :  { %v4933_v5 = vmul.f32 1.442695, %v4930_v15  ;;  %v12340_v15 = vld [vmem:[%s20700_s7 + $0x400] sm:$0xff] }
0x1563   :  { %v4931_v62 = vmul.f32 1.442695, %v4929_v20  ;;  %v12341_v20 = vld [vmem:[%s20700_s7 + $0x408] sm:$0xff] }
0x1564   :  { %16795 = vpow2.f32 %v4933_v5  ;;  %v15766_v5 = vpack.c.bf16 %v12341_v20, %v12340_v15 }
0x1565   :  { %16797 = vpow2.f32 %v4931_v62  ;;  %v14310_v45 = vpop.f32.mrb[102].mxu0 }
0x1566   :  { %v5271_v24 = vmul.f32 0.35355338, %v14310_v45  ;;  %v5261_v32 = vpop.f32.mrb[103].mxu0 }
0x1567   :  { %v5270_v25 = vmul.f32 0.35355338, %v5261_v32 }
0x1568   :  { %v5273_v7 = vadd.f32 %v18542_v48, %v5271_v24 }
0x1569   :  { %v5272_v26 = vadd.f32 %v18548_v50, %v5270_v25 }
0x156a   :  { %v5276_v27 = vmul.f32 1.442695, %v5273_v7  ;;  %v12342_v7 = vld [vmem:[%s20700_s7 + $0x410] sm:$0xff] }
0x156b   :  { %v5274_v61 = vmul.f32 1.442695, %v5272_v26  ;;  %v12343_v26 = vld [vmem:[%s20700_s7 + $0x418] sm:$0xff] }
0x156c   :  { %16799 = vpow2.f32 %v5276_v27 }
0x156d   :  { %16801 = vpow2.f32 %v5274_v61 }
0x156e   :  { %v16796_v21 = vpop.eup %16795 }
0x156f   :  { %v16798_v22 = vpop.eup %16797  ;;  %v4938_v12 = vsel %vm777_vm1, %v16796_v21, 0.0 }
0x1570   :  { %4939 = vadd.xlane.f32.xlu1 %v4938_v12  ;;  %14231 = vmatprep.mubr.msk.f32.mxu1 %vm777_vm1, %v16798_v22  ;;  %v4935_v6 = vsel %vm777_vm1, %v16798_v22, 0.0 }
0x1571   :  { %14232 = vmatmul.mubr.msk.f32.vlgmr.msra.gmra.mrb[22].mxu1 %vm777_vm1, %v16796_v21  ;;  %4936 = vadd.xlane.f32.xlu0 %v4935_v6  ;;  %v15770_v6 = vpack.c.bf16 %v12343_v26, %v12342_v7  ;;  %v12380_v26 = vld [vmem:[%s20700_s7 + $0x520] sm:$0xff] }
0x1572   :  { %15737 = vmatpush3.bf16.msra.mxu1 %v15734_v3  ;;  %v12350_v3 = vld [vmem:[%s20700_s7 + $0x450] sm:$0xff] }
0x1574   :  { %4746 = vadd.xlane.f32.xlu1 %v4745_v28 }
0x1575   :  { %4743 = vadd.xlane.f32.xlu0 %v4742_v29  ;;  %v12345_v29 = vld [vmem:[%s20700_s7 + $0x428] sm:$0xff] }
0x1576   :  { %v16800_v43 = vpop.eup %16799 }
0x1577   :  { %v16802_v34 = vpop.eup %16801  ;;  %v5281_v63 = vsel %vm777_vm1, %v16800_v43, 0.0 }
0x1578   :  { %5282 = vadd.xlane.f32.xlu1 %v5281_v63  ;;  %14315 = vmatprep.mubr.msk.f32.mxu0 %vm777_vm1, %v16802_v34  ;;  %v5278_v16 = vsel %vm777_vm1, %v16802_v34, 0.0  ;;  %v12346_v63 = vld [vmem:[%s20700_s7 + $0x430] sm:$0xff] }
0x1579   :  { %14316 = vmatmul.mubr.msk.f32.vlgmr.msra.gmra.mrb[104].mxu0 %vm777_vm1, %v16800_v43  ;;  %5279 = vadd.xlane.f32.xlu0 %v5278_v16  ;;  %v15774_v43 = vpack.c.bf16 %v12345_v29, %v12344_v8  ;;  %v12386_v8 = vld [vmem:[%s20700_s7 + $0x550] sm:$0xff]  ;;  %v12387_v29 = vld [vmem:[%s20700_s7 + $0x558] sm:$0xff] }
0x157a   :  { %15841 = vmatpush3.bf16.xpose.msra.mxu0 %v18530_v54  ;;  %14357 = vmatprep.mubr.f32.mxu0 %v4343_v37  ;;  %v12360_v54 = vld [vmem:[%s20700_s7 + $0x490] sm:$0xff] }
0x157b   :  { %15843 = vmatprep.subr.bf16.mxu0 %v18537_v39  ;;  %v15738_v42 = vpack.c.bf16 %v12361_v36, %v12360_v54  ;;  %v12351_v36 = vld [vmem:[%s20700_s7 + $0x458] sm:$0xff] }
0x157c   :  { %v15786_v58 = vpack.c.bf16 %v12351_v36, %v12350_v3  ;;  %v12395_v3 = vld [vmem:[%s20700_s7 + $0x588] sm:$0xff] }
0x157d   :  { %15739 = vmatprep.subr.bf16.mxu1 %v15738_v42 }
0x157e   :  { %15741 = vmatpush3.bf16.msra.mxu1 %v15738_v42 }
0x1581   :  { %14358 = vmatmul.mubr.f32.vlgmr.msra.gmra.mrb[106].mxu0 %v4349_v31  ;;  %v12348_v31 = vld [vmem:[%s20700_s7 + $0x440] sm:$0xff] }
0x1582   :  { %15845 = vmatpush3.bf16.msra.mxu0 %v18537_v39  ;;  %v12362_v39 = vld [vmem:[%s20700_s7 + $0x4a0] sm:$0xff]  ;;  %v15782_v40 = vpack.c.bf16 %v12349_v35, %v12348_v31  ;;  %v12390_v31 = vld [vmem:[%s20700_s7 + $0x570] sm:$0xff]  ;;  %v12391_v35 = vld [vmem:[%s20700_s7 + $0x578] sm:$0xff] }
0x1583   :  { %v15742_v55 = vpack.c.bf16 %v12363_v47, %v12362_v39 }
0x1585   :  { %15743 = vmatprep.subr.bf16.mxu1 %v15742_v55 }
0x1586   :  { %15745 = vmatpush3.bf16.msra.mxu1 %v15742_v55 }
0x1587   :  { %15747 = vmatprep.subr.bf16.mxu1 %v15746_v11 }
0x158a   :  { %15749 = vmatpush3.bf16.msra.mxu1 %v15746_v11 }
0x158b   :  { %15751 = vmatprep.subr.bf16.mxu1 %v15750_v18 }
0x158e   :  { %15753 = vmatpush3.bf16.msra.mxu1 %v15750_v18 }
0x158f   :  { %15755 = vmatprep.subr.bf16.mxu1 %v15754_v60 }
0x1592   :  { %15757 = vmatpush3.bf16.msra.mxu1 %v15754_v60  ;;  %v12355_v60 = vld [vmem:[%s20700_s7 + $0x478] sm:$0xff] }
0x1593   :  { %15759 = vmatprep.subr.bf16.mxu1 %v15758_v10 }
0x1596   :  { %15761 = vmatpush3.bf16.msra.mxu1 %v15758_v10  ;;  %v12377_v10 = vld [vmem:[%s20700_s7 + $0x508] sm:$0xff] }
0x1597   :  { %15763 = vmatprep.subr.bf16.mxu1 %v15762_v41  ;;  %v15806_v20 = vpack.c.bf16 %v12377_v10, %v12376_v59  ;;  %v12406_v59 = vld [vmem:[%s20700_s7 + $0x5e0] sm:$0xff]  ;;  %v12407_v10 = vld [vmem:[%s20700_s7 + $0x5e8] sm:$0xff] }
0x159a   :  { %15765 = vmatpush3.bf16.msra.mxu1 %v15762_v41  ;;  %v12379_v41 = vld [vmem:[%s20700_s7 + $0x518] sm:$0xff] }
0x159b   :  { %15767 = vmatprep.subr.bf16.mxu1 %v15766_v5 }
0x15fd   :  { %v4940_v24 = vpop.xlane.xlu1 %4939 }
0x15fe   :  { %v4937_v62 = vpop.xlane.xlu0 %4936 }
0x15ff   :  { %16803 = vrcp.f32 %v4937_v62 }
0x1601   :  { %v4747_v55 = vpop.xlane.xlu1 %4746 }
0x1602   :  { %v4744_v45 = vpop.xlane.xlu0 %4743 }
0x1603   :  { %16805 = vrcp.f32 %v4744_v45 }
0x1604   :  { %16807 = vrcp.f32 %v4940_v24 }
0x1605   :  { %16809 = vrcp.f32 %v4747_v55 }
0x1606   :  { %v5280_v49 = vpop.xlane.xlu0 %5279 }
0x1609   :  { %v16804_v32 = vpop.eup %16803 }
0x160d   :  { %v16806_v27 = vpop.eup %16805 }
0x160e   :  { %v16808_v21 = vpop.eup %16807  ;;  %v4833_v28 = vmul.f32 %v16806_v27, %v18565_v19  ;;  %v12347_v19 = vld [vmem:[%s20700_s7 + $0x438] sm:$0xff]  ;;  %v12381_v27 = vld [vmem:[%s20700_s7 + $0x528] sm:$0xff] }
0x160f   :  { %v15778_v16 = vpack.c.bf16 %v12347_v19, %v12346_v63  ;;  %v16810_v23 = vpop.eup %16809  ;;  %v12388_v63 = vld [vmem:[%s20700_s7 + $0x560] sm:$0xff]  ;;  %v12389_v19 = vld [vmem:[%s20700_s7 + $0x568] sm:$0xff] }
0x1644   :  { %v14233_v25 = vpop.f32.mrb[22].mxu1 }
0x1645   :  { %v5017_v61 = vpop.f32.mrb[23].mxu1  ;;  %v5027_v12 = vmul.f32 %v16808_v21, %v14233_v25  ;;  %v15810_v25 = vpack.c.bf16 %v12379_v41, %v12378_v56  ;;  %v12383_v21 = vld [vmem:[%s20700_s7 + $0x538] sm:$0xff]  ;;  %v12408_v56 = vld [vmem:[%s20700_s7 + $0x5f0] sm:$0xff] }
0x1646   :  { %v5026_v22 = vmul.f32 %v16804_v32, %v5017_v61  ;;  %v4834_v32 = vmul.f32 %v16810_v23, %v18563_v51  ;;  %v15814_v61 = vpack.c.bf16 %v12381_v27, %v12380_v26  ;;  %v12382_v51 = vld [vmem:[%s20700_s7 + $0x530] sm:$0xff]  ;;  %v15870_v23 = vpack.c.bf16 %v12407_v10, %v12406_v59  ;;  %v12409_v41 = vld [vmem:[%s20700_s7 + $0x5f8] sm:$0xff]  ;;  %v12411_v27 = vld [vmem:[%s20702_s8 + $0x2] ss:$0 sm:$0xff] }
0x1648   :  { %14266 = vmatprep.mubr.f32.mxu1 %v5026_v22  ;;  %v15818_v22 = vpack.c.bf16 %v12383_v21, %v12382_v51 }
0x1649   :  { %14267 = vmatmul.mubr.f32.vlgmr.msra.gmra.mrb[24].mxu1 %v5027_v12  ;;  %v12384_v12 = vld [vmem:[%s20700_s7 + $0x540] sm:$0xff] }
0x164a   :  { %15769 = vmatpush3.bf16.msra.mxu1 %v15766_v5  ;;  %14301 = vmatprep.mubr.f32.mxu1 %v4833_v28 }
0x164b   :  { %15771 = vmatprep.subr.bf16.mxu1 %v15770_v6 }
0x164c   :  { %v18655_v34 = vpop.f32.mrb[104].mxu0 }
0x164d   :  { %v5360_v37 = vpop.f32.mrb[105].mxu0 }
0x164e   :  { %15773 = vmatpush3.bf16.msra.mxu1 %v15770_v6  ;;  %v12385_v6 = vld [vmem:[%s20700_s7 + $0x548] sm:$0xff] }
0x164f   :  { %15775 = vmatprep.subr.bf16.mxu1 %v15774_v43  ;;  %v15822_v28 = vpack.c.bf16 %v12385_v6, %v12384_v12 }
0x1652   :  { %15777 = vmatpush3.bf16.msra.mxu1 %v15774_v43  ;;  %v15826_v43 = vpack.c.bf16 %v12387_v29, %v12386_v8 }
0x1653   :  { %15779 = vmatprep.subr.bf16.mxu1 %v15778_v16 }
0x1654   :  { %v14359_v54 = vpop.f32.mrb[106].mxu0 }
0x1655   :  { %v5541_v42 = vmul.f32 0.35355338, %v14359_v54  ;;  %v5531_v39 = vpop.f32.mrb[107].mxu0  ;;  %v12394_v54 = vld [vmem:[%s20700_s7 + $0x580] sm:$0xff] }
0x1656   :  { %v5540_v47 = vmul.f32 0.35355338, %v5531_v39  ;;  %15781 = vmatpush3.bf16.msra.mxu1 %v15778_v16  ;;  %v15830_v16 = vpack.c.bf16 %v12389_v19, %v12388_v63  ;;  %v15846_v36 = vpack.c.bf16 %v12395_v3, %v12394_v54  ;;  %v12397_v39 = vld [vmem:[%s20700_s7 + $0x598] sm:$0xff]  ;;  %v12417_v63 = vld [vmem:[%s20703_s11 + $0x48] sm:$0xff]  ;;  %v12418_v19 = vld [vmem:[%s20703_s11 + $0x50] sm:$0xff] }
0x1657   :  { %v5543_v57 = vadd.f32 %v18542_v48, %v5541_v42  ;;  %15783 = vmatprep.subr.bf16.mxu1 %v15782_v40  ;;  %v15790_v48 = vpack.c.bf16 %v12353_v17, %v12352_v44  ;;  %v12396_v42 = vld [vmem:[%s20700_s7 + $0x590] sm:$0xff] }
0x1658   :  { %v5542_v11 = vadd.f32 %v18548_v50, %v5540_v47  ;;  %v12354_v50 = vld [vmem:[%s20700_s7 + $0x470] sm:$0xff] }
0x1659   :  { %v5546_v18 = vmul.f32 1.442695, %v5543_v57  ;;  %v15794_v30 = vpack.c.bf16 %v12355_v60, %v12354_v50  ;;  %v15850_v57 = vpack.c.bf16 %v12397_v39, %v12396_v42  ;;  %v12400_v17 = vld [vmem:[%s20700_s7 + $0x5b0] sm:$0xff]  ;;  %v12405_v60 = vld [vmem:[%s20700_s7 + $0x5d8] sm:$0xff] }
0x165a   :  { %v5544_v9 = vmul.f32 1.442695, %v5542_v11  ;;  %15785 = vmatpush3.bf16.msra.mxu1 %v15782_v40  ;;  %v15834_v40 = vpack.c.bf16 %v12391_v35, %v12390_v31  ;;  %v12399_v11 = vld [vmem:[%s20700_s7 + $0x5a8] sm:$0xff]  ;;  %v12404_v50 = vld [vmem:[%s20700_s7 + $0x5d0] sm:$0xff]  ;;  %v12424_v35 = vld [vmem:[%s20704_s13 + $0x100] sm:$0xff] }
0x165b   :  { %16811 = vpow2.f32 %v5546_v18  ;;  %15787 = vmatprep.subr.bf16.mxu1 %v15786_v58 }
0x165c   :  { %16813 = vpow2.f32 %v5544_v9  ;;  %v12403_v9 = vld [vmem:[%s20700_s7 + $0x5c8] sm:$0xff] }
0x165d   :  { %16815 = vrcp.f32 %v5280_v49  ;;  %v12402_v49 = vld [vmem:[%s20700_s7 + $0x5c0] sm:$0xff] }
0x165e   :  { %15789 = vmatpush3.bf16.msra.mxu1 %v15786_v58  ;;  %v12398_v58 = vld [vmem:[%s20700_s7 + $0x5a0] sm:$0xff] }
0x165f   :  { %15791 = vmatprep.subr.bf16.mxu1 %v15790_v48  ;;  %v15854_v44 = vpack.c.bf16 %v12399_v11, %v12398_v58 }
0x1662   :  { %15793 = vmatpush3.bf16.msra.mxu1 %v15790_v48  ;;  %v15862_v48 = vpack.c.bf16 %v12403_v9, %v12402_v49 }
0x1663   :  { %15795 = vmatprep.subr.bf16.mxu1 %v15794_v30 }
0x1665   :  { %v16812_v15 = vpop.eup %16811 }
0x1666   :  { %v16814_v5 = vpop.eup %16813  ;;  %15797 = vmatpush3.bf16.msra.mxu1 %v15794_v30  ;;  %v5551_v62 = vsel %vm777_vm1, %v16812_v15, 0.0  ;;  %v15866_v30 = vpack.c.bf16 %v12405_v60, %v12404_v50  ;;  %v12414_v60 = vld [vmem:[%s20705_s9 + $0x2] ss:$0 sm:$0xff] }
0x1667   :  { %v16816_v45 = vpop.eup %16815  ;;  %5552 = vadd.xlane.f32.xlu1 %v5551_v62  ;;  %14364 = vmatprep.mubr.msk.f32.mxu0 %vm777_vm1, %v16814_v5  ;;  %v5548_v24 = vsel %vm777_vm1, %v16814_v5, 0.0 }
0x1668   :  { %v5369_v7 = vmul.f32 %v16816_v45, %v5360_v37  ;;  %14365 = vmatmul.mubr.msk.f32.vlgmr.msra.gmra.mrb[108].mxu0 %vm777_vm1, %v16812_v15  ;;  %5549 = vadd.xlane.f32.xlu0 %v5548_v24  ;;  %v5283_v37 = vpop.xlane.xlu1 %5282  ;;  %v15874_v15 = vpack.c.bf16 %v12409_v41, %v12408_v56 }
0x1669   :  { %14302 = vmatmul.mubr.f32.vlgmr.msra.gmra.mrb[24].mxu1 %v4834_v32  ;;  %15807 = vmatprep.subr.bf16.mxu1 %v15806_v20  ;;  %16817 = vrcp.f32 %v5283_v37 }
0x166a   :  { %15809 = vmatpush3.bf16.msra.mxu1 %v15806_v20  ;;  %14350 = vmatprep.mubr.f32.mxu1 %v5369_v7 }
0x166b   :  { %15811 = vmatprep.subr.bf16.mxu1 %v15810_v25 }
0x166e   :  { %15813 = vmatpush3.bf16.msra.mxu1 %v15810_v25 }
0x166f   :  { %15815 = vmatprep.subr.bf16.mxu1 %v15814_v61 }
0x1672   :  { %15817 = vmatpush3.bf16.msra.mxu1 %v15814_v61 }
0x1673   :  { %15819 = vmatprep.subr.bf16.mxu1 %v15818_v22  ;;  %v16818_v47 = vpop.eup %16817 }
0x1674   :  { %v5370_v55 = vmul.f32 %v16818_v47, %v18655_v34  ;;  %v12401_v34 = vld [vmem:[%s20700_s7 + $0x5b8] sm:$0xff] }
0x1675   :  { %v15858_v18 = vpack.c.bf16 %v12401_v34, %v12400_v17 }
0x1676   :  { %15821 = vmatpush3.bf16.msra.mxu1 %v15818_v22 }
0x1677   :  { %15823 = vmatprep.subr.bf16.mxu1 %v15822_v28 }
0x167a   :  { %15825 = vmatpush3.bf16.msra.mxu1 %v15822_v28 }
0x167b   :  { %15827 = vmatprep.subr.bf16.mxu1 %v15826_v43 }
0x167e   :  { %15829 = vmatpush3.bf16.msra.mxu1 %v15826_v43  ;;  %v12416_v43 = vld [vmem:[%s20703_s11 + $0x40] sm:$0xff] }
0x167f   :  { %15831 = vmatprep.subr.bf16.mxu1 %v15830_v16  ;;  %v15878_v37 = vpack.c.bf16 %v12417_v63, %v12416_v43  ;;  %v12438_v43 = vld [vmem:[%s20704_s13 + $0x170] sm:$0xff]  ;;  %v12439_v63 = vld [vmem:[%s20704_s13 + $0x178] sm:$0xff] }
0x1681   :  { %15879 = vmatprep.subr.bf16.mxu0 %v15878_v37 }
0x1682   :  { %15833 = vmatpush3.bf16.msra.mxu1 %v15830_v16  ;;  %v12419_v16 = vld [vmem:[%s20703_s11 + $0x58] sm:$0xff]  ;;  %15881 = vmatpush3.bf16.msra.mxu0 %v15878_v37  ;;  %v12421_v37 = vld [vmem:[%s20707_s12 + $0x2] ss:$0 sm:$0xff] }
0x1683   :  { %15835 = vmatprep.subr.bf16.mxu1 %v15834_v40  ;;  %v15882_v31 = vpack.c.bf16 %v12419_v16, %v12418_v19  ;;  %v15914_v19 = vpack.c.bf16 %v12439_v63, %v12438_v43 }
0x1685   :  { %15883 = vmatprep.subr.bf16.mxu0 %v15882_v31 }
0x1686   :  { %15837 = vmatpush3.bf16.msra.mxu1 %v15834_v40  ;;  %15885 = vmatpush3.bf16.msra.mxu0 %v15882_v31  ;;  %v12425_v40 = vld [vmem:[%s20704_s13 + $0x108] sm:$0xff] }
0x1687   :  { %15847 = vmatprep.subr.bf16.mxu1 %v15846_v36  ;;  %v15886_v54 = vpack.c.bf16 %v12425_v40, %v12424_v35 }
0x1689   :  { %14351 = vmatmul.mubr.f32.vlgmr.msra.gmra.mrb[24].mxu1 %v5370_v55  ;;  %15887 = vmatprep.subr.bf16.mxu0 %v15886_v54 }
0x168a   :  { %15849 = vmatpush3.bf16.msra.mxu1 %v15846_v36 }
0x168b   :  { %15851 = vmatprep.subr.bf16.mxu1 %v15850_v57 }
0x168e   :  { %15853 = vmatpush3.bf16.msra.mxu1 %v15850_v57 }
0x168f   :  { %15855 = vmatprep.subr.bf16.mxu1 %v15854_v44 }
0x1692   :  { %15857 = vmatpush3.bf16.msra.mxu1 %v15854_v44 }
0x1693   :  { %15859 = vmatprep.subr.bf16.mxu1 %v15858_v18 }
0x1696   :  { %15861 = vmatpush3.bf16.msra.mxu1 %v15858_v18 }
0x1697   :  { %15863 = vmatprep.subr.bf16.mxu1 %v15862_v48 }
0x169a   :  { %15865 = vmatpush3.bf16.msra.mxu1 %v15862_v48 }
0x169b   :  { %15867 = vmatprep.subr.bf16.mxu1 %v15866_v30 }
0x169e   :  { %15869 = vmatpush3.bf16.msra.mxu1 %v15866_v30 }
0x169f   :  { %15871 = vmatprep.subr.bf16.mxu1 %v15870_v23 }
0x16a2   :  { %15873 = vmatpush3.bf16.msra.mxu1 %v15870_v23  ;;  %v12415_v23 = vld [vmem:[%s20720_s30 + $0x2] ss:$0 sm:$0xff] }
0x16a3   :  { %15875 = vmatprep.subr.bf16.mxu1 %v15874_v15 }
0x16a6   :  { %15877 = vmatpush3.bf16.msra.mxu1 %v15874_v15 }
0x16f4   :  { %v5553_v5 = vpop.xlane.xlu1 %5552 }
0x16f5   :  { %v5550_v20 = vpop.xlane.xlu0 %5549 }
0x16f6   :  { %16819 = vrcp.f32 %v5550_v20 }
0x16f7   :  { %16821 = vrcp.f32 %v5553_v5  ;;  %v12426_v5 = vld [vmem:[%s20704_s13 + $0x110] sm:$0xff] }
0x1700   :  { %v16820_v45 = vpop.eup %16819 }
0x1701   :  { %v16822_v32 = vpop.eup %16821 }
0x173b   :  { %v14366_v62 = vpop.f32.mrb[108].mxu0 }
0x173c   :  { %v5630_v24 = vpop.f32.mrb[109].mxu0  ;;  %v5640_v7 = vmul.f32 %v16822_v32, %v14366_v62  ;;  %v12427_v62 = vld [vmem:[%s20704_s13 + $0x118] sm:$0xff]  ;;  %v12429_v32 = vld [vmem:[%s20704_s13 + $0x128] sm:$0xff] }
0x173d   :  { %v5639_v25 = vmul.f32 %v16820_v45, %v5630_v24  ;;  %v15890_v45 = vpack.c.bf16 %v12427_v62, %v12426_v5  ;;  %v12428_v24 = vld [vmem:[%s20704_s13 + $0x120] sm:$0xff] }
0x173f   :  { %14399 = vmatprep.mubr.f32.mxu1 %v5639_v25  ;;  %v15894_v25 = vpack.c.bf16 %v12429_v32, %v12428_v24  ;;  %v12459_v24 = vld [vmem:[%s20696_s5 + $0x4e8] sm:$0xff] }
0x1740   :  { %14400 = vmatmul.mubr.f32.vlgmr.msra.gmra.mrb[24].mxu1 %v5640_v7  ;;  %v12430_v7 = vld [vmem:[%s20704_s13 + $0x130] sm:$0xff] }
0x1813   :  { %v14401_v26 = vpop.f32.mrb[24].mxu1 }
0x1814   :  { %v5736_v61 = vadd.f32 %v14401_v26, %v18293_v53  ;;  %v5724_v51 = vpop.f32.mrb[25].mxu1  ;;  %v12431_v26 = vld [vmem:[%s20704_s13 + $0x138] sm:$0xff] }
0x1815   :  { %v5735_v21 = vadd.f32 %v5724_v51, %v18295_v46  ;;  %v12433_v51 = vld [vmem:[%s20704_s13 + $0x148] sm:$0xff] }
0x1816   :  { %v18796_v22 = vadd.f32 %v12411_v27, %v5736_v61  ;;  %v12432_v61 = vld [vmem:[%s20704_s13 + $0x140] sm:$0xff] }
0x1817   :  { %v18798_v12 = vadd.f32 %v12411_v27, %v5735_v21  ;;  %v15898_v27 = vpack.c.bf16 %v12431_v26, %v12430_v7  ;;  %v12434_v21 = vld [vmem:[%s20704_s13 + $0x150] sm:$0xff]  ;;  %v12458_v7 = vld [vmem:[%s20696_s5 + $0x4e0] sm:$0xff] }
0x1818   :  { %v5754_v6 = vsel %vm66_vm0, %v18796_v22, 0.0  ;;  %v5760_v28 = vmul.f32 %v18796_v22, %v18796_v22 }
0x1819   :  { %5755 = vadd.xlane.f32.xlu1 %v5754_v6  ;;  %v5751_v8 = vsel %vm66_vm0, %v18798_v12, 0.0  ;;  %v5759_v53 = vmul.f32 %v18798_v12, %v18798_v12  ;;  %v15902_v6 = vpack.c.bf16 %v12433_v51, %v12432_v61  ;;  %v12483_v61 = vld [vmem:[%s20696_s5 + $0x5a8] sm:$0xff] }
0x181a   :  { %5752 = vadd.xlane.f32.xlu0 %v5751_v8  ;;  %v5764_v46 = vsel %vm66_vm0, %v5760_v28, 0.0  ;;  %v12435_v28 = vld [vmem:[%s20704_s13 + $0x158] sm:$0xff] }
0x181b   :  { %v5761_v29 = vsel %vm66_vm0, %v5759_v53, 0.0  ;;  %v15906_v8 = vpack.c.bf16 %v12435_v28, %v12434_v21  ;;  %v12436_v53 = vld [vmem:[%s20704_s13 + $0x160] sm:$0xff] }
0x181c   :  { %v12470_v21 = vld [vmem:[%s20696_s5 + $0x540] sm:$0xff] }
0x181d   :  { %5765 = vadd.xlane.f32.xlu1 %v5764_v46  ;;  %v12437_v46 = vld [vmem:[%s20704_s13 + $0x168] sm:$0xff] }
0x181e   :  { %5762 = vadd.xlane.f32.xlu0 %v5761_v29  ;;  %v15910_v29 = vpack.c.bf16 %v12437_v46, %v12436_v53  ;;  %v12461_v53 = vld [vmem:[%s20696_s5 + $0x4f8] sm:$0xff] }
0x18a6   :  { %v5756_v3 = vpop.xlane.xlu1 %5755 }
0x18a7   :  { %v5758_v36 = vmul.f32 0.03125, %v5756_v3  ;;  %v5753_v42 = vpop.xlane.xlu0 %5752 }
0x18a8   :  { %v5757_v39 = vmul.f32 0.03125, %v5753_v42 }
0x18a9   :  { %v5770_v55 = vmul.f32 %v5758_v36, %v5758_v36  ;;  %v5774_v9 = vsub.f32 %v18796_v22, %v5758_v36 }
0x18aa   :  { %v5766_v47 = vpop.xlane.xlu1 %5765  ;;  %v5769_v11 = vmul.f32 %v5757_v39, %v5757_v39  ;;  %v5773_v50 = vsub.f32 %v18798_v12, %v5757_v39 }
0x18ab   :  { %v5768_v57 = vmul.f32 0.03125, %v5766_v47  ;;  %v5763_v58 = vpop.xlane.xlu0 %5762 }
0x18ac   :  { %v5767_v44 = vmul.f32 0.03125, %v5763_v58 }
0x18ad   :  { %v5772_v17 = vsub.f32 %v5768_v57, %v5770_v55 }
0x18ae   :  { %v5771_v34 = vsub.f32 %v5767_v44, %v5769_v11 }
0x18af   :  { %v5776_v18 = vadd.f32 1e-05, %v5772_v17 }
0x18b0   :  { %v5775_v49 = vadd.f32 1e-05, %v5771_v34 }
0x18b1   :  { %16823 = vrsqrt.f32 %v5776_v18 }
0x18b2   :  { %16825 = vrsqrt.f32 %v5775_v49 }
0x18bb   :  { %v16824_v48 = vpop.eup %16823 }
0x18bc   :  { %v16826_v30 = vpop.eup %16825  ;;  %v5780_v59 = vmul.f32 %v16824_v48, %v5774_v9 }
0x18bd   :  { %v5779_v10 = vmul.f32 %v16826_v30, %v5773_v50 }
0x18be   :  { %v5788_v56 = vmul.f32 %v12414_v60, %v5780_v59  ;;  %v12441_v59 = vld [vmem:[%s20708_s14 + $0x2] ss:$0 sm:$0xff] }
0x18bf   :  { %v5787_v41 = vmul.f32 %v12414_v60, %v5779_v10 }
0x18c0   :  { %v5796_v20 = vadd.f32 %v12415_v23, %v5788_v56 }
0x18c1   :  { %v5795_v15 = vadd.f32 %v12415_v23, %v5787_v41 }
0x18c3   :  { %14410 = vmatprep.mubr.msk.f32.mxu0 %vm66_vm0, %v5795_v15 }
0x18c4   :  { %14411 = vmatmul.mubr.msk.f32.vlgmr.msra.gmra.mrb[110].mxu0 %vm66_vm0, %v5796_v20 }
0x18c5   :  { %15889 = vmatpush3.bf16.msra.mxu0 %v15886_v54 }
0x18c6   :  { %15891 = vmatprep.subr.bf16.mxu0 %v15890_v45 }
0x18c9   :  { %15893 = vmatpush3.bf16.msra.mxu0 %v15890_v45  ;;  %v12447_v45 = vld [vmem:[%s20696_s5 + $0x488] sm:$0xff] }
0x18ca   :  { %15895 = vmatprep.subr.bf16.mxu0 %v15894_v25  ;;  %v15918_v32 = vpack.c.bf16 %v12459_v24, %v12447_v45  ;;  %v12450_v45 = vld [vmem:[%s20696_s5 + $0x4a0] sm:$0xff] }
0x18cb   :  { %v12462_v24 = vld [vmem:[%s20696_s5 + $0x500] sm:$0xff] }
0x18cd   :  { %15897 = vmatpush3.bf16.msra.mxu0 %v15894_v25  ;;  %v12446_v25 = vld [vmem:[%s20696_s5 + $0x480] sm:$0xff] }
0x18ce   :  { %15899 = vmatprep.subr.bf16.mxu0 %v15898_v27  ;;  %v15920_v26 = vpack.c.bf16 %v12458_v7, %v12446_v25  ;;  %v12487_v25 = vld [vmem:[%s20696_s5 + $0x5c8] sm:$0xff]  ;;  %v15936_v7 = vpack.c.bf16 %v12462_v24, %v12450_v45 }
0x18d1   :  { %15901 = vmatpush3.bf16.msra.mxu0 %v15898_v27  ;;  %v12471_v27 = vld [vmem:[%s20696_s5 + $0x548] sm:$0xff] }
0x18d2   :  { %15903 = vmatprep.subr.bf16.mxu0 %v15902_v6  ;;  %v15922_v51 = vpack.c.bf16 %v12483_v61, %v12471_v27  ;;  %v12474_v27 = vld [vmem:[%s20696_s5 + $0x560] sm:$0xff] }
0x18d3   :  { %v12486_v61 = vld [vmem:[%s20696_s5 + $0x5c0] sm:$0xff] }
0x18d5   :  { %15905 = vmatpush3.bf16.msra.mxu0 %v15902_v6  ;;  %v12482_v6 = vld [vmem:[%s20696_s5 + $0x5a0] sm:$0xff] }
0x18d6   :  { %15907 = vmatprep.subr.bf16.mxu0 %v15906_v8  ;;  %v15924_v28 = vpack.c.bf16 %v12482_v6, %v12470_v21  ;;  %v12465_v21 = vld [vmem:[%s20696_s5 + $0x518] sm:$0xff]  ;;  %v15940_v6 = vpack.c.bf16 %v12486_v61, %v12474_v27 }
0x18d9   :  { %15909 = vmatpush3.bf16.msra.mxu0 %v15906_v8  ;;  %v12449_v8 = vld [vmem:[%s20696_s5 + $0x498] sm:$0xff] }
0x18da   :  { %15911 = vmatprep.subr.bf16.mxu0 %v15910_v29  ;;  %v15926_v46 = vpack.c.bf16 %v12461_v53, %v12449_v8  ;;  %v12452_v8 = vld [vmem:[%s20696_s5 + $0x4b0] sm:$0xff] }
0x18db   :  { %v12464_v53 = vld [vmem:[%s20696_s5 + $0x510] sm:$0xff] }
0x18dd   :  { %15913 = vmatpush3.bf16.msra.mxu0 %v15910_v29 }
0x18de   :  { %15915 = vmatprep.subr.bf16.mxu0 %v15914_v19 }
0x18e1   :  { %15917 = vmatpush3.bf16.msra.mxu0 %v15914_v19 }
0x18e2   :  { %15919 = vmatprep.subr.bf16.mxu0 %v15918_v32  ;;  %v12475_v32 = vld [vmem:[%s20696_s5 + $0x568] sm:$0xff] }
0x1997   :  { %v14412_v16 = vpop.f32.mrb[110].mxu0 }
0x1998   :  { %v5888_v31 = vadd.f32 %v14412_v16, %v12421_v37  ;;  %v5882_v35 = vpop.f32.mrb[111].mxu0 }
0x1999   :  { %v5883_v40 = vadd.f32 %v12421_v37, %v5882_v35 }
0x199a   :  { %v5894_v54 = vmul.f32 0.044715, %v5888_v31  ;;  %v5892_v9 = vmul.f32 0.5, %v5888_v31 }
0x199b   :  { %v5893_v3 = vmul.f32 0.044715, %v5883_v40  ;;  %v5891_v18 = vmul.f32 0.5, %v5883_v40 }
0x199c   :  { %v5896_v36 = vmul.f32 %v5894_v54, %v5888_v31 }
0x199d   :  { %v5895_v42 = vmul.f32 %v5893_v3, %v5883_v40 }
0x199e   :  { %v5898_v39 = vmul.f32 %v5896_v36, %v5888_v31 }
0x199f   :  { %v5897_v47 = vmul.f32 %v5895_v42, %v5883_v40 }
0x19a0   :  { %v5900_v55 = vadd.f32 %v5898_v39, %v5888_v31 }
0x19a1   :  { %v5899_v57 = vadd.f32 %v5897_v47, %v5883_v40 }
0x19a2   :  { %v5902_v58 = vmul.f32 0.7978846, %v5900_v55 }
0x19a3   :  { %v5901_v11 = vmul.f32 0.7978846, %v5899_v57  ;;  %v12444_v57 = vld [vmem:[%s20697_s3 + $0x3] ss:$0 sm:$0xff] }
0x19a4   :  { %16827 = vtanh.f32 %v5902_v58 }
0x19a5   :  { %16829 = vtanh.f32 %v5901_v11  ;;  %v12448_v11 = vld [vmem:[%s20696_s5 + $0x490] sm:$0xff] }
0x19ae   :  { %v16828_v44 = vpop.eup %16827 }
0x19af   :  { %v16830_v17 = vpop.eup %16829  ;;  %v5906_v34 = vadd.f32 1.0, %v16828_v44  ;;  %v12460_v44 = vld [vmem:[%s20696_s5 + $0x4f0] sm:$0xff] }
0x19b0   :  { %v5905_v49 = vadd.f32 1.0, %v16830_v17  ;;  %v12445_v17 = vld [vmem:[%s20698_s4 + $0x3] ss:$0 sm:$0xff] }
0x19b1   :  { %v5908_v50 = vmul.f32 %v5906_v34, %v5892_v9  ;;  %v12473_v34 = vld [vmem:[%s20696_s5 + $0x558] sm:$0xff] }
0x19b2   :  { %v5907_v48 = vmul.f32 %v5905_v49, %v5891_v18  ;;  %v12485_v18 = vld [vmem:[%s20696_s5 + $0x5b8] sm:$0xff] }
0x19b4   :  { %14445 = vmatprep.mubr.f32.mxu0 %v5907_v48 }
0x19b5   :  { %14446 = vmatmul.mubr.f32.vlgmr.msra.gmra.mrb[112].mxu0 %v5908_v50  ;;  %v15928_v50 = vpack.c.bf16 %v12460_v44, %v12448_v11  ;;  %v12469_v11 = vld [vmem:[%s20696_s5 + $0x538] sm:$0xff] }
0x19b6   :  { %6247 = vmatprep.mubr.f32.mxu0 %v16977_v38  ;;  %15921 = vmatpush1.bf16.msra.mxu0 %v15920_v26  ;;  %v15938_v26 = vpack.c.bf16 %v12487_v25, %v12475_v32 }
0x19b7   :  { %15923 = vmatprep.subr.bf16.mxu0 %v15922_v51  ;;  %v12453_v51 = vld [vmem:[%s20696_s5 + $0x4b8] sm:$0xff] }
0x19ba   :  { %15925 = vmatpush1.bf16.msra.mxu0 %v15924_v28  ;;  %v15942_v28 = vpack.c.bf16 %v12465_v21, %v12453_v51 }
0x19bb   :  { %15927 = vmatprep.subr.bf16.mxu0 %v15926_v46  ;;  %v12477_v46 = vld [vmem:[%s20696_s5 + $0x578] sm:$0xff] }
0x1a88   :  { %v14447_v60 = vpop.f32.mrb[112].mxu0 }
0x1a89   :  { %v6002_v30 = vadd.f32 %v14447_v60, %v18796_v22  ;;  %v5992_v10 = vpop.f32.mrb[113].mxu0 }
0x1a8a   :  { %v6001_v23 = vadd.f32 %v5992_v10, %v18798_v12  ;;  %v12472_v10 = vld [vmem:[%s20696_s5 + $0x550] sm:$0xff] }
0x1a8b   :  { %v18889_v56 = vadd.f32 %v12441_v59, %v6002_v30 }
0x1a8c   :  { %v18891_v41 = vadd.f32 %v12441_v59, %v6001_v23  ;;  %v15930_v59 = vpack.c.bf16 %v12485_v18, %v12473_v34  ;;  %v12484_v23 = vld [vmem:[%s20696_s5 + $0x5b0] sm:$0xff] }
0x1a8d   :  { %v6026_v5 = vmul.f32 %v18889_v56, %v18889_v56  ;;  %v6020_v12 = vsel %vm66_vm0, %v18889_v56, 0.0  ;;  %v12456_v34 = vld [vmem:[%s20696_s5 + $0x4d0] sm:$0xff] }
0x1a8e   :  { %v6017_v15 = vsel %vm66_vm0, %v18891_v41, 0.0  ;;  %v6025_v20 = vmul.f32 %v18891_v41, %v18891_v41  ;;  %v12468_v18 = vld [vmem:[%s20696_s5 + $0x530] sm:$0xff] }
0x1a8f   :  { %6018 = vadd.xlane.f32.xlu0 %v6017_v15  ;;  %v6030_v62 = vsel %vm66_vm0, %v6026_v5, 0.0  ;;  %v12451_v15 = vld [vmem:[%s20696_s5 + $0x4a8] sm:$0xff]  ;;  %v15932_v5 = vpack.c.bf16 %v12484_v23, %v12472_v10 }
0x1a90   :  { %v6027_v22 = vsel %vm66_vm0, %v6025_v20, 0.0  ;;  %v12463_v20 = vld [vmem:[%s20696_s5 + $0x508] sm:$0xff] }
0x1a91   :  { %6028 = vadd.xlane.f32.xlu1 %v6027_v22  ;;  %v19097_v23 = vld [vmem:[%s20699_s6 + $0x24] sm:$0xff] }
0x1a92   :  { %v6140_v27 = vrot.slane %v19097_v23, %v17308_v2 }
0x1a93   :  { %6021 = vadd.xlane.f32.xlu0 %v6020_v12 }
0x1a95   :  { %6031 = vadd.xlane.f32.xlu1 %v6030_v62  ;;  %v15934_v62 = vpack.c.bf16 %v12463_v20, %v12451_v15  ;;  %v6120_v15 = vrot.slane %v19097_v23, %v17278_v52 }
0x1b1c   :  { %v6019_v29 = vpop.xlane.xlu0 %6018 }
0x1b1d   :  { %v6023_v43 = vmul.f32 0.03125, %v6019_v29  ;;  %v12489_v29 = vld [vmem:[%s20696_s5 + $0x5d8] sm:$0xff] }
0x1b1e   :  { %v6029_v63 = vpop.xlane.xlu1 %6028 }
0x1b1f   :  { %v6035_v19 = vmul.f32 %v6023_v43, %v6023_v43  ;;  %v6033_v37 = vmul.f32 0.03125, %v6029_v63  ;;  %v6039_v47 = vsub.f32 %v18891_v41, %v6023_v43  ;;  %v15944_v43 = vpack.c.bf16 %v12464_v53, %v12452_v8 }
0x1b20   :  { %v6022_v16 = vpop.xlane.xlu0 %6021  ;;  %v15946_v63 = vpack.c.bf16 %v12489_v29, %v12477_v46 }
0x1b21   :  { %v6037_v31 = vsub.f32 %v6033_v37, %v6035_v19  ;;  %v6024_v35 = vmul.f32 0.03125, %v6022_v16  ;;  %v12476_v19 = vld [vmem:[%s20696_s5 + $0x570] sm:$0xff]  ;;  %v12455_v16 = vld [vmem:[%s20696_s5 + $0x4c8] sm:$0xff] }
0x1b22   :  { %v6032_v40 = vpop.xlane.xlu1 %6031  ;;  %v12488_v37 = vld [vmem:[%s20696_s5 + $0x5d0] sm:$0xff] }
0x1b23   :  { %v6041_v54 = vadd.f32 1e-05, %v6037_v31  ;;  %v6036_v3 = vmul.f32 %v6024_v35, %v6024_v35  ;;  %v6034_v36 = vmul.f32 0.03125, %v6032_v40  ;;  %v6040_v9 = vsub.f32 %v18889_v56, %v6024_v35  ;;  %v12467_v31 = vld [vmem:[%s20696_s5 + $0x528] sm:$0xff] }
0x1b24   :  { %v15948_v35 = vpack.c.bf16 %v12488_v37, %v12476_v19  ;;  %v15950_v40 = vpack.c.bf16 %v12467_v31, %v12455_v16  ;;  %v6148_v19 = vrot.slane %v19097_v23, %v17310_v4 }
0x1b25   :  { %16831 = vrsqrt.f32 %v6041_v54  ;;  %v6038_v42 = vsub.f32 %v6034_v36, %v6036_v3  ;;  %v12454_v54 = vld [vmem:[%s20696_s5 + $0x4c0] sm:$0xff]  ;;  %v12479_v36 = vld [vmem:[%s20696_s5 + $0x588] sm:$0xff] }
0x1b26   :  { %v12466_v3 = vld [vmem:[%s20696_s5 + $0x520] sm:$0xff] }
0x1b27   :  { %v6042_v39 = vadd.f32 1e-05, %v6038_v42  ;;  %v12491_v42 = vld [vmem:[%s20696_s5 + $0x5e8] sm:$0xff] }
0x1b29   :  { %16833 = vrsqrt.f32 %v6042_v39  ;;  %v15952_v39 = vpack.c.bf16 %v12466_v3, %v12454_v54  ;;  %v12495_v3 = vld [vmem:[%s20699_s6 + $0x2c] sm:$0xf] }
0x1b2f   :  { %v16832_v55 = vpop.eup %16831 }
0x1b30   :  { %v6045_v58 = vmul.f32 %v16832_v55, %v6039_v47  ;;  %v15954_v47 = vpack.c.bf16 %v12491_v42, %v12479_v36  ;;  %v12478_v55 = vld [vmem:[%s20696_s5 + $0x580] sm:$0xff] }
0x1b32   :  { %v6053_v49 = vmul.f32 %v12444_v57, %v6045_v58  ;;  %v12457_v58 = vld [vmem:[%s20696_s5 + $0x4d8] sm:$0xff] }
0x1b33   :  { %v16834_v48 = vpop.eup %16833 }
0x1b34   :  { %v6046_v60 = vmul.f32 %v16834_v48, %v6040_v9  ;;  %v18953_v30 = vadd.f32 %v12445_v17, %v6053_v49  ;;  %v12481_v49 = vld [vmem:[%s20696_s5 + $0x598] sm:$0xff]  ;;  %v15960_v48 = vpack.c.bf16 %v12468_v18, %v12456_v34  ;;  %v6160_v18 = vrot.slane %v12495_v3, %v17319_v13 }
0x1b35   :  { %v12493_v9 = vld [vmem:[%s20696_s5 + $0x5f8] sm:$0xff] }
0x1b36   :  { %v6054_v22 = vmul.f32 %v12444_v57, %v6046_v60  ;;  %12496 = vmatmul.mubr.msk.f32.vlgmr.msra.gmra.mrb[114].mxu0 %vm66_vm0, %v18953_v30  ;;  %v12490_v57 = vld [vmem:[%s20696_s5 + $0x5e0] sm:$0xff]  ;;  %v12480_v60 = vld [vmem:[%s20696_s5 + $0x590] sm:$0xff] }
0x1b37   :  { %15929 = vmatpush1.bf16.msra.mxu0 %v15928_v50  ;;  %6253 = vmatprep.mubr.f32.mxu0 %v16977_v38  ;;  %v15956_v44 = vpack.c.bf16 %v12490_v57, %v12478_v55  ;;  %v15962_v50 = vpack.c.bf16 %v12493_v9, %v12481_v49  ;;  %v6152_v55 = vrot.slane %v12495_v3, %v17278_v52 }
0x1b38   :  { %v18970_v12 = vadd.f32 %v12445_v17, %v6054_v22  ;;  %15931 = vmatprep.subr.bf16.mxu0 %v15930_v59  ;;  %v15958_v17 = vpack.c.bf16 %v12469_v11, %v12457_v58  ;;  %v12492_v59 = vld [vmem:[%s20696_s5 + $0x5f0] sm:$0xff]  ;;  %v6156_v58 = vrot.slane %v12495_v3, %v17331_v33 }
0x1b39   :  { %v15964_v10 = vpack.c.bf16 %v12492_v59, %v12480_v60 }
0x1b3a   :  { %12497 = vmatmul.mubr.msk.f32.gmra.mrb[116].mxu0 %vm66_vm0, %v18970_v12 }
0x1b3b   :  { %15933 = vmatpush1.bf16.msra.mxu0 %v15932_v5  ;;  %6324 = vmatprep.mubr.f32.mxu0 %v16977_v38 }
0x1b3c   :  { %15935 = vmatprep.subr.bf16.mxu0 %v15934_v62 }
0x1b3e   :  { %12498 = vmatmul.mubr.msk.f32.vlgmr.msra.gmra.mrb[118].mxu0 %vm66_vm0, %v18953_v30 }
0x1b3f   :  { %15937 = vmatpush1.bf16.msra.mxu0 %v15936_v7  ;;  %6330 = vmatprep.mubr.f32.mxu0 %v16977_v38  ;;  %v6136_v7 = vrot.slane %v19097_v23, %v17304_v0 }
0x1b40   :  { %15939 = vmatprep.subr.bf16.mxu0 %v15938_v26 }
0x1b42   :  { %12499 = vmatmul.mubr.msk.f32.gmra.mrb[120].mxu0 %vm66_vm0, %v18970_v12 }
0x1b43   :  { %15941 = vmatpush1.bf16.msra.mxu0 %v15940_v6  ;;  %6401 = vmatprep.mubr.f32.mxu0 %v16977_v38 }
0x1b44   :  { %15943 = vmatprep.subr.bf16.mxu0 %v15942_v28 }
0x1b46   :  { %12500 = vmatmul.mubr.msk.f32.vlgmr.msra.gmra.mrb[122].mxu0 %vm66_vm0, %v18953_v30 }
0x1b47   :  { %15945 = vmatpush1.bf16.msra.mxu0 %v15944_v43  ;;  %6407 = vmatprep.mubr.f32.mxu0 %v16977_v38  ;;  %v6144_v43 = vrot.slane %v19097_v23, %v17306_v1 }
0x1b48   :  { %15947 = vmatprep.subr.bf16.mxu0 %v15946_v63 }
0x1b4a   :  { %12501 = vmatmul.mubr.msk.f32.gmra.mrb[124].mxu0 %vm66_vm0, %v18970_v12 }
0x1b4b   :  { %15949 = vmatpush1.bf16.msra.mxu0 %v15948_v35  ;;  %6478 = vmatprep.mubr.f32.mxu0 %v16977_v38 }
0x1b4c   :  { %15951 = vmatprep.subr.bf16.mxu0 %v15950_v40 }
0x1b4e   :  { %12502 = vmatmul.mubr.msk.f32.vlgmr.msra.gmra.mrb[126].mxu0 %vm66_vm0, %v18953_v30 }
0x1b4f   :  { %15953 = vmatpush1.bf16.msra.mxu0 %v15952_v39  ;;  %6484 = vmatprep.mubr.f32.mxu0 %v16977_v38 }
0x1b50   :  { %15955 = vmatprep.subr.bf16.mxu0 %v15954_v47 }
0x1b52   :  { %12503 = vmatmul.mubr.msk.f32.gmra.mrb[128].mxu0 %vm66_vm0, %v18970_v12 }
0x1b53   :  { %15957 = vmatpush1.bf16.msra.mxu0 %v15956_v44  ;;  %6555 = vmatprep.mubr.f32.mxu0 %v16977_v38 }
0x1b54   :  { %15959 = vmatprep.subr.bf16.mxu0 %v15958_v17 }
0x1b56   :  { %12504 = vmatmul.mubr.msk.f32.vlgmr.msra.gmra.mrb[130].mxu0 %vm66_vm0, %v18953_v30 }
0x1b57   :  { %15961 = vmatpush1.bf16.msra.mxu0 %v15960_v48  ;;  %6561 = vmatprep.mubr.f32.mxu0 %v16977_v38  ;;  %v6164_v48 = vrot.slane %v12495_v3, %v17321_v14 }
0x1b58   :  { %15963 = vmatprep.subr.bf16.mxu0 %v15962_v50 }
0x1b5a   :  { %12505 = vmatmul.mubr.msk.f32.gmra.mrb[132].mxu0 %vm66_vm0, %v18970_v12 }
0x1b5b   :  { %15965 = vmatpush1.bf16.msra.mxu0 %v15964_v10  ;;  %6632 = vmatprep.mubr.f32.mxu0 %v16977_v38 }
0x1b5e   :  { %12506 = vmatmul.mubr.msk.f32.vlgmr.msra.gmra.mrb[134].mxu0 %vm66_vm0, %v18953_v30 }
0x1b5f   :  { %6638 = vmatprep.mubr.f32.mxu0 %v16977_v38 }
0x1b62   :  { %12507 = vmatmul.mubr.msk.f32.gmra.mrb[136].mxu0 %vm66_vm0, %v18970_v12 }
0x1c09   :  { %v6249_v20 = vpop.f32.mrb[114].mxu0 }
0x1c0a   :  { %v6250_v22 = vadd.f32 %v6249_v20, %v6120_v15  ;;  %v19101_v5 = vpop.f32.mrb[115].mxu0 }
0x1c0c   :  { %14452 = vmatprep.mubr.f32.mxu0 %v6250_v22 }
0x1c0d   :  { %v6255_v62 = vpop.f32.mrb[116].mxu0 }
0x1c0e   :  { %v19103_v30 = vpop.f32.mrb[117].mxu0  ;;  %v6256_v36 = vadd.f32 %v6255_v62, %v6120_v15 }
0x1c11   :  { %v19105_v45 = vpop.f32.mrb[118].mxu0 }
0x1c12   :  { %v19107_v24 = vpop.f32.mrb[119].mxu0 }
0x1c15   :  { %v19109_v12 = vpop.f32.mrb[120].mxu0 }
0x1c16   :  { %v19111_v32 = vpop.f32.mrb[121].mxu0 }
0x1c19   :  { %v6403_v25 = vpop.f32.mrb[122].mxu0 }
0x1c1a   :  { %v6405_v26 = vpop.f32.mrb[123].mxu0  ;;  %v6404_v51 = vadd.f32 %v6403_v25, %v6136_v7 }
0x1c1b   :  { %v6406_v28 = vadd.f32 %v6405_v26, %v6140_v27 }
0x1c1d   :  { %v6409_v61 = vpop.f32.mrb[124].mxu0 }
0x1c1e   :  { %v6410_v21 = vadd.f32 %v6409_v61, %v6136_v7  ;;  %v6411_v6 = vpop.f32.mrb[125].mxu0 }
0x1c1f   :  { %v6412_v8 = vadd.f32 %v6411_v6, %v6140_v27 }
0x1c20   :  { %v15966_v53 = vpack.c.bf16 %v6410_v21, %v6404_v51 }
0x1c21   :  { %v19117_v46 = vpack.c.bf16 %v6412_v8, %v6406_v28  ;;  %v6480_v29 = vpop.f32.mrb[126].mxu0  ;;  %v19138_v28 = vld [vmem:[%s20701_s2 + $0x8] sm:$0xff] }
0x1c22   :  { %v6482_v63 = vpop.f32.mrb[127].mxu0  ;;  %15967 = vmatprep.subr.bf16.mxu0 %v15966_v53  ;;  %v6481_v16 = vadd.f32 %v6480_v29, %v6144_v43 }
0x1c23   :  { %15969 = vmatpush3.bf16.xpose.msra.mxu0 %v15966_v53  ;;  %v6483_v40 = vadd.f32 %v6482_v63, %v6148_v19  ;;  %v19144_v53 = vld [vmem:[%s20701_s2] sm:$0xff] }
0x1c25   :  { %v6486_v37 = vpop.f32.mrb[128].mxu0 }
0x1c26   :  { %v6487_v31 = vadd.f32 %v6486_v37, %v6144_v43  ;;  %v6488_v35 = vpop.f32.mrb[129].mxu0 }
0x1c27   :  { %v6489_v54 = vadd.f32 %v6488_v35, %v6148_v19  ;;  %v6124_v19 = vrot.slane %v19097_v23, %v17331_v33  ;;  %v6128_v35 = vrot.slane %v19097_v23, %v17319_v13 }
0x1c28   :  { %v16046_v42 = vpack.c.bf16 %v6487_v31, %v6481_v16 }
0x1c29   :  { %v19126_v39 = vpack.c.bf16 %v6489_v54, %v6483_v40  ;;  %v6557_v47 = vpop.f32.mrb[130].mxu0  ;;  %v6252_v31 = vadd.f32 %v19101_v5, %v6124_v19  ;;  %v6258_v40 = vadd.f32 %v19103_v30, %v6124_v19  ;;  %v6327_v54 = vadd.f32 %v19105_v45, %v6128_v35  ;;  %v12536_v19 = vld [vmem:[%s20700_s7 + $0x6c0] sm:$0xff] }
0x1c2a   :  { %v6559_v57 = vpop.f32.mrb[131].mxu0  ;;  %14453 = vmatmul.mubr.f32.vlgmr.msra.gmra.mrb[138].mxu0 %v6256_v36  ;;  %v6558_v44 = vadd.f32 %v6557_v47, %v6152_v55  ;;  %v6333_v5 = vadd.f32 %v19109_v12, %v6128_v35  ;;  %v12539_v35 = vld [vmem:[%s20700_s7 + $0x6d8] sm:$0xff] }
0x1c2b   :  { %v6560_v49 = vadd.f32 %v6559_v57, %v6156_v58 }
0x1c2d   :  { %v6563_v11 = vpop.f32.mrb[132].mxu0 }
0x1c2e   :  { %v6564_v17 = vadd.f32 %v6563_v11, %v6152_v55  ;;  %v6565_v34 = vpop.f32.mrb[133].mxu0 }
0x1c2f   :  { %v6566_v9 = vadd.f32 %v6565_v34, %v6156_v58 }
0x1c30   :  { %v15970_v50 = vpack.c.bf16 %v6564_v17, %v6558_v44 }
0x1c31   :  { %v15978_v60 = vpack.c.bf16 %v6566_v9, %v6560_v49  ;;  %v6634_v59 = vpop.f32.mrb[134].mxu0 }
0x1c32   :  { %v6635_v10 = vadd.f32 %v6634_v59, %v6160_v18  ;;  %v6636_v15 = vpop.f32.mrb[135].mxu0  ;;  %15971 = vmatprep.subr.bf16.mxu0 %v15970_v50 }
0x1c33   :  { %v6637_v20 = vadd.f32 %v6636_v15, %v6164_v48  ;;  %15973 = vmatpush3.bf16.msra.mxu0 %v15970_v50  ;;  %15979 = vmatprep.subr.bf16.mxu1 %v15978_v60  ;;  %v6132_v15 = vrot.slane %v19097_v23, %v17321_v14 }
0x1c34   :  { %15975 = vmatprep.subr.bf16.mxu0 %v19117_v46  ;;  %15981 = vmatpush3.bf16.msra.mxu1 %v15978_v60 }
0x1c35   :  { %v6640_v22 = vpop.f32.mrb[136].mxu0  ;;  %v6335_v23 = vadd.f32 %v19111_v32, %v6132_v15  ;;  %v12531_v32 = vld [vmem:[%s20700_s7 + $0x698] sm:$0xff] }
0x1c36   :  { %v6641_v62 = vadd.f32 %v6640_v22, %v6160_v18  ;;  %v6642_v25 = vpop.f32.mrb[137].mxu0 }
0x1c37   :  { %v6643_v7 = vadd.f32 %v6642_v25, %v6164_v48 }
0x1c38   :  { %v16050_v26 = vpack.c.bf16 %v6641_v62, %v6635_v10 }
0x1c39   :  { %v19133_v27 = vpack.c.bf16 %v6643_v7, %v6637_v20  ;;  %v6329_v7 = vadd.f32 %v19107_v24, %v6132_v15  ;;  %v12528_v24 = vld [vmem:[%s20700_s7 + $0x680] sm:$0xff] }
0x1c3a   :  { %v12514_v15 = vld [vmem:[%s20700_s7 + $0x620] sm:$0xff] }
0x1cfd   :  { %v14454_v61 = vpop.f32.mrb[138].mxu0 }
0x1cfe   :  { %v6721_v51 = vmul.f32 0.35355338, %v14454_v61  ;;  %v6711_v21 = vpop.f32.mrb[139].mxu0  ;;  %v12529_v61 = vld [vmem:[%s20700_s7 + $0x688] sm:$0xff] }
0x1cff   :  { %v6720_v6 = vmul.f32 0.35355338, %v6711_v21 }
0x1d00   :  { %v6723_v8 = vadd.f32 %v19138_v28, %v6721_v51  ;;  %v15982_v51 = vpack.c.bf16 %v12529_v61, %v12528_v24  ;;  %v12519_v24 = vld [vmem:[%s20700_s7 + $0x648] sm:$0xff] }
0x1d01   :  { %v6722_v29 = vadd.f32 %v19144_v53, %v6720_v6  ;;  %v12533_v6 = vld [vmem:[%s20700_s7 + $0x6a8] sm:$0xff] }
0x1d02   :  { %v6726_v43 = vmul.f32 1.442695, %v6723_v8  ;;  %15983 = vmatprep.subr.bf16.mxu1 %v15982_v51 }
0x1d03   :  { %v6724_v63 = vmul.f32 1.442695, %v6722_v29  ;;  %v12534_v29 = vld [vmem:[%s20700_s7 + $0x6b0] sm:$0xff] }
0x1d05   :  { %16835 = vpow2.f32 %v6724_v63 }
0x1d06   :  { %16837 = vpow2.f32 %v6726_v43  ;;  %v12535_v43 = vld [vmem:[%s20700_s7 + $0x6b8] sm:$0xff] }
0x1d07   :  { %v15994_v63 = vpack.c.bf16 %v12535_v43, %v12534_v29 }
0x1d0f   :  { %v16836_v37 = vpop.eup %16835 }
0x1d10   :  { %v16838_v16 = vpop.eup %16837  ;;  %14459 = vmatprep.mubr.msk.f32.mxu0 %vm777_vm1, %v16836_v37  ;;  %v6728_v20 = vsel %vm777_vm1, %v16836_v37, 0.0  ;;  %v12537_v37 = vld [vmem:[%s20700_s7 + $0x6c8] sm:$0xff] }
0x1d11   :  { %14460 = vmatmul.mubr.msk.f32.vlgmr.msra.gmra.mrb[140].mxu0 %vm777_vm1, %v16838_v16  ;;  %v6731_v10 = vsel %vm777_vm1, %v16838_v16, 0.0  ;;  %v15998_v16 = vpack.c.bf16 %v12537_v37, %v12536_v19  ;;  %v12522_v19 = vld [vmem:[%s20700_s7 + $0x660] sm:$0xff]  ;;  %v12523_v37 = vld [vmem:[%s20700_s7 + $0x668] sm:$0xff] }
0x1d12   :  { %15977 = vmatpush3.bf16.xpose.msra.mxu0 %v19117_v46  ;;  %14466 = vmatprep.mubr.f32.mxu0 %v6252_v31  ;;  %v12538_v31 = vld [vmem:[%s20700_s7 + $0x6d0] sm:$0xff] }
0x1d13   :  { %16047 = vmatprep.subr.bf16.mxu0 %v16046_v42 }
0x1d19   :  { %14467 = vmatmul.mubr.f32.vlgmr.msra.gmra.mrb[142].mxu0 %v6258_v40  ;;  %v16002_v40 = vpack.c.bf16 %v12539_v35, %v12538_v31 }
0x1d1a   :  { %16049 = vmatpush3.bf16.xpose.msra.mxu0 %v16046_v42  ;;  %14550 = vmatprep.mubr.f32.mxu0 %v6327_v54  ;;  %v12540_v54 = vld [vmem:[%s20700_s7 + $0x6e0] sm:$0xff] }
0x1d1b   :  { %16051 = vmatprep.subr.bf16.mxu0 %v16050_v26 }
0x1d21   :  { %14551 = vmatmul.mubr.f32.vlgmr.msra.gmra.mrb[144].mxu0 %v6333_v5  ;;  %v12541_v5 = vld [vmem:[%s20700_s7 + $0x6e8] sm:$0xff] }
0x1d22   :  { %16053 = vmatpush3.bf16.msra.mxu0 %v16050_v26 }
0x1d23   :  { %16087 = vmatprep.subr.bf16.mxu0 %v19126_v39 }
0x1de4   :  { %v19159_v46 = vpop.f32.mrb[140].mxu0 }
0x1de5   :  { %v19161_v3 = vpop.f32.mrb[141].mxu0 }
0x1dec   :  { %v14468_v36 = vpop.f32.mrb[142].mxu0 }
0x1ded   :  { %v6914_v47 = vmul.f32 0.35355338, %v14468_v36  ;;  %v6904_v55 = vpop.f32.mrb[143].mxu0  ;;  %v16006_v36 = vpack.c.bf16 %v12541_v5, %v12540_v54  ;;  %v12546_v5 = vld [vmem:[%s20700_s7 + $0x700] sm:$0xff] }
0x1dee   :  { %v6913_v30 = vmul.f32 0.35355338, %v6904_v55  ;;  %v12543_v55 = vld [vmem:[%s20700_s7 + $0x6f8] sm:$0xff] }
0x1def   :  { %v6916_v45 = vadd.f32 %v19138_v28, %v6914_v47  ;;  %v12542_v47 = vld [vmem:[%s20700_s7 + $0x6f0] sm:$0xff] }
0x1df0   :  { %v6915_v42 = vadd.f32 %v19144_v53, %v6913_v30  ;;  %v16010_v30 = vpack.c.bf16 %v12543_v55, %v12542_v47  ;;  %v12548_v55 = vld [vmem:[%s20700_s7 + $0x710] sm:$0xff] }
0x1df1   :  { %v6919_v57 = vmul.f32 1.442695, %v6916_v45  ;;  %v12510_v45 = vld [vmem:[%s20700_s7 + $0x600] sm:$0xff] }
0x1df2   :  { %v6917_v58 = vmul.f32 1.442695, %v6915_v42  ;;  %v12511_v42 = vld [vmem:[%s20700_s7 + $0x608] sm:$0xff] }
0x1df3   :  { %16839 = vpow2.f32 %v6919_v57  ;;  %v16014_v57 = vpack.c.bf16 %v12511_v42, %v12510_v45 }
0x1df4   :  { %16841 = vpow2.f32 %v6917_v58  ;;  %v14552_v12 = vpop.f32.mrb[144].mxu0 }
0x1df5   :  { %v7257_v11 = vmul.f32 0.35355338, %v14552_v12  ;;  %v7247_v44 = vpop.f32.mrb[145].mxu0 }
0x1df6   :  { %v7256_v17 = vmul.f32 0.35355338, %v7247_v44 }
0x1df7   :  { %v7259_v34 = vadd.f32 %v19138_v28, %v7257_v11 }
0x1df8   :  { %v7258_v18 = vadd.f32 %v19144_v53, %v7256_v17 }
0x1df9   :  { %v7262_v49 = vmul.f32 1.442695, %v7259_v34  ;;  %v12512_v34 = vld [vmem:[%s20700_s7 + $0x610] sm:$0xff] }
0x1dfa   :  { %v7260_v9 = vmul.f32 1.442695, %v7258_v18  ;;  %v12513_v18 = vld [vmem:[%s20700_s7 + $0x618] sm:$0xff] }
0x1dfb   :  { %16843 = vpow2.f32 %v7262_v49 }
0x1dfc   :  { %16845 = vpow2.f32 %v7260_v9 }
0x1dfd   :  { %v16840_v48 = vpop.eup %16839 }
0x1dfe   :  { %v16842_v50 = vpop.eup %16841  ;;  %v6924_v60 = vsel %vm777_vm1, %v16840_v48, 0.0 }
0x1dff   :  { %6925 = vadd.xlane.f32.xlu1 %v6924_v60  ;;  %14473 = vmatprep.mubr.msk.f32.mxu1 %vm777_vm1, %v16842_v50  ;;  %v6921_v59 = vsel %vm777_vm1, %v16842_v50, 0.0 }
0x1e00   :  { %14474 = vmatmul.mubr.msk.f32.vlgmr.msra.gmra.mrb[26].mxu1 %vm777_vm1, %v16840_v48  ;;  %6922 = vadd.xlane.f32.xlu0 %v6921_v59  ;;  %v16018_v59 = vpack.c.bf16 %v12513_v18, %v12512_v34  ;;  %v12550_v18 = vld [vmem:[%s20700_s7 + $0x720] sm:$0xff] }
0x1e01   :  { %15985 = vmatpush3.bf16.msra.mxu1 %v15982_v51  ;;  %v12520_v51 = vld [vmem:[%s20700_s7 + $0x650] sm:$0xff] }
0x1e03   :  { %6732 = vadd.xlane.f32.xlu1 %v6731_v10 }
0x1e04   :  { %6729 = vadd.xlane.f32.xlu0 %v6728_v20  ;;  %v12515_v20 = vld [vmem:[%s20700_s7 + $0x628] sm:$0xff] }
0x1e05   :  { %v16844_v22 = vpop.eup %16843 }
0x1e06   :  { %v16846_v62 = vpop.eup %16845  ;;  %v7267_v25 = vsel %vm777_vm1, %v16844_v22, 0.0 }
0x1e07   :  { %7268 = vadd.xlane.f32.xlu1 %v7267_v25  ;;  %14557 = vmatprep.mubr.msk.f32.mxu0 %vm777_vm1, %v16846_v62  ;;  %v7264_v26 = vsel %vm777_vm1, %v16846_v62, 0.0  ;;  %v12516_v25 = vld [vmem:[%s20700_s7 + $0x630] sm:$0xff] }
0x1e08   :  { %14558 = vmatmul.mubr.msk.f32.vlgmr.msra.gmra.mrb[146].mxu0 %vm777_vm1, %v16844_v22  ;;  %7265 = vadd.xlane.f32.xlu0 %v7264_v26  ;;  %v16022_v22 = vpack.c.bf16 %v12515_v20, %v12514_v15  ;;  %v12556_v15 = vld [vmem:[%s20700_s7 + $0x750] sm:$0xff]  ;;  %v12557_v20 = vld [vmem:[%s20700_s7 + $0x758] sm:$0xff] }
0x1e09   :  { %16089 = vmatpush3.bf16.xpose.msra.mxu0 %v19126_v39  ;;  %14599 = vmatprep.mubr.f32.mxu0 %v6329_v7  ;;  %v12530_v39 = vld [vmem:[%s20700_s7 + $0x690] sm:$0xff] }
0x1e0a   :  { %16091 = vmatprep.subr.bf16.mxu0 %v19133_v27  ;;  %v15986_v21 = vpack.c.bf16 %v12531_v32, %v12530_v39  ;;  %v12521_v32 = vld [vmem:[%s20700_s7 + $0x658] sm:$0xff] }
0x1e0b   :  { %v16034_v43 = vpack.c.bf16 %v12521_v32, %v12520_v51  ;;  %v12565_v51 = vld [vmem:[%s20700_s7 + $0x788] sm:$0xff] }
0x1e0c   :  { %15987 = vmatprep.subr.bf16.mxu1 %v15986_v21 }
0x1e0d   :  { %15989 = vmatpush3.bf16.msra.mxu1 %v15986_v21 }
0x1e10   :  { %14600 = vmatmul.mubr.f32.vlgmr.msra.gmra.mrb[148].mxu0 %v6335_v23  ;;  %v12518_v23 = vld [vmem:[%s20700_s7 + $0x640] sm:$0xff] }
0x1e11   :  { %16093 = vmatpush3.bf16.msra.mxu0 %v19133_v27  ;;  %v12532_v27 = vld [vmem:[%s20700_s7 + $0x6a0] sm:$0xff]  ;;  %v16030_v61 = vpack.c.bf16 %v12519_v24, %v12518_v23  ;;  %v12560_v23 = vld [vmem:[%s20700_s7 + $0x770] sm:$0xff]  ;;  %v12561_v24 = vld [vmem:[%s20700_s7 + $0x778] sm:$0xff] }
0x1e12   :  { %v15990_v8 = vpack.c.bf16 %v12533_v6, %v12532_v27 }
0x1e14   :  { %15991 = vmatprep.subr.bf16.mxu1 %v15990_v8 }
0x1e15   :  { %15993 = vmatpush3.bf16.msra.mxu1 %v15990_v8 }
0x1e16   :  { %15995 = vmatprep.subr.bf16.mxu1 %v15994_v63 }
0x1e19   :  { %15997 = vmatpush3.bf16.msra.mxu1 %v15994_v63 }
0x1e1a   :  { %15999 = vmatprep.subr.bf16.mxu1 %v15998_v16 }
0x1e1d   :  { %16001 = vmatpush3.bf16.msra.mxu1 %v15998_v16 }
0x1e1e   :  { %16003 = vmatprep.subr.bf16.mxu1 %v16002_v40 }
0x1e21   :  { %16005 = vmatpush3.bf16.msra.mxu1 %v16002_v40  ;;  %v12525_v40 = vld [vmem:[%s20700_s7 + $0x678] sm:$0xff] }
0x1e22   :  { %16007 = vmatprep.subr.bf16.mxu1 %v16006_v36 }
0x1e25   :  { %16009 = vmatpush3.bf16.msra.mxu1 %v16006_v36  ;;  %v12547_v36 = vld [vmem:[%s20700_s7 + $0x708] sm:$0xff] }
0x1e26   :  { %16011 = vmatprep.subr.bf16.mxu1 %v16010_v30  ;;  %v16054_v42 = vpack.c.bf16 %v12547_v36, %v12546_v5  ;;  %v12576_v5 = vld [vmem:[%s20700_s7 + $0x7e0] sm:$0xff]  ;;  %v12577_v36 = vld [vmem:[%s20700_s7 + $0x7e8] sm:$0xff] }
0x1e29   :  { %16013 = vmatpush3.bf16.msra.mxu1 %v16010_v30  ;;  %v12549_v30 = vld [vmem:[%s20700_s7 + $0x718] sm:$0xff] }
0x1e2a   :  { %16015 = vmatprep.subr.bf16.mxu1 %v16014_v57 }
0x1e8c   :  { %v6926_v11 = vpop.xlane.xlu1 %6925 }
0x1e8d   :  { %v6923_v58 = vpop.xlane.xlu0 %6922 }
0x1e8e   :  { %16847 = vrcp.f32 %v6923_v58 }
0x1e90   :  { %v6733_v8 = vpop.xlane.xlu1 %6732 }
0x1e91   :  { %v6730_v12 = vpop.xlane.xlu0 %6729 }
0x1e92   :  { %16849 = vrcp.f32 %v6730_v12 }
0x1e93   :  { %16851 = vrcp.f32 %v6926_v11 }
0x1e94   :  { %16853 = vrcp.f32 %v6733_v8 }
0x1e95   :  { %v7266_v31 = vpop.xlane.xlu0 %7265 }
0x1e98   :  { %v16848_v44 = vpop.eup %16847 }
0x1e9c   :  { %v16850_v49 = vpop.eup %16849 }
0x1e9d   :  { %v16852_v48 = vpop.eup %16851  ;;  %v6819_v10 = vmul.f32 %v16850_v49, %v19161_v3  ;;  %v12517_v3 = vld [vmem:[%s20700_s7 + $0x638] sm:$0xff]  ;;  %v12551_v49 = vld [vmem:[%s20700_s7 + $0x728] sm:$0xff] }
0x1e9e   :  { %v16026_v26 = vpack.c.bf16 %v12517_v3, %v12516_v25  ;;  %v16854_v47 = vpop.eup %16853  ;;  %v12558_v25 = vld [vmem:[%s20700_s7 + $0x760] sm:$0xff]  ;;  %v12559_v3 = vld [vmem:[%s20700_s7 + $0x768] sm:$0xff] }
0x1ed3   :  { %v14475_v17 = vpop.f32.mrb[26].mxu1 }
0x1ed4   :  { %v7003_v9 = vpop.f32.mrb[27].mxu1  ;;  %v7013_v60 = vmul.f32 %v16852_v48, %v14475_v17  ;;  %v16058_v17 = vpack.c.bf16 %v12549_v30, %v12548_v55  ;;  %v12553_v48 = vld [vmem:[%s20700_s7 + $0x738] sm:$0xff]  ;;  %v12578_v55 = vld [vmem:[%s20700_s7 + $0x7f0] sm:$0xff] }
0x1ed5   :  { %v7012_v50 = vmul.f32 %v16848_v44, %v7003_v9  ;;  %v6820_v44 = vmul.f32 %v16854_v47, %v19159_v46  ;;  %v16062_v9 = vpack.c.bf16 %v12551_v49, %v12550_v18  ;;  %v12552_v46 = vld [vmem:[%s20700_s7 + $0x730] sm:$0xff]  ;;  %v16118_v47 = vpack.c.bf16 %v12577_v36, %v12576_v5  ;;  %v12579_v30 = vld [vmem:[%s20700_s7 + $0x7f8] sm:$0xff]  ;;  %v12581_v49 = vld [vmem:[%s20702_s8 + $0x3] ss:$0 sm:$0xff] }
0x1ed7   :  { %14508 = vmatprep.mubr.f32.mxu1 %v7012_v50  ;;  %v16066_v50 = vpack.c.bf16 %v12553_v48, %v12552_v46 }
0x1ed8   :  { %14509 = vmatmul.mubr.f32.vlgmr.msra.gmra.mrb[28].mxu1 %v7013_v60  ;;  %v12554_v60 = vld [vmem:[%s20700_s7 + $0x740] sm:$0xff] }
0x1ed9   :  { %16017 = vmatpush3.bf16.msra.mxu1 %v16014_v57  ;;  %14543 = vmatprep.mubr.f32.mxu1 %v6819_v10 }
0x1eda   :  { %16019 = vmatprep.subr.bf16.mxu1 %v16018_v59 }
0x1edb   :  { %v19251_v62 = vpop.f32.mrb[146].mxu0 }
0x1edc   :  { %v7346_v7 = vpop.f32.mrb[147].mxu0 }
0x1edd   :  { %16021 = vmatpush3.bf16.msra.mxu1 %v16018_v59  ;;  %v12555_v59 = vld [vmem:[%s20700_s7 + $0x748] sm:$0xff] }
0x1ede   :  { %16023 = vmatprep.subr.bf16.mxu1 %v16022_v22  ;;  %v16070_v10 = vpack.c.bf16 %v12555_v59, %v12554_v60 }
0x1ee1   :  { %16025 = vmatpush3.bf16.msra.mxu1 %v16022_v22  ;;  %v16074_v22 = vpack.c.bf16 %v12557_v20, %v12556_v15 }
0x1ee2   :  { %16027 = vmatprep.subr.bf16.mxu1 %v16026_v26 }
0x1ee3   :  { %v14601_v39 = vpop.f32.mrb[148].mxu0 }
0x1ee4   :  { %v7527_v21 = vmul.f32 0.35355338, %v14601_v39  ;;  %v7517_v27 = vpop.f32.mrb[149].mxu0  ;;  %v12564_v39 = vld [vmem:[%s20700_s7 + $0x780] sm:$0xff] }
0x1ee5   :  { %v7526_v6 = vmul.f32 0.35355338, %v7517_v27  ;;  %16029 = vmatpush3.bf16.msra.mxu1 %v16026_v26  ;;  %v16078_v26 = vpack.c.bf16 %v12559_v3, %v12558_v25  ;;  %v16094_v32 = vpack.c.bf16 %v12565_v51, %v12564_v39  ;;  %v12567_v27 = vld [vmem:[%s20700_s7 + $0x798] sm:$0xff]  ;;  %v12587_v25 = vld [vmem:[%s20703_s11 + $0x68] sm:$0xff]  ;;  %v12588_v3 = vld [vmem:[%s20703_s11 + $0x70] sm:$0xff] }
0x1ee6   :  { %v7529_v29 = vadd.f32 %v19138_v28, %v7527_v21  ;;  %16031 = vmatprep.subr.bf16.mxu1 %v16030_v61  ;;  %v16038_v28 = vpack.c.bf16 %v12523_v37, %v12522_v19  ;;  %v12566_v21 = vld [vmem:[%s20700_s7 + $0x790] sm:$0xff] }
0x1ee7   :  { %v7528_v63 = vadd.f32 %v19144_v53, %v7526_v6  ;;  %v12524_v53 = vld [vmem:[%s20700_s7 + $0x670] sm:$0xff] }
0x1ee8   :  { %v7532_v16 = vmul.f32 1.442695, %v7529_v29  ;;  %v16042_v54 = vpack.c.bf16 %v12525_v40, %v12524_v53  ;;  %v16098_v29 = vpack.c.bf16 %v12567_v27, %v12566_v21  ;;  %v12570_v37 = vld [vmem:[%s20700_s7 + $0x7b0] sm:$0xff]  ;;  %v12575_v40 = vld [vmem:[%s20700_s7 + $0x7d8] sm:$0xff] }
0x1ee9   :  { %v7530_v35 = vmul.f32 1.442695, %v7528_v63  ;;  %16033 = vmatpush3.bf16.msra.mxu1 %v16030_v61  ;;  %v16082_v61 = vpack.c.bf16 %v12561_v24, %v12560_v23  ;;  %v12569_v63 = vld [vmem:[%s20700_s7 + $0x7a8] sm:$0xff]  ;;  %v12574_v53 = vld [vmem:[%s20700_s7 + $0x7d0] sm:$0xff]  ;;  %v12594_v24 = vld [vmem:[%s20704_s13 + $0x180] sm:$0xff] }
0x1eea   :  { %16855 = vpow2.f32 %v7532_v16  ;;  %16035 = vmatprep.subr.bf16.mxu1 %v16034_v43 }
0x1eeb   :  { %16857 = vpow2.f32 %v7530_v35  ;;  %v12573_v35 = vld [vmem:[%s20700_s7 + $0x7c8] sm:$0xff] }
0x1eec   :  { %16859 = vrcp.f32 %v7266_v31  ;;  %v12572_v31 = vld [vmem:[%s20700_s7 + $0x7c0] sm:$0xff] }
0x1eed   :  { %16037 = vmatpush3.bf16.msra.mxu1 %v16034_v43  ;;  %v12568_v43 = vld [vmem:[%s20700_s7 + $0x7a0] sm:$0xff] }
0x1eee   :  { %16039 = vmatprep.subr.bf16.mxu1 %v16038_v28  ;;  %v16102_v19 = vpack.c.bf16 %v12569_v63, %v12568_v43 }
0x1ef1   :  { %16041 = vmatpush3.bf16.msra.mxu1 %v16038_v28  ;;  %v16110_v28 = vpack.c.bf16 %v12573_v35, %v12572_v31 }
0x1ef2   :  { %16043 = vmatprep.subr.bf16.mxu1 %v16042_v54 }
0x1ef4   :  { %v16856_v45 = vpop.eup %16855 }
0x1ef5   :  { %v16858_v57 = vpop.eup %16857  ;;  %16045 = vmatpush3.bf16.msra.mxu1 %v16042_v54  ;;  %v7537_v58 = vsel %vm777_vm1, %v16856_v45, 0.0  ;;  %v16114_v54 = vpack.c.bf16 %v12575_v40, %v12574_v53  ;;  %v12584_v40 = vld [vmem:[%s20705_s9 + $0x3] ss:$0 sm:$0xff] }
0x1ef6   :  { %v16860_v12 = vpop.eup %16859  ;;  %7538 = vadd.xlane.f32.xlu1 %v7537_v58  ;;  %14606 = vmatprep.mubr.msk.f32.mxu0 %vm777_vm1, %v16858_v57  ;;  %v7534_v11 = vsel %vm777_vm1, %v16858_v57, 0.0 }
0x1ef7   :  { %v7355_v34 = vmul.f32 %v16860_v12, %v7346_v7  ;;  %14607 = vmatmul.mubr.msk.f32.vlgmr.msra.gmra.mrb[150].mxu0 %vm777_vm1, %v16856_v45  ;;  %7535 = vadd.xlane.f32.xlu0 %v7534_v11  ;;  %v7269_v7 = vpop.xlane.xlu1 %7268  ;;  %v16122_v45 = vpack.c.bf16 %v12579_v30, %v12578_v55 }
0x1ef8   :  { %14544 = vmatmul.mubr.f32.vlgmr.msra.gmra.mrb[28].mxu1 %v6820_v44  ;;  %16055 = vmatprep.subr.bf16.mxu1 %v16054_v42  ;;  %16861 = vrcp.f32 %v7269_v7 }
0x1ef9   :  { %16057 = vmatpush3.bf16.msra.mxu1 %v16054_v42  ;;  %14592 = vmatprep.mubr.f32.mxu1 %v7355_v34 }
0x1efa   :  { %16059 = vmatprep.subr.bf16.mxu1 %v16058_v17 }
0x1efd   :  { %16061 = vmatpush3.bf16.msra.mxu1 %v16058_v17 }
0x1efe   :  { %16063 = vmatprep.subr.bf16.mxu1 %v16062_v9 }
0x1f01   :  { %16065 = vmatpush3.bf16.msra.mxu1 %v16062_v9 }
0x1f02   :  { %16067 = vmatprep.subr.bf16.mxu1 %v16066_v50  ;;  %v16862_v6 = vpop.eup %16861 }
0x1f03   :  { %v7356_v8 = vmul.f32 %v16862_v6, %v19251_v62  ;;  %v12571_v62 = vld [vmem:[%s20700_s7 + $0x7b8] sm:$0xff] }
0x1f04   :  { %v16106_v16 = vpack.c.bf16 %v12571_v62, %v12570_v37 }
0x1f05   :  { %16069 = vmatpush3.bf16.msra.mxu1 %v16066_v50 }
0x1f06   :  { %16071 = vmatprep.subr.bf16.mxu1 %v16070_v10 }
0x1f09   :  { %16073 = vmatpush3.bf16.msra.mxu1 %v16070_v10 }
0x1f0a   :  { %16075 = vmatprep.subr.bf16.mxu1 %v16074_v22 }
0x1f0d   :  { %16077 = vmatpush3.bf16.msra.mxu1 %v16074_v22  ;;  %v12586_v22 = vld [vmem:[%s20703_s11 + $0x60] sm:$0xff] }
0x1f0e   :  { %16079 = vmatprep.subr.bf16.mxu1 %v16078_v26  ;;  %v16126_v7 = vpack.c.bf16 %v12587_v25, %v12586_v22  ;;  %v12608_v22 = vld [vmem:[%s20704_s13 + $0x1f0] sm:$0xff]  ;;  %v12609_v25 = vld [vmem:[%s20704_s13 + $0x1f8] sm:$0xff] }
0x1f10   :  { %16127 = vmatprep.subr.bf16.mxu0 %v16126_v7 }
0x1f11   :  { %16081 = vmatpush3.bf16.msra.mxu1 %v16078_v26  ;;  %v12589_v26 = vld [vmem:[%s20703_s11 + $0x78] sm:$0xff]  ;;  %16129 = vmatpush3.bf16.msra.mxu0 %v16126_v7  ;;  %v12591_v7 = vld [vmem:[%s20707_s12 + $0x3] ss:$0 sm:$0xff] }
0x1f12   :  { %16083 = vmatprep.subr.bf16.mxu1 %v16082_v61  ;;  %v16130_v23 = vpack.c.bf16 %v12589_v26, %v12588_v3  ;;  %v16162_v3 = vpack.c.bf16 %v12609_v25, %v12608_v22 }
0x1f14   :  { %16131 = vmatprep.subr.bf16.mxu0 %v16130_v23 }
0x1f15   :  { %16085 = vmatpush3.bf16.msra.mxu1 %v16082_v61  ;;  %16133 = vmatpush3.bf16.msra.mxu0 %v16130_v23  ;;  %v12595_v61 = vld [vmem:[%s20704_s13 + $0x188] sm:$0xff] }
0x1f16   :  { %16095 = vmatprep.subr.bf16.mxu1 %v16094_v32  ;;  %v16134_v39 = vpack.c.bf16 %v12595_v61, %v12594_v24 }
0x1f18   :  { %14593 = vmatmul.mubr.f32.vlgmr.msra.gmra.mrb[28].mxu1 %v7356_v8  ;;  %16135 = vmatprep.subr.bf16.mxu0 %v16134_v39 }
0x1f19   :  { %16097 = vmatpush3.bf16.msra.mxu1 %v16094_v32 }
0x1f1a   :  { %16099 = vmatprep.subr.bf16.mxu1 %v16098_v29 }
0x1f1d   :  { %16101 = vmatpush3.bf16.msra.mxu1 %v16098_v29 }
0x1f1e   :  { %16103 = vmatprep.subr.bf16.mxu1 %v16102_v19 }
0x1f21   :  { %16105 = vmatpush3.bf16.msra.mxu1 %v16102_v19 }
0x1f22   :  { %16107 = vmatprep.subr.bf16.mxu1 %v16106_v16 }
0x1f25   :  { %16109 = vmatpush3.bf16.msra.mxu1 %v16106_v16 }
0x1f26   :  { %16111 = vmatprep.subr.bf16.mxu1 %v16110_v28 }
0x1f29   :  { %16113 = vmatpush3.bf16.msra.mxu1 %v16110_v28 }
0x1f2a   :  { %16115 = vmatprep.subr.bf16.mxu1 %v16114_v54 }
0x1f2d   :  { %16117 = vmatpush3.bf16.msra.mxu1 %v16114_v54 }
0x1f2e   :  { %16119 = vmatprep.subr.bf16.mxu1 %v16118_v47 }
0x1f31   :  { %16121 = vmatpush3.bf16.msra.mxu1 %v16118_v47  ;;  %v12585_v47 = vld [vmem:[%s20720_s30 + $0x3] ss:$0 sm:$0xff] }
0x1f32   :  { %16123 = vmatprep.subr.bf16.mxu1 %v16122_v45 }
0x1f35   :  { %16125 = vmatpush3.bf16.msra.mxu1 %v16122_v45 }
0x1f83   :  { %v7539_v57 = vpop.xlane.xlu1 %7538 }
0x1f84   :  { %v7536_v42 = vpop.xlane.xlu0 %7535 }
0x1f85   :  { %16863 = vrcp.f32 %v7536_v42 }
0x1f86   :  { %16865 = vrcp.f32 %v7539_v57  ;;  %v12596_v57 = vld [vmem:[%s20704_s13 + $0x190] sm:$0xff] }
0x1f8f   :  { %v16864_v12 = vpop.eup %16863 }
0x1f90   :  { %v16866_v44 = vpop.eup %16865 }
0x1fca   :  { %v14608_v58 = vpop.f32.mrb[150].mxu0 }
0x1fcb   :  { %v7616_v11 = vpop.f32.mrb[151].mxu0  ;;  %v7626_v34 = vmul.f32 %v16866_v44, %v14608_v58  ;;  %v12597_v58 = vld [vmem:[%s20704_s13 + $0x198] sm:$0xff]  ;;  %v12599_v44 = vld [vmem:[%s20704_s13 + $0x1a8] sm:$0xff] }
0x1fcc   :  { %v7625_v17 = vmul.f32 %v16864_v12, %v7616_v11  ;;  %v16138_v12 = vpack.c.bf16 %v12597_v58, %v12596_v57  ;;  %v12598_v11 = vld [vmem:[%s20704_s13 + $0x1a0] sm:$0xff] }
0x1fce   :  { %14641 = vmatprep.mubr.f32.mxu1 %v7625_v17  ;;  %v16142_v17 = vpack.c.bf16 %v12599_v44, %v12598_v11  ;;  %v12629_v11 = vld [vmem:[%s20696_s5 + $0x668] sm:$0xff] }
0x1fcf   :  { %14642 = vmatmul.mubr.f32.vlgmr.msra.gmra.mrb[28].mxu1 %v7626_v34  ;;  %v12600_v34 = vld [vmem:[%s20704_s13 + $0x1b0] sm:$0xff] }
0x20a2   :  { %v14643_v18 = vpop.f32.mrb[28].mxu1 }
0x20a3   :  { %v7722_v9 = vadd.f32 %v14643_v18, %v18889_v56  ;;  %v7710_v46 = vpop.f32.mrb[29].mxu1  ;;  %v12601_v18 = vld [vmem:[%s20704_s13 + $0x1b8] sm:$0xff] }
0x20a4   :  { %v7721_v48 = vadd.f32 %v7710_v46, %v18891_v41  ;;  %v12603_v46 = vld [vmem:[%s20704_s13 + $0x1c8] sm:$0xff] }
0x20a5   :  { %v19392_v50 = vadd.f32 %v12581_v49, %v7722_v9  ;;  %v12602_v9 = vld [vmem:[%s20704_s13 + $0x1c0] sm:$0xff] }
0x20a6   :  { %v19394_v60 = vadd.f32 %v12581_v49, %v7721_v48  ;;  %v16146_v49 = vpack.c.bf16 %v12601_v18, %v12600_v34  ;;  %v12604_v48 = vld [vmem:[%s20704_s13 + $0x1d0] sm:$0xff]  ;;  %v12628_v34 = vld [vmem:[%s20696_s5 + $0x660] sm:$0xff] }
0x20a7   :  { %v7740_v59 = vsel %vm66_vm0, %v19392_v50, 0.0  ;;  %v7746_v10 = vmul.f32 %v19392_v50, %v19392_v50 }
0x20a8   :  { %7741 = vadd.xlane.f32.xlu1 %v7740_v59  ;;  %v7737_v15 = vsel %vm66_vm0, %v19394_v60, 0.0  ;;  %v7745_v56 = vmul.f32 %v19394_v60, %v19394_v60  ;;  %v16150_v59 = vpack.c.bf16 %v12603_v46, %v12602_v9  ;;  %v12653_v9 = vld [vmem:[%s20696_s5 + $0x728] sm:$0xff] }
0x20a9   :  { %7738 = vadd.xlane.f32.xlu0 %v7737_v15  ;;  %v7750_v41 = vsel %vm66_vm0, %v7746_v10, 0.0  ;;  %v12605_v10 = vld [vmem:[%s20704_s13 + $0x1d8] sm:$0xff] }
0x20aa   :  { %v7747_v20 = vsel %vm66_vm0, %v7745_v56, 0.0  ;;  %v16154_v15 = vpack.c.bf16 %v12605_v10, %v12604_v48  ;;  %v12606_v56 = vld [vmem:[%s20704_s13 + $0x1e0] sm:$0xff] }
0x20ab   :  { %v12640_v48 = vld [vmem:[%s20696_s5 + $0x6c0] sm:$0xff] }
0x20ac   :  { %7751 = vadd.xlane.f32.xlu1 %v7750_v41  ;;  %v12607_v41 = vld [vmem:[%s20704_s13 + $0x1e8] sm:$0xff] }
0x20ad   :  { %7748 = vadd.xlane.f32.xlu0 %v7747_v20  ;;  %v16158_v20 = vpack.c.bf16 %v12607_v41, %v12606_v56  ;;  %v12631_v56 = vld [vmem:[%s20696_s5 + $0x678] sm:$0xff] }
0x2135   :  { %v7742_v51 = vpop.xlane.xlu1 %7741 }
0x2136   :  { %v7744_v32 = vmul.f32 0.03125, %v7742_v51  ;;  %v7739_v21 = vpop.xlane.xlu0 %7738 }
0x2137   :  { %v7743_v27 = vmul.f32 0.03125, %v7739_v21 }
0x2138   :  { %v7756_v8 = vmul.f32 %v7744_v32, %v7744_v32  ;;  %v7760_v35 = vsub.f32 %v19392_v50, %v7744_v32 }
0x2139   :  { %v7752_v6 = vpop.xlane.xlu1 %7751  ;;  %v7755_v63 = vmul.f32 %v7743_v27, %v7743_v27  ;;  %v7759_v53 = vsub.f32 %v19394_v60, %v7743_v27 }
0x213a   :  { %v7754_v29 = vmul.f32 0.03125, %v7752_v6  ;;  %v7749_v43 = vpop.xlane.xlu0 %7748 }
0x213b   :  { %v7753_v19 = vmul.f32 0.03125, %v7749_v43 }
0x213c   :  { %v7758_v37 = vsub.f32 %v7754_v29, %v7756_v8 }
0x213d   :  { %v7757_v62 = vsub.f32 %v7753_v19, %v7755_v63 }
0x213e   :  { %v7762_v16 = vadd.f32 1e-05, %v7758_v37 }
0x213f   :  { %v7761_v31 = vadd.f32 1e-05, %v7757_v62 }
0x2140   :  { %16867 = vrsqrt.f32 %v7762_v16 }
0x2141   :  { %16869 = vrsqrt.f32 %v7761_v31 }
0x214a   :  { %v16868_v28 = vpop.eup %16867 }
0x214b   :  { %v16870_v54 = vpop.eup %16869  ;;  %v7766_v5 = vmul.f32 %v16868_v28, %v7760_v35 }
0x214c   :  { %v7765_v36 = vmul.f32 %v16870_v54, %v7759_v53 }
0x214d   :  { %v7774_v55 = vmul.f32 %v12584_v40, %v7766_v5  ;;  %v12611_v5 = vld [vmem:[%s20708_s14 + $0x3] ss:$0 sm:$0xff] }
0x214e   :  { %v7773_v30 = vmul.f32 %v12584_v40, %v7765_v36 }
0x214f   :  { %v7782_v42 = vadd.f32 %v12585_v47, %v7774_v55 }
0x2150   :  { %v7781_v45 = vadd.f32 %v12585_v47, %v7773_v30 }
0x2152   :  { %14652 = vmatprep.mubr.msk.f32.mxu0 %vm66_vm0, %v7781_v45 }
0x2153   :  { %14653 = vmatmul.mubr.msk.f32.vlgmr.msra.gmra.mrb[152].mxu0 %vm66_vm0, %v7782_v42 }
0x2154   :  { %16137 = vmatpush3.bf16.msra.mxu0 %v16134_v39 }
0x2155   :  { %16139 = vmatprep.subr.bf16.mxu0 %v16138_v12 }
0x2158   :  { %16141 = vmatpush3.bf16.msra.mxu0 %v16138_v12  ;;  %v12617_v12 = vld [vmem:[%s20696_s5 + $0x608] sm:$0xff] }
0x2159   :  { %16143 = vmatprep.subr.bf16.mxu0 %v16142_v17  ;;  %v16166_v44 = vpack.c.bf16 %v12629_v11, %v12617_v12  ;;  %v12620_v12 = vld [vmem:[%s20696_s5 + $0x620] sm:$0xff] }
0x215a   :  { %v12632_v11 = vld [vmem:[%s20696_s5 + $0x680] sm:$0xff] }
0x215c   :  { %16145 = vmatpush3.bf16.msra.mxu0 %v16142_v17  ;;  %v12616_v17 = vld [vmem:[%s20696_s5 + $0x600] sm:$0xff] }
0x215d   :  { %16147 = vmatprep.subr.bf16.mxu0 %v16146_v49  ;;  %v16168_v18 = vpack.c.bf16 %v12628_v34, %v12616_v17  ;;  %v12657_v17 = vld [vmem:[%s20696_s5 + $0x748] sm:$0xff]  ;;  %v16184_v34 = vpack.c.bf16 %v12632_v11, %v12620_v12 }
0x2160   :  { %16149 = vmatpush3.bf16.msra.mxu0 %v16146_v49  ;;  %v12641_v49 = vld [vmem:[%s20696_s5 + $0x6c8] sm:$0xff] }
0x2161   :  { %16151 = vmatprep.subr.bf16.mxu0 %v16150_v59  ;;  %v16170_v46 = vpack.c.bf16 %v12653_v9, %v12641_v49  ;;  %v12644_v49 = vld [vmem:[%s20696_s5 + $0x6e0] sm:$0xff] }
0x2162   :  { %v12656_v9 = vld [vmem:[%s20696_s5 + $0x740] sm:$0xff] }
0x2164   :  { %16153 = vmatpush3.bf16.msra.mxu0 %v16150_v59  ;;  %v12652_v59 = vld [vmem:[%s20696_s5 + $0x720] sm:$0xff] }
0x2165   :  { %16155 = vmatprep.subr.bf16.mxu0 %v16154_v15  ;;  %v16172_v10 = vpack.c.bf16 %v12652_v59, %v12640_v48  ;;  %v12635_v48 = vld [vmem:[%s20696_s5 + $0x698] sm:$0xff]  ;;  %v16188_v59 = vpack.c.bf16 %v12656_v9, %v12644_v49 }
0x2168   :  { %16157 = vmatpush3.bf16.msra.mxu0 %v16154_v15  ;;  %v12619_v15 = vld [vmem:[%s20696_s5 + $0x618] sm:$0xff] }
0x2169   :  { %16159 = vmatprep.subr.bf16.mxu0 %v16158_v20  ;;  %v16174_v41 = vpack.c.bf16 %v12631_v56, %v12619_v15  ;;  %v12622_v15 = vld [vmem:[%s20696_s5 + $0x630] sm:$0xff] }
0x216a   :  { %v12634_v56 = vld [vmem:[%s20696_s5 + $0x690] sm:$0xff] }
0x216c   :  { %16161 = vmatpush3.bf16.msra.mxu0 %v16158_v20 }
0x216d   :  { %16163 = vmatprep.subr.bf16.mxu0 %v16162_v3 }
0x2170   :  { %16165 = vmatpush3.bf16.msra.mxu0 %v16162_v3 }
0x2171   :  { %16167 = vmatprep.subr.bf16.mxu0 %v16166_v44  ;;  %v12645_v44 = vld [vmem:[%s20696_s5 + $0x6e8] sm:$0xff] }
0x2226   :  { %v14654_v26 = vpop.f32.mrb[152].mxu0 }
0x2227   :  { %v7874_v23 = vadd.f32 %v14654_v26, %v12591_v7  ;;  %v7868_v24 = vpop.f32.mrb[153].mxu0 }
0x2228   :  { %v7869_v61 = vadd.f32 %v12591_v7, %v7868_v24 }
0x2229   :  { %v7880_v39 = vmul.f32 0.044715, %v7874_v23  ;;  %v7878_v35 = vmul.f32 0.5, %v7874_v23 }
0x222a   :  { %v7879_v51 = vmul.f32 0.044715, %v7869_v61  ;;  %v7877_v16 = vmul.f32 0.5, %v7869_v61 }
0x222b   :  { %v7882_v32 = vmul.f32 %v7880_v39, %v7874_v23 }
0x222c   :  { %v7881_v21 = vmul.f32 %v7879_v51, %v7869_v61 }
0x222d   :  { %v7884_v27 = vmul.f32 %v7882_v32, %v7874_v23 }
0x222e   :  { %v7883_v6 = vmul.f32 %v7881_v21, %v7869_v61 }
0x222f   :  { %v7886_v8 = vadd.f32 %v7884_v27, %v7874_v23 }
0x2230   :  { %v7885_v29 = vadd.f32 %v7883_v6, %v7869_v61 }
0x2231   :  { %v7888_v43 = vmul.f32 0.7978846, %v7886_v8 }
0x2232   :  { %v7887_v63 = vmul.f32 0.7978846, %v7885_v29  ;;  %v12614_v29 = vld [vmem:[%s20697_s3 + $0x4] ss:$0 sm:$0xff] }
0x2233   :  { %16871 = vtanh.f32 %v7888_v43 }
0x2234   :  { %16873 = vtanh.f32 %v7887_v63  ;;  %v12618_v63 = vld [vmem:[%s20696_s5 + $0x610] sm:$0xff] }
0x223d   :  { %v16872_v19 = vpop.eup %16871 }
0x223e   :  { %v16874_v37 = vpop.eup %16873  ;;  %v7892_v62 = vadd.f32 1.0, %v16872_v19  ;;  %v12630_v19 = vld [vmem:[%s20696_s5 + $0x670] sm:$0xff] }
0x223f   :  { %v7891_v31 = vadd.f32 1.0, %v16874_v37  ;;  %v12615_v37 = vld [vmem:[%s20698_s4 + $0x4] ss:$0 sm:$0xff] }
0x2240   :  { %v7894_v53 = vmul.f32 %v7892_v62, %v7878_v35  ;;  %v12643_v62 = vld [vmem:[%s20696_s5 + $0x6d8] sm:$0xff] }
0x2241   :  { %v7893_v28 = vmul.f32 %v7891_v31, %v7877_v16  ;;  %v12655_v16 = vld [vmem:[%s20696_s5 + $0x738] sm:$0xff] }
0x2243   :  { %14687 = vmatprep.mubr.f32.mxu0 %v7893_v28 }
0x2244   :  { %14688 = vmatmul.mubr.f32.vlgmr.msra.gmra.mrb[154].mxu0 %v7894_v53  ;;  %v16176_v53 = vpack.c.bf16 %v12630_v19, %v12618_v63  ;;  %v12639_v63 = vld [vmem:[%s20696_s5 + $0x6b8] sm:$0xff] }
0x2245   :  { %8233 = vmatprep.mubr.f32.mxu0 %v16977_v38  ;;  %16169 = vmatpush1.bf16.msra.mxu0 %v16168_v18  ;;  %v16186_v18 = vpack.c.bf16 %v12657_v17, %v12645_v44 }
0x2246   :  { %16171 = vmatprep.subr.bf16.mxu0 %v16170_v46  ;;  %v12623_v46 = vld [vmem:[%s20696_s5 + $0x638] sm:$0xff] }
0x2249   :  { %16173 = vmatpush1.bf16.msra.mxu0 %v16172_v10  ;;  %v16190_v10 = vpack.c.bf16 %v12635_v48, %v12623_v46 }
0x224a   :  { %16175 = vmatprep.subr.bf16.mxu0 %v16174_v41  ;;  %v12647_v41 = vld [vmem:[%s20696_s5 + $0x6f8] sm:$0xff] }
0x2317   :  { %v14689_v40 = vpop.f32.mrb[154].mxu0 }
0x2318   :  { %v7988_v54 = vadd.f32 %v14689_v40, %v19392_v50  ;;  %v7978_v36 = vpop.f32.mrb[155].mxu0 }
0x2319   :  { %v7987_v47 = vadd.f32 %v7978_v36, %v19394_v60  ;;  %v12642_v36 = vld [vmem:[%s20696_s5 + $0x6d0] sm:$0xff] }
0x231a   :  { %v19485_v55 = vadd.f32 %v12611_v5, %v7988_v54 }
0x231b   :  { %v19487_v30 = vadd.f32 %v12611_v5, %v7987_v47  ;;  %v16178_v5 = vpack.c.bf16 %v12655_v16, %v12643_v62  ;;  %v12654_v47 = vld [vmem:[%s20696_s5 + $0x730] sm:$0xff] }
0x231c   :  { %v8012_v57 = vmul.f32 %v19485_v55, %v19485_v55  ;;  %v8006_v60 = vsel %vm66_vm0, %v19485_v55, 0.0  ;;  %v12626_v62 = vld [vmem:[%s20696_s5 + $0x650] sm:$0xff] }
0x231d   :  { %v8003_v45 = vsel %vm66_vm0, %v19487_v30, 0.0  ;;  %v8011_v42 = vmul.f32 %v19487_v30, %v19487_v30  ;;  %v12638_v16 = vld [vmem:[%s20696_s5 + $0x6b0] sm:$0xff] }
0x231e   :  { %8004 = vadd.xlane.f32.xlu0 %v8003_v45  ;;  %v8016_v58 = vsel %vm66_vm0, %v8012_v57, 0.0  ;;  %v12621_v45 = vld [vmem:[%s20696_s5 + $0x628] sm:$0xff]  ;;  %v16180_v57 = vpack.c.bf16 %v12654_v47, %v12642_v36  ;;  %v19693_v47 = vld [vmem:[%s20699_s6 + $0x30] sm:$0xff] }
0x231f   :  { %v8013_v50 = vsel %vm66_vm0, %v8011_v42, 0.0  ;;  %v12633_v42 = vld [vmem:[%s20696_s5 + $0x688] sm:$0xff]  ;;  %v8126_v49 = vrot.slane %v19693_v47, %v17308_v2 }
0x2320   :  { %8014 = vadd.xlane.f32.xlu1 %v8013_v50 }
0x2322   :  { %8007 = vadd.xlane.f32.xlu0 %v8006_v60 }
0x2324   :  { %8017 = vadd.xlane.f32.xlu1 %v8016_v58  ;;  %v16182_v58 = vpack.c.bf16 %v12633_v42, %v12621_v45  ;;  %v8106_v45 = vrot.slane %v19693_v47, %v17278_v52 }
0x23ab   :  { %v8005_v20 = vpop.xlane.xlu0 %8004 }
0x23ac   :  { %v8009_v22 = vmul.f32 0.03125, %v8005_v20  ;;  %v12659_v20 = vld [vmem:[%s20696_s5 + $0x758] sm:$0xff] }
0x23ad   :  { %v8015_v25 = vpop.xlane.xlu1 %8014 }
0x23ae   :  { %v8021_v3 = vmul.f32 %v8009_v22, %v8009_v22  ;;  %v8019_v7 = vmul.f32 0.03125, %v8015_v25  ;;  %v8025_v6 = vsub.f32 %v19487_v30, %v8009_v22  ;;  %v16192_v22 = vpack.c.bf16 %v12634_v56, %v12622_v15 }
0x23af   :  { %v8008_v26 = vpop.xlane.xlu0 %8007  ;;  %v16194_v25 = vpack.c.bf16 %v12659_v20, %v12647_v41 }
0x23b0   :  { %v8023_v23 = vsub.f32 %v8019_v7, %v8021_v3  ;;  %v8010_v24 = vmul.f32 0.03125, %v8008_v26  ;;  %v12646_v3 = vld [vmem:[%s20696_s5 + $0x6f0] sm:$0xff]  ;;  %v12625_v26 = vld [vmem:[%s20696_s5 + $0x648] sm:$0xff] }
0x23b1   :  { %v8018_v61 = vpop.xlane.xlu1 %8017  ;;  %v12658_v7 = vld [vmem:[%s20696_s5 + $0x750] sm:$0xff] }
0x23b2   :  { %v8027_v39 = vadd.f32 1e-05, %v8023_v23  ;;  %v8022_v51 = vmul.f32 %v8010_v24, %v8010_v24  ;;  %v8020_v32 = vmul.f32 0.03125, %v8018_v61  ;;  %v8026_v35 = vsub.f32 %v19485_v55, %v8010_v24  ;;  %v12637_v23 = vld [vmem:[%s20696_s5 + $0x6a8] sm:$0xff] }
0x23b3   :  { %v16196_v24 = vpack.c.bf16 %v12658_v7, %v12646_v3  ;;  %v16198_v61 = vpack.c.bf16 %v12637_v23, %v12625_v26  ;;  %v8134_v3 = vrot.slane %v19693_v47, %v17310_v4 }
0x23b4   :  { %16875 = vrsqrt.f32 %v8027_v39  ;;  %v8024_v21 = vsub.f32 %v8020_v32, %v8022_v51  ;;  %v12624_v39 = vld [vmem:[%s20696_s5 + $0x640] sm:$0xff]  ;;  %v12649_v32 = vld [vmem:[%s20696_s5 + $0x708] sm:$0xff] }
0x23b5   :  { %v12636_v51 = vld [vmem:[%s20696_s5 + $0x6a0] sm:$0xff] }
0x23b6   :  { %v8028_v27 = vadd.f32 1e-05, %v8024_v21  ;;  %v12661_v21 = vld [vmem:[%s20696_s5 + $0x768] sm:$0xff] }
0x23b8   :  { %16877 = vrsqrt.f32 %v8028_v27  ;;  %v16200_v27 = vpack.c.bf16 %v12636_v51, %v12624_v39  ;;  %v12665_v51 = vld [vmem:[%s20699_s6 + $0x38] sm:$0xf] }
0x23be   :  { %v16876_v8 = vpop.eup %16875 }
0x23bf   :  { %v8031_v43 = vmul.f32 %v16876_v8, %v8025_v6  ;;  %v16202_v6 = vpack.c.bf16 %v12661_v21, %v12649_v32  ;;  %v12648_v8 = vld [vmem:[%s20696_s5 + $0x700] sm:$0xff] }
0x23c1   :  { %v8039_v31 = vmul.f32 %v12614_v29, %v8031_v43  ;;  %v12627_v43 = vld [vmem:[%s20696_s5 + $0x658] sm:$0xff] }
0x23c2   :  { %v16878_v28 = vpop.eup %16877 }
0x23c3   :  { %v8032_v40 = vmul.f32 %v16878_v28, %v8026_v35  ;;  %v19549_v54 = vadd.f32 %v12615_v37, %v8039_v31  ;;  %v12651_v31 = vld [vmem:[%s20696_s5 + $0x718] sm:$0xff]  ;;  %v16208_v28 = vpack.c.bf16 %v12638_v16, %v12626_v62  ;;  %v8146_v16 = vrot.slane %v12665_v51, %v17319_v13 }
0x23c4   :  { %v12663_v35 = vld [vmem:[%s20696_s5 + $0x778] sm:$0xff] }
0x23c5   :  { %v8040_v50 = vmul.f32 %v12614_v29, %v8032_v40  ;;  %12666 = vmatmul.mubr.msk.f32.vlgmr.msra.gmra.mrb[156].mxu0 %vm66_vm0, %v19549_v54  ;;  %v12660_v29 = vld [vmem:[%s20696_s5 + $0x760] sm:$0xff]  ;;  %v12650_v40 = vld [vmem:[%s20696_s5 + $0x710] sm:$0xff] }
0x23c6   :  { %16177 = vmatpush1.bf16.msra.mxu0 %v16176_v53  ;;  %8239 = vmatprep.mubr.f32.mxu0 %v16977_v38  ;;  %v16204_v19 = vpack.c.bf16 %v12660_v29, %v12648_v8  ;;  %v16210_v53 = vpack.c.bf16 %v12663_v35, %v12651_v31  ;;  %v8138_v8 = vrot.slane %v12665_v51, %v17278_v52 }
0x23c7   :  { %v19566_v60 = vadd.f32 %v12615_v37, %v8040_v50  ;;  %16179 = vmatprep.subr.bf16.mxu0 %v16178_v5  ;;  %v16206_v37 = vpack.c.bf16 %v12639_v63, %v12627_v43  ;;  %v12662_v5 = vld [vmem:[%s20696_s5 + $0x770] sm:$0xff]  ;;  %v8142_v43 = vrot.slane %v12665_v51, %v17331_v33 }
0x23c8   :  { %v16212_v36 = vpack.c.bf16 %v12662_v5, %v12650_v40 }
0x23c9   :  { %12667 = vmatmul.mubr.msk.f32.gmra.mrb[158].mxu0 %vm66_vm0, %v19566_v60 }
0x23ca   :  { %16181 = vmatpush1.bf16.msra.mxu0 %v16180_v57  ;;  %8310 = vmatprep.mubr.f32.mxu0 %v16977_v38 }
0x23cb   :  { %16183 = vmatprep.subr.bf16.mxu0 %v16182_v58 }
0x23cd   :  { %12668 = vmatmul.mubr.msk.f32.vlgmr.msra.gmra.mrb[160].mxu0 %vm66_vm0, %v19549_v54 }
0x23ce   :  { %16185 = vmatpush1.bf16.msra.mxu0 %v16184_v34  ;;  %8316 = vmatprep.mubr.f32.mxu0 %v16977_v38  ;;  %v8122_v34 = vrot.slane %v19693_v47, %v17304_v0 }
0x23cf   :  { %16187 = vmatprep.subr.bf16.mxu0 %v16186_v18 }
0x23d1   :  { %12669 = vmatmul.mubr.msk.f32.gmra.mrb[162].mxu0 %vm66_vm0, %v19566_v60 }
0x23d2   :  { %16189 = vmatpush1.bf16.msra.mxu0 %v16188_v59  ;;  %8387 = vmatprep.mubr.f32.mxu0 %v16977_v38 }
0x23d3   :  { %16191 = vmatprep.subr.bf16.mxu0 %v16190_v10 }
0x23d5   :  { %12670 = vmatmul.mubr.msk.f32.vlgmr.msra.gmra.mrb[164].mxu0 %vm66_vm0, %v19549_v54 }
0x23d6   :  { %16193 = vmatpush1.bf16.msra.mxu0 %v16192_v22  ;;  %8393 = vmatprep.mubr.f32.mxu0 %v16977_v38  ;;  %v8130_v22 = vrot.slane %v19693_v47, %v17306_v1 }
0x23d7   :  { %16195 = vmatprep.subr.bf16.mxu0 %v16194_v25 }
0x23d9   :  { %12671 = vmatmul.mubr.msk.f32.gmra.mrb[166].mxu0 %vm66_vm0, %v19566_v60 }
0x23da   :  { %16197 = vmatpush1.bf16.msra.mxu0 %v16196_v24  ;;  %8464 = vmatprep.mubr.f32.mxu0 %v16977_v38 }
0x23db   :  { %16199 = vmatprep.subr.bf16.mxu0 %v16198_v61 }
0x23dd   :  { %12672 = vmatmul.mubr.msk.f32.vlgmr.msra.gmra.mrb[168].mxu0 %vm66_vm0, %v19549_v54 }
0x23de   :  { %16201 = vmatpush1.bf16.msra.mxu0 %v16200_v27  ;;  %8470 = vmatprep.mubr.f32.mxu0 %v16977_v38 }
0x23df   :  { %16203 = vmatprep.subr.bf16.mxu0 %v16202_v6 }
0x23e1   :  { %12673 = vmatmul.mubr.msk.f32.gmra.mrb[170].mxu0 %vm66_vm0, %v19566_v60 }
0x23e2   :  { %16205 = vmatpush1.bf16.msra.mxu0 %v16204_v19  ;;  %8541 = vmatprep.mubr.f32.mxu0 %v16977_v38 }
0x23e3   :  { %16207 = vmatprep.subr.bf16.mxu0 %v16206_v37 }
0x23e5   :  { %12674 = vmatmul.mubr.msk.f32.vlgmr.msra.gmra.mrb[172].mxu0 %vm66_vm0, %v19549_v54 }
0x23e6   :  { %16209 = vmatpush1.bf16.msra.mxu0 %v16208_v28  ;;  %8547 = vmatprep.mubr.f32.mxu0 %v16977_v38  ;;  %v8150_v28 = vrot.slane %v12665_v51, %v17321_v14 }
0x23e7   :  { %16211 = vmatprep.subr.bf16.mxu0 %v16210_v53 }
0x23e9   :  { %12675 = vmatmul.mubr.msk.f32.gmra.mrb[174].mxu0 %vm66_vm0, %v19566_v60 }
0x23ea   :  { %16213 = vmatpush1.bf16.msra.mxu0 %v16212_v36  ;;  %8618 = vmatprep.mubr.f32.mxu0 %v16977_v38 }
0x23ed   :  { %12676 = vmatmul.mubr.msk.f32.vlgmr.msra.gmra.mrb[176].mxu0 %vm66_vm0, %v19549_v54 }
0x23ee   :  { %8624 = vmatprep.mubr.f32.mxu0 %v16977_v38 }
0x23f1   :  { %12677 = vmatmul.mubr.msk.f32.gmra.mrb[178].mxu0 %vm66_vm0, %v19566_v60 }
0x2498   :  { %v8235_v42 = vpop.f32.mrb[156].mxu0 }
0x2499   :  { %v8236_v50 = vadd.f32 %v8235_v42, %v8106_v45  ;;  %v19697_v57 = vpop.f32.mrb[157].mxu0 }
0x249b   :  { %14694 = vmatprep.mubr.f32.mxu0 %v8236_v50 }
0x249c   :  { %v8241_v58 = vpop.f32.mrb[158].mxu0 }
0x249d   :  { %v19699_v54 = vpop.f32.mrb[159].mxu0  ;;  %v8242_v32 = vadd.f32 %v8241_v58, %v8106_v45 }
0x24a0   :  { %v19701_v12 = vpop.f32.mrb[160].mxu0 }
0x24a1   :  { %v19703_v11 = vpop.f32.mrb[161].mxu0 }
0x24a4   :  { %v19705_v60 = vpop.f32.mrb[162].mxu0 }
0x24a5   :  { %v19707_v44 = vpop.f32.mrb[163].mxu0 }
0x24a8   :  { %v8389_v17 = vpop.f32.mrb[164].mxu0 }
0x24a9   :  { %v8391_v18 = vpop.f32.mrb[165].mxu0  ;;  %v8390_v46 = vadd.f32 %v8389_v17, %v8122_v34 }
0x24aa   :  { %v8392_v10 = vadd.f32 %v8391_v18, %v8126_v49 }
0x24ac   :  { %v8395_v9 = vpop.f32.mrb[166].mxu0 }
0x24ad   :  { %v8396_v48 = vadd.f32 %v8395_v9, %v8122_v34  ;;  %v8397_v59 = vpop.f32.mrb[167].mxu0 }
0x24ae   :  { %v8398_v15 = vadd.f32 %v8397_v59, %v8126_v49 }
0x24af   :  { %v16214_v56 = vpack.c.bf16 %v8396_v48, %v8390_v46 }
0x24b0   :  { %v19713_v41 = vpack.c.bf16 %v8398_v15, %v8392_v10  ;;  %v8466_v20 = vpop.f32.mrb[168].mxu0  ;;  %v19734_v10 = vld [vmem:[%s20701_s2 + $0x8] sm:$0xff] }
0x24b1   :  { %v8468_v25 = vpop.f32.mrb[169].mxu0  ;;  %16215 = vmatprep.subr.bf16.mxu0 %v16214_v56  ;;  %v8467_v26 = vadd.f32 %v8466_v20, %v8130_v22 }
0x24b2   :  { %16217 = vmatpush3.bf16.xpose.msra.mxu0 %v16214_v56  ;;  %v8469_v61 = vadd.f32 %v8468_v25, %v8134_v3  ;;  %v19740_v56 = vld [vmem:[%s20701_s2] sm:$0xff] }
0x24b4   :  { %v8472_v7 = vpop.f32.mrb[170].mxu0 }
0x24b5   :  { %v8473_v23 = vadd.f32 %v8472_v7, %v8130_v22  ;;  %v8474_v24 = vpop.f32.mrb[171].mxu0 }
0x24b6   :  { %v8475_v39 = vadd.f32 %v8474_v24, %v8134_v3  ;;  %v8110_v3 = vrot.slane %v19693_v47, %v17331_v33  ;;  %v8114_v24 = vrot.slane %v19693_v47, %v17319_v13 }
0x24b7   :  { %v16294_v21 = vpack.c.bf16 %v8473_v23, %v8467_v26 }
0x24b8   :  { %v19722_v27 = vpack.c.bf16 %v8475_v39, %v8469_v61  ;;  %v8543_v6 = vpop.f32.mrb[172].mxu0  ;;  %v8238_v23 = vadd.f32 %v19697_v57, %v8110_v3  ;;  %v8244_v61 = vadd.f32 %v19699_v54, %v8110_v3  ;;  %v8313_v39 = vadd.f32 %v19701_v12, %v8114_v24  ;;  %v12706_v3 = vld [vmem:[%s20700_s7 + $0x8c0] sm:$0xff] }
0x24b9   :  { %v8545_v29 = vpop.f32.mrb[173].mxu0  ;;  %14695 = vmatmul.mubr.f32.vlgmr.msra.gmra.mrb[180].mxu0 %v8242_v32  ;;  %v8544_v19 = vadd.f32 %v8543_v6, %v8138_v8  ;;  %v8319_v57 = vadd.f32 %v19705_v60, %v8114_v24  ;;  %v12709_v24 = vld [vmem:[%s20700_s7 + $0x8d8] sm:$0xff] }
0x24ba   :  { %v8546_v31 = vadd.f32 %v8545_v29, %v8142_v43 }
0x24bc   :  { %v8549_v63 = vpop.f32.mrb[174].mxu0 }
0x24bd   :  { %v8550_v37 = vadd.f32 %v8549_v63, %v8138_v8  ;;  %v8551_v62 = vpop.f32.mrb[175].mxu0 }
0x24be   :  { %v8552_v35 = vadd.f32 %v8551_v62, %v8142_v43 }
0x24bf   :  { %v16218_v53 = vpack.c.bf16 %v8550_v37, %v8544_v19 }
0x24c0   :  { %v16226_v40 = vpack.c.bf16 %v8552_v35, %v8546_v31  ;;  %v8620_v5 = vpop.f32.mrb[176].mxu0 }
0x24c1   :  { %v8621_v36 = vadd.f32 %v8620_v5, %v8146_v16  ;;  %v8622_v45 = vpop.f32.mrb[177].mxu0  ;;  %16219 = vmatprep.subr.bf16.mxu0 %v16218_v53 }
0x24c2   :  { %v8623_v42 = vadd.f32 %v8622_v45, %v8150_v28  ;;  %16221 = vmatpush3.bf16.msra.mxu0 %v16218_v53  ;;  %16227 = vmatprep.subr.bf16.mxu1 %v16226_v40  ;;  %v8118_v45 = vrot.slane %v19693_v47, %v17321_v14 }
0x24c3   :  { %16223 = vmatprep.subr.bf16.mxu0 %v19713_v41  ;;  %16229 = vmatpush3.bf16.msra.mxu1 %v16226_v40 }
0x24c4   :  { %v8626_v50 = vpop.f32.mrb[178].mxu0  ;;  %v8321_v47 = vadd.f32 %v19707_v44, %v8118_v45  ;;  %v12701_v44 = vld [vmem:[%s20700_s7 + $0x898] sm:$0xff] }
0x24c5   :  { %v8627_v58 = vadd.f32 %v8626_v50, %v8146_v16  ;;  %v8628_v17 = vpop.f32.mrb[179].mxu0 }
0x24c6   :  { %v8629_v34 = vadd.f32 %v8628_v17, %v8150_v28 }
0x24c7   :  { %v16298_v18 = vpack.c.bf16 %v8627_v58, %v8621_v36 }
0x24c8   :  { %v19729_v49 = vpack.c.bf16 %v8629_v34, %v8623_v42  ;;  %v8315_v34 = vadd.f32 %v19703_v11, %v8118_v45  ;;  %v12698_v11 = vld [vmem:[%s20700_s7 + $0x880] sm:$0xff] }
0x24c9   :  { %v12684_v45 = vld [vmem:[%s20700_s7 + $0x820] sm:$0xff] }
0x258c   :  { %v14696_v9 = vpop.f32.mrb[180].mxu0 }
0x258d   :  { %v8707_v46 = vmul.f32 0.35355338, %v14696_v9  ;;  %v8697_v48 = vpop.f32.mrb[181].mxu0  ;;  %v12699_v9 = vld [vmem:[%s20700_s7 + $0x888] sm:$0xff] }
0x258e   :  { %v8706_v59 = vmul.f32 0.35355338, %v8697_v48 }
0x258f   :  { %v8709_v15 = vadd.f32 %v19734_v10, %v8707_v46  ;;  %v16230_v46 = vpack.c.bf16 %v12699_v9, %v12698_v11  ;;  %v12689_v11 = vld [vmem:[%s20700_s7 + $0x848] sm:$0xff] }
0x2590   :  { %v8708_v20 = vadd.f32 %v19740_v56, %v8706_v59  ;;  %v12703_v59 = vld [vmem:[%s20700_s7 + $0x8a8] sm:$0xff] }
0x2591   :  { %v8712_v22 = vmul.f32 1.442695, %v8709_v15  ;;  %16231 = vmatprep.subr.bf16.mxu1 %v16230_v46 }
0x2592   :  { %v8710_v25 = vmul.f32 1.442695, %v8708_v20  ;;  %v12704_v20 = vld [vmem:[%s20700_s7 + $0x8b0] sm:$0xff] }
0x2594   :  { %16879 = vpow2.f32 %v8710_v25 }
0x2595   :  { %16881 = vpow2.f32 %v8712_v22  ;;  %v12705_v22 = vld [vmem:[%s20700_s7 + $0x8b8] sm:$0xff] }
0x2596   :  { %v16242_v25 = vpack.c.bf16 %v12705_v22, %v12704_v20 }
0x259e   :  { %v16880_v7 = vpop.eup %16879 }
0x259f   :  { %v16882_v26 = vpop.eup %16881  ;;  %14701 = vmatprep.mubr.msk.f32.mxu0 %vm777_vm1, %v16880_v7  ;;  %v8714_v42 = vsel %vm777_vm1, %v16880_v7, 0.0  ;;  %v12707_v7 = vld [vmem:[%s20700_s7 + $0x8c8] sm:$0xff] }
0x25a0   :  { %14702 = vmatmul.mubr.msk.f32.vlgmr.msra.gmra.mrb[182].mxu0 %vm777_vm1, %v16882_v26  ;;  %v8717_v36 = vsel %vm777_vm1, %v16882_v26, 0.0  ;;  %v16246_v26 = vpack.c.bf16 %v12707_v7, %v12706_v3  ;;  %v12692_v3 = vld [vmem:[%s20700_s7 + $0x860] sm:$0xff]  ;;  %v12693_v7 = vld [vmem:[%s20700_s7 + $0x868] sm:$0xff] }
0x25a1   :  { %16225 = vmatpush3.bf16.xpose.msra.mxu0 %v19713_v41  ;;  %14708 = vmatprep.mubr.f32.mxu0 %v8238_v23  ;;  %v12708_v23 = vld [vmem:[%s20700_s7 + $0x8d0] sm:$0xff] }
0x25a2   :  { %16295 = vmatprep.subr.bf16.mxu0 %v16294_v21 }
0x25a8   :  { %14709 = vmatmul.mubr.f32.vlgmr.msra.gmra.mrb[184].mxu0 %v8244_v61  ;;  %v16250_v61 = vpack.c.bf16 %v12709_v24, %v12708_v23 }
0x25a9   :  { %16297 = vmatpush3.bf16.xpose.msra.mxu0 %v16294_v21  ;;  %14792 = vmatprep.mubr.f32.mxu0 %v8313_v39  ;;  %v12710_v39 = vld [vmem:[%s20700_s7 + $0x8e0] sm:$0xff] }
0x25aa   :  { %16299 = vmatprep.subr.bf16.mxu0 %v16298_v18 }
0x25b0   :  { %14793 = vmatmul.mubr.f32.vlgmr.msra.gmra.mrb[186].mxu0 %v8319_v57  ;;  %v12711_v57 = vld [vmem:[%s20700_s7 + $0x8e8] sm:$0xff] }
0x25b1   :  { %16301 = vmatpush3.bf16.msra.mxu0 %v16298_v18 }
0x25b2   :  { %16335 = vmatprep.subr.bf16.mxu0 %v19722_v27 }
0x2673   :  { %v19755_v41 = vpop.f32.mrb[182].mxu0 }
0x2674   :  { %v19757_v51 = vpop.f32.mrb[183].mxu0 }
0x267b   :  { %v14710_v32 = vpop.f32.mrb[184].mxu0 }
0x267c   :  { %v8900_v6 = vmul.f32 0.35355338, %v14710_v32  ;;  %v8890_v8 = vpop.f32.mrb[185].mxu0  ;;  %v16254_v32 = vpack.c.bf16 %v12711_v57, %v12710_v39  ;;  %v12716_v57 = vld [vmem:[%s20700_s7 + $0x900] sm:$0xff] }
0x267d   :  { %v8899_v54 = vmul.f32 0.35355338, %v8890_v8  ;;  %v12713_v8 = vld [vmem:[%s20700_s7 + $0x8f8] sm:$0xff] }
0x267e   :  { %v8902_v12 = vadd.f32 %v19734_v10, %v8900_v6  ;;  %v12712_v6 = vld [vmem:[%s20700_s7 + $0x8f0] sm:$0xff] }
0x267f   :  { %v8901_v21 = vadd.f32 %v19740_v56, %v8899_v54  ;;  %v16258_v54 = vpack.c.bf16 %v12713_v8, %v12712_v6  ;;  %v12718_v8 = vld [vmem:[%s20700_s7 + $0x910] sm:$0xff] }
0x2680   :  { %v8905_v29 = vmul.f32 1.442695, %v8902_v12  ;;  %v12680_v12 = vld [vmem:[%s20700_s7 + $0x800] sm:$0xff] }
0x2681   :  { %v8903_v43 = vmul.f32 1.442695, %v8901_v21  ;;  %v12681_v21 = vld [vmem:[%s20700_s7 + $0x808] sm:$0xff] }
0x2682   :  { %16883 = vpow2.f32 %v8905_v29  ;;  %v16262_v29 = vpack.c.bf16 %v12681_v21, %v12680_v12 }
0x2683   :  { %16885 = vpow2.f32 %v8903_v43  ;;  %v14794_v60 = vpop.f32.mrb[186].mxu0 }
0x2684   :  { %v9243_v63 = vmul.f32 0.35355338, %v14794_v60  ;;  %v9233_v19 = vpop.f32.mrb[187].mxu0 }
0x2685   :  { %v9242_v37 = vmul.f32 0.35355338, %v9233_v19 }
0x2686   :  { %v9245_v62 = vadd.f32 %v19734_v10, %v9243_v63 }
0x2687   :  { %v9244_v16 = vadd.f32 %v19740_v56, %v9242_v37 }
0x2688   :  { %v9248_v31 = vmul.f32 1.442695, %v9245_v62  ;;  %v12682_v62 = vld [vmem:[%s20700_s7 + $0x810] sm:$0xff] }
0x2689   :  { %v9246_v35 = vmul.f32 1.442695, %v9244_v16  ;;  %v12683_v16 = vld [vmem:[%s20700_s7 + $0x818] sm:$0xff] }
0x268a   :  { %16887 = vpow2.f32 %v9248_v31 }
0x268b   :  { %16889 = vpow2.f32 %v9246_v35 }
0x268c   :  { %v16884_v28 = vpop.eup %16883 }
0x268d   :  { %v16886_v53 = vpop.eup %16885  ;;  %v8910_v40 = vsel %vm777_vm1, %v16884_v28, 0.0 }
0x268e   :  { %8911 = vadd.xlane.f32.xlu1 %v8910_v40  ;;  %14715 = vmatprep.mubr.msk.f32.mxu1 %vm777_vm1, %v16886_v53  ;;  %v8907_v5 = vsel %vm777_vm1, %v16886_v53, 0.0 }
0x268f   :  { %14716 = vmatmul.mubr.msk.f32.vlgmr.msra.gmra.mrb[30].mxu1 %vm777_vm1, %v16884_v28  ;;  %8908 = vadd.xlane.f32.xlu0 %v8907_v5  ;;  %v16266_v5 = vpack.c.bf16 %v12683_v16, %v12682_v62  ;;  %v12720_v16 = vld [vmem:[%s20700_s7 + $0x920] sm:$0xff] }
0x2690   :  { %16233 = vmatpush3.bf16.msra.mxu1 %v16230_v46  ;;  %v12690_v46 = vld [vmem:[%s20700_s7 + $0x850] sm:$0xff] }
0x2692   :  { %8718 = vadd.xlane.f32.xlu1 %v8717_v36 }
0x2693   :  { %8715 = vadd.xlane.f32.xlu0 %v8714_v42  ;;  %v12685_v42 = vld [vmem:[%s20700_s7 + $0x828] sm:$0xff] }
0x2694   :  { %v16888_v50 = vpop.eup %16887 }
0x2695   :  { %v16890_v58 = vpop.eup %16889  ;;  %v9253_v17 = vsel %vm777_vm1, %v16888_v50, 0.0 }
0x2696   :  { %9254 = vadd.xlane.f32.xlu1 %v9253_v17  ;;  %14799 = vmatprep.mubr.msk.f32.mxu0 %vm777_vm1, %v16890_v58  ;;  %v9250_v18 = vsel %vm777_vm1, %v16890_v58, 0.0  ;;  %v12686_v17 = vld [vmem:[%s20700_s7 + $0x830] sm:$0xff] }
0x2697   :  { %14800 = vmatmul.mubr.msk.f32.vlgmr.msra.gmra.mrb[188].mxu0 %vm777_vm1, %v16888_v50  ;;  %9251 = vadd.xlane.f32.xlu0 %v9250_v18  ;;  %v16270_v50 = vpack.c.bf16 %v12685_v42, %v12684_v45  ;;  %v12726_v45 = vld [vmem:[%s20700_s7 + $0x950] sm:$0xff]  ;;  %v12727_v42 = vld [vmem:[%s20700_s7 + $0x958] sm:$0xff] }
0x2698   :  { %16337 = vmatpush3.bf16.xpose.msra.mxu0 %v19722_v27  ;;  %14841 = vmatprep.mubr.f32.mxu0 %v8315_v34  ;;  %v12700_v27 = vld [vmem:[%s20700_s7 + $0x890] sm:$0xff] }
0x2699   :  { %16339 = vmatprep.subr.bf16.mxu0 %v19729_v49  ;;  %v16234_v48 = vpack.c.bf16 %v12701_v44, %v12700_v27  ;;  %v12691_v44 = vld [vmem:[%s20700_s7 + $0x858] sm:$0xff] }
0x269a   :  { %v16282_v22 = vpack.c.bf16 %v12691_v44, %v12690_v46  ;;  %v12735_v46 = vld [vmem:[%s20700_s7 + $0x988] sm:$0xff] }
0x269b   :  { %16235 = vmatprep.subr.bf16.mxu1 %v16234_v48 }
0x269c   :  { %16237 = vmatpush3.bf16.msra.mxu1 %v16234_v48 }
0x269f   :  { %14842 = vmatmul.mubr.f32.vlgmr.msra.gmra.mrb[190].mxu0 %v8321_v47  ;;  %v12688_v47 = vld [vmem:[%s20700_s7 + $0x840] sm:$0xff] }
0x26a0   :  { %16341 = vmatpush3.bf16.msra.mxu0 %v19729_v49  ;;  %v12702_v49 = vld [vmem:[%s20700_s7 + $0x8a0] sm:$0xff]  ;;  %v16278_v9 = vpack.c.bf16 %v12689_v11, %v12688_v47  ;;  %v12730_v47 = vld [vmem:[%s20700_s7 + $0x970] sm:$0xff]  ;;  %v12731_v11 = vld [vmem:[%s20700_s7 + $0x978] sm:$0xff] }
0x26a1   :  { %v16238_v15 = vpack.c.bf16 %v12703_v59, %v12702_v49 }
0x26a3   :  { %16239 = vmatprep.subr.bf16.mxu1 %v16238_v15 }
0x26a4   :  { %16241 = vmatpush3.bf16.msra.mxu1 %v16238_v15 }
0x26a5   :  { %16243 = vmatprep.subr.bf16.mxu1 %v16242_v25 }
0x26a8   :  { %16245 = vmatpush3.bf16.msra.mxu1 %v16242_v25 }
0x26a9   :  { %16247 = vmatprep.subr.bf16.mxu1 %v16246_v26 }
0x26ac   :  { %16249 = vmatpush3.bf16.msra.mxu1 %v16246_v26 }
0x26ad   :  { %16251 = vmatprep.subr.bf16.mxu1 %v16250_v61 }
0x26b0   :  { %16253 = vmatpush3.bf16.msra.mxu1 %v16250_v61  ;;  %v12695_v61 = vld [vmem:[%s20700_s7 + $0x878] sm:$0xff] }
0x26b1   :  { %16255 = vmatprep.subr.bf16.mxu1 %v16254_v32 }
0x26b4   :  { %16257 = vmatpush3.bf16.msra.mxu1 %v16254_v32  ;;  %v12717_v32 = vld [vmem:[%s20700_s7 + $0x908] sm:$0xff] }
0x26b5   :  { %16259 = vmatprep.subr.bf16.mxu1 %v16258_v54  ;;  %v16302_v21 = vpack.c.bf16 %v12717_v32, %v12716_v57  ;;  %v12746_v57 = vld [vmem:[%s20700_s7 + $0x9e0] sm:$0xff]  ;;  %v12747_v32 = vld [vmem:[%s20700_s7 + $0x9e8] sm:$0xff] }
0x26b8   :  { %16261 = vmatpush3.bf16.msra.mxu1 %v16258_v54  ;;  %v12719_v54 = vld [vmem:[%s20700_s7 + $0x918] sm:$0xff] }
0x26b9   :  { %16263 = vmatprep.subr.bf16.mxu1 %v16262_v29 }
0x271b   :  { %v8912_v63 = vpop.xlane.xlu1 %8911 }
0x271c   :  { %v8909_v43 = vpop.xlane.xlu0 %8908 }
0x271d   :  { %16891 = vrcp.f32 %v8909_v43 }
0x271f   :  { %v8719_v15 = vpop.xlane.xlu1 %8718 }
0x2720   :  { %v8716_v60 = vpop.xlane.xlu0 %8715 }
0x2721   :  { %16893 = vrcp.f32 %v8716_v60 }
0x2722   :  { %16895 = vrcp.f32 %v8912_v63 }
0x2723   :  { %16897 = vrcp.f32 %v8719_v15 }
0x2724   :  { %v9252_v23 = vpop.xlane.xlu0 %9251 }
0x2727   :  { %v16892_v19 = vpop.eup %16891 }
0x272b   :  { %v16894_v31 = vpop.eup %16893 }
0x272c   :  { %v16896_v28 = vpop.eup %16895  ;;  %v8805_v36 = vmul.f32 %v16894_v31, %v19757_v51  ;;  %v12687_v51 = vld [vmem:[%s20700_s7 + $0x838] sm:$0xff]  ;;  %v12721_v31 = vld [vmem:[%s20700_s7 + $0x928] sm:$0xff] }
0x272d   :  { %v16274_v18 = vpack.c.bf16 %v12687_v51, %v12686_v17  ;;  %v16898_v6 = vpop.eup %16897  ;;  %v12728_v17 = vld [vmem:[%s20700_s7 + $0x960] sm:$0xff]  ;;  %v12729_v51 = vld [vmem:[%s20700_s7 + $0x968] sm:$0xff] }
0x2762   :  { %v14717_v37 = vpop.f32.mrb[30].mxu1 }
0x2763   :  { %v8989_v35 = vpop.f32.mrb[31].mxu1  ;;  %v8999_v40 = vmul.f32 %v16896_v28, %v14717_v37  ;;  %v16306_v37 = vpack.c.bf16 %v12719_v54, %v12718_v8  ;;  %v12723_v28 = vld [vmem:[%s20700_s7 + $0x938] sm:$0xff]  ;;  %v12748_v8 = vld [vmem:[%s20700_s7 + $0x9f0] sm:$0xff] }
0x2764   :  { %v8998_v53 = vmul.f32 %v16892_v19, %v8989_v35  ;;  %v8806_v19 = vmul.f32 %v16898_v6, %v19755_v41  ;;  %v16310_v35 = vpack.c.bf16 %v12721_v31, %v12720_v16  ;;  %v12722_v41 = vld [vmem:[%s20700_s7 + $0x930] sm:$0xff]  ;;  %v16366_v6 = vpack.c.bf16 %v12747_v32, %v12746_v57  ;;  %v12749_v54 = vld [vmem:[%s20700_s7 + $0x9f8] sm:$0xff]  ;;  %v12751_v31 = vld [vmem:[%s20702_s8 + $0x4] ss:$0 sm:$0xff] }
0x2766   :  { %14750 = vmatprep.mubr.f32.mxu1 %v8998_v53  ;;  %v16314_v53 = vpack.c.bf16 %v12723_v28, %v12722_v41 }
0x2767   :  { %14751 = vmatmul.mubr.f32.vlgmr.msra.gmra.mrb[32].mxu1 %v8999_v40  ;;  %v12724_v40 = vld [vmem:[%s20700_s7 + $0x940] sm:$0xff] }
0x2768   :  { %16265 = vmatpush3.bf16.msra.mxu1 %v16262_v29  ;;  %14785 = vmatprep.mubr.f32.mxu1 %v8805_v36 }
0x2769   :  { %16267 = vmatprep.subr.bf16.mxu1 %v16266_v5 }
0x276a   :  { %v19847_v58 = vpop.f32.mrb[188].mxu0 }
0x276b   :  { %v9332_v34 = vpop.f32.mrb[189].mxu0 }
0x276c   :  { %16269 = vmatpush3.bf16.msra.mxu1 %v16266_v5  ;;  %v12725_v5 = vld [vmem:[%s20700_s7 + $0x948] sm:$0xff] }
0x276d   :  { %16271 = vmatprep.subr.bf16.mxu1 %v16270_v50  ;;  %v16318_v36 = vpack.c.bf16 %v12725_v5, %v12724_v40 }
0x2770   :  { %16273 = vmatpush3.bf16.msra.mxu1 %v16270_v50  ;;  %v16322_v50 = vpack.c.bf16 %v12727_v42, %v12726_v45 }
0x2771   :  { %16275 = vmatprep.subr.bf16.mxu1 %v16274_v18 }
0x2772   :  { %v14843_v27 = vpop.f32.mrb[190].mxu0 }
0x2773   :  { %v9513_v48 = vmul.f32 0.35355338, %v14843_v27  ;;  %v9503_v49 = vpop.f32.mrb[191].mxu0  ;;  %v12734_v27 = vld [vmem:[%s20700_s7 + $0x980] sm:$0xff] }
0x2774   :  { %v9512_v59 = vmul.f32 0.35355338, %v9503_v49  ;;  %16277 = vmatpush3.bf16.msra.mxu1 %v16274_v18  ;;  %v16326_v18 = vpack.c.bf16 %v12729_v51, %v12728_v17  ;;  %v16342_v44 = vpack.c.bf16 %v12735_v46, %v12734_v27  ;;  %v12737_v49 = vld [vmem:[%s20700_s7 + $0x998] sm:$0xff]  ;;  %v12757_v17 = vld [vmem:[%s20703_s11 + $0x88] sm:$0xff]  ;;  %v12758_v51 = vld [vmem:[%s20703_s11 + $0x90] sm:$0xff] }
0x2775   :  { %v9515_v20 = vadd.f32 %v19734_v10, %v9513_v48  ;;  %16279 = vmatprep.subr.bf16.mxu1 %v16278_v9  ;;  %v16286_v10 = vpack.c.bf16 %v12693_v7, %v12692_v3  ;;  %v12736_v48 = vld [vmem:[%s20700_s7 + $0x990] sm:$0xff] }
0x2776   :  { %v9514_v25 = vadd.f32 %v19740_v56, %v9512_v59  ;;  %v12694_v56 = vld [vmem:[%s20700_s7 + $0x870] sm:$0xff] }
0x2777   :  { %v9518_v26 = vmul.f32 1.442695, %v9515_v20  ;;  %v16290_v39 = vpack.c.bf16 %v12695_v61, %v12694_v56  ;;  %v16346_v20 = vpack.c.bf16 %v12737_v49, %v12736_v48  ;;  %v12740_v7 = vld [vmem:[%s20700_s7 + $0x9b0] sm:$0xff]  ;;  %v12745_v61 = vld [vmem:[%s20700_s7 + $0x9d8] sm:$0xff] }
0x2778   :  { %v9516_v24 = vmul.f32 1.442695, %v9514_v25  ;;  %16281 = vmatpush3.bf16.msra.mxu1 %v16278_v9  ;;  %v16330_v9 = vpack.c.bf16 %v12731_v11, %v12730_v47  ;;  %v12739_v25 = vld [vmem:[%s20700_s7 + $0x9a8] sm:$0xff]  ;;  %v12744_v56 = vld [vmem:[%s20700_s7 + $0x9d0] sm:$0xff]  ;;  %v12764_v11 = vld [vmem:[%s20704_s13 + $0x200] sm:$0xff] }
0x2779   :  { %16899 = vpow2.f32 %v9518_v26  ;;  %16283 = vmatprep.subr.bf16.mxu1 %v16282_v22 }
0x277a   :  { %16901 = vpow2.f32 %v9516_v24  ;;  %v12743_v24 = vld [vmem:[%s20700_s7 + $0x9c8] sm:$0xff] }
0x277b   :  { %16903 = vrcp.f32 %v9252_v23  ;;  %v12742_v23 = vld [vmem:[%s20700_s7 + $0x9c0] sm:$0xff] }
0x277c   :  { %16285 = vmatpush3.bf16.msra.mxu1 %v16282_v22  ;;  %v12738_v22 = vld [vmem:[%s20700_s7 + $0x9a0] sm:$0xff] }
0x277d   :  { %16287 = vmatprep.subr.bf16.mxu1 %v16286_v10  ;;  %v16350_v3 = vpack.c.bf16 %v12739_v25, %v12738_v22 }
0x2780   :  { %16289 = vmatpush3.bf16.msra.mxu1 %v16286_v10  ;;  %v16358_v10 = vpack.c.bf16 %v12743_v24, %v12742_v23 }
0x2781   :  { %16291 = vmatprep.subr.bf16.mxu1 %v16290_v39 }
0x2783   :  { %v16900_v12 = vpop.eup %16899 }
0x2784   :  { %v16902_v29 = vpop.eup %16901  ;;  %16293 = vmatpush3.bf16.msra.mxu1 %v16290_v39  ;;  %v9523_v43 = vsel %vm777_vm1, %v16900_v12, 0.0  ;;  %v16362_v39 = vpack.c.bf16 %v12745_v61, %v12744_v56  ;;  %v12754_v61 = vld [vmem:[%s20705_s9 + $0x4] ss:$0 sm:$0xff] }
0x2785   :  { %v16904_v60 = vpop.eup %16903  ;;  %9524 = vadd.xlane.f32.xlu1 %v9523_v43  ;;  %14848 = vmatprep.mubr.msk.f32.mxu0 %vm777_vm1, %v16902_v29  ;;  %v9520_v63 = vsel %vm777_vm1, %v16902_v29, 0.0 }
0x2786   :  { %v9341_v62 = vmul.f32 %v16904_v60, %v9332_v34  ;;  %14849 = vmatmul.mubr.msk.f32.vlgmr.msra.gmra.mrb[192].mxu0 %vm777_vm1, %v16900_v12  ;;  %9521 = vadd.xlane.f32.xlu0 %v9520_v63  ;;  %v9255_v34 = vpop.xlane.xlu1 %9254  ;;  %v16370_v12 = vpack.c.bf16 %v12749_v54, %v12748_v8 }
0x2787   :  { %14786 = vmatmul.mubr.f32.vlgmr.msra.gmra.mrb[32].mxu1 %v8806_v19  ;;  %16303 = vmatprep.subr.bf16.mxu1 %v16302_v21  ;;  %16905 = vrcp.f32 %v9255_v34 }
0x2788   :  { %16305 = vmatpush3.bf16.msra.mxu1 %v16302_v21  ;;  %14834 = vmatprep.mubr.f32.mxu1 %v9341_v62 }
0x2789   :  { %16307 = vmatprep.subr.bf16.mxu1 %v16306_v37 }
0x278c   :  { %16309 = vmatpush3.bf16.msra.mxu1 %v16306_v37 }
0x278d   :  { %16311 = vmatprep.subr.bf16.mxu1 %v16310_v35 }
0x2790   :  { %16313 = vmatpush3.bf16.msra.mxu1 %v16310_v35 }
0x2791   :  { %16315 = vmatprep.subr.bf16.mxu1 %v16314_v53  ;;  %v16906_v59 = vpop.eup %16905 }
0x2792   :  { %v9342_v15 = vmul.f32 %v16906_v59, %v19847_v58  ;;  %v12741_v58 = vld [vmem:[%s20700_s7 + $0x9b8] sm:$0xff] }
0x2793   :  { %v16354_v26 = vpack.c.bf16 %v12741_v58, %v12740_v7 }
0x2794   :  { %16317 = vmatpush3.bf16.msra.mxu1 %v16314_v53 }
0x2795   :  { %16319 = vmatprep.subr.bf16.mxu1 %v16318_v36 }
0x2798   :  { %16321 = vmatpush3.bf16.msra.mxu1 %v16318_v36 }
0x2799   :  { %16323 = vmatprep.subr.bf16.mxu1 %v16322_v50 }
0x279c   :  { %16325 = vmatpush3.bf16.msra.mxu1 %v16322_v50  ;;  %v12756_v50 = vld [vmem:[%s20703_s11 + $0x80] sm:$0xff] }
0x279d   :  { %16327 = vmatprep.subr.bf16.mxu1 %v16326_v18  ;;  %v16374_v34 = vpack.c.bf16 %v12757_v17, %v12756_v50  ;;  %v12778_v50 = vld [vmem:[%s20704_s13 + $0x270] sm:$0xff]  ;;  %v12779_v17 = vld [vmem:[%s20704_s13 + $0x278] sm:$0xff] }
0x279f   :  { %16375 = vmatprep.subr.bf16.mxu0 %v16374_v34 }
0x27a0   :  { %16329 = vmatpush3.bf16.msra.mxu1 %v16326_v18  ;;  %v12759_v18 = vld [vmem:[%s20703_s11 + $0x98] sm:$0xff]  ;;  %16377 = vmatpush3.bf16.msra.mxu0 %v16374_v34  ;;  %v12761_v34 = vld [vmem:[%s20707_s12 + $0x4] ss:$0 sm:$0xff] }
0x27a1   :  { %16331 = vmatprep.subr.bf16.mxu1 %v16330_v9  ;;  %v16378_v47 = vpack.c.bf16 %v12759_v18, %v12758_v51  ;;  %v16410_v51 = vpack.c.bf16 %v12779_v17, %v12778_v50 }
0x27a3   :  { %16379 = vmatprep.subr.bf16.mxu0 %v16378_v47 }
0x27a4   :  { %16333 = vmatpush3.bf16.msra.mxu1 %v16330_v9  ;;  %16381 = vmatpush3.bf16.msra.mxu0 %v16378_v47  ;;  %v12765_v9 = vld [vmem:[%s20704_s13 + $0x208] sm:$0xff] }
0x27a5   :  { %16343 = vmatprep.subr.bf16.mxu1 %v16342_v44  ;;  %v16382_v27 = vpack.c.bf16 %v12765_v9, %v12764_v11 }
0x27a7   :  { %14835 = vmatmul.mubr.f32.vlgmr.msra.gmra.mrb[32].mxu1 %v9342_v15  ;;  %16383 = vmatprep.subr.bf16.mxu0 %v16382_v27 }
0x27a8   :  { %16345 = vmatpush3.bf16.msra.mxu1 %v16342_v44 }
0x27a9   :  { %16347 = vmatprep.subr.bf16.mxu1 %v16346_v20 }
0x27ac   :  { %16349 = vmatpush3.bf16.msra.mxu1 %v16346_v20 }
0x27ad   :  { %16351 = vmatprep.subr.bf16.mxu1 %v16350_v3 }
0x27b0   :  { %16353 = vmatpush3.bf16.msra.mxu1 %v16350_v3 }
0x27b1   :  { %16355 = vmatprep.subr.bf16.mxu1 %v16354_v26 }
0x27b4   :  { %16357 = vmatpush3.bf16.msra.mxu1 %v16354_v26 }
0x27b5   :  { %16359 = vmatprep.subr.bf16.mxu1 %v16358_v10 }
0x27b8   :  { %16361 = vmatpush3.bf16.msra.mxu1 %v16358_v10 }
0x27b9   :  { %16363 = vmatprep.subr.bf16.mxu1 %v16362_v39 }
0x27bc   :  { %16365 = vmatpush3.bf16.msra.mxu1 %v16362_v39 }
0x27bd   :  { %16367 = vmatprep.subr.bf16.mxu1 %v16366_v6 }
0x27c0   :  { %16369 = vmatpush3.bf16.msra.mxu1 %v16366_v6  ;;  %v12755_v6 = vld [vmem:[%s20720_s30 + $0x4] ss:$0 sm:$0xff] }
0x27c1   :  { %16371 = vmatprep.subr.bf16.mxu1 %v16370_v12 }
0x27c4   :  { %16373 = vmatpush3.bf16.msra.mxu1 %v16370_v12 }
0x2812   :  { %v9525_v29 = vpop.xlane.xlu1 %9524 }
0x2813   :  { %v9522_v21 = vpop.xlane.xlu0 %9521 }
0x2814   :  { %16907 = vrcp.f32 %v9522_v21 }
0x2815   :  { %16909 = vrcp.f32 %v9525_v29  ;;  %v12766_v29 = vld [vmem:[%s20704_s13 + $0x210] sm:$0xff] }
0x281e   :  { %v16908_v60 = vpop.eup %16907 }
0x281f   :  { %v16910_v19 = vpop.eup %16909 }
0x2859   :  { %v14850_v43 = vpop.f32.mrb[192].mxu0 }
0x285a   :  { %v9602_v63 = vpop.f32.mrb[193].mxu0  ;;  %v9612_v62 = vmul.f32 %v16910_v19, %v14850_v43  ;;  %v12767_v43 = vld [vmem:[%s20704_s13 + $0x218] sm:$0xff]  ;;  %v12769_v19 = vld [vmem:[%s20704_s13 + $0x228] sm:$0xff] }
0x285b   :  { %v9611_v37 = vmul.f32 %v16908_v60, %v9602_v63  ;;  %v16386_v60 = vpack.c.bf16 %v12767_v43, %v12766_v29  ;;  %v12768_v63 = vld [vmem:[%s20704_s13 + $0x220] sm:$0xff] }
0x285d   :  { %14883 = vmatprep.mubr.f32.mxu1 %v9611_v37  ;;  %v16390_v37 = vpack.c.bf16 %v12769_v19, %v12768_v63  ;;  %v12799_v63 = vld [vmem:[%s20696_s5 + $0x7e8] sm:$0xff] }
0x285e   :  { %14884 = vmatmul.mubr.f32.vlgmr.msra.gmra.mrb[32].mxu1 %v9612_v62  ;;  %v12770_v62 = vld [vmem:[%s20704_s13 + $0x230] sm:$0xff] }
0x2931   :  { %v14885_v16 = vpop.f32.mrb[32].mxu1 }
0x2932   :  { %v9708_v35 = vadd.f32 %v14885_v16, %v19485_v55  ;;  %v9696_v41 = vpop.f32.mrb[33].mxu1  ;;  %v12771_v16 = vld [vmem:[%s20704_s13 + $0x238] sm:$0xff] }
0x2933   :  { %v9707_v28 = vadd.f32 %v9696_v41, %v19487_v30  ;;  %v12773_v41 = vld [vmem:[%s20704_s13 + $0x248] sm:$0xff] }
0x2934   :  { %v19988_v53 = vadd.f32 %v12751_v31, %v9708_v35  ;;  %v12772_v35 = vld [vmem:[%s20704_s13 + $0x240] sm:$0xff] }
0x2935   :  { %v19990_v40 = vadd.f32 %v12751_v31, %v9707_v28  ;;  %v16394_v31 = vpack.c.bf16 %v12771_v16, %v12770_v62  ;;  %v12774_v28 = vld [vmem:[%s20704_s13 + $0x250] sm:$0xff]  ;;  %v12798_v62 = vld [vmem:[%s20696_s5 + $0x7e0] sm:$0xff] }
0x2936   :  { %v9726_v5 = vsel %vm66_vm0, %v19988_v53, 0.0  ;;  %v9732_v36 = vmul.f32 %v19988_v53, %v19988_v53 }
0x2937   :  { %9727 = vadd.xlane.f32.xlu1 %v9726_v5  ;;  %v9723_v45 = vsel %vm66_vm0, %v19990_v40, 0.0  ;;  %v9731_v55 = vmul.f32 %v19990_v40, %v19990_v40  ;;  %v16398_v5 = vpack.c.bf16 %v12773_v41, %v12772_v35  ;;  %v12823_v35 = vld [vmem:[%s20696_s5 + $0x8a8] sm:$0xff] }
0x2938   :  { %9724 = vadd.xlane.f32.xlu0 %v9723_v45  ;;  %v9736_v30 = vsel %vm66_vm0, %v9732_v36, 0.0  ;;  %v12775_v36 = vld [vmem:[%s20704_s13 + $0x258] sm:$0xff] }
0x2939   :  { %v9733_v42 = vsel %vm66_vm0, %v9731_v55, 0.0  ;;  %v16402_v45 = vpack.c.bf16 %v12775_v36, %v12774_v28  ;;  %v12776_v55 = vld [vmem:[%s20704_s13 + $0x260] sm:$0xff] }
0x293a   :  { %v12810_v28 = vld [vmem:[%s20696_s5 + $0x840] sm:$0xff] }
0x293b   :  { %9737 = vadd.xlane.f32.xlu1 %v9736_v30  ;;  %v12777_v30 = vld [vmem:[%s20704_s13 + $0x268] sm:$0xff] }
0x293c   :  { %9734 = vadd.xlane.f32.xlu0 %v9733_v42  ;;  %v16406_v42 = vpack.c.bf16 %v12777_v30, %v12776_v55  ;;  %v12801_v55 = vld [vmem:[%s20696_s5 + $0x7f8] sm:$0xff] }
0x29c4   :  { %v9728_v46 = vpop.xlane.xlu1 %9727 }
0x29c5   :  { %v9730_v44 = vmul.f32 0.03125, %v9728_v46  ;;  %v9725_v48 = vpop.xlane.xlu0 %9724 }
0x29c6   :  { %v9729_v49 = vmul.f32 0.03125, %v9725_v48 }
0x29c7   :  { %v9742_v15 = vmul.f32 %v9730_v44, %v9730_v44  ;;  %v9746_v24 = vsub.f32 %v19988_v53, %v9730_v44 }
0x29c8   :  { %v9738_v59 = vpop.xlane.xlu1 %9737  ;;  %v9741_v25 = vmul.f32 %v9729_v49, %v9729_v49  ;;  %v9745_v56 = vsub.f32 %v19990_v40, %v9729_v49 }
0x29c9   :  { %v9740_v20 = vmul.f32 0.03125, %v9738_v59  ;;  %v9735_v22 = vpop.xlane.xlu0 %9734 }
0x29ca   :  { %v9739_v3 = vmul.f32 0.03125, %v9735_v22 }
0x29cb   :  { %v9744_v7 = vsub.f32 %v9740_v20, %v9742_v15 }
0x29cc   :  { %v9743_v58 = vsub.f32 %v9739_v3, %v9741_v25 }
0x29cd   :  { %v9748_v26 = vadd.f32 1e-05, %v9744_v7 }
0x29ce   :  { %v9747_v23 = vadd.f32 1e-05, %v9743_v58 }
0x29cf   :  { %16911 = vrsqrt.f32 %v9748_v26 }
0x29d0   :  { %16913 = vrsqrt.f32 %v9747_v23 }
0x29d9   :  { %v16912_v10 = vpop.eup %16911 }
0x29da   :  { %v16914_v39 = vpop.eup %16913  ;;  %v9752_v57 = vmul.f32 %v16912_v10, %v9746_v24 }
0x29db   :  { %v9751_v32 = vmul.f32 %v16914_v39, %v9745_v56 }
0x29dc   :  { %v9760_v8 = vmul.f32 %v12754_v61, %v9752_v57  ;;  %v12781_v57 = vld [vmem:[%s20708_s14 + $0x4] ss:$0 sm:$0xff] }
0x29dd   :  { %v9759_v54 = vmul.f32 %v12754_v61, %v9751_v32 }
0x29de   :  { %v9768_v21 = vadd.f32 %v12755_v6, %v9760_v8 }
0x29df   :  { %v9767_v12 = vadd.f32 %v12755_v6, %v9759_v54 }
0x29e1   :  { %14894 = vmatprep.mubr.msk.f32.mxu0 %vm66_vm0, %v9767_v12 }
0x29e2   :  { %14895 = vmatmul.mubr.msk.f32.vlgmr.msra.gmra.mrb[194].mxu0 %vm66_vm0, %v9768_v21 }
0x29e3   :  { %16385 = vmatpush3.bf16.msra.mxu0 %v16382_v27 }
0x29e4   :  { %16387 = vmatprep.subr.bf16.mxu0 %v16386_v60 }
0x29e7   :  { %16389 = vmatpush3.bf16.msra.mxu0 %v16386_v60  ;;  %v12787_v60 = vld [vmem:[%s20696_s5 + $0x788] sm:$0xff] }
0x29e8   :  { %16391 = vmatprep.subr.bf16.mxu0 %v16390_v37  ;;  %v16414_v19 = vpack.c.bf16 %v12799_v63, %v12787_v60  ;;  %v12790_v60 = vld [vmem:[%s20696_s5 + $0x7a0] sm:$0xff] }
0x29e9   :  { %v12802_v63 = vld [vmem:[%s20696_s5 + $0x800] sm:$0xff] }
0x29eb   :  { %16393 = vmatpush3.bf16.msra.mxu0 %v16390_v37  ;;  %v12786_v37 = vld [vmem:[%s20696_s5 + $0x780] sm:$0xff] }
0x29ec   :  { %16395 = vmatprep.subr.bf16.mxu0 %v16394_v31  ;;  %v16416_v16 = vpack.c.bf16 %v12798_v62, %v12786_v37  ;;  %v12827_v37 = vld [vmem:[%s20696_s5 + $0x8c8] sm:$0xff]  ;;  %v16432_v62 = vpack.c.bf16 %v12802_v63, %v12790_v60 }
0x29ef   :  { %16397 = vmatpush3.bf16.msra.mxu0 %v16394_v31  ;;  %v12811_v31 = vld [vmem:[%s20696_s5 + $0x848] sm:$0xff] }
0x29f0   :  { %16399 = vmatprep.subr.bf16.mxu0 %v16398_v5  ;;  %v16418_v41 = vpack.c.bf16 %v12823_v35, %v12811_v31  ;;  %v12814_v31 = vld [vmem:[%s20696_s5 + $0x860] sm:$0xff] }
0x29f1   :  { %v12826_v35 = vld [vmem:[%s20696_s5 + $0x8c0] sm:$0xff] }
0x29f3   :  { %16401 = vmatpush3.bf16.msra.mxu0 %v16398_v5  ;;  %v12822_v5 = vld [vmem:[%s20696_s5 + $0x8a0] sm:$0xff] }
0x29f4   :  { %16403 = vmatprep.subr.bf16.mxu0 %v16402_v45  ;;  %v16420_v36 = vpack.c.bf16 %v12822_v5, %v12810_v28  ;;  %v12805_v28 = vld [vmem:[%s20696_s5 + $0x818] sm:$0xff]  ;;  %v16436_v5 = vpack.c.bf16 %v12826_v35, %v12814_v31 }
0x29f7   :  { %16405 = vmatpush3.bf16.msra.mxu0 %v16402_v45  ;;  %v12789_v45 = vld [vmem:[%s20696_s5 + $0x798] sm:$0xff] }
0x29f8   :  { %16407 = vmatprep.subr.bf16.mxu0 %v16406_v42  ;;  %v16422_v30 = vpack.c.bf16 %v12801_v55, %v12789_v45  ;;  %v12792_v45 = vld [vmem:[%s20696_s5 + $0x7b0] sm:$0xff] }
0x29f9   :  { %v12804_v55 = vld [vmem:[%s20696_s5 + $0x810] sm:$0xff] }
0x29fb   :  { %16409 = vmatpush3.bf16.msra.mxu0 %v16406_v42 }
0x29fc   :  { %16411 = vmatprep.subr.bf16.mxu0 %v16410_v51 }
0x29ff   :  { %16413 = vmatpush3.bf16.msra.mxu0 %v16410_v51 }
0x2a00   :  { %16415 = vmatprep.subr.bf16.mxu0 %v16414_v19  ;;  %v12815_v19 = vld [vmem:[%s20696_s5 + $0x868] sm:$0xff] }
0x2ab5   :  { %v14896_v18 = vpop.f32.mrb[194].mxu0 }
0x2ab6   :  { %v9860_v47 = vadd.f32 %v14896_v18, %v12761_v34  ;;  %v9854_v11 = vpop.f32.mrb[195].mxu0 }
0x2ab7   :  { %v9855_v9 = vadd.f32 %v12761_v34, %v9854_v11 }
0x2ab8   :  { %v9866_v27 = vmul.f32 0.044715, %v9860_v47  ;;  %v9864_v24 = vmul.f32 0.5, %v9860_v47 }
0x2ab9   :  { %v9865_v46 = vmul.f32 0.044715, %v9855_v9  ;;  %v9863_v26 = vmul.f32 0.5, %v9855_v9 }
0x2aba   :  { %v9868_v44 = vmul.f32 %v9866_v27, %v9860_v47 }
0x2abb   :  { %v9867_v48 = vmul.f32 %v9865_v46, %v9855_v9 }
0x2abc   :  { %v9870_v49 = vmul.f32 %v9868_v44, %v9860_v47 }
0x2abd   :  { %v9869_v59 = vmul.f32 %v9867_v48, %v9855_v9 }
0x2abe   :  { %v9872_v15 = vadd.f32 %v9870_v49, %v9860_v47 }
0x2abf   :  { %v9871_v20 = vadd.f32 %v9869_v59, %v9855_v9 }
0x2ac0   :  { %v9874_v22 = vmul.f32 0.7978846, %v9872_v15 }
0x2ac1   :  { %v9873_v25 = vmul.f32 0.7978846, %v9871_v20  ;;  %v12784_v20 = vld [vmem:[%s20697_s3 + $0x5] ss:$0 sm:$0xff] }
0x2ac2   :  { %16915 = vtanh.f32 %v9874_v22 }
0x2ac3   :  { %16917 = vtanh.f32 %v9873_v25  ;;  %v12788_v25 = vld [vmem:[%s20696_s5 + $0x790] sm:$0xff] }
0x2acc   :  { %v16916_v3 = vpop.eup %16915 }
0x2acd   :  { %v16918_v7 = vpop.eup %16917  ;;  %v9878_v58 = vadd.f32 1.0, %v16916_v3  ;;  %v12800_v3 = vld [vmem:[%s20696_s5 + $0x7f0] sm:$0xff] }
0x2ace   :  { %v9877_v23 = vadd.f32 1.0, %v16918_v7  ;;  %v12785_v7 = vld [vmem:[%s20698_s4 + $0x5] ss:$0 sm:$0xff] }
0x2acf   :  { %v9880_v56 = vmul.f32 %v9878_v58, %v9864_v24  ;;  %v12813_v58 = vld [vmem:[%s20696_s5 + $0x858] sm:$0xff] }
0x2ad0   :  { %v9879_v10 = vmul.f32 %v9877_v23, %v9863_v26  ;;  %v12825_v26 = vld [vmem:[%s20696_s5 + $0x8b8] sm:$0xff] }
0x2ad2   :  { %14929 = vmatprep.mubr.f32.mxu0 %v9879_v10 }
0x2ad3   :  { %14930 = vmatmul.mubr.f32.vlgmr.msra.gmra.mrb[196].mxu0 %v9880_v56  ;;  %v16424_v56 = vpack.c.bf16 %v12800_v3, %v12788_v25  ;;  %v12809_v25 = vld [vmem:[%s20696_s5 + $0x838] sm:$0xff] }
0x2ad4   :  { %10219 = vmatprep.mubr.f32.mxu0 %v16977_v38  ;;  %16417 = vmatpush1.bf16.msra.mxu0 %v16416_v16  ;;  %v16434_v16 = vpack.c.bf16 %v12827_v37, %v12815_v19 }
0x2ad5   :  { %16419 = vmatprep.subr.bf16.mxu0 %v16418_v41  ;;  %v12793_v41 = vld [vmem:[%s20696_s5 + $0x7b8] sm:$0xff] }
0x2ad8   :  { %16421 = vmatpush1.bf16.msra.mxu0 %v16420_v36  ;;  %v16438_v36 = vpack.c.bf16 %v12805_v28, %v12793_v41 }
0x2ad9   :  { %16423 = vmatprep.subr.bf16.mxu0 %v16422_v30  ;;  %v12817_v30 = vld [vmem:[%s20696_s5 + $0x878] sm:$0xff] }
0x2ba6   :  { %v14931_v61 = vpop.f32.mrb[196].mxu0 }
0x2ba7   :  { %v9974_v39 = vadd.f32 %v14931_v61, %v19988_v53  ;;  %v9964_v32 = vpop.f32.mrb[197].mxu0 }
0x2ba8   :  { %v9973_v6 = vadd.f32 %v9964_v32, %v19990_v40  ;;  %v12812_v32 = vld [vmem:[%s20696_s5 + $0x850] sm:$0xff] }
0x2ba9   :  { %v20081_v8 = vadd.f32 %v12781_v57, %v9974_v39 }
0x2baa   :  { %v20083_v54 = vadd.f32 %v12781_v57, %v9973_v6  ;;  %v16426_v57 = vpack.c.bf16 %v12825_v26, %v12813_v58  ;;  %v12824_v6 = vld [vmem:[%s20696_s5 + $0x8b0] sm:$0xff] }
0x2bab   :  { %v9998_v29 = vmul.f32 %v20081_v8, %v20081_v8  ;;  %v9992_v40 = vsel %vm66_vm0, %v20081_v8, 0.0  ;;  %v12796_v58 = vld [vmem:[%s20696_s5 + $0x7d0] sm:$0xff] }
0x2bac   :  { %v9989_v12 = vsel %vm66_vm0, %v20083_v54, 0.0  ;;  %v9997_v21 = vmul.f32 %v20083_v54, %v20083_v54  ;;  %v12808_v26 = vld [vmem:[%s20696_s5 + $0x830] sm:$0xff] }
0x2bad   :  { %9990 = vadd.xlane.f32.xlu0 %v9989_v12  ;;  %v10002_v43 = vsel %vm66_vm0, %v9998_v29, 0.0  ;;  %v12791_v12 = vld [vmem:[%s20696_s5 + $0x7a8] sm:$0xff]  ;;  %v16428_v29 = vpack.c.bf16 %v12824_v6, %v12812_v32  ;;  %v20289_v6 = vld [vmem:[%s20699_s6 + $0x3c] sm:$0xff] }
0x2bae   :  { %v9999_v53 = vsel %vm66_vm0, %v9997_v21, 0.0  ;;  %v12803_v21 = vld [vmem:[%s20696_s5 + $0x808] sm:$0xff]  ;;  %v10108_v37 = vrot.slane %v20289_v6, %v17304_v0  ;;  %v10120_v0 = vrot.slane %v20289_v6, %v17310_v4 }
0x2baf   :  { %10000 = vadd.xlane.f32.xlu1 %v9999_v53 }
0x2bb1   :  { %9993 = vadd.xlane.f32.xlu0 %v9992_v40 }
0x2bb3   :  { %10003 = vadd.xlane.f32.xlu1 %v10002_v43  ;;  %v16430_v43 = vpack.c.bf16 %v12803_v21, %v12791_v12  ;;  %v10092_v12 = vrot.slane %v20289_v6, %v17278_v52 }
0x2c3a   :  { %v9991_v42 = vpop.xlane.xlu0 %9990 }
0x2c3b   :  { %v9995_v50 = vmul.f32 0.03125, %v9991_v42  ;;  %v12829_v42 = vld [vmem:[%s20696_s5 + $0x8d8] sm:$0xff] }
0x2c3c   :  { %v10001_v17 = vpop.xlane.xlu1 %10000 }
0x2c3d   :  { %v10007_v51 = vmul.f32 %v9995_v50, %v9995_v50  ;;  %v10005_v34 = vmul.f32 0.03125, %v10001_v17  ;;  %v10011_v59 = vsub.f32 %v20083_v54, %v9995_v50  ;;  %v16440_v50 = vpack.c.bf16 %v12804_v55, %v12792_v45 }
0x2c3e   :  { %v9994_v18 = vpop.xlane.xlu0 %9993  ;;  %v16442_v17 = vpack.c.bf16 %v12829_v42, %v12817_v30  ;;  %v10116_v42 = vrot.slane %v20289_v6, %v17306_v1 }
0x2c3f   :  { %v10009_v47 = vsub.f32 %v10005_v34, %v10007_v51  ;;  %v9996_v11 = vmul.f32 0.03125, %v9994_v18  ;;  %v12816_v51 = vld [vmem:[%s20696_s5 + $0x870] sm:$0xff]  ;;  %v12795_v18 = vld [vmem:[%s20696_s5 + $0x7c8] sm:$0xff] }
0x2c40   :  { %v10004_v9 = vpop.xlane.xlu1 %10003  ;;  %v12828_v34 = vld [vmem:[%s20696_s5 + $0x8d0] sm:$0xff] }
0x2c41   :  { %v10013_v27 = vadd.f32 1e-05, %v10009_v47  ;;  %v10008_v46 = vmul.f32 %v9996_v11, %v9996_v11  ;;  %v10006_v44 = vmul.f32 0.03125, %v10004_v9  ;;  %v10012_v24 = vsub.f32 %v20081_v8, %v9996_v11  ;;  %v12807_v47 = vld [vmem:[%s20696_s5 + $0x828] sm:$0xff] }
0x2c42   :  { %v16444_v11 = vpack.c.bf16 %v12828_v34, %v12816_v51  ;;  %v16446_v9 = vpack.c.bf16 %v12807_v47, %v12795_v18 }
0x2c43   :  { %16919 = vrsqrt.f32 %v10013_v27  ;;  %v10010_v48 = vsub.f32 %v10006_v44, %v10008_v46  ;;  %v12794_v27 = vld [vmem:[%s20696_s5 + $0x7c0] sm:$0xff]  ;;  %v12819_v44 = vld [vmem:[%s20696_s5 + $0x888] sm:$0xff] }
0x2c44   :  { %v12806_v46 = vld [vmem:[%s20696_s5 + $0x820] sm:$0xff] }
0x2c45   :  { %v10014_v49 = vadd.f32 1e-05, %v10010_v48  ;;  %v12831_v48 = vld [vmem:[%s20696_s5 + $0x8e8] sm:$0xff] }
0x2c47   :  { %16921 = vrsqrt.f32 %v10014_v49  ;;  %v16448_v49 = vpack.c.bf16 %v12806_v46, %v12794_v27 }
0x2c4d   :  { %v16920_v15 = vpop.eup %16919 }
0x2c4e   :  { %v10017_v22 = vmul.f32 %v16920_v15, %v10011_v59  ;;  %v16450_v59 = vpack.c.bf16 %v12831_v48, %v12819_v44  ;;  %v12818_v15 = vld [vmem:[%s20696_s5 + $0x880] sm:$0xff] }
0x2c50   :  { %v10025_v23 = vmul.f32 %v12784_v20, %v10017_v22  ;;  %v12797_v22 = vld [vmem:[%s20696_s5 + $0x7d8] sm:$0xff] }
0x2c51   :  { %v16922_v10 = vpop.eup %16921 }
0x2c52   :  { %v10018_v61 = vmul.f32 %v16922_v10, %v10012_v24  ;;  %v20145_v39 = vadd.f32 %v12785_v7, %v10025_v23  ;;  %v12821_v23 = vld [vmem:[%s20696_s5 + $0x898] sm:$0xff]  ;;  %v16456_v10 = vpack.c.bf16 %v12808_v26, %v12796_v58 }
0x2c53   :  { %v12833_v24 = vld [vmem:[%s20696_s5 + $0x8f8] sm:$0xff] }
0x2c54   :  { %v10026_v53 = vmul.f32 %v12784_v20, %v10018_v61  ;;  %12836 = vmatmul.mubr.msk.f32.vlgmr.msra.gmra.mrb[198].mxu0 %vm66_vm0, %v20145_v39  ;;  %v12830_v20 = vld [vmem:[%s20696_s5 + $0x8e0] sm:$0xff]  ;;  %v12820_v61 = vld [vmem:[%s20696_s5 + $0x890] sm:$0xff] }
0x2c55   :  { %16425 = vmatpush1.bf16.msra.mxu0 %v16424_v56  ;;  %10225 = vmatprep.mubr.f32.mxu0 %v16977_v38  ;;  %v16452_v3 = vpack.c.bf16 %v12830_v20, %v12818_v15  ;;  %v16458_v56 = vpack.c.bf16 %v12833_v24, %v12821_v23 }
0x2c56   :  { %v20162_v40 = vadd.f32 %v12785_v7, %v10026_v53  ;;  %16427 = vmatprep.subr.bf16.mxu0 %v16426_v57  ;;  %v16454_v7 = vpack.c.bf16 %v12809_v25, %v12797_v22  ;;  %v12832_v57 = vld [vmem:[%s20696_s5 + $0x8f0] sm:$0xff] }
0x2c57   :  { %v16460_v32 = vpack.c.bf16 %v12832_v57, %v12820_v61 }
0x2c58   :  { %12837 = vmatmul.mubr.msk.f32.gmra.mrb[200].mxu0 %vm66_vm0, %v20162_v40 }
0x2c59   :  { %16429 = vmatpush1.bf16.msra.mxu0 %v16428_v29  ;;  %10296 = vmatprep.mubr.f32.mxu0 %v16977_v38 }
0x2c5a   :  { %16431 = vmatprep.subr.bf16.mxu0 %v16430_v43 }
0x2c5c   :  { %12838 = vmatmul.mubr.msk.f32.vlgmr.msra.gmra.mrb[202].mxu0 %vm66_vm0, %v20145_v39 }
0x2c5d   :  { %16433 = vmatpush1.bf16.msra.mxu0 %v16432_v62  ;;  %10302 = vmatprep.mubr.f32.mxu0 %v16977_v38 }
0x2c5e   :  { %16435 = vmatprep.subr.bf16.mxu0 %v16434_v16  ;;  %v10112_v16 = vrot.slane %v20289_v6, %v17308_v2 }
0x2c60   :  { %12839 = vmatmul.mubr.msk.f32.gmra.mrb[204].mxu0 %vm66_vm0, %v20162_v40 }
0x2c61   :  { %16437 = vmatpush1.bf16.msra.mxu0 %v16436_v5  ;;  %10373 = vmatprep.mubr.f32.mxu0 %v16977_v38 }
0x2c62   :  { %16439 = vmatprep.subr.bf16.mxu0 %v16438_v36 }
0x2c64   :  { %12840 = vmatmul.mubr.msk.f32.vlgmr.msra.gmra.mrb[206].mxu0 %vm66_vm0, %v20145_v39 }
0x2c65   :  { %16441 = vmatpush1.bf16.msra.mxu0 %v16440_v50  ;;  %10379 = vmatprep.mubr.f32.mxu0 %v16977_v38 }
0x2c66   :  { %16443 = vmatprep.subr.bf16.mxu0 %v16442_v17 }
0x2c68   :  { %12841 = vmatmul.mubr.msk.f32.gmra.mrb[208].mxu0 %vm66_vm0, %v20162_v40 }
0x2c69   :  { %16445 = vmatpush1.bf16.msra.mxu0 %v16444_v11  ;;  %10450 = vmatprep.mubr.f32.mxu0 %v16977_v38  ;;  %v12835_v11 = vld [vmem:[%s20699_s6 + $0x44] sm:$0xf] }
0x2c6a   :  { %16447 = vmatprep.subr.bf16.mxu0 %v16446_v9  ;;  %v10124_v44 = vrot.slane %v12835_v11, %v17278_v52  ;;  %v10128_v4 = vrot.slane %v12835_v11, %v17331_v33  ;;  %v10132_v22 = vrot.slane %v12835_v11, %v17319_v13 }
0x2c6c   :  { %12842 = vmatmul.mubr.msk.f32.vlgmr.msra.gmra.mrb[210].mxu0 %vm66_vm0, %v20145_v39 }
0x2c6d   :  { %16449 = vmatpush1.bf16.msra.mxu0 %v16448_v49  ;;  %10456 = vmatprep.mubr.f32.mxu0 %v16977_v38 }
0x2c6e   :  { %16451 = vmatprep.subr.bf16.mxu0 %v16450_v59 }
0x2c70   :  { %12843 = vmatmul.mubr.msk.f32.gmra.mrb[212].mxu0 %vm66_vm0, %v20162_v40 }
0x2c71   :  { %16453 = vmatpush1.bf16.msra.mxu0 %v16452_v3  ;;  %10527 = vmatprep.mubr.f32.mxu0 %v16977_v38 }
0x2c72   :  { %16455 = vmatprep.subr.bf16.mxu0 %v16454_v7  ;;  %v10136_v7 = vrot.slane %v12835_v11, %v17321_v14 }
0x2c74   :  { %12844 = vmatmul.mubr.msk.f32.vlgmr.msra.gmra.mrb[214].mxu0 %vm66_vm0, %v20145_v39 }
0x2c75   :  { %16457 = vmatpush1.bf16.msra.mxu0 %v16456_v10  ;;  %10533 = vmatprep.mubr.f32.mxu0 %v16977_v38 }
0x2c76   :  { %16459 = vmatprep.subr.bf16.mxu0 %v16458_v56 }
0x2c78   :  { %12845 = vmatmul.mubr.msk.f32.gmra.mrb[216].mxu0 %vm66_vm0, %v20162_v40 }
0x2c79   :  { %16461 = vmatpush1.bf16.msra.mxu0 %v16460_v32  ;;  %10604 = vmatprep.mubr.f32.mxu0 %v16977_v38 }
0x2c7c   :  { %12846 = vmatmul.mubr.msk.f32.vlgmr.msra.gmra.mrb[218].mxu0 %vm66_vm0, %v20145_v39 }
0x2c7d   :  { %10610 = vmatprep.mubr.f32.mxu0 %v16977_v38 }
0x2c80   :  { %12847 = vmatmul.mubr.msk.f32.gmra.mrb[220].mxu0 %vm66_vm0, %v20162_v40 }
0x2d27   :  { %v10221_v21 = vpop.f32.mrb[198].mxu0 }
0x2d28   :  { %v10222_v53 = vadd.f32 %v10221_v21, %v10092_v12  ;;  %v20293_v29 = vpop.f32.mrb[199].mxu0 }
0x2d2a   :  { %14936 = vmatprep.mubr.f32.mxu0 %v10222_v53 }
0x2d2b   :  { %v10227_v43 = vpop.f32.mrb[200].mxu0 }
0x2d2c   :  { %v20295_v39 = vpop.f32.mrb[201].mxu0  ;;  %v10228_v9 = vadd.f32 %v10227_v43, %v10092_v12 }
0x2d2f   :  { %v20297_v38 = vpop.f32.mrb[202].mxu0 }
0x2d30   :  { %v20299_v60 = vpop.f32.mrb[203].mxu0 }
0x2d33   :  { %v20301_v40 = vpop.f32.mrb[204].mxu0 }
0x2d34   :  { %v20303_v63 = vpop.f32.mrb[205].mxu0 }
0x2d37   :  { %v10375_v19 = vpop.f32.mrb[206].mxu0 }
0x2d38   :  { %v10377_v62 = vpop.f32.mrb[207].mxu0  ;;  %v10376_v35 = vadd.f32 %v10375_v19, %v10108_v37 }
0x2d39   :  { %v10378_v5 = vadd.f32 %v10377_v62, %v10112_v16  ;;  %v20330_v62 = vld [vmem:[%s20701_s2 + $0x8] sm:$0xff] }
0x2d3b   :  { %v10381_v31 = vpop.f32.mrb[208].mxu0 }
0x2d3c   :  { %v10382_v41 = vadd.f32 %v10381_v31, %v10108_v37  ;;  %v10383_v28 = vpop.f32.mrb[209].mxu0  ;;  %v20336_v31 = vld [vmem:[%s20701_s2] sm:$0xff] }
0x2d3d   :  { %v10384_v36 = vadd.f32 %v10383_v28, %v10112_v16 }
0x2d3e   :  { %v16462_v45 = vpack.c.bf16 %v10382_v41, %v10376_v35 }
0x2d3f   :  { %v20309_v55 = vpack.c.bf16 %v10384_v36, %v10378_v5  ;;  %v10452_v30 = vpop.f32.mrb[210].mxu0  ;;  %v10096_v5 = vrot.slane %v20289_v6, %v17331_v33 }
0x2d40   :  { %v10454_v50 = vpop.f32.mrb[211].mxu0  ;;  %16463 = vmatprep.subr.bf16.mxu0 %v16462_v45  ;;  %v10453_v17 = vadd.f32 %v10452_v30, %v10116_v42 }
0x2d41   :  { %16465 = vmatpush3.bf16.xpose.msra.mxu0 %v16462_v45  ;;  %v10455_v18 = vadd.f32 %v10454_v50, %v10120_v0  ;;  %v10224_v30 = vadd.f32 %v20293_v29, %v10096_v5  ;;  %v10230_v50 = vadd.f32 %v20295_v39, %v10096_v5  ;;  %v12882_v5 = vld [vmem:[%s20700_s7 + $0xaf0] sm:$0xff] }
0x2d43   :  { %v10458_v2 = vpop.f32.mrb[212].mxu0 }
0x2d44   :  { %v10459_v51 = vadd.f32 %v10458_v2, %v10116_v42  ;;  %v10460_v34 = vpop.f32.mrb[213].mxu0  ;;  %v10100_v42 = vrot.slane %v20289_v6, %v17319_v13 }
0x2d45   :  { %v10461_v47 = vadd.f32 %v10460_v34, %v10120_v0 }
0x2d46   :  { %v16542_v27 = vpack.c.bf16 %v10459_v51, %v10453_v17  ;;  %v10299_v0 = vadd.f32 %v20297_v38, %v10100_v42  ;;  %v10305_v33 = vadd.f32 %v20301_v40, %v10100_v42  ;;  %v12851_v42 = vld [vmem:[%s20700_s7 + $0xa08] sm:$0xff] }
0x2d47   :  { %v20318_v46 = vpack.c.bf16 %v10461_v47, %v10455_v18  ;;  %v10529_v1 = vpop.f32.mrb[214].mxu0 }
0x2d48   :  { %v10531_v48 = vpop.f32.mrb[215].mxu0  ;;  %14937 = vmatmul.mubr.f32.vlgmr.msra.gmra.mrb[222].mxu0 %v10228_v9  ;;  %v10530_v59 = vadd.f32 %v10529_v1, %v10124_v44 }
0x2d49   :  { %v10532_v25 = vadd.f32 %v10531_v48, %v10128_v4 }
0x2d4b   :  { %v10535_v49 = vpop.f32.mrb[216].mxu0 }
0x2d4c   :  { %v10536_v15 = vadd.f32 %v10535_v49, %v10124_v44  ;;  %v10537_v20 = vpop.f32.mrb[217].mxu0 }
0x2d4d   :  { %v10538_v3 = vadd.f32 %v10537_v20, %v10128_v4 }
0x2d4e   :  { %v16466_v58 = vpack.c.bf16 %v10536_v15, %v10530_v59 }
0x2d4f   :  { %v16474_v26 = vpack.c.bf16 %v10538_v3, %v10532_v25  ;;  %v10606_v23 = vpop.f32.mrb[218].mxu0 }
0x2d50   :  { %v10607_v24 = vadd.f32 %v10606_v23, %v10132_v22  ;;  %v10608_v10 = vpop.f32.mrb[219].mxu0  ;;  %16467 = vmatprep.subr.bf16.mxu0 %v16466_v58 }
0x2d51   :  { %v10609_v52 = vadd.f32 %v10608_v10, %v10136_v7  ;;  %16469 = vmatpush3.bf16.msra.mxu0 %v16466_v58  ;;  %16475 = vmatprep.subr.bf16.mxu1 %v16474_v26 }
0x2d52   :  { %16471 = vmatprep.subr.bf16.mxu0 %v20309_v55  ;;  %16477 = vmatpush3.bf16.msra.mxu1 %v16474_v26 }
0x2d53   :  { %v10612_v56 = vpop.f32.mrb[220].mxu0 }
0x2d54   :  { %v10613_v61 = vadd.f32 %v10612_v56, %v10132_v22  ;;  %v10614_v57 = vpop.f32.mrb[221].mxu0  ;;  %v10104_v22 = vrot.slane %v20289_v6, %v17321_v14  ;;  %v12868_v6 = vld [vmem:[%s20700_s7 + $0xa80] sm:$0xff]  ;;  %v12873_v56 = vld [vmem:[%s20700_s7 + $0xaa8] sm:$0xff] }
0x2d55   :  { %v10615_v32 = vadd.f32 %v10614_v57, %v10136_v7  ;;  %v12874_v57 = vld [vmem:[%s20700_s7 + $0xab0] sm:$0xff] }
0x2d56   :  { %v16546_v12 = vpack.c.bf16 %v10613_v61, %v10607_v24  ;;  %v10301_v26 = vadd.f32 %v20299_v60, %v10104_v22  ;;  %v10307_v14 = vadd.f32 %v20303_v63, %v10104_v22  ;;  %v12869_v60 = vld [vmem:[%s20700_s7 + $0xa88] sm:$0xff]  ;;  %v12871_v63 = vld [vmem:[%s20700_s7 + $0xa98] sm:$0xff] }
0x2d57   :  { %v20325_v21 = vpack.c.bf16 %v10615_v32, %v10609_v52  ;;  %v16478_v24 = vpack.c.bf16 %v12869_v60, %v12868_v6  ;;  %v12872_v52 = vld [vmem:[%s20700_s7 + $0xaa0] sm:$0xff]  ;;  %v12875_v32 = vld [vmem:[%s20700_s7 + $0xab8] sm:$0xff] }
0x2d58   :  { %v16486_v61 = vpack.c.bf16 %v12873_v56, %v12872_v52 }
0x2d59   :  { %16479 = vmatprep.subr.bf16.mxu1 %v16478_v24 }
0x2e1b   :  { %v14938_v53 = vpop.f32.mrb[222].mxu0 }
0x2e1c   :  { %v10693_v43 = vmul.f32 0.35355338, %v14938_v53  ;;  %v10683_v19 = vpop.f32.mrb[223].mxu0  ;;  %v12877_v53 = vld [vmem:[%s20700_s7 + $0xac8] sm:$0xff] }
0x2e1d   :  { %v10692_v37 = vmul.f32 0.35355338, %v10683_v19  ;;  %v12878_v19 = vld [vmem:[%s20700_s7 + $0xad0] sm:$0xff] }
0x2e1e   :  { %v10695_v16 = vadd.f32 %v20330_v62, %v10693_v43 }
0x2e1f   :  { %v10694_v35 = vadd.f32 %v20336_v31, %v10692_v37  ;;  %v12879_v37 = vld [vmem:[%s20700_s7 + $0xad8] sm:$0xff] }
0x2e20   :  { %v10698_v41 = vmul.f32 1.442695, %v10695_v16  ;;  %v16498_v16 = vpack.c.bf16 %v12879_v37, %v12878_v19 }
0x2e21   :  { %v10696_v28 = vmul.f32 1.442695, %v10694_v35  ;;  %v12880_v35 = vld [vmem:[%s20700_s7 + $0xae0] sm:$0xff] }
0x2e23   :  { %16923 = vpow2.f32 %v10696_v28 }
0x2e24   :  { %16925 = vpow2.f32 %v10698_v41  ;;  %v12881_v41 = vld [vmem:[%s20700_s7 + $0xae8] sm:$0xff] }
0x2e25   :  { %v16502_v28 = vpack.c.bf16 %v12881_v41, %v12880_v35 }
0x2e2d   :  { %v16924_v36 = vpop.eup %16923 }
0x2e2e   :  { %v16926_v45 = vpop.eup %16925  ;;  %14943 = vmatprep.mubr.msk.f32.mxu0 %vm777_vm1, %v16924_v36  ;;  %v10700_v25 = vsel %vm777_vm1, %v16924_v36, 0.0  ;;  %v12883_v36 = vld [vmem:[%s20700_s7 + $0xaf8] sm:$0xff] }
0x2e2f   :  { %14944 = vmatmul.mubr.msk.f32.vlgmr.msra.gmra.mrb[224].mxu0 %vm777_vm1, %v16926_v45  ;;  %v10703_v20 = vsel %vm777_vm1, %v16926_v45, 0.0  ;;  %v16506_v45 = vpack.c.bf16 %v12883_v36, %v12882_v5 }
0x2e30   :  { %16473 = vmatpush3.bf16.xpose.msra.mxu0 %v20309_v55  ;;  %14950 = vmatprep.mubr.f32.mxu0 %v10224_v30  ;;  %v12850_v30 = vld [vmem:[%s20700_s7 + $0xa00] sm:$0xff] }
0x2e31   :  { %16543 = vmatprep.subr.bf16.mxu0 %v16542_v27 }
0x2e37   :  { %14951 = vmatmul.mubr.f32.vlgmr.msra.gmra.mrb[226].mxu0 %v10230_v50  ;;  %v16510_v50 = vpack.c.bf16 %v12851_v42, %v12850_v30  ;;  %v12890_v30 = vld [vmem:[%s20700_s7 + $0xb20] sm:$0xff]  ;;  %v12891_v42 = vld [vmem:[%s20700_s7 + $0xb28] sm:$0xff] }
0x2e38   :  { %16545 = vmatpush3.bf16.xpose.msra.mxu0 %v16542_v27  ;;  %15034 = vmatprep.mubr.f32.mxu0 %v10299_v0 }
0x2e39   :  { %16547 = vmatprep.subr.bf16.mxu0 %v16546_v12 }
0x2e3f   :  { %15035 = vmatmul.mubr.f32.vlgmr.msra.gmra.mrb[228].mxu0 %v10305_v33 }
0x2e40   :  { %16549 = vmatpush3.bf16.msra.mxu0 %v16546_v12  ;;  %v16490_v12 = vpack.c.bf16 %v12875_v32, %v12874_v57  ;;  %v12886_v32 = vld [vmem:[%s20700_s7 + $0xb00] sm:$0xff] }
0x2e41   :  { %16583 = vmatprep.subr.bf16.mxu0 %v20318_v46 }
0x2f02   :  { %v20351_v29 = vpop.f32.mrb[224].mxu0 }
0x2f03   :  { %v20353_v55 = vpop.f32.mrb[225].mxu0 }
0x2f0a   :  { %v14952_v2 = vpop.f32.mrb[226].mxu0 }
0x2f0b   :  { %v10886_v13 = vmul.f32 0.35355338, %v14952_v2  ;;  %v10876_v17 = vpop.f32.mrb[227].mxu0 }
0x2f0c   :  { %v10885_v39 = vmul.f32 0.35355338, %v10876_v17 }
0x2f0d   :  { %v10888_v38 = vadd.f32 %v20330_v62, %v10886_v13 }
0x2f0e   :  { %v10887_v51 = vadd.f32 %v20336_v31, %v10885_v39  ;;  %v12852_v39 = vld [vmem:[%s20700_s7 + $0xa10] sm:$0xff] }
0x2f0f   :  { %v10891_v34 = vmul.f32 1.442695, %v10888_v38  ;;  %v12853_v38 = vld [vmem:[%s20700_s7 + $0xa18] sm:$0xff] }
0x2f10   :  { %v10889_v18 = vmul.f32 1.442695, %v10887_v51 }
0x2f11   :  { %16927 = vpow2.f32 %v10891_v34 }
0x2f12   :  { %16929 = vpow2.f32 %v10889_v18  ;;  %v15036_v40 = vpop.f32.mrb[228].mxu0 }
0x2f13   :  { %v11229_v47 = vmul.f32 0.35355338, %v15036_v40  ;;  %v11219_v11 = vpop.f32.mrb[229].mxu0 }
0x2f14   :  { %v11228_v9 = vmul.f32 0.35355338, %v11219_v11  ;;  %v16514_v11 = vpack.c.bf16 %v12853_v38, %v12852_v39  ;;  %v12896_v39 = vld [vmem:[%s20700_s7 + $0xb50] sm:$0xff]  ;;  %v12897_v38 = vld [vmem:[%s20700_s7 + $0xb58] sm:$0xff] }
0x2f15   :  { %v11231_v27 = vadd.f32 %v20330_v62, %v11229_v47 }
0x2f16   :  { %v11230_v1 = vadd.f32 %v20336_v31, %v11228_v9 }
0x2f17   :  { %v11234_v44 = vmul.f32 1.442695, %v11231_v27  ;;  %v12854_v27 = vld [vmem:[%s20700_s7 + $0xa20] sm:$0xff] }
0x2f18   :  { %v11232_v48 = vmul.f32 1.442695, %v11230_v1  ;;  %v12855_v1 = vld [vmem:[%s20700_s7 + $0xa28] sm:$0xff] }
0x2f19   :  { %16931 = vpow2.f32 %v11234_v44  ;;  %v16518_v44 = vpack.c.bf16 %v12855_v1, %v12854_v27  ;;  %v12904_v1 = vld [vmem:[%s20700_s7 + $0xb80] sm:$0xff] }
0x2f1a   :  { %16933 = vpow2.f32 %v11232_v48 }
0x2f1b   :  { %v16928_v4 = vpop.eup %16927 }
0x2f1c   :  { %v16930_v49 = vpop.eup %16929  ;;  %v10896_v59 = vsel %vm777_vm1, %v16928_v4, 0.0 }
0x2f1d   :  { %10897 = vadd.xlane.f32.xlu1 %v10896_v59  ;;  %14957 = vmatprep.mubr.msk.f32.mxu1 %vm777_vm1, %v16930_v49  ;;  %v10893_v15 = vsel %vm777_vm1, %v16930_v49, 0.0 }
0x2f1e   :  { %14958 = vmatmul.mubr.msk.f32.vlgmr.msra.gmra.mrb[34].mxu1 %vm777_vm1, %v16928_v4  ;;  %10894 = vadd.xlane.f32.xlu0 %v10893_v15  ;;  %v12856_v4 = vld [vmem:[%s20700_s7 + $0xa30] sm:$0xff]  ;;  %v12858_v15 = vld [vmem:[%s20700_s7 + $0xa40] sm:$0xff] }
0x2f1f   :  { %16481 = vmatpush3.bf16.msra.mxu1 %v16478_v24  ;;  %v12862_v24 = vld [vmem:[%s20700_s7 + $0xa60] sm:$0xff] }
0x2f21   :  { %10704 = vadd.xlane.f32.xlu1 %v10703_v20  ;;  %v12859_v20 = vld [vmem:[%s20700_s7 + $0xa48] sm:$0xff] }
0x2f22   :  { %10701 = vadd.xlane.f32.xlu0 %v10700_v25  ;;  %v16526_v22 = vpack.c.bf16 %v12859_v20, %v12858_v15 }
0x2f23   :  { %v16932_v3 = vpop.eup %16931 }
0x2f24   :  { %v16934_v7 = vpop.eup %16933  ;;  %v11239_v58 = vsel %vm777_vm1, %v16932_v3, 0.0 }
0x2f25   :  { %11240 = vadd.xlane.f32.xlu1 %v11239_v58  ;;  %15041 = vmatprep.mubr.msk.f32.mxu0 %vm777_vm1, %v16934_v7  ;;  %v11236_v23 = vsel %vm777_vm1, %v16934_v7, 0.0  ;;  %v12861_v7 = vld [vmem:[%s20700_s7 + $0xa58] sm:$0xff] }
0x2f26   :  { %15042 = vmatmul.mubr.msk.f32.vlgmr.msra.gmra.mrb[230].mxu0 %vm777_vm1, %v16932_v3  ;;  %11237 = vadd.xlane.f32.xlu0 %v11236_v23  ;;  %v12860_v3 = vld [vmem:[%s20700_s7 + $0xa50] sm:$0xff] }
0x2f27   :  { %16585 = vmatpush3.bf16.xpose.msra.mxu0 %v20318_v46  ;;  %15083 = vmatprep.mubr.f32.mxu0 %v10301_v26  ;;  %v12870_v46 = vld [vmem:[%s20700_s7 + $0xa90] sm:$0xff]  ;;  %v16530_v60 = vpack.c.bf16 %v12861_v7, %v12860_v3 }
0x2f28   :  { %16587 = vmatprep.subr.bf16.mxu0 %v20325_v21  ;;  %v16482_v10 = vpack.c.bf16 %v12871_v63, %v12870_v46  ;;  %v12863_v63 = vld [vmem:[%s20700_s7 + $0xa68] sm:$0xff]  ;;  %v12910_v7 = vld [vmem:[%s20700_s7 + $0xbb0] sm:$0xff] }
0x2f2a   :  { %16483 = vmatprep.subr.bf16.mxu1 %v16482_v10 }
0x2f2b   :  { %16485 = vmatpush3.bf16.msra.mxu1 %v16482_v10 }
0x2f2c   :  { %16487 = vmatprep.subr.bf16.mxu1 %v16486_v61 }
0x2f2e   :  { %15084 = vmatmul.mubr.f32.vlgmr.msra.gmra.mrb[232].mxu0 %v10307_v14 }
0x2f2f   :  { %16589 = vmatpush3.bf16.msra.mxu0 %v20325_v21  ;;  %v12876_v21 = vld [vmem:[%s20700_s7 + $0xac0] sm:$0xff]  ;;  %16489 = vmatpush3.bf16.msra.mxu1 %v16486_v61  ;;  %v12865_v61 = vld [vmem:[%s20700_s7 + $0xa78] sm:$0xff] }
0x2f30   :  { %16491 = vmatprep.subr.bf16.mxu1 %v16490_v12  ;;  %v16494_v43 = vpack.c.bf16 %v12877_v53, %v12876_v21  ;;  %v12888_v53 = vld [vmem:[%s20700_s7 + $0xb10] sm:$0xff] }
0x2f33   :  { %16493 = vmatpush3.bf16.msra.mxu1 %v16490_v12  ;;  %v12887_v12 = vld [vmem:[%s20700_s7 + $0xb08] sm:$0xff] }
0x2f34   :  { %16495 = vmatprep.subr.bf16.mxu1 %v16494_v43  ;;  %v16550_v37 = vpack.c.bf16 %v12887_v12, %v12886_v32 }
0x2f37   :  { %16497 = vmatpush3.bf16.msra.mxu1 %v16494_v43  ;;  %v12889_v43 = vld [vmem:[%s20700_s7 + $0xb18] sm:$0xff] }
0x2f38   :  { %16499 = vmatprep.subr.bf16.mxu1 %v16498_v16  ;;  %v16554_v36 = vpack.c.bf16 %v12889_v43, %v12888_v53 }
0x2f3b   :  { %16501 = vmatpush3.bf16.msra.mxu1 %v16498_v16 }
0x2f3c   :  { %16503 = vmatprep.subr.bf16.mxu1 %v16502_v28 }
0x2f3f   :  { %16505 = vmatpush3.bf16.msra.mxu1 %v16502_v28 }
0x2f40   :  { %16507 = vmatprep.subr.bf16.mxu1 %v16506_v45 }
0x2f43   :  { %16509 = vmatpush3.bf16.msra.mxu1 %v16506_v45 }
0x2f44   :  { %16511 = vmatprep.subr.bf16.mxu1 %v16510_v50 }
0x2faa   :  { %v10898_v2 = vpop.xlane.xlu1 %10897 }
0x2fab   :  { %v10895_v0 = vpop.xlane.xlu0 %10894 }
0x2fac   :  { %16935 = vrcp.f32 %v10895_v0  ;;  %v12893_v0 = vld [vmem:[%s20700_s7 + $0xb38] sm:$0xff] }
0x2fae   :  { %v10705_v14 = vpop.xlane.xlu1 %10704 }
0x2faf   :  { %v10702_v33 = vpop.xlane.xlu0 %10701 }
0x2fb0   :  { %16937 = vrcp.f32 %v10702_v33 }
0x2fb1   :  { %16939 = vrcp.f32 %v10898_v2  ;;  %v12894_v2 = vld [vmem:[%s20700_s7 + $0xb40] sm:$0xff] }
0x2fb2   :  { %16941 = vrcp.f32 %v10705_v14 }
0x2fb3   :  { %v11238_v52 = vpop.xlane.xlu0 %11237 }
0x2fb6   :  { %v16936_v13 = vpop.eup %16935 }
0x2fba   :  { %v16938_v51 = vpop.eup %16937 }
0x2fbb   :  { %v16940_v18 = vpop.eup %16939  ;;  %v10791_v9 = vmul.f32 %v16938_v51, %v20353_v55  ;;  %v12857_v55 = vld [vmem:[%s20700_s7 + $0xa38] sm:$0xff]  ;;  %v16570_v51 = vpack.c.bf16 %v12897_v38, %v12896_v39  ;;  %v12935_v39 = vld [vmem:[%s20704_s13 + $0x288] sm:$0xff] }
0x2fbc   :  { %v16522_v59 = vpack.c.bf16 %v12857_v55, %v12856_v4  ;;  %v16942_v21 = vpop.eup %16941  ;;  %v12906_v55 = vld [vmem:[%s20700_s7 + $0xb90] sm:$0xff] }
0x2fbd   :  { %v10792_v5 = vmul.f32 %v16942_v21, %v20351_v29  ;;  %v12892_v29 = vld [vmem:[%s20700_s7 + $0xb30] sm:$0xff] }
0x2fbe   :  { %v16562_v33 = vpack.c.bf16 %v12893_v0, %v12892_v29  ;;  %v12927_v29 = vld [vmem:[%s20703_s11 + $0xa8] sm:$0xff]  ;;  %v12928_v0 = vld [vmem:[%s20703_s11 + $0xb0] sm:$0xff] }
0x2ff1   :  { %v14959_v17 = vpop.f32.mrb[34].mxu1 }
0x2ff2   :  { %v10975_v34 = vpop.f32.mrb[35].mxu1  ;;  %v10985_v47 = vmul.f32 %v16940_v18, %v14959_v17  ;;  %v12899_v18 = vld [vmem:[%s20700_s7 + $0xb68] sm:$0xff] }
0x2ff3   :  { %v10984_v40 = vmul.f32 %v16936_v13, %v10975_v34  ;;  %v12895_v13 = vld [vmem:[%s20700_s7 + $0xb48] sm:$0xff]  ;;  %v12898_v34 = vld [vmem:[%s20700_s7 + $0xb60] sm:$0xff] }
0x2ff4   :  { %v16566_v17 = vpack.c.bf16 %v12895_v13, %v12894_v2  ;;  %v12929_v2 = vld [vmem:[%s20703_s11 + $0xb8] sm:$0xff] }
0x2ff5   :  { %14992 = vmatprep.mubr.f32.mxu1 %v10984_v40  ;;  %v11241_v40 = vpop.xlane.xlu1 %11240  ;;  %v16626_v13 = vpack.c.bf16 %v12929_v2, %v12928_v0 }
0x2ff6   :  { %14993 = vmatmul.mubr.f32.vlgmr.msra.gmra.mrb[36].mxu1 %v10985_v47  ;;  %v16574_v47 = vpack.c.bf16 %v12899_v18, %v12898_v34 }
0x2ff7   :  { %16513 = vmatpush3.bf16.msra.mxu1 %v16510_v50  ;;  %15027 = vmatprep.mubr.f32.mxu1 %v10791_v9  ;;  %v16558_v50 = vpack.c.bf16 %v12891_v42, %v12890_v30  ;;  %v12901_v9 = vld [vmem:[%s20700_s7 + $0xb78] sm:$0xff] }
0x2ff8   :  { %16515 = vmatprep.subr.bf16.mxu1 %v16514_v11 }
0x2ff9   :  { %v20443_v48 = vpop.f32.mrb[230].mxu0 }
0x2ffa   :  { %v11318_v49 = vpop.f32.mrb[231].mxu0 }
0x2ffb   :  { %16517 = vmatpush3.bf16.msra.mxu1 %v16514_v11  ;;  %v12900_v11 = vld [vmem:[%s20700_s7 + $0xb70] sm:$0xff] }
0x2ffc   :  { %16519 = vmatprep.subr.bf16.mxu1 %v16518_v44  ;;  %v16578_v27 = vpack.c.bf16 %v12901_v9, %v12900_v11 }
0x2fff   :  { %16521 = vmatpush3.bf16.msra.mxu1 %v16518_v44  ;;  %v12905_v44 = vld [vmem:[%s20700_s7 + $0xb88] sm:$0xff] }
0x3000   :  { %16523 = vmatprep.subr.bf16.mxu1 %v16522_v59  ;;  %v16590_v4 = vpack.c.bf16 %v12905_v44, %v12904_v1 }
0x3001   :  { %v15085_v25 = vpop.f32.mrb[232].mxu0 }
0x3002   :  { %v11499_v58 = vmul.f32 0.35355338, %v15085_v25  ;;  %v11489_v26 = vpop.f32.mrb[233].mxu0  ;;  %v12909_v25 = vld [vmem:[%s20700_s7 + $0xba8] sm:$0xff] }
0x3003   :  { %v11498_v23 = vmul.f32 0.35355338, %v11489_v26  ;;  %16525 = vmatpush3.bf16.msra.mxu1 %v16522_v59  ;;  %v12912_v26 = vld [vmem:[%s20700_s7 + $0xbc0] sm:$0xff] }
0x3004   :  { %v11501_v6 = vadd.f32 %v20330_v62, %v11499_v58  ;;  %16527 = vmatprep.subr.bf16.mxu1 %v16526_v22  ;;  %v16534_v62 = vpack.c.bf16 %v12863_v63, %v12862_v24  ;;  %v12916_v24 = vld [vmem:[%s20700_s7 + $0xbe0] sm:$0xff]  ;;  %v12917_v63 = vld [vmem:[%s20700_s7 + $0xbe8] sm:$0xff] }
0x3005   :  { %v11500_v46 = vadd.f32 %v20336_v31, %v11498_v23  ;;  %v12864_v31 = vld [vmem:[%s20700_s7 + $0xa70] sm:$0xff]  ;;  %v12913_v23 = vld [vmem:[%s20700_s7 + $0xbc8] sm:$0xff] }
0x3006   :  { %v11504_v10 = vmul.f32 1.442695, %v11501_v6  ;;  %v16538_v57 = vpack.c.bf16 %v12865_v61, %v12864_v31  ;;  %v16606_v14 = vpack.c.bf16 %v12913_v23, %v12912_v26  ;;  %v12914_v6 = vld [vmem:[%s20700_s7 + $0xbd0] sm:$0xff] }
0x3007   :  { %v11502_v56 = vmul.f32 1.442695, %v11500_v46  ;;  %16529 = vmatpush3.bf16.msra.mxu1 %v16526_v22  ;;  %v12908_v22 = vld [vmem:[%s20700_s7 + $0xba0] sm:$0xff] }
0x3008   :  { %16943 = vpow2.f32 %v11504_v10  ;;  %16531 = vmatprep.subr.bf16.mxu1 %v16530_v60  ;;  %v16598_v3 = vpack.c.bf16 %v12909_v25, %v12908_v22  ;;  %v16614_v10 = vpack.c.bf16 %v12917_v63, %v12916_v24  ;;  %v12924_v25 = vld [vmem:[%s20705_s9 + $0x5] ss:$0 sm:$0xff] }
0x3009   :  { %16945 = vpow2.f32 %v11502_v56  ;;  %v12919_v56 = vld [vmem:[%s20700_s7 + $0xbf8] sm:$0xff]  ;;  %v12938_v63 = vld [vmem:[%s20704_s13 + $0x2a0] sm:$0xff] }
0x300a   :  { %16947 = vrcp.f32 %v11238_v52  ;;  %v12918_v52 = vld [vmem:[%s20700_s7 + $0xbf0] sm:$0xff] }
0x300b   :  { %16533 = vmatpush3.bf16.msra.mxu1 %v16530_v60  ;;  %16949 = vrcp.f32 %v11241_v40  ;;  %v12915_v60 = vld [vmem:[%s20700_s7 + $0xbd8] sm:$0xff] }
0x300c   :  { %16535 = vmatprep.subr.bf16.mxu1 %v16534_v62  ;;  %v16610_v46 = vpack.c.bf16 %v12915_v60, %v12914_v6  ;;  %v12936_v60 = vld [vmem:[%s20704_s13 + $0x290] sm:$0xff] }
0x300f   :  { %16537 = vmatpush3.bf16.msra.mxu1 %v16534_v62  ;;  %v16618_v62 = vpack.c.bf16 %v12919_v56, %v12918_v52  ;;  %v12940_v56 = vld [vmem:[%s20704_s13 + $0x2b0] sm:$0xff] }
0x3010   :  { %16539 = vmatprep.subr.bf16.mxu1 %v16538_v57 }
0x3012   :  { %v16944_v19 = vpop.eup %16943 }
0x3013   :  { %v16946_v16 = vpop.eup %16945  ;;  %16541 = vmatpush3.bf16.msra.mxu1 %v16538_v57  ;;  %v11509_v35 = vsel %vm777_vm1, %v16944_v19, 0.0 }
0x3014   :  { %v16948_v41 = vpop.eup %16947  ;;  %11510 = vadd.xlane.f32.xlu1 %v11509_v35  ;;  %15090 = vmatprep.mubr.msk.f32.mxu0 %vm777_vm1, %v16946_v16  ;;  %v11506_v28 = vsel %vm777_vm1, %v16946_v16, 0.0 }
0x3015   :  { %v11327_v45 = vmul.f32 %v16948_v41, %v11318_v49  ;;  %15091 = vmatmul.mubr.msk.f32.vlgmr.msra.gmra.mrb[234].mxu0 %vm777_vm1, %v16944_v19  ;;  %11507 = vadd.xlane.f32.xlu0 %v11506_v28  ;;  %v12907_v49 = vld [vmem:[%s20700_s7 + $0xb98] sm:$0xff]  ;;  %v16950_v59 = vpop.eup %16949 }
0x3016   :  { %15028 = vmatmul.mubr.f32.vlgmr.msra.gmra.mrb[36].mxu1 %v10792_v5  ;;  %16551 = vmatprep.subr.bf16.mxu1 %v16550_v37  ;;  %v11328_v15 = vmul.f32 %v16950_v59, %v20443_v48  ;;  %v16594_v20 = vpack.c.bf16 %v12907_v49, %v12906_v55  ;;  %v12911_v48 = vld [vmem:[%s20700_s7 + $0xbb8] sm:$0xff] }
0x3017   :  { %16553 = vmatpush3.bf16.msra.mxu1 %v16550_v37  ;;  %15076 = vmatprep.mubr.f32.mxu1 %v11327_v45  ;;  %v16602_v58 = vpack.c.bf16 %v12911_v48, %v12910_v7  ;;  %v12921_v37 = vld [vmem:[%s20702_s8 + $0x5] ss:$0 sm:$0xff] }
0x3018   :  { %16555 = vmatprep.subr.bf16.mxu1 %v16554_v36 }
0x301b   :  { %16557 = vmatpush3.bf16.msra.mxu1 %v16554_v36 }
0x301c   :  { %16559 = vmatprep.subr.bf16.mxu1 %v16558_v50 }
0x301f   :  { %16561 = vmatpush3.bf16.msra.mxu1 %v16558_v50  ;;  %v12926_v50 = vld [vmem:[%s20703_s11 + $0xa0] sm:$0xff] }
0x3020   :  { %16563 = vmatprep.subr.bf16.mxu1 %v16562_v33 }
0x3023   :  { %16565 = vmatpush3.bf16.msra.mxu1 %v16562_v33  ;;  %v16622_v33 = vpack.c.bf16 %v12927_v29, %v12926_v50 }
0x3024   :  { %16567 = vmatprep.subr.bf16.mxu1 %v16566_v17 }
0x3025   :  { %16623 = vmatprep.subr.bf16.mxu0 %v16622_v33 }
0x3026   :  { %16625 = vmatpush3.bf16.msra.mxu0 %v16622_v33 }
0x3027   :  { %16569 = vmatpush3.bf16.msra.mxu1 %v16566_v17  ;;  %16627 = vmatprep.subr.bf16.mxu0 %v16626_v13  ;;  %v12934_v17 = vld [vmem:[%s20704_s13 + $0x280] sm:$0xff] }
0x3028   :  { %16571 = vmatprep.subr.bf16.mxu1 %v16570_v51  ;;  %v16630_v38 = vpack.c.bf16 %v12935_v39, %v12934_v17 }
0x302a   :  { %16629 = vmatpush3.bf16.msra.mxu0 %v16626_v13 }
0x302b   :  { %16573 = vmatpush3.bf16.msra.mxu1 %v16570_v51  ;;  %16631 = vmatprep.subr.bf16.mxu0 %v16630_v38 }
0x302c   :  { %16575 = vmatprep.subr.bf16.mxu1 %v16574_v47 }
0x302f   :  { %16577 = vmatpush3.bf16.msra.mxu1 %v16574_v47 }
0x3030   :  { %16579 = vmatprep.subr.bf16.mxu1 %v16578_v27 }
0x3033   :  { %16581 = vmatpush3.bf16.msra.mxu1 %v16578_v27 }
0x3034   :  { %16591 = vmatprep.subr.bf16.mxu1 %v16590_v4 }
0x3036   :  { %15077 = vmatmul.mubr.f32.vlgmr.msra.gmra.mrb[36].mxu1 %v11328_v15 }
0x3037   :  { %16593 = vmatpush3.bf16.msra.mxu1 %v16590_v4 }
0x3038   :  { %16595 = vmatprep.subr.bf16.mxu1 %v16594_v20 }
0x303b   :  { %16597 = vmatpush3.bf16.msra.mxu1 %v16594_v20 }
0x303c   :  { %16599 = vmatprep.subr.bf16.mxu1 %v16598_v3 }
0x303f   :  { %16601 = vmatpush3.bf16.msra.mxu1 %v16598_v3 }
0x3040   :  { %16603 = vmatprep.subr.bf16.mxu1 %v16602_v58 }
0x3043   :  { %16605 = vmatpush3.bf16.msra.mxu1 %v16602_v58  ;;  %v12925_v58 = vld [vmem:[%s20720_s30 + $0x5] ss:$0 sm:$0xff] }
0x3044   :  { %16607 = vmatprep.subr.bf16.mxu1 %v16606_v14 }
0x3047   :  { %16609 = vmatpush3.bf16.msra.mxu1 %v16606_v14 }
0x3048   :  { %16611 = vmatprep.subr.bf16.mxu1 %v16610_v46 }
0x304b   :  { %16613 = vmatpush3.bf16.msra.mxu1 %v16610_v46  ;;  %v12937_v46 = vld [vmem:[%s20704_s13 + $0x298] sm:$0xff] }
0x304c   :  { %16615 = vmatprep.subr.bf16.mxu1 %v16614_v10  ;;  %v16634_v24 = vpack.c.bf16 %v12937_v46, %v12936_v60 }
0x304f   :  { %16617 = vmatpush3.bf16.msra.mxu1 %v16614_v10  ;;  %v12939_v10 = vld [vmem:[%s20704_s13 + $0x2a8] sm:$0xff] }
0x3050   :  { %16619 = vmatprep.subr.bf16.mxu1 %v16618_v62  ;;  %v16638_v52 = vpack.c.bf16 %v12939_v10, %v12938_v63 }
0x3053   :  { %16621 = vmatpush3.bf16.msra.mxu1 %v16618_v62  ;;  %v12941_v62 = vld [vmem:[%s20704_s13 + $0x2b8] sm:$0xff] }
0x30a1   :  { %v11511_v61 = vpop.xlane.xlu1 %11510 }
0x30a2   :  { %v11508_v31 = vpop.xlane.xlu0 %11507 }
0x30a3   :  { %16951 = vrcp.f32 %v11508_v31  ;;  %v16642_v31 = vpack.c.bf16 %v12941_v62, %v12940_v56 }
0x30a4   :  { %16953 = vrcp.f32 %v11511_v61  ;;  %v12942_v61 = vld [vmem:[%s20704_s13 + $0x2c0] sm:$0xff] }
0x30ad   :  { %v16952_v32 = vpop.eup %16951 }
0x30ae   :  { %v16954_v21 = vpop.eup %16953 }
0x30e8   :  { %v15092_v57 = vpop.f32.mrb[234].mxu0 }
0x30e9   :  { %v11588_v12 = vpop.f32.mrb[235].mxu0  ;;  %v11598_v43 = vmul.f32 %v16954_v21, %v15092_v57  ;;  %v12943_v57 = vld [vmem:[%s20704_s13 + $0x2c8] sm:$0xff]  ;;  %v12945_v21 = vld [vmem:[%s20704_s13 + $0x2d8] sm:$0xff] }
0x30ea   :  { %v11597_v53 = vmul.f32 %v16952_v32, %v11588_v12  ;;  %v12944_v32 = vld [vmem:[%s20704_s13 + $0x2d0] sm:$0xff]  ;;  %v16646_v12 = vpack.c.bf16 %v12943_v57, %v12942_v61  ;;  %v12952_v57 = vld [vmem:[%s20709_s15] ss:$0 sm:$0xff] }
0x30ec   :  { %15125 = vmatprep.mubr.f32.mxu1 %v11597_v53  ;;  %v16650_v53 = vpack.c.bf16 %v12945_v21, %v12944_v32  ;;  %v12953_v21 = vld [vmem:[%s20710_s16] ss:$0 sm:$0xff] }
0x30ed   :  { %15126 = vmatmul.mubr.f32.vlgmr.msra.gmra.mrb[36].mxu1 %v11598_v43  ;;  %v12946_v43 = vld [vmem:[%s20704_s13 + $0x2e0] sm:$0xff] }
0x31c0   :  { %v15127_v19 = vpop.f32.mrb[36].mxu1 }
0x31c1   :  { %v11694_v16 = vadd.f32 %v15127_v19, %v20081_v8  ;;  %v11682_v35 = vpop.f32.mrb[37].mxu1  ;;  %v12947_v19 = vld [vmem:[%s20704_s13 + $0x2e8] sm:$0xff] }
0x31c2   :  { %v11693_v41 = vadd.f32 %v11682_v35, %v20083_v54  ;;  %v12949_v35 = vld [vmem:[%s20704_s13 + $0x2f8] sm:$0xff] }
0x31c3   :  { %v20584_v28 = vadd.f32 %v12921_v37, %v11694_v16  ;;  %v12948_v16 = vld [vmem:[%s20704_s13 + $0x2f0] sm:$0xff] }
0x31c4   :  { %v20586_v5 = vadd.f32 %v12921_v37, %v11693_v41  ;;  %v16654_v37 = vpack.c.bf16 %v12947_v19, %v12946_v43  ;;  %v16658_v41 = vpack.c.bf16 %v12949_v35, %v12948_v16 }
0x31c5   :  { %v11712_v36 = vsel %vm66_vm0, %v20584_v28, 0.0  ;;  %v11718_v45 = vmul.f32 %v20584_v28, %v20584_v28 }
0x31c6   :  { %11713 = vadd.xlane.f32.xlu1 %v11712_v36  ;;  %v11709_v30 = vsel %vm66_vm0, %v20586_v5, 0.0  ;;  %v11717_v8 = vmul.f32 %v20586_v5, %v20586_v5  ;;  %v12931_v36 = vld [vmem:[%s20707_s12 + $0x5] ss:$0 sm:$0xff] }
0x31c7   :  { %11710 = vadd.xlane.f32.xlu0 %v11709_v30  ;;  %v11722_v54 = vsel %vm66_vm0, %v11718_v45, 0.0 }
0x31c8   :  { %v11719_v42 = vsel %vm66_vm0, %v11717_v8, 0.0 }
0x31ca   :  { %11723 = vadd.xlane.f32.xlu1 %v11722_v54 }
0x31cb   :  { %11720 = vadd.xlane.f32.xlu0 %v11719_v42 }
0x3253   :  { %v11714_v51 = vpop.xlane.xlu1 %11713 }
0x3254   :  { %v11716_v34 = vmul.f32 0.03125, %v11714_v51  ;;  %v11711_v18 = vpop.xlane.xlu0 %11710 }
0x3255   :  { %v11715_v40 = vmul.f32 0.03125, %v11711_v18 }
0x3256   :  { %v11728_v11 = vmul.f32 %v11716_v34, %v11716_v34  ;;  %v11732_v15 = vsub.f32 %v20584_v28, %v11716_v34 }
0x3257   :  { %v11724_v47 = vpop.xlane.xlu1 %11723  ;;  %v11727_v1 = vmul.f32 %v11715_v40, %v11715_v40  ;;  %v11731_v22 = vsub.f32 %v20586_v5, %v11715_v40 }
0x3258   :  { %v11726_v9 = vmul.f32 0.03125, %v11724_v47  ;;  %v11721_v27 = vpop.xlane.xlu0 %11720 }
0x3259   :  { %v11725_v44 = vmul.f32 0.03125, %v11721_v27 }
0x325a   :  { %v11730_v4 = vsub.f32 %v11726_v9, %v11728_v11 }
0x325b   :  { %v11729_v55 = vsub.f32 %v11725_v44, %v11727_v1  ;;  %v12951_v44 = vld [vmem:[%s20708_s14 + $0x5] ss:$0 sm:$0xff] }
0x325c   :  { %v11734_v49 = vadd.f32 1e-05, %v11730_v4 }
0x325d   :  { %v11733_v59 = vadd.f32 1e-05, %v11729_v55 }
0x325e   :  { %16955 = vrsqrt.f32 %v11734_v49 }
0x325f   :  { %16957 = vrsqrt.f32 %v11733_v59 }
0x3268   :  { %v16956_v20 = vpop.eup %16955 }
0x3269   :  { %v16958_v3 = vpop.eup %16957  ;;  %v11738_v7 = vmul.f32 %v16956_v20, %v11732_v15 }
0x326a   :  { %v11737_v48 = vmul.f32 %v16958_v3, %v11731_v22 }
0x326b   :  { %v11746_v26 = vmul.f32 %v12924_v25, %v11738_v7 }
0x326c   :  { %v11745_v23 = vmul.f32 %v12924_v25, %v11737_v48 }
0x326d   :  { %v11754_v6 = vadd.f32 %v12925_v58, %v11746_v26 }
0x326e   :  { %v11753_v14 = vadd.f32 %v12925_v58, %v11745_v23 }
0x3270   :  { %15136 = vmatprep.mubr.msk.f32.mxu0 %vm66_vm0, %v11753_v14 }
0x3271   :  { %15137 = vmatmul.mubr.msk.f32.vlgmr.msra.gmra.mrb[236].mxu0 %vm66_vm0, %v11754_v6 }
0x3272   :  { %16633 = vmatpush3.bf16.msra.mxu0 %v16630_v38 }
0x3273   :  { %16635 = vmatprep.subr.bf16.mxu0 %v16634_v24 }
0x3276   :  { %16637 = vmatpush3.bf16.msra.mxu0 %v16634_v24 }
0x3277   :  { %16639 = vmatprep.subr.bf16.mxu0 %v16638_v52 }
0x327a   :  { %16641 = vmatpush3.bf16.msra.mxu0 %v16638_v52 }
0x327b   :  { %16643 = vmatprep.subr.bf16.mxu0 %v16642_v31 }
0x327e   :  { %16645 = vmatpush3.bf16.msra.mxu0 %v16642_v31 }
0x327f   :  { %16647 = vmatprep.subr.bf16.mxu0 %v16646_v12 }
0x3282   :  { %16649 = vmatpush3.bf16.msra.mxu0 %v16646_v12 }
0x3283   :  { %16651 = vmatprep.subr.bf16.mxu0 %v16650_v53 }
0x3286   :  { %16653 = vmatpush3.bf16.msra.mxu0 %v16650_v53 }
0x3287   :  { %16655 = vmatprep.subr.bf16.mxu0 %v16654_v37 }
0x328a   :  { %16657 = vmatpush3.bf16.msra.mxu0 %v16654_v37 }
0x328b   :  { %16659 = vmatprep.subr.bf16.mxu0 %v16658_v41 }
0x328e   :  { %16661 = vmatpush3.bf16.msra.mxu0 %v16658_v41 }
0x3344   :  { %v15138_v45 = vpop.f32.mrb[236].mxu0 }
0x3345   :  { %v11846_v30 = vadd.f32 %v15138_v45, %v12931_v36  ;;  %v11840_v8 = vpop.f32.mrb[237].mxu0 }
0x3346   :  { %v11841_v54 = vadd.f32 %v12931_v36, %v11840_v8 }
0x3347   :  { %v11852_v42 = vmul.f32 0.044715, %v11846_v30  ;;  %v11850_v11 = vmul.f32 0.5, %v11846_v30 }
0x3348   :  { %v11851_v50 = vmul.f32 0.044715, %v11841_v54  ;;  %v11849_v40 = vmul.f32 0.5, %v11841_v54 }
0x3349   :  { %v11854_v29 = vmul.f32 %v11852_v42, %v11846_v30 }
0x334a   :  { %v11853_v0 = vmul.f32 %v11851_v50, %v11841_v54 }
0x334b   :  { %v11856_v33 = vmul.f32 %v11854_v29, %v11846_v30 }
0x334c   :  { %v11855_v2 = vmul.f32 %v11853_v0, %v11841_v54 }
0x334d   :  { %v11858_v13 = vadd.f32 %v11856_v33, %v11846_v30 }
0x334e   :  { %v11857_v17 = vadd.f32 %v11855_v2, %v11841_v54 }
0x334f   :  { %v11860_v39 = vmul.f32 0.7978846, %v11858_v13 }
0x3350   :  { %v11859_v38 = vmul.f32 0.7978846, %v11857_v17 }
0x3351   :  { %16959 = vtanh.f32 %v11860_v39 }
0x3352   :  { %16961 = vtanh.f32 %v11859_v38 }
0x335b   :  { %v16960_v51 = vpop.eup %16959 }
0x335c   :  { %v16962_v34 = vpop.eup %16961  ;;  %v11864_v18 = vadd.f32 1.0, %v16960_v51 }
0x335d   :  { %v11863_v47 = vadd.f32 1.0, %v16962_v34 }
0x335e   :  { %v11866_v27 = vmul.f32 %v11864_v18, %v11850_v11 }
0x335f   :  { %v11865_v9 = vmul.f32 %v11863_v47, %v11849_v40 }
0x3361   :  { %15171 = vmatprep.mubr.f32.mxu0 %v11865_v9 }
0x3362   :  { %15172 = vmatmul.mubr.f32.vlgmr.msra.gmra.mrb[238].mxu0 %v11866_v27 }
0x3435   :  { %v15173_v1 = vpop.f32.mrb[238].mxu0 }
0x3436   :  { %v11960_v4 = vadd.f32 %v15173_v1, %v20584_v28  ;;  %v11950_v55 = vpop.f32.mrb[239].mxu0 }
0x3437   :  { %v11959_v49 = vadd.f32 %v11950_v55, %v20586_v5 }
0x3438   :  { %v11970_v59 = vadd.f32 %v12951_v44, %v11960_v4 }
0x3439   :  { %v11969_v15 = vadd.f32 %v12951_v44, %v11959_v49 }
0x343a   :  { %v11976_v20 = vsel %vm66_vm0, %v11970_v59, 0.0  ;;  %v11982_v22 = vmul.f32 %v11970_v59, %v11970_v59 }
0x343b   :  { %11977 = vadd.xlane.f32.xlu1 %v11976_v20  ;;  %v11973_v25 = vsel %vm66_vm0, %v11969_v15, 0.0  ;;  %v11981_v3 = vmul.f32 %v11969_v15, %v11969_v15 }
0x343c   :  { %11974 = vadd.xlane.f32.xlu0 %v11973_v25  ;;  %v11986_v7 = vsel %vm66_vm0, %v11982_v22, 0.0 }
0x343d   :  { %v11983_v48 = vsel %vm66_vm0, %v11981_v3, 0.0 }
0x343f   :  { %11987 = vadd.xlane.f32.xlu1 %v11986_v7 }
0x3440   :  { %11984 = vadd.xlane.f32.xlu0 %v11983_v48 }
0x34c8   :  { %v11978_v28 = vpop.xlane.xlu1 %11977 }
0x34c9   :  { %v11980_v58 = vmul.f32 0.03125, %v11978_v28  ;;  %v11975_v26 = vpop.xlane.xlu0 %11974 }
0x34ca   :  { %v11979_v5 = vmul.f32 0.03125, %v11975_v26 }
0x34cb   :  { %v11992_v14 = vmul.f32 %v11980_v58, %v11980_v58  ;;  %v11996_v62 = vsub.f32 %v11970_v59, %v11980_v58 }
0x34cc   :  { %v11988_v23 = vpop.xlane.xlu1 %11987  ;;  %v11991_v46 = vmul.f32 %v11979_v5, %v11979_v5  ;;  %v11995_v61 = vsub.f32 %v11969_v15, %v11979_v5 }
0x34cd   :  { %v11990_v6 = vmul.f32 0.03125, %v11988_v23  ;;  %v11985_v60 = vpop.xlane.xlu0 %11984 }
0x34ce   :  { %v11989_v24 = vmul.f32 0.03125, %v11985_v60 }
0x34cf   :  { %v11994_v63 = vsub.f32 %v11990_v6, %v11992_v14 }
0x34d0   :  { %v11993_v10 = vsub.f32 %v11989_v24, %v11991_v46 }
0x34d1   :  { %v11998_v52 = vadd.f32 1e-05, %v11994_v63 }
0x34d2   :  { %v11997_v56 = vadd.f32 1e-05, %v11993_v10 }
0x34d3   :  { %16963 = vrsqrt.f32 %v11998_v52 }
0x34d4   :  { %16965 = vrsqrt.f32 %v11997_v56 }
0x34dd   :  { %v16964_v31 = vpop.eup %16963 }
0x34de   :  { %v16966_v32 = vpop.eup %16965  ;;  %v12002_v12 = vmul.f32 %v16964_v31, %v11996_v62 }
0x34df   :  { %v12001_v53 = vmul.f32 %v16966_v32, %v11995_v61 }
0x34e0   :  { %v12010_v43 = vmul.f32 %v12952_v57, %v12002_v12 }
0x34e1   :  { %v12009_v19 = vmul.f32 %v12952_v57, %v12001_v53 }
0x34e2   :  { %v12018_v37 = vadd.f32 %v12953_v21, %v12010_v43 }
0x34e3   :  { %v12017_v16 = vadd.f32 %v12953_v21, %v12009_v19 }
0x34e4   :  { %12020 = vst.msk [vmem:[%s20711_s17 + $0x8] sm:$0xff] %vm66_vm0, %v12018_v37 }
0x34e5   :  { %12019 = vst.msk [vmem:[%s20711_s17] sm:$0xff] %vm66_vm0, %v12017_v16 }

</bundles_post_ra>
